<compile_context>
chip_gen: v5e
topology: v5e:2x2
jax: 0.10.0
libtpu: 0.0.40
codegen_flags: <defaults>
</compile_context>

<pallas_src>
import functools

import jax
import jax.numpy as jnp
import numpy as np
from jax.experimental import pallas as pl
from jax.experimental.pallas import tpu as pltpu


def _round_up(x, m):
    return (x + m - 1) // m * m


def _im2col_wide(src_ref, M, Wp):
    """9 sublane-shifted reads of a flat zero-haloed (rows, C) buffer,
    concatenated along lanes -> (M, 9*C) patch matrix for one MXU matmul."""
    taps = []
    for kh in range(3):
        for kw in range(3):
            off = kh * Wp + kw                       # static sublane offset
            taps.append(src_ref[off:off + M, :])
    return jnp.concatenate(taps, axis=-1)


def projection_kernel(xw_ref, w1_ref, b1_ref, w2_ref, b2_ref, o_ref, hp_ref,
                      *, H, W, Cin, Chid, Cout):
    # xw_ref: (rows_in, Cin)   flat zero-haloed input, rows_in >= (H+2)*Wp + 2
    # w1_ref: (9*Cin, Chid)    conv1 weights as a dense 2-D slab
    # b1_ref: (1, Chid)
    # w2_ref: (9*Chid, Cout)   conv2 weights as a dense 2-D slab
    # b2_ref: (1, Cout)
    # o_ref : (H*Wp, Cout)     "wide" output rows (j >= W sliced off outside)
    # hp_ref: (hp_rows, Chid)  VMEM scratch: zero-haloed ReLU(conv1) activation
    Wp = W + 2
    M = H * Wp                                        # wide output rows

    # ---- conv1: im2col -> ONE matmul (K = 9*Cin) + bias + ReLU -------------
    patch1 = _im2col_wide(xw_ref, M, Wp)              # (M, 9*Cin)
    h = jnp.dot(patch1, w1_ref[...], preferred_element_type=jnp.float32)
    h = jnp.maximum(h + b1_ref[...], 0.0)             # (M, Chid)

    # Wide columns j >= W are wrap-around garbage; zero them so they become
    # conv2's left/right zero padding once staged into hp_ref.
    col = jax.lax.broadcasted_iota(jnp.int32, (M, 1), 0) % Wp
    h = jnp.where(col < W, h, 0.0)

    # ---- stage activation into the zero-haloed VMEM buffer (no HBM trip) ---
    # Zero only the two border strips; the interior is fully overwritten.
    hp_rows = hp_ref.shape[0]
    hp_ref[0:Wp + 1, :] = jnp.zeros((Wp + 1, Chid), jnp.float32)
    hp_ref[Wp + 1:Wp + 1 + M, :] = h
    hp_ref[Wp + 1 + M:hp_rows, :] = jnp.zeros(
        (hp_rows - (Wp + 1 + M), Chid), jnp.float32)

    # ---- conv2: im2col -> ONE matmul (K = 9*Chid) + bias, dense store ------
    patch2 = _im2col_wide(hp_ref, M, Wp)              # (M, 9*Chid)
    out = jnp.dot(patch2, w2_ref[...], preferred_element_type=jnp.float32)
    o_ref[...] = (out + b2_ref[...]).astype(o_ref.dtype)


def projection_v2_nhwc(x_nhwc, params):
    """Fused conv3x3 -> ReLU -> conv3x3 (padding=1), NHWC in / NHWC out."""
    N, H, W, Cin = x_nhwc.shape
    w1, b1, w2, b2 = params["w1"], params["b1"], params["w2"], params["b2"]
    Chid, Cout = w1.shape[-1], w2.shape[-1]
    Wp = W + 2
    M = H * Wp
    assert M % 8 == 0, "H*(W+2) must be a multiple of 8 (sublane tiling)"

    # Flat zero-haloed input slab per image: ((H+2)*Wp, Cin) plus 2 extra zero
    # rows so the shifted tap reads for the (discarded) wide columns of the
    # last row stay in bounds; rounded up to a sublane multiple of 8.
    rows_in = _round_up((H + 2) * Wp + 2, 8)
    xp = jnp.pad(x_nhwc, ((0, 0), (1, 1), (1, 1), (0, 0)))       # spatial halo
    xp = xp.reshape(N, (H + 2) * Wp, Cin)
    xp = jnp.pad(xp, ((0, 0), (0, rows_in - (H + 2) * Wp), (0, 0)))
    x2d = xp.reshape(N * rows_in, Cin)

    # Weights / biases as dense 2-D slabs feeding the single-matmul form.
    w1f = w1.reshape(9 * Cin, Chid)
    w2f = w2.reshape(9 * Chid, Cout)
    b1r = b1.reshape(1, Chid)
    b2r = b2.reshape(1, Cout)

    hp_rows = _round_up((H + 2) * Wp + 2, 8)

    kernel = functools.partial(projection_kernel, H=H, W=W,
                               Cin=Cin, Chid=Chid, Cout=Cout)

    out2d = pl.pallas_call(
        kernel,
        out_shape=jax.ShapeDtypeStruct((N * M, Cout), x_nhwc.dtype),
        grid_spec=pltpu.PrefetchScalarGridSpec(
            num_scalar_prefetch=0,
            grid=(N,),
            in_specs=[
                pl.BlockSpec((rows_in, Cin), lambda n: (n, 0)),
                pl.BlockSpec((9 * Cin, Chid), lambda n: (0, 0)),
                pl.BlockSpec((1, Chid), lambda n: (0, 0)),
                pl.BlockSpec((9 * Chid, Cout), lambda n: (0, 0)),
                pl.BlockSpec((1, Cout), lambda n: (0, 0)),
            ],
            out_specs=pl.BlockSpec((M, Cout), lambda n: (n, 0)),
            scratch_shapes=[
                pltpu.VMEM((hp_rows, Chid), jnp.float32),
            ],
        ),
        compiler_params=pltpu.CompilerParams(
            dimension_semantics=("parallel",)),
    )(x2d, w1f, b1r, w2f, b2r)

    # Keep only the valid wide columns (j < W); XLA fuses this slice into the
    # layout pass the consumer needs anyway (e.g. the NCHW transpose below).
    out = out2d.reshape(N, H, Wp, Cout)[:, :, :W, :]
    return out


def projection_v2(x_nchw, params):
    """Forward pass matching the PyTorch ProjectionV2 module (NCHW in/out)."""
    # NCHW <-> NHWC transposes only to match the PyTorch boundary layout;
    # prefer projection_v2_nhwc when producer/consumer are already NHWC.
    x = jnp.transpose(x_nchw, (0, 2, 3, 1))
    out = projection_v2_nhwc(x, params)
    return jnp.transpose(out, (0, 3, 1, 2))


def init_params(key, in_chs, out_chs, hidden_dim):
    k1, k2, k3, k4 = jax.random.split(key, 4)
    # Deterministic init, roughly PyTorch's kaiming-uniform scale.
    fan1 = in_chs * 9
    fan2 = hidden_dim * 9
    w1 = jax.random.uniform(k1, (3, 3, in_chs, hidden_dim), jnp.float32,
                            -1.0 / np.sqrt(fan1), 1.0 / np.sqrt(fan1))
    b1 = jax.random.uniform(k2, (hidden_dim,), jnp.float32,
                            -1.0 / np.sqrt(fan1), 1.0 / np.sqrt(fan1))
    w2 = jax.random.uniform(k3, (3, 3, hidden_dim, out_chs), jnp.float32,
                            -1.0 / np.sqrt(fan2), 1.0 / np.sqrt(fan2))
    b2 = jax.random.uniform(k4, (out_chs,), jnp.float32,
                            -1.0 / np.sqrt(fan2), 1.0 / np.sqrt(fan2))
    return {"w1": w1, "b1": b1, "w2": w2, "b2": b2}


def _reference(x_nchw, params):
    """Pure-JAX reference (lax.conv) for correctness check."""
    x = jnp.transpose(x_nchw, (0, 2, 3, 1))
    dn = ("NHWC", "HWIO", "NHWC")
    h = jax.lax.conv_general_dilated(x, params["w1"], (1, 1), "SAME",
                                     dimension_numbers=dn) + params["b1"]
    h = jnp.maximum(h, 0.0)
    o = jax.lax.conv_general_dilated(h, params["w2"], (1, 1), "SAME",
                                     dimension_numbers=dn) + params["b2"]
    return jnp.transpose(o, (0, 3, 1, 2))


if __name__ == "__main__":
    key = jax.random.PRNGKey(0)
    kx, kp = jax.random.split(key)

    N, in_chs, H, W = 2, 4, 16, 16
    out_chs, hidden_dim = 8, 32

    x = jax.random.normal(kx, (N, in_chs, H, W), jnp.float32)
    params = init_params(kp, in_chs, out_chs, hidden_dim)

    fwd = jax.jit(projection_v2)
    out = jax.block_until_ready(fwd(x, params))

    ref = jax.block_until_ready(_reference(x, params))
    np.testing.assert_allclose(np.asarray(out), np.asarray(ref),
                               rtol=1e-4, atol=1e-4)

    print("KERNEL_OK")
</pallas_src>

<mosaic_0001>
module attributes {stable_mosaic.version = 11 : i64} {
  func.func @projection_kernel(%arg0: i32, %arg1: memref<328x4xf32, #tpu.memory_space<vmem>>, %arg2: memref<36x32xf32, #tpu.memory_space<vmem>>, %arg3: memref<1x32xf32, #tpu.memory_space<vmem>>, %arg4: memref<288x8xf32, #tpu.memory_space<vmem>>, %arg5: memref<1x8xf32, #tpu.memory_space<vmem>>, %arg6: memref<288x8xf32, #tpu.memory_space<vmem>>, %arg7: memref<328x32xf32, #tpu.memory_space<vmem>>) attributes {dimension_semantics = [#tpu.dimension_semantics<parallel>], iteration_bounds = array<i64: 2>, scalar_prefetch = 0 : i64, scratch_operands = 1 : i64, tpu.core_type = #tpu.core_type<tc>, window_params = [{transform_indices = @transform_0, window_bounds = array<i64: 328, 4>}, {pipeline_mode = #tpu.pipeline_mode<synchronous>, transform_indices = @transform_1, window_bounds = array<i64: 36, 32>}, {pipeline_mode = #tpu.pipeline_mode<synchronous>, transform_indices = @transform_2, window_bounds = array<i64: 1, 32>}, {pipeline_mode = #tpu.pipeline_mode<synchronous>, transform_indices = @transform_3, window_bounds = array<i64: 288, 8>}, {pipeline_mode = #tpu.pipeline_mode<synchronous>, transform_indices = @transform_4, window_bounds = array<i64: 1, 8>}, {transform_indices = @transform_5, window_bounds = array<i64: 288, 8>}]} {
    %c0 = arith.constant 0 : index
    %c0_0 = arith.constant 0 : index
    %0 = vector.load %arg1[%c0, %c0_0] : memref<328x4xf32, #tpu.memory_space<vmem>>, vector<288x4xf32>
    %c1 = arith.constant 1 : index
    %c0_1 = arith.constant 0 : index
    %1 = vector.load %arg1[%c1, %c0_1] : memref<328x4xf32, #tpu.memory_space<vmem>>, vector<288x4xf32>
    %c2 = arith.constant 2 : index
    %c0_2 = arith.constant 0 : index
    %2 = vector.load %arg1[%c2, %c0_2] : memref<328x4xf32, #tpu.memory_space<vmem>>, vector<288x4xf32>
    %c18 = arith.constant 18 : index
    %c0_3 = arith.constant 0 : index
    %3 = vector.load %arg1[%c18, %c0_3] : memref<328x4xf32, #tpu.memory_space<vmem>>, vector<288x4xf32>
    %c19 = arith.constant 19 : index
    %c0_4 = arith.constant 0 : index
    %4 = vector.load %arg1[%c19, %c0_4] : memref<328x4xf32, #tpu.memory_space<vmem>>, vector<288x4xf32>
    %c20 = arith.constant 20 : index
    %c0_5 = arith.constant 0 : index
    %5 = vector.load %arg1[%c20, %c0_5] : memref<328x4xf32, #tpu.memory_space<vmem>>, vector<288x4xf32>
    %c36 = arith.constant 36 : index
    %c0_6 = arith.constant 0 : index
    %6 = vector.load %arg1[%c36, %c0_6] : memref<328x4xf32, #tpu.memory_space<vmem>>, vector<288x4xf32>
    %c37 = arith.constant 37 : index
    %c0_7 = arith.constant 0 : index
    %7 = vector.load %arg1[%c37, %c0_7] : memref<328x4xf32, #tpu.memory_space<vmem>>, vector<288x4xf32>
    %c38 = arith.constant 38 : index
    %c0_8 = arith.constant 0 : index
    %8 = vector.load %arg1[%c38, %c0_8] : memref<328x4xf32, #tpu.memory_space<vmem>>, vector<288x4xf32>
    %9 = tpu.concatenate %0, %1, %2, %3, %4, %5, %6, %7, %8 in 1 : vector<288x4xf32>, vector<288x4xf32>, vector<288x4xf32>, vector<288x4xf32>, vector<288x4xf32>, vector<288x4xf32>, vector<288x4xf32>, vector<288x4xf32>, vector<288x4xf32> -> vector<288x36xf32>
    %c0_9 = arith.constant 0 : index
    %c0_10 = arith.constant 0 : index
    %10 = vector.load %arg2[%c0_9, %c0_10] : memref<36x32xf32, #tpu.memory_space<vmem>>, vector<36x32xf32>
    %cst = arith.constant dense<0.000000e+00> : vector<288x32xf32>
    %11 = tpu.matmul %9, %10, %cst {dimension_numbers = #tpu.dot_dimension_numbers<[1], [0], [0], [1], [0, 0, 1, 1], [], []>} : vector<288x36xf32>, vector<36x32xf32>, vector<288x32xf32> -> vector<288x32xf32>
    %c0_11 = arith.constant 0 : index
    %c0_12 = arith.constant 0 : index
    %12 = vector.load %arg3[%c0_11, %c0_12] : memref<1x32xf32, #tpu.memory_space<vmem>>, vector<1x32xf32>
    %13 = vector.broadcast %12 : vector<1x32xf32> to vector<288x32xf32>
    %14 = arith.addf %11, %13 : vector<288x32xf32>
    %cst_13 = arith.constant 0.000000e+00 : f32
    %15 = vector.broadcast %cst_13 : f32 to vector<288x32xf32>
    %16 = arith.maximumf %14, %15 : vector<288x32xf32>
    %17 = tpu.iota {dimensions = array<i32: 0>} : vector<288x1xi32>
    %c18_i32 = arith.constant 18 : i32
    %c0_i32 = arith.constant 0 : i32
    %18 = arith.cmpi eq, %c18_i32, %c0_i32 : i32
    %c1_i32 = arith.constant 1 : i32
    %19 = arith.select %18, %c1_i32, %c18_i32 : i32
    %20 = vector.broadcast %19 : i32 to vector<288x1xi32>
    %21 = arith.remsi %17, %20 : vector<288x1xi32>
    %c0_i32_14 = arith.constant 0 : i32
    %22 = vector.broadcast %c0_i32_14 : i32 to vector<288x1xi32>
    %23 = arith.cmpi ne, %21, %22 : vector<288x1xi32>
    %c0_i32_15 = arith.constant 0 : i32
    %24 = vector.broadcast %c0_i32_15 : i32 to vector<288x1xi32>
    %25 = arith.cmpi slt, %21, %24 : vector<288x1xi32>
    %c0_i32_16 = arith.constant 0 : i32
    %26 = arith.cmpi slt, %19, %c0_i32_16 : i32
    %27 = vector.broadcast %26 : i1 to vector<288x1xi1>
    %28 = vector.broadcast %27 : vector<288x1xi1> to vector<288x1xi1>
    %29 = arith.xori %25, %28 : vector<288x1xi1>
    %30 = arith.andi %29, %23 : vector<288x1xi1>
    %31 = vector.broadcast %19 : i32 to vector<288x1xi32>
    %32 = arith.addi %21, %31 : vector<288x1xi32>
    %33 = arith.select %30, %32, %21 : vector<288x1xi1>, vector<288x1xi32>
    %c16_i32 = arith.constant 16 : i32
    %34 = vector.broadcast %c16_i32 : i32 to vector<288x1xi32>
    %35 = arith.cmpi slt, %33, %34 : vector<288x1xi32>
    %cst_17 = arith.constant 0.000000e+00 : f32
    %36 = vector.shape_cast %35 : vector<288x1xi1> to vector<288x1xi1>
    %37 = vector.broadcast %36 : vector<288x1xi1> to vector<288x32xi1>
    %38 = vector.broadcast %cst_17 : f32 to vector<288x32xf32>
    %39 = arith.select %37, %16, %38 : vector<288x32xi1>, vector<288x32xf32>
    %cst_18 = arith.constant 0.000000e+00 : f32
    %40 = vector.broadcast %cst_18 : f32 to vector<19x32xf32>
    %c0_19 = arith.constant 0 : index
    %c0_20 = arith.constant 0 : index
    %41 = vector.load %arg7[%c0_19, %c0_20] : memref<328x32xf32, #tpu.memory_space<vmem>>, vector<19x32xf32>
    tpu.vector_store %arg7[%c0_19, %c0_20], %40 {strides = array<i32>} : memref<328x32xf32, #tpu.memory_space<vmem>>, vector<19x32xf32>,
    %c19_21 = arith.constant 19 : index
    %c0_22 = arith.constant 0 : index
    %42 = vector.load %arg7[%c19_21, %c0_22] : memref<328x32xf32, #tpu.memory_space<vmem>>, vector<288x32xf32>
    tpu.vector_store %arg7[%c19_21, %c0_22], %39 {strides = array<i32>} : memref<328x32xf32, #tpu.memory_space<vmem>>, vector<288x32xf32>,
    %cst_23 = arith.constant 0.000000e+00 : f32
    %43 = vector.broadcast %cst_23 : f32 to vector<21x32xf32>
    %c307 = arith.constant 307 : index
    %c0_24 = arith.constant 0 : index
    %44 = vector.load %arg7[%c307, %c0_24] : memref<328x32xf32, #tpu.memory_space<vmem>>, vector<21x32xf32>
    tpu.vector_store %arg7[%c307, %c0_24], %43 {strides = array<i32>} : memref<328x32xf32, #tpu.memory_space<vmem>>, vector<21x32xf32>,
    %c0_25 = arith.constant 0 : index
    %c0_26 = arith.constant 0 : index
    %45 = vector.load %arg7[%c0_25, %c0_26] : memref<328x32xf32, #tpu.memory_space<vmem>>, vector<288x32xf32>
    %c1_27 = arith.constant 1 : index
    %c0_28 = arith.constant 0 : index
    %46 = vector.load %arg7[%c1_27, %c0_28] : memref<328x32xf32, #tpu.memory_space<vmem>>, vector<288x32xf32>
    %c2_29 = arith.constant 2 : index
    %c0_30 = arith.constant 0 : index
    %47 = vector.load %arg7[%c2_29, %c0_30] : memref<328x32xf32, #tpu.memory_space<vmem>>, vector<288x32xf32>
    %c18_31 = arith.constant 18 : index
    %c0_32 = arith.constant 0 : index
    %48 = vector.load %arg7[%c18_31, %c0_32] : memref<328x32xf32, #tpu.memory_space<vmem>>, vector<288x32xf32>
    %c19_33 = arith.constant 19 : index
    %c0_34 = arith.constant 0 : index
    %49 = vector.load %arg7[%c19_33, %c0_34] : memref<328x32xf32, #tpu.memory_space<vmem>>, vector<288x32xf32>
    %c20_35 = arith.constant 20 : index
    %c0_36 = arith.constant 0 : index
    %50 = vector.load %arg7[%c20_35, %c0_36] : memref<328x32xf32, #tpu.memory_space<vmem>>, vector<288x32xf32>
    %c36_37 = arith.constant 36 : index
    %c0_38 = arith.constant 0 : index
    %51 = vector.load %arg7[%c36_37, %c0_38] : memref<328x32xf32, #tpu.memory_space<vmem>>, vector<288x32xf32>
    %c37_39 = arith.constant 37 : index
    %c0_40 = arith.constant 0 : index
    %52 = vector.load %arg7[%c37_39, %c0_40] : memref<328x32xf32, #tpu.memory_space<vmem>>, vector<288x32xf32>
    %c38_41 = arith.constant 38 : index
    %c0_42 = arith.constant 0 : index
    %53 = vector.load %arg7[%c38_41, %c0_42] : memref<328x32xf32, #tpu.memory_space<vmem>>, vector<288x32xf32>
    %54 = tpu.concatenate %45, %46, %47, %48, %49, %50, %51, %52, %53 in 1 : vector<288x32xf32>, vector<288x32xf32>, vector<288x32xf32>, vector<288x32xf32>, vector<288x32xf32>, vector<288x32xf32>, vector<288x32xf32>, vector<288x32xf32>, vector<288x32xf32> -> vector<288x288xf32>
    %c0_43 = arith.constant 0 : index
    %c0_44 = arith.constant 0 : index
    %55 = vector.load %arg4[%c0_43, %c0_44] : memref<288x8xf32, #tpu.memory_space<vmem>>, vector<288x8xf32>
    %cst_45 = arith.constant dense<0.000000e+00> : vector<288x8xf32>
    %56 = tpu.matmul %54, %55, %cst_45 {dimension_numbers = #tpu.dot_dimension_numbers<[1], [0], [0], [1], [0, 0, 1, 1], [], []>} : vector<288x288xf32>, vector<288x8xf32>, vector<288x8xf32> -> vector<288x8xf32>
    %c0_46 = arith.constant 0 : index
    %c0_47 = arith.constant 0 : index
    %57 = vector.load %arg5[%c0_46, %c0_47] : memref<1x8xf32, #tpu.memory_space<vmem>>, vector<1x8xf32>
    %58 = vector.broadcast %57 : vector<1x8xf32> to vector<288x8xf32>
    %59 = arith.addf %56, %58 : vector<288x8xf32>
    %c0_48 = arith.constant 0 : index
    %c0_49 = arith.constant 0 : index
    %60 = vector.load %arg6[%c0_48, %c0_49] : memref<288x8xf32, #tpu.memory_space<vmem>>, vector<288x8xf32>
    tpu.vector_store %arg6[%c0_48, %c0_49], %59 {strides = array<i32>} : memref<288x8xf32, #tpu.memory_space<vmem>>, vector<288x8xf32>,
    return
  }
  func.func @transform_0(%arg0: i32) -> (i32, i32) {
    %c0_i32 = arith.constant 0 : i32
    %c0_i32_0 = arith.constant 0 : i32
    return %arg0, %c0_i32 : i32, i32
  }
  func.func @transform_1(%arg0: i32) -> (i32, i32) {
    %c0_i32 = arith.constant 0 : i32
    %c0_i32_0 = arith.constant 0 : i32
    %c0_i32_1 = arith.constant 0 : i32
    return %c0_i32, %c0_i32_0 : i32, i32
  }
  func.func @transform_2(%arg0: i32) -> (i32, i32) {
    %c0_i32 = arith.constant 0 : i32
    %c0_i32_0 = arith.constant 0 : i32
    %c0_i32_1 = arith.constant 0 : i32
    return %c0_i32, %c0_i32_0 : i32, i32
  }
  func.func @transform_3(%arg0: i32) -> (i32, i32) {
    %c0_i32 = arith.constant 0 : i32
    %c0_i32_0 = arith.constant 0 : i32
    %c0_i32_1 = arith.constant 0 : i32
    return %c0_i32, %c0_i32_0 : i32, i32
  }
  func.func @transform_4(%arg0: i32) -> (i32, i32) {
    %c0_i32 = arith.constant 0 : i32
    %c0_i32_0 = arith.constant 0 : i32
    %c0_i32_1 = arith.constant 0 : i32
    return %c0_i32, %c0_i32_0 : i32, i32
  }
  func.func @transform_5(%arg0: i32) -> (i32, i32) {
    %c0_i32 = arith.constant 0 : i32
    %c0_i32_0 = arith.constant 0 : i32
    return %arg0, %c0_i32 : i32, i32
  }
}

</mosaic_0001>

<bundles_post_ra>
// kernel: projection_v2.1
= control target key start
LH: loop header
LB: loop body
LE: loop exit
PB: predicated region body
PF: predicated region fallthrough
CT: control target
= control target key end

     0   :  { %s6173_s18 = smov 0   ;;  %s10472_s0 = inlined_call_operand.vmem [shape: f32[656,4], index: 0, kind: input, shape index: {}]   ;;  %s10473_s1 = inlined_call_operand.vmem [shape: f32[36,32], index: 1, kind: input, shape index: {}]   ;;  %s10474_s2 = inlined_call_operand.vmem [shape: f32[1,32], index: 2, kind: input, shape index: {}]   ;;  %s10475_s3 = inlined_call_operand.vmem [shape: f32[288,8], index: 3, kind: input, shape index: {}]   ;;  %s10476_s4 = inlined_call_operand.vmem [shape: f32[1,8], index: 4, kind: input, shape index: {}]   ;;  %s10477_s5 = inlined_call_operand.vmem [shape: f32[576,8], index: 5, kind: output, shape index: {}]  }
   0x1 LB: > { %s5481_s19 = sadd.s32 4294967295, %s6129_s18   ;;  %p5485_p0 = scmp.ge.s32.totalorder %s6129_s18, 1  ;;  %s6129_s18 = sphi %s6173_s18, %s15_s18  }
   0x2   : > { %p188_p1 = scmp.lt.s32.totalorder %s6129_s18, 3 }
   0x4   : > { %p189_p2 = pnand %p5485_p0, %p188_p1 }
   0x6   : > { %192 = sbr.rel (%p189_p2) target bundleno = 1782 (0x6f6), region = 40 }
   0xb   : > { %s216_s20 = smul.u32 41, %s5481_s19  ;;  %s6131_s25 = smov 4   ;;  %vm1982_vm0 = vcmask 1043456   ;;  %vm1568_vm1 = vcmask 31744   ;;  %vm1605_vm2 = vcmask 64512   ;;  %vm1642_vm3 = vcmask 97280  }
   0xc   : > { %s6132_s26 = smov 8   ;;  %s6133_s27 = smov 12   ;;  %vm1679_vm4 = vcmask 130048   ;;  %vm1716_vm5 = vcmask 162816   ;;  %vm1753_vm6 = vcmask 195584   ;;  %vm1790_vm7 = vcmask 228352  }
   0xd   : > { %p217_p3 = scmp.lt.s32.totalorder %s216_s20, 81  ;;  %s6134_s28 = smov 16   ;;  %vm1873_vm8 = vcmask 293888   ;;  %vm1827_vm9 = vcmask 261120  }
   0xe   : > { %s6135_s29 = smov 20   ;;  %s6136_s30 = smov 24  }
   0xf   : > { %s10997_s20 = smov (!%p217_p3, %s216_s20), 81  ;;  %s6137_s6 = smov 28  }
  0x10   : > { %s5486_s21 = sshll.u32 %s10997_s20, 3  ;;  %s6138_s7 = smov 32  }
  0x11   : > { %s6186_s24 = scalar_lea.vmem %s10472_s0, %s5486_s21  ;;  %s6141_s10 = smov 64  }
  0x12   : > { %v268_v0 = vld [vmem:[%s6186_s24 + $0x21] sm:$0xff]  ;;  %v266_v1 = vld [vmem:[%s6186_s24 + $0x11] sm:$0xff]  ;;  %v269_v3 = vld [vmem:[%s6186_s24 + $0x29] sm:$0xff]  ;;  %s6142_s11 = smov 96  }
  0x13   : > { %v264_v2 = vld [vmem:[%s6186_s24 + $0x1] sm:$0xff]  ;;  %528 = vrot.lane.b32.xlu2 %v268_v0, %s6131_s25  ;;  %524 = vrot.lane.b32.xlu1 %v266_v1, %s6131_s25  ;;  %v267_v4 = vld [vmem:[%s6186_s24 + $0x19] sm:$0xff] }
  0x14   : > { %520 = vrot.lane.b32.xlu0 %v264_v2, %s6131_s25  ;;  %v265_v5 = vld [vmem:[%s6186_s24 + $0x9] sm:$0xff]  ;;  %v272_v6 = vld [vmem:[%s6186_s24 + $0x41] sm:$0xff]  ;;  %v271_v7 = vld [vmem:[%s6186_s24 + $0x39] sm:$0xff] }
  0x15   : > { %v270_v8 = vld [vmem:[%s6186_s24 + $0x31] sm:$0xff]  ;;  %v275_v9 = vld [vmem:[%s6186_s24 + $0x59] sm:$0xff]  ;;  %v273_v11 = vld [vmem:[%s6186_s24 + $0x49] sm:$0xff] }
  0x16   : > { %v274_v10 = vld [vmem:[%s6186_s24 + $0x51] sm:$0xff]  ;;  %v277_v13 = vld [vmem:[%s6186_s24 + $0x69] sm:$0xff]  ;;  %v276_v14 = vld [vmem:[%s6186_s24 + $0x61] sm:$0xff] }
  0x17   : > { %v278_v12 = vld [vmem:[%s6186_s24 + $0x71] sm:$0xff]  ;;  %v281_v15 = vld [vmem:[%s6186_s24 + $0x89] sm:$0xff]  ;;  %v280_v16 = vld [vmem:[%s6186_s24 + $0x81] sm:$0xff] }
  0x18   : > { %v279_v17 = vld [vmem:[%s6186_s24 + $0x79] sm:$0xff]  ;;  %v284_v18 = vld [vmem:[%s6186_s24 + $0xa1] sm:$0xff]  ;;  %v282_v20 = vld [vmem:[%s6186_s24 + $0x91] sm:$0xff] }
  0x19   : > { %v283_v19 = vld [vmem:[%s6186_s24 + $0x99] sm:$0xff]  ;;  %v286_v22 = vld [vmem:[%s6186_s24 + $0xb1] sm:$0xff]  ;;  %v285_v23 = vld [vmem:[%s6186_s24 + $0xa9] sm:$0xff] }
  0x1a   : > { %v287_v21 = vld [vmem:[%s6186_s24 + $0xb9] sm:$0xff]  ;;  %v290_v24 = vld [vmem:[%s6186_s24 + $0xd1] sm:$0xff]  ;;  %v289_v25 = vld [vmem:[%s6186_s24 + $0xc9] sm:$0xff] }
  0x1b   : > { %530 = vrot.lane.b32.xlu2 %v269_v3, %s6131_s25  ;;  %526 = vrot.lane.b32.xlu1 %v267_v4, %s6131_s25  ;;  %v288_v26 = vld [vmem:[%s6186_s24 + $0xc1] sm:$0xff]  ;;  %v293_v27 = vld [vmem:[%s6186_s24 + $0xe9] sm:$0xff] }
  0x1c   : > { %522 = vrot.lane.b32.xlu0 %v265_v5, %s6131_s25  ;;  %v292_v28 = vld [vmem:[%s6186_s24 + $0xe1] sm:$0xff]  ;;  %v291_v29 = vld [vmem:[%s6186_s24 + $0xd9] sm:$0xff]  ;;  %v294_v32 = vld [vmem:[%s6186_s24 + $0xf1] sm:$0xff] }
  0x1d   : > { %v296_v30 = vld [vmem:[%s6186_s24 + $0x101] sm:$0xff]  ;;  %v295_v31 = vld [vmem:[%s6186_s24 + $0xf9] sm:$0xff]  ;;  %v298_v34 = vld [vmem:[%s6186_s24 + $0x111] sm:$0xff] }
  0x1e   : > { %v299_v33 = vld [vmem:[%s6186_s24 + $0x119] sm:$0xff]  ;;  %v297_v35 = vld [vmem:[%s6186_s24 + $0x109] sm:$0xff] }
  0x1f   : > { %v6263_v37 = vld [vmem:[%s6186_s24 + $0x12] sm:$0xff]  ;;  %v301_v38 = vld [vmem:[%s6186_s24 + $0xa] sm:$0xff]  ;;  %v300_v39 = vld [vmem:[%s6186_s24 + $0x2] sm:$0xff] }
  0x20   : > { %v6274_v41 = vld [vmem:[%s6186_s24 + $0x2a] sm:$0xff]  ;;  %v6277_v42 = vld [vmem:[%s6186_s24 + $0x22] sm:$0xff]  ;;  %v6280_v43 = vld [vmem:[%s6186_s24 + $0x1a] sm:$0xff] }
  0x21   : > { %v6291_v45 = vld [vmem:[%s6186_s24 + $0x42] sm:$0xff]  ;;  %v6294_v46 = vld [vmem:[%s6186_s24 + $0x3a] sm:$0xff]  ;;  %v6297_v47 = vld [vmem:[%s6186_s24 + $0x32] sm:$0xff] }
  0x22   : > { %v6312_v51 = vld [vmem:[%s6186_s24 + $0x5a] sm:$0xff]  ;;  %v6315_v52 = vld [vmem:[%s6186_s24 + $0x52] sm:$0xff]  ;;  %v6318_v53 = vld [vmem:[%s6186_s24 + $0x4a] sm:$0xff] }
  0x23   : > { %536 = vrot.lane.b32.xlu2 %v272_v6, %s6131_s25  ;;  %534 = vrot.lane.b32.xlu1 %v271_v7, %s6131_s25  ;;  %v6333_v57 = vld [vmem:[%s6186_s24 + $0x72] sm:$0xff]  ;;  %v6336_v58 = vld [vmem:[%s6186_s24 + $0x6a] sm:$0xff] }
  0x24   : > { %532 = vrot.lane.b32.xlu0 %v270_v8, %s6131_s25  ;;  %v6339_v59 = vld [vmem:[%s6186_s24 + $0x62] sm:$0xff]  ;;  %v6354_v63 = vld [vmem:[%s6186_s24 + $0x8a] sm:$0xff]  ;;  %v6360_v1 = vld [vmem:[%s6186_s24 + $0x7a] sm:$0xff] }
  0x25   : > { %v6357_v0 = vld [vmem:[%s6186_s24 + $0x82] sm:$0xff]  ;;  %v6378_v6 = vld [vmem:[%s6186_s24 + $0x9a] sm:$0xff]  ;;  %v6381_v7 = vld [vmem:[%s6186_s24 + $0x92] sm:$0xff] }
  0x26   : > { %v6375_v5 = vld [vmem:[%s6186_s24 + $0xa2] sm:$0xff] }
  0x2b   : > { %542 = vrot.lane.b32.xlu2 %v275_v9, %s6131_s25  ;;  %540 = vrot.lane.b32.xlu1 %v274_v10, %s6131_s25 }
  0x2c   : > { %538 = vrot.lane.b32.xlu0 %v273_v11, %s6131_s25  ;;  %v6396_v11 = vld [vmem:[%s6186_s24 + $0xba] sm:$0xff] }
  0x33   : > { %548 = vrot.lane.b32.xlu2 %v278_v12, %s6131_s25  ;;  %546 = vrot.lane.b32.xlu1 %v277_v13, %s6131_s25  ;;  %v6399_v12 = vld [vmem:[%s6186_s24 + $0xb2] sm:$0xff]  ;;  %v6402_v13 = vld [vmem:[%s6186_s24 + $0xaa] sm:$0xff] }
  0x34   : > { %544 = vrot.lane.b32.xlu0 %v276_v14, %s6131_s25 }
  0x3b   : > { %554 = vrot.lane.b32.xlu2 %v281_v15, %s6131_s25  ;;  %552 = vrot.lane.b32.xlu1 %v280_v16, %s6131_s25 }
  0x3c   : > { %550 = vrot.lane.b32.xlu0 %v279_v17, %s6131_s25  ;;  %v6417_v17 = vld [vmem:[%s6186_s24 + $0xd2] sm:$0xff] }
  0x43   : > { %560 = vrot.lane.b32.xlu2 %v284_v18, %s6131_s25  ;;  %558 = vrot.lane.b32.xlu1 %v283_v19, %s6131_s25  ;;  %v6420_v18 = vld [vmem:[%s6186_s24 + $0xca] sm:$0xff]  ;;  %v6423_v19 = vld [vmem:[%s6186_s24 + $0xc2] sm:$0xff] }
  0x44   : > { %556 = vrot.lane.b32.xlu0 %v282_v20, %s6131_s25 }
  0x4b   : > { %566 = vrot.lane.b32.xlu2 %v287_v21, %s6131_s25  ;;  %564 = vrot.lane.b32.xlu1 %v286_v22, %s6131_s25 }
  0x4c   : > { %562 = vrot.lane.b32.xlu0 %v285_v23, %s6131_s25  ;;  %v6438_v23 = vld [vmem:[%s6186_s24 + $0xea] sm:$0xff] }
  0x53   : > { %572 = vrot.lane.b32.xlu2 %v290_v24, %s6131_s25  ;;  %570 = vrot.lane.b32.xlu1 %v289_v25, %s6131_s25  ;;  %v6441_v24 = vld [vmem:[%s6186_s24 + $0xe2] sm:$0xff]  ;;  %v6444_v25 = vld [vmem:[%s6186_s24 + $0xda] sm:$0xff] }
  0x54   : > { %568 = vrot.lane.b32.xlu0 %v288_v26, %s6131_s25 }
  0x5b   : > { %578 = vrot.lane.b32.xlu2 %v293_v27, %s6131_s25  ;;  %576 = vrot.lane.b32.xlu1 %v292_v28, %s6131_s25 }
  0x5c   : > { %574 = vrot.lane.b32.xlu0 %v291_v29, %s6131_s25  ;;  %v6459_v29 = vld [vmem:[%s6186_s24 + $0x102] sm:$0xff] }
  0x63   : > { %584 = vrot.lane.b32.xlu2 %v296_v30, %s6131_s25  ;;  %582 = vrot.lane.b32.xlu1 %v295_v31, %s6131_s25  ;;  %v6462_v30 = vld [vmem:[%s6186_s24 + $0xfa] sm:$0xff]  ;;  %v6465_v31 = vld [vmem:[%s6186_s24 + $0xf2] sm:$0xff] }
  0x64   : > { %580 = vrot.lane.b32.xlu0 %v294_v32, %s6131_s25 }
  0x6b   : > { %590 = vrot.lane.b32.xlu2 %v299_v33, %s6131_s25  ;;  %588 = vrot.lane.b32.xlu1 %v298_v34, %s6131_s25 }
  0x6c   : > { %586 = vrot.lane.b32.xlu0 %v297_v35, %s6131_s25  ;;  %v6480_v35 = vld [vmem:[%s6186_s24 + $0x11a] sm:$0xff] }
  0x6d   : > { %v6260_v36 = vpop.permute.xlu2 %528 }
  0x73   : > { %668 = vrot.lane.b32.xlu2 %v6263_v37, %s6132_s26  ;;  %666 = vrot.lane.b32.xlu1 %v301_v38, %s6132_s26  ;;  %v6483_v38 = vld [vmem:[%s6186_s24 + $0x112] sm:$0xff] }
  0x74   : > { %664 = vrot.lane.b32.xlu0 %v300_v39, %s6132_s26  ;;  %v6486_v39 = vld [vmem:[%s6186_s24 + $0x10a] sm:$0xff] }
  0x75   : > { %v6271_v40 = vpop.permute.xlu2 %530 }
  0x7b   : > { %674 = vrot.lane.b32.xlu2 %v6274_v41, %s6132_s26  ;;  %672 = vrot.lane.b32.xlu1 %v6277_v42, %s6132_s26 }
  0x7c   : > { %670 = vrot.lane.b32.xlu0 %v6280_v43, %s6132_s26 }
  0x7d   : > { %v6288_v44 = vpop.permute.xlu2 %536 }
  0x83   : > { %680 = vrot.lane.b32.xlu2 %v6291_v45, %s6132_s26  ;;  %678 = vrot.lane.b32.xlu1 %v6294_v46, %s6132_s26 }
  0x84   : > { %676 = vrot.lane.b32.xlu0 %v6297_v47, %s6132_s26 }
  0x85   : > { %v6305_v48 = vpop.permute.xlu2 %542  ;;  %v6307_v49 = vpop.permute.xlu1 %524 }
  0x86   : > { %v6309_v50 = vpop.permute.xlu0 %520 }
  0x8b   : > { %686 = vrot.lane.b32.xlu2 %v6312_v51, %s6132_s26  ;;  %684 = vrot.lane.b32.xlu1 %v6315_v52, %s6132_s26 }
  0x8c   : > { %682 = vrot.lane.b32.xlu0 %v6318_v53, %s6132_s26 }
  0x8d   : > { %v6326_v54 = vpop.permute.xlu2 %548  ;;  %v6328_v55 = vpop.permute.xlu1 %526 }
  0x8e   : > { %10483 = vst [vmem:[#allocation3_spill] sm:$0xff] %v6326_v54  ;;  %v6330_v56 = vpop.permute.xlu0 %522 }
  0x93   : > { %692 = vrot.lane.b32.xlu2 %v6333_v57, %s6132_s26  ;;  %690 = vrot.lane.b32.xlu1 %v6336_v58, %s6132_s26 }
  0x94   : > { %688 = vrot.lane.b32.xlu0 %v6339_v59, %s6132_s26 }
  0x95   : > { %v6347_v60 = vpop.permute.xlu2 %554  ;;  %v6349_v61 = vpop.permute.xlu1 %534 }
  0x96   : > { %10484 = vst [vmem:[#allocation4_spill] sm:$0xff] %v6347_v60  ;;  %v6351_v62 = vpop.permute.xlu0 %532 }
  0x97   : > { %10485 = vst [vmem:[#allocation5_spill] sm:$0xff] %v6349_v61  ;;  %v7020_v61 = vld [vmem:[%s6186_s24 + $0x11c] sm:$0xff] }
  0x98   : > { %10486 = vst [vmem:[#allocation6_spill] sm:$0xff] %v6351_v62  ;;  %v7014_v62 = vld [vmem:[%s6186_s24 + $0x12c] sm:$0xff] }
  0x9b   : > { %698 = vrot.lane.b32.xlu2 %v6354_v63, %s6132_s26  ;;  %696 = vrot.lane.b32.xlu1 %v6357_v0, %s6132_s26 }
  0x9c   : > { %694 = vrot.lane.b32.xlu0 %v6360_v1, %s6132_s26 }
  0x9d   : > { %v6368_v2 = vpop.permute.xlu2 %560  ;;  %v6370_v3 = vpop.permute.xlu1 %540 }
  0x9e   : > { %10487 = vst [vmem:[#allocation7_spill] sm:$0xff] %v6368_v2  ;;  %v6372_v4 = vpop.permute.xlu0 %538  ;;  %v6999_v2 = vld [vmem:[%s6186_s24 + $0x104] sm:$0xff] }
  0x9f   : > { %10488 = vst [vmem:[#allocation8_spill] sm:$0xff] %v6370_v3  ;;  %v6996_v3 = vld [vmem:[%s6186_s24 + $0x10c] sm:$0xff] }
  0xa0   : > { %10489 = vst [vmem:[#allocation9_spill] sm:$0xff] %v6372_v4  ;;  %v6993_v4 = vld [vmem:[%s6186_s24 + $0x114] sm:$0xff] }
  0xa3   : > { %704 = vrot.lane.b32.xlu2 %v6375_v5, %s6132_s26  ;;  %702 = vrot.lane.b32.xlu1 %v6378_v6, %s6132_s26 }
  0xa4   : > { %700 = vrot.lane.b32.xlu0 %v6381_v7, %s6132_s26 }
  0xa5   : > { %v6389_v8 = vpop.permute.xlu2 %566  ;;  %v6391_v9 = vpop.permute.xlu1 %546 }
  0xa6   : > { %10490 = vst [vmem:[#allocation10_spill] sm:$0xff] %v6389_v8  ;;  %v6393_v10 = vpop.permute.xlu0 %544  ;;  %v6978_v8 = vld [vmem:[%s6186_s24 + $0xec] sm:$0xff] }
  0xa7   : > { %10491 = vst [vmem:[#allocation11_spill] sm:$0xff] %v6391_v9  ;;  %v6975_v9 = vld [vmem:[%s6186_s24 + $0xf4] sm:$0xff] }
  0xa8   : > { %10492 = vst [vmem:[#allocation12_spill] sm:$0xff] %v6393_v10  ;;  %v6972_v10 = vld [vmem:[%s6186_s24 + $0xfc] sm:$0xff] }
  0xab   : > { %710 = vrot.lane.b32.xlu2 %v6396_v11, %s6132_s26  ;;  %708 = vrot.lane.b32.xlu1 %v6399_v12, %s6132_s26 }
  0xac   : > { %706 = vrot.lane.b32.xlu0 %v6402_v13, %s6132_s26 }
  0xad   : > { %v6410_v14 = vpop.permute.xlu2 %572  ;;  %v6412_v15 = vpop.permute.xlu1 %552 }
  0xae   : > { %10493 = vst [vmem:[#allocation13_spill] sm:$0xff] %v6410_v14  ;;  %v6414_v16 = vpop.permute.xlu0 %550  ;;  %v6957_v14 = vld [vmem:[%s6186_s24 + $0xd4] sm:$0xff] }
  0xaf   : > { %10494 = vst [vmem:[#allocation14_spill] sm:$0xff] %v6412_v15  ;;  %v6954_v15 = vld [vmem:[%s6186_s24 + $0xdc] sm:$0xff] }
  0xb0   : > { %10495 = vst [vmem:[#allocation15_spill] sm:$0xff] %v6414_v16  ;;  %v6951_v16 = vld [vmem:[%s6186_s24 + $0xe4] sm:$0xff] }
  0xb3   : > { %716 = vrot.lane.b32.xlu2 %v6417_v17, %s6132_s26  ;;  %714 = vrot.lane.b32.xlu1 %v6420_v18, %s6132_s26 }
  0xb4   : > { %712 = vrot.lane.b32.xlu0 %v6423_v19, %s6132_s26 }
  0xb5   : > { %v6431_v20 = vpop.permute.xlu2 %578  ;;  %v6433_v21 = vpop.permute.xlu1 %558 }
  0xb6   : > { %10496 = vst [vmem:[#allocation16_spill] sm:$0xff] %v6431_v20  ;;  %v6435_v22 = vpop.permute.xlu0 %556  ;;  %v6936_v20 = vld [vmem:[%s6186_s24 + $0xbc] sm:$0xff] }
  0xb7   : > { %10497 = vst [vmem:[#allocation17_spill] sm:$0xff] %v6433_v21  ;;  %v6933_v21 = vld [vmem:[%s6186_s24 + $0xc4] sm:$0xff] }
  0xb8   : > { %10498 = vst [vmem:[#allocation18_spill] sm:$0xff] %v6435_v22  ;;  %v6930_v22 = vld [vmem:[%s6186_s24 + $0xcc] sm:$0xff] }
  0xbb   : > { %722 = vrot.lane.b32.xlu2 %v6438_v23, %s6132_s26  ;;  %720 = vrot.lane.b32.xlu1 %v6441_v24, %s6132_s26 }
  0xbc   : > { %718 = vrot.lane.b32.xlu0 %v6444_v25, %s6132_s26 }
  0xbd   : > { %v6452_v26 = vpop.permute.xlu2 %584  ;;  %v6454_v27 = vpop.permute.xlu1 %564 }
  0xbe   : > { %10499 = vst [vmem:[#allocation19_spill] sm:$0xff] %v6452_v26  ;;  %v6456_v28 = vpop.permute.xlu0 %562 }
  0xbf   : > { %10500 = vst [vmem:[#allocation20_spill] sm:$0xff] %v6454_v27 }
  0xc0   : > { %10501 = vst [vmem:[#allocation21_spill] sm:$0xff] %v6456_v28 }
  0xc3   : > { %728 = vrot.lane.b32.xlu2 %v6459_v29, %s6132_s26  ;;  %726 = vrot.lane.b32.xlu1 %v6462_v30, %s6132_s26 }
  0xc4   : > { %724 = vrot.lane.b32.xlu0 %v6465_v31, %s6132_s26 }
  0xc5   : > { %v6473_v32 = vpop.permute.xlu2 %590  ;;  %v6475_v33 = vpop.permute.xlu1 %570 }
  0xc6   : > { %10502 = vst [vmem:[#allocation22_spill] sm:$0xff] %v6473_v32  ;;  %v6477_v34 = vpop.permute.xlu0 %568 }
  0xc7   : > { %10503 = vst [vmem:[#allocation23_spill] sm:$0xff] %v6475_v33 }
  0xc8   : > { %10504 = vst [vmem:[#allocation24_spill] sm:$0xff] %v6477_v34 }
  0xcb   : > { %734 = vrot.lane.b32.xlu2 %v6480_v35, %s6132_s26  ;;  %732 = vrot.lane.b32.xlu1 %v6483_v38, %s6132_s26 }
  0xcc   : > { %730 = vrot.lane.b32.xlu0 %v6486_v39, %s6132_s26 }
  0xcd   : > { %v6494_v32 = vpop.permute.xlu2 %668  ;;  %v6496_v33 = vpop.permute.xlu1 %576 }
  0xce   : > { %10505 = vst [vmem:[#allocation25_spill] sm:$0xff] %v6496_v33  ;;  %v6498_v34 = vpop.permute.xlu0 %574  ;;  %v6912_v33 = vld [vmem:[%s6186_s24 + $0xac] sm:$0xff] }
  0xcf   : > { %10506 = vst [vmem:[#allocation26_spill] sm:$0xff] %v6498_v34  ;;  %v6909_v34 = vld [vmem:[%s6186_s24 + $0xb4] sm:$0xff] }
  0xd3   : > { %778 = vrot.lane.b32.xlu2 %v6277_v42, %s6133_s27  ;;  %776 = vrot.lane.b32.xlu1 %v6280_v43, %s6133_s27 }
  0xd4   : > { %774 = vrot.lane.b32.xlu0 %v6263_v37, %s6133_s27 }
  0xd5   : > { %v6506_v28 = vpop.permute.xlu2 %674  ;;  %v6508_v27 = vpop.permute.xlu1 %582 }
  0xd6   : > { %10507 = vst [vmem:[#allocation27_spill] sm:$0xff] %v6508_v27  ;;  %v6510_v26 = vpop.permute.xlu0 %580  ;;  %v6894_v27 = vld [vmem:[%s6186_s24 + $0x8c] sm:$0xff] }
  0xd7   : > { %10508 = vst [vmem:[#allocation28_spill] sm:$0xff] %v6510_v26  ;;  %v6888_v26 = vld [vmem:[%s6186_s24 + $0x9c] sm:$0xff] }
  0xdb   : > { %784 = vrot.lane.b32.xlu2 %v6294_v46, %s6133_s27  ;;  %782 = vrot.lane.b32.xlu1 %v6297_v47, %s6133_s27 }
  0xdc   : > { %780 = vrot.lane.b32.xlu0 %v6274_v41, %s6133_s27 }
  0xdd   : > { %v6518_v42 = vpop.permute.xlu2 %680  ;;  %v6520_v43 = vpop.permute.xlu1 %588 }
  0xde   : > { %10509 = vst [vmem:[#allocation29_spill] sm:$0xff] %v6518_v42  ;;  %v6522_v37 = vpop.permute.xlu0 %586 }
  0xdf   : > { %10510 = vst [vmem:[#allocation30_spill] sm:$0xff] %v6520_v43 }
  0xe0   : > { %10511 = vst [vmem:[#allocation31_spill] sm:$0xff] %v6522_v37  ;;  %v6873_v37 = vld [vmem:[%s6186_s24 + $0x74] sm:$0xff] }
  0xe3   : > { %790 = vrot.lane.b32.xlu2 %v6315_v52, %s6133_s27  ;;  %788 = vrot.lane.b32.xlu1 %v6318_v53, %s6133_s27 }
  0xe4   : > { %786 = vrot.lane.b32.xlu0 %v6291_v45, %s6133_s27 }
  0xe5   : > { %v6530_v46 = vpop.permute.xlu2 %686  ;;  %v6532_v47 = vpop.permute.xlu1 %666 }
  0xe6   : > { %10512 = vst [vmem:[#allocation32_spill] sm:$0xff] %v6530_v46  ;;  %v6534_v41 = vpop.permute.xlu0 %664  ;;  %v6870_v46 = vld [vmem:[%s6186_s24 + $0x7c] sm:$0xff] }
  0xeb   : > { %796 = vrot.lane.b32.xlu2 %v6336_v58, %s6133_s27  ;;  %794 = vrot.lane.b32.xlu1 %v6339_v59, %s6133_s27 }
  0xec   : > { %792 = vrot.lane.b32.xlu0 %v6312_v51, %s6133_s27 }
  0xed   : > { %v6542_v52 = vpop.permute.xlu2 %692  ;;  %v6544_v53 = vpop.permute.xlu1 %672 }
  0xee   : > { %10513 = vst [vmem:[#allocation33_spill] sm:$0xff] %v6542_v52  ;;  %v6546_v45 = vpop.permute.xlu0 %670  ;;  %v6867_v52 = vld [vmem:[%s6186_s24 + $0x84] sm:$0xff] }
  0xf3   : > { %802 = vrot.lane.b32.xlu2 %v6357_v0, %s6133_s27  ;;  %800 = vrot.lane.b32.xlu1 %v6360_v1, %s6133_s27 }
  0xf4   : > { %798 = vrot.lane.b32.xlu0 %v6333_v57, %s6133_s27 }
  0xf5   : > { %v6554_v58 = vpop.permute.xlu2 %698  ;;  %v6556_v59 = vpop.permute.xlu1 %678 }
  0xf6   : > { %10514 = vst [vmem:[#allocation34_spill] sm:$0xff] %v6554_v58  ;;  %v6558_v51 = vpop.permute.xlu0 %676 }
  0xf7   : > { %10515 = vst [vmem:[#allocation35_spill] sm:$0xff] %v6556_v59 }
  0xf8   : > { %10516 = vst [vmem:[#allocation36_spill] sm:$0xff] %v6558_v51  ;;  %v6915_v51 = vld [vmem:[%s6186_s24 + $0xa4] sm:$0xff] }
  0xfb   : > { %808 = vrot.lane.b32.xlu2 %v6378_v6, %s6133_s27  ;;  %806 = vrot.lane.b32.xlu1 %v6381_v7, %s6133_s27 }
  0xfc   : > { %804 = vrot.lane.b32.xlu0 %v6354_v63, %s6133_s27 }
  0xfd   : > { %v6566_v0 = vpop.permute.xlu2 %704  ;;  %v6568_v1 = vpop.permute.xlu1 %684 }
  0xfe   : > { %10517 = vst [vmem:[#allocation37_spill] sm:$0xff] %v6566_v0  ;;  %v6570_v57 = vpop.permute.xlu0 %682  ;;  %v6852_v0 = vld [vmem:[%s6186_s24 + $0x5c] sm:$0xff] }
  0xff   : > { %10518 = vst [vmem:[#allocation38_spill] sm:$0xff] %v6568_v1  ;;  %v6849_v1 = vld [vmem:[%s6186_s24 + $0x64] sm:$0xff] }
 0x100   : > { %10519 = vst [vmem:[#allocation39_spill] sm:$0xff] %v6570_v57  ;;  %v6846_v57 = vld [vmem:[%s6186_s24 + $0x6c] sm:$0xff] }
 0x103   : > { %814 = vrot.lane.b32.xlu2 %v6399_v12, %s6133_s27  ;;  %812 = vrot.lane.b32.xlu1 %v6402_v13, %s6133_s27 }
 0x104   : > { %810 = vrot.lane.b32.xlu0 %v6375_v5, %s6133_s27 }
 0x105   : > { %v6578_v6 = vpop.permute.xlu2 %710  ;;  %v6580_v7 = vpop.permute.xlu1 %690 }
 0x106   : > { %10520 = vst [vmem:[#allocation40_spill] sm:$0xff] %v6578_v6  ;;  %v6582_v63 = vpop.permute.xlu0 %688  ;;  %v6831_v6 = vld [vmem:[%s6186_s24 + $0x44] sm:$0xff] }
 0x107   : > { %10521 = vst [vmem:[#allocation41_spill] sm:$0xff] %v6580_v7  ;;  %v6828_v7 = vld [vmem:[%s6186_s24 + $0x4c] sm:$0xff] }
 0x108   : > { %10522 = vst [vmem:[#allocation42_spill] sm:$0xff] %v6582_v63  ;;  %v6810_v63 = vld [vmem:[%s6186_s24 + $0x2c] sm:$0xff] }
 0x10b   : > { %820 = vrot.lane.b32.xlu2 %v6420_v18, %s6133_s27  ;;  %818 = vrot.lane.b32.xlu1 %v6423_v19, %s6133_s27 }
 0x10c   : > { %816 = vrot.lane.b32.xlu0 %v6396_v11, %s6133_s27 }
 0x10d   : > { %v6590_v12 = vpop.permute.xlu2 %716  ;;  %v6592_v13 = vpop.permute.xlu1 %696 }
 0x10e   : > { %10523 = vst [vmem:[#allocation43_spill] sm:$0xff] %v6590_v12  ;;  %v6594_v5 = vpop.permute.xlu0 %694  ;;  %v356_v12 = vld [vmem:[%s6186_s24 + $0xa3] sm:$0xff] }
 0x10f   : > { %10524 = vst [vmem:[#allocation44_spill] sm:$0xff] %v6592_v13  ;;  %v353_v13 = vld [vmem:[%s6186_s24 + $0x8b] sm:$0xff] }
 0x110   : > { %10525 = vst [vmem:[#allocation45_spill] sm:$0xff] %v6594_v5  ;;  %v354_v5 = vld [vmem:[%s6186_s24 + $0x93] sm:$0xff] }
 0x113   : > { %826 = vrot.lane.b32.xlu2 %v6441_v24, %s6133_s27  ;;  %824 = vrot.lane.b32.xlu1 %v6444_v25, %s6133_s27 }
 0x114   : > { %822 = vrot.lane.b32.xlu0 %v6417_v17, %s6133_s27 }
 0x115   : > { %v6602_v18 = vpop.permute.xlu2 %722  ;;  %v6604_v11 = vpop.permute.xlu1 %702 }
 0x116   : > { %10526 = vst [vmem:[#allocation46_spill] sm:$0xff] %v6602_v18  ;;  %v6606_v19 = vpop.permute.xlu0 %700  ;;  %v350_v18 = vld [vmem:[%s6186_s24 + $0x73] sm:$0xff] }
 0x117   : > { %10527 = vst [vmem:[#allocation47_spill] sm:$0xff] %v6604_v11  ;;  %v351_v11 = vld [vmem:[%s6186_s24 + $0x7b] sm:$0xff] }
 0x118   : > { %10528 = vst [vmem:[#allocation48_spill] sm:$0xff] %v6606_v19  ;;  %v344_v19 = vld [vmem:[%s6186_s24 + $0x43] sm:$0xff] }
 0x11b   : > { %832 = vrot.lane.b32.xlu2 %v6462_v30, %s6133_s27  ;;  %830 = vrot.lane.b32.xlu1 %v6465_v31, %s6133_s27 }
 0x11c   : > { %828 = vrot.lane.b32.xlu0 %v6438_v23, %s6133_s27 }
 0x11d   : > { %v6614_v24 = vpop.permute.xlu2 %728  ;;  %v6616_v17 = vpop.permute.xlu1 %708 }
 0x11e   : > { %10529 = vst [vmem:[#allocation49_spill] sm:$0xff] %v6614_v24  ;;  %v6618_v25 = vpop.permute.xlu0 %706  ;;  %v336_v24 = vld [vmem:[%s6186_s24 + $0x122] sm:$0xff] }
 0x11f   : > { %10530 = vst [vmem:[#allocation50_spill] sm:$0xff] %v6616_v17  ;;  %v337_v17 = vld [vmem:[%s6186_s24 + $0x12a] sm:$0xff] }
 0x120   : > { %10531 = vst [vmem:[#allocation51_spill] sm:$0xff] %v6618_v25  ;;  %v341_v25 = vld [vmem:[%s6186_s24 + $0x2b] sm:$0xff] }
 0x123   : > { %838 = vrot.lane.b32.xlu2 %v6483_v38, %s6133_s27  ;;  %836 = vrot.lane.b32.xlu1 %v6486_v39, %s6133_s27 }
 0x124   : > { %834 = vrot.lane.b32.xlu0 %v6459_v29, %s6133_s27 }
 0x125   : > { %v6626_v30 = vpop.permute.xlu2 %734  ;;  %v6628_v23 = vpop.permute.xlu1 %714 }
 0x126   : > { %10532 = vst [vmem:[#allocation52_spill] sm:$0xff] %v6626_v30  ;;  %v6630_v31 = vpop.permute.xlu0 %712  ;;  %v338_v30 = vld [vmem:[%s6186_s24 + $0x13] sm:$0xff] }
 0x127   : > { %10533 = vst [vmem:[#allocation53_spill] sm:$0xff] %v6628_v23  ;;  %v340_v23 = vld [vmem:[%s6186_s24 + $0x23] sm:$0xff] }
 0x128   : > { %10534 = vst [vmem:[#allocation54_spill] sm:$0xff] %v6630_v31  ;;  %v339_v31 = vld [vmem:[%s6186_s24 + $0x1b] sm:$0xff] }
 0x12b   : > { %844 = vrot.lane.b32.xlu2 %v337_v17, %s6133_s27  ;;  %842 = vrot.lane.b32.xlu1 %v336_v24, %s6133_s27 }
 0x12c   : > { %840 = vrot.lane.b32.xlu0 %v6480_v35, %s6133_s27 }
 0x12d   : > { %v6638_v38 = vpop.permute.xlu2 %778  ;;  %v6640_v29 = vpop.permute.xlu1 %720 }
 0x12e   : > { %10535 = vst [vmem:[#allocation55_spill] sm:$0xff] %v6640_v29  ;;  %v6642_v39 = vpop.permute.xlu0 %718  ;;  %v342_v29 = vld [vmem:[%s6186_s24 + $0x33] sm:$0xff] }
 0x12f   : > { %10536 = vst [vmem:[#allocation56_spill] sm:$0xff] %v6642_v39  ;;  %v343_v39 = vld [vmem:[%s6186_s24 + $0x3b] sm:$0xff] }
 0x133   : > { %922 = vrot.lane.b32.xlu2 %v340_v23, %s6134_s28  ;;  %920 = vrot.lane.b32.xlu1 %v339_v31, %s6134_s28 }
 0x134   : > { %918 = vrot.lane.b32.xlu0 %v338_v30, %s6134_s28 }
 0x135   : > { %v6650_v35 = vpop.permute.xlu2 %784  ;;  %v6652_v24 = vpop.permute.xlu1 %726 }
 0x136   : > { %10537 = vst [vmem:[#allocation57_spill] sm:$0xff] %v6650_v35  ;;  %v6654_v17 = vpop.permute.xlu0 %724 }
 0x137   : > { %10538 = vst [vmem:[#allocation58_spill] sm:$0xff] %v6652_v24  ;;  %v346_v24 = vld [vmem:[%s6186_s24 + $0x53] sm:$0xff] }
 0x138   : > { %10539 = vst [vmem:[#allocation59_spill] sm:$0xff] %v6654_v17  ;;  %v345_v17 = vld [vmem:[%s6186_s24 + $0x4b] sm:$0xff] }
 0x13b   : > { %928 = vrot.lane.b32.xlu2 %v343_v39, %s6134_s28  ;;  %926 = vrot.lane.b32.xlu1 %v342_v29, %s6134_s28 }
 0x13c   : > { %924 = vrot.lane.b32.xlu0 %v341_v25, %s6134_s28 }
 0x13d   : > { %v6662_v23 = vpop.permute.xlu2 %790  ;;  %v6664_v30 = vpop.permute.xlu1 %732 }
 0x13e   : > { %10540 = vst [vmem:[#allocation60_spill] sm:$0xff] %v6662_v23  ;;  %v6666_v31 = vpop.permute.xlu0 %730  ;;  %v347_v23 = vld [vmem:[%s6186_s24 + $0x5b] sm:$0xff] }
 0x13f   : > { %10541 = vst [vmem:[#allocation61_spill] sm:$0xff] %v6664_v30  ;;  %v349_v30 = vld [vmem:[%s6186_s24 + $0x6b] sm:$0xff] }
 0x140   : > { %10542 = vst [vmem:[#allocation62_spill] sm:$0xff] %v6666_v31  ;;  %v348_v31 = vld [vmem:[%s6186_s24 + $0x63] sm:$0xff] }
 0x143   : > { %934 = vrot.lane.b32.xlu2 %v346_v24, %s6134_s28  ;;  %932 = vrot.lane.b32.xlu1 %v345_v17, %s6134_s28 }
 0x144   : > { %930 = vrot.lane.b32.xlu0 %v344_v19, %s6134_s28 }
 0x145   : > { %v6674_v29 = vpop.permute.xlu2 %796  ;;  %v6676_v25 = vpop.permute.xlu1 %776 }
 0x146   : > { %10543 = vst [vmem:[#allocation63_spill] sm:$0xff] %v6674_v29  ;;  %v6678_v39 = vpop.permute.xlu0 %774  ;;  %v352_v29 = vld [vmem:[%s6186_s24 + $0x83] sm:$0xff] }
 0x14b   : > { %940 = vrot.lane.b32.xlu2 %v349_v30, %s6134_s28  ;;  %938 = vrot.lane.b32.xlu1 %v348_v31, %s6134_s28 }
 0x14c   : > { %936 = vrot.lane.b32.xlu0 %v347_v23, %s6134_s28 }
 0x14d   : > { %v6686_v24 = vpop.permute.xlu2 %802  ;;  %v6688_v19 = vpop.permute.xlu1 %782 }
 0x14e   : > { %10544 = vst [vmem:[#allocation64_spill] sm:$0xff] %v6686_v24  ;;  %v6690_v17 = vpop.permute.xlu0 %780  ;;  %v355_v24 = vld [vmem:[%s6186_s24 + $0x9b] sm:$0xff] }
 0x153   : > { %946 = vrot.lane.b32.xlu2 %v352_v29, %s6134_s28  ;;  %944 = vrot.lane.b32.xlu1 %v351_v11, %s6134_s28 }
 0x154   : > { %942 = vrot.lane.b32.xlu0 %v350_v18, %s6134_s28 }
 0x155   : > { %v6698_v30 = vpop.permute.xlu2 %808  ;;  %v6700_v23 = vpop.permute.xlu1 %788 }
 0x156   : > { %10545 = vst [vmem:[#allocation65_spill] sm:$0xff] %v6698_v30  ;;  %v6702_v31 = vpop.permute.xlu0 %786  ;;  %v358_v30 = vld [vmem:[%s6186_s24 + $0xb3] sm:$0xff] }
 0x157   : > { %10546 = vst [vmem:[#allocation66_spill] sm:$0xff] %v6700_v23  ;;  %v357_v23 = vld [vmem:[%s6186_s24 + $0xab] sm:$0xff] }
 0x158   : > { %10547 = vst [vmem:[#allocation67_spill] sm:$0xff] %v6702_v31  ;;  %v6891_v31 = vld [vmem:[%s6186_s24 + $0x94] sm:$0xff] }
 0x15b   : > { %952 = vrot.lane.b32.xlu2 %v355_v24, %s6134_s28  ;;  %950 = vrot.lane.b32.xlu1 %v354_v5, %s6134_s28 }
 0x15c   : > { %948 = vrot.lane.b32.xlu0 %v353_v13, %s6134_s28 }
 0x15d   : > { %v6710_v11 = vpop.permute.xlu2 %814  ;;  %v6712_v18 = vpop.permute.xlu1 %794 }
 0x15e   : > { %10548 = vst [vmem:[#allocation68_spill] sm:$0xff] %v6710_v11  ;;  %v6714_v29 = vpop.permute.xlu0 %792  ;;  %v359_v11 = vld [vmem:[%s6186_s24 + $0xbb] sm:$0xff] }
 0x15f   : > { %10549 = vst [vmem:[#allocation69_spill] sm:$0xff] %v6712_v18  ;;  %v361_v18 = vld [vmem:[%s6186_s24 + $0xcb] sm:$0xff] }
 0x160   : > { %10550 = vst [vmem:[#allocation70_spill] sm:$0xff] %v6714_v29  ;;  %v360_v29 = vld [vmem:[%s6186_s24 + $0xc3] sm:$0xff] }
 0x163   : > { %958 = vrot.lane.b32.xlu2 %v358_v30, %s6134_s28  ;;  %956 = vrot.lane.b32.xlu1 %v357_v23, %s6134_s28 }
 0x164   : > { %954 = vrot.lane.b32.xlu0 %v356_v12, %s6134_s28 }
 0x165   : > { %v6722_v5 = vpop.permute.xlu2 %820  ;;  %v6724_v13 = vpop.permute.xlu1 %800 }
 0x166   : > { %10551 = vst [vmem:[#allocation71_spill] sm:$0xff] %v6722_v5  ;;  %v6726_v24 = vpop.permute.xlu0 %798  ;;  %v362_v5 = vld [vmem:[%s6186_s24 + $0xd3] sm:$0xff] }
 0x167   : > { %10552 = vst [vmem:[#allocation72_spill] sm:$0xff] %v6724_v13  ;;  %v364_v13 = vld [vmem:[%s6186_s24 + $0xe3] sm:$0xff] }
 0x168   : > { %10553 = vst [vmem:[#allocation73_spill] sm:$0xff] %v6726_v24  ;;  %v363_v24 = vld [vmem:[%s6186_s24 + $0xdb] sm:$0xff] }
 0x16b   : > { %964 = vrot.lane.b32.xlu2 %v361_v18, %s6134_s28  ;;  %962 = vrot.lane.b32.xlu1 %v360_v29, %s6134_s28 }
 0x16c   : > { %960 = vrot.lane.b32.xlu0 %v359_v11, %s6134_s28 }
 0x16d   : > { %v6734_v30 = vpop.permute.xlu2 %826  ;;  %v6736_v12 = vpop.permute.xlu1 %806 }
 0x16e   : > { %10554 = vst [vmem:[#allocation74_spill] sm:$0xff] %v6734_v30  ;;  %v6738_v23 = vpop.permute.xlu0 %804  ;;  %v365_v30 = vld [vmem:[%s6186_s24 + $0xeb] sm:$0xff] }
 0x16f   : > { %10555 = vst [vmem:[#allocation75_spill] sm:$0xff] %v6736_v12  ;;  %v367_v12 = vld [vmem:[%s6186_s24 + $0xfb] sm:$0xff] }
 0x170   : > { %10556 = vst [vmem:[#allocation76_spill] sm:$0xff] %v6738_v23  ;;  %v366_v23 = vld [vmem:[%s6186_s24 + $0xf3] sm:$0xff] }
 0x173   : > { %970 = vrot.lane.b32.xlu2 %v364_v13, %s6134_s28  ;;  %968 = vrot.lane.b32.xlu1 %v363_v24, %s6134_s28 }
 0x174   : > { %966 = vrot.lane.b32.xlu0 %v362_v5, %s6134_s28 }
 0x175   : > { %v6746_v18 = vpop.permute.xlu2 %832  ;;  %v6748_v11 = vpop.permute.xlu1 %812 }
 0x176   : > { %10557 = vst [vmem:[#allocation77_spill] sm:$0xff] %v6746_v18  ;;  %v6750_v29 = vpop.permute.xlu0 %810  ;;  %v368_v18 = vld [vmem:[%s6186_s24 + $0x103] sm:$0xff] }
 0x177   : > { %10558 = vst [vmem:[#allocation78_spill] sm:$0xff] %v6748_v11  ;;  %v370_v11 = vld [vmem:[%s6186_s24 + $0x113] sm:$0xff] }
 0x178   : > { %10559 = vst [vmem:[#allocation79_spill] sm:$0xff] %v6750_v29  ;;  %v369_v29 = vld [vmem:[%s6186_s24 + $0x10b] sm:$0xff] }
 0x17b   : > { %976 = vrot.lane.b32.xlu2 %v367_v12, %s6134_s28  ;;  %974 = vrot.lane.b32.xlu1 %v366_v23, %s6134_s28 }
 0x17c   : > { %972 = vrot.lane.b32.xlu0 %v365_v30, %s6134_s28 }
 0x17d   : > { %v6758_v13 = vpop.permute.xlu2 %838  ;;  %v6760_v5 = vpop.permute.xlu1 %818 }
 0x17e   : > { %10560 = vst [vmem:[#allocation80_spill] sm:$0xff] %v6758_v13  ;;  %v6762_v24 = vpop.permute.xlu0 %816  ;;  %v371_v13 = vld [vmem:[%s6186_s24 + $0x11b] sm:$0xff] }
 0x17f   : > { %10561 = vst [vmem:[#allocation81_spill] sm:$0xff] %v6760_v5  ;;  %v373_v5 = vld [vmem:[%s6186_s24 + $0x12b] sm:$0xff] }
 0x180   : > { %10562 = vst [vmem:[#allocation82_spill] sm:$0xff] %v6762_v24  ;;  %v372_v24 = vld [vmem:[%s6186_s24 + $0x123] sm:$0xff] }
 0x183   : > { %982 = vrot.lane.b32.xlu2 %v370_v11, %s6134_s28  ;;  %980 = vrot.lane.b32.xlu1 %v369_v29, %s6134_s28 }
 0x184   : > { %978 = vrot.lane.b32.xlu0 %v368_v18, %s6134_s28 }
 0x185   : > { %v6770_v12 = vpop.permute.xlu2 %844  ;;  %v6772_v30 = vpop.permute.xlu1 %824 }
 0x186   : > { %10563 = vst [vmem:[#allocation83_spill] sm:$0xff] %v6770_v12  ;;  %v6774_v23 = vpop.permute.xlu0 %822  ;;  %v374_v12 = vld [vmem:[%s6186_s24 + $0x14] sm:$0xff] }
 0x187   : > { %10564 = vst [vmem:[#allocation84_spill] sm:$0xff] %v6772_v30  ;;  %v6789_v30 = vld [vmem:[%s6186_s24 + $0x24] sm:$0xff] }
 0x188   : > { %10565 = vst [vmem:[#allocation85_spill] sm:$0xff] %v6774_v23  ;;  %v375_v23 = vld [vmem:[%s6186_s24 + $0x1c] sm:$0xff] }
 0x18b   : > { %988 = vrot.lane.b32.xlu2 %v373_v5, %s6134_s28  ;;  %986 = vrot.lane.b32.xlu1 %v372_v24, %s6134_s28 }
 0x18c   : > { %984 = vrot.lane.b32.xlu0 %v371_v13, %s6134_s28 }
 0x18d   : > { %v6782_v11 = vpop.permute.xlu2 %922  ;;  %v6784_v18 = vpop.permute.xlu1 %830 }
 0x18e   : > { %10566 = vst [vmem:[#allocation86_spill] sm:$0xff] %v6784_v18  ;;  %v6786_v29 = vpop.permute.xlu0 %828  ;;  %v6807_v18 = vld [vmem:[%s6186_s24 + $0x34] sm:$0xff] }
 0x18f   : > { %10567 = vst [vmem:[#allocation87_spill] sm:$0xff] %v6786_v29  ;;  %v6804_v29 = vld [vmem:[%s6186_s24 + $0x3c] sm:$0xff] }
 0x193   : > { %1066 = vrot.lane.b32.xlu2 %v6789_v30, %s6135_s29  ;;  %1064 = vrot.lane.b32.xlu1 %v375_v23, %s6135_s29 }
 0x194   : > { %1062 = vrot.lane.b32.xlu0 %v374_v12, %s6135_s29 }
 0x195   : > { %v6797_v13 = vpop.permute.xlu2 %928  ;;  %v6799_v5 = vpop.permute.xlu1 %836 }
 0x196   : > { %10568 = vst [vmem:[#allocation88_spill] sm:$0xff] %v6797_v13  ;;  %v6801_v24 = vpop.permute.xlu0 %834  ;;  %v7017_v13 = vld [vmem:[%s6186_s24 + $0x124] sm:$0xff] }
 0x197   : > { %10569 = vst [vmem:[#allocation89_spill] sm:$0xff] %v6799_v5  ;;  %v6825_v5 = vld [vmem:[%s6186_s24 + $0x54] sm:$0xff] }
 0x198   : > { %10570 = vst [vmem:[#allocation90_spill] sm:$0xff] %v6801_v24 }
 0x19b   : > { %1072 = vrot.lane.b32.xlu2 %v6804_v29, %s6135_s29  ;;  %1070 = vrot.lane.b32.xlu1 %v6807_v18, %s6135_s29 }
 0x19c   : > { %1068 = vrot.lane.b32.xlu0 %v6810_v63, %s6135_s29 }
 0x19d   : > { %v6818_v12 = vpop.permute.xlu2 %934  ;;  %v6820_v23 = vpop.permute.xlu1 %842 }
 0x19e   : > { %10571 = vst [vmem:[#allocation91_spill] sm:$0xff] %v6818_v12  ;;  %v6822_v24 = vpop.permute.xlu0 %840 }
 0x19f   : > { %10572 = vst [vmem:[#allocation92_spill] sm:$0xff] %v6820_v23 }
 0x1a0   : > { %10573 = vst [vmem:[#allocation93_spill] sm:$0xff] %v6822_v24 }
 0x1a3   : > { %1078 = vrot.lane.b32.xlu2 %v6825_v5, %s6135_s29  ;;  %1076 = vrot.lane.b32.xlu1 %v6828_v7, %s6135_s29 }
 0x1a4   : > { %1074 = vrot.lane.b32.xlu0 %v6831_v6, %s6135_s29 }
 0x1a5   : > { %v6839_v23 = vpop.permute.xlu2 %940  ;;  %v6841_v24 = vpop.permute.xlu1 %920 }
 0x1a6   : > { %10574 = vst [vmem:[#allocation94_spill] sm:$0xff] %v6839_v23  ;;  %v6843_v12 = vpop.permute.xlu0 %918 }
 0x1ab   : > { %1084 = vrot.lane.b32.xlu2 %v6846_v57, %s6135_s29  ;;  %1082 = vrot.lane.b32.xlu1 %v6849_v1, %s6135_s29 }
 0x1ac   : > { %1080 = vrot.lane.b32.xlu0 %v6852_v0, %s6135_s29 }
 0x1ad   : > { %v6860_v23 = vpop.permute.xlu2 %946  ;;  %v6862_v59 = vpop.permute.xlu1 %926 }
 0x1ae   : > { %10575 = vst [vmem:[#allocation95_spill] sm:$0xff] %v6860_v23  ;;  %v6864_v58 = vpop.permute.xlu0 %924 }
 0x1b3   : > { %1090 = vrot.lane.b32.xlu2 %v6867_v52, %s6135_s29  ;;  %1088 = vrot.lane.b32.xlu1 %v6870_v46, %s6135_s29 }
 0x1b4   : > { %1086 = vrot.lane.b32.xlu0 %v6873_v37, %s6135_s29 }
 0x1b5   : > { %v6881_v23 = vpop.permute.xlu2 %952  ;;  %v6883_v43 = vpop.permute.xlu1 %932 }
 0x1b6   : > { %10576 = vst [vmem:[#allocation96_spill] sm:$0xff] %v6881_v23  ;;  %v6885_v42 = vpop.permute.xlu0 %930 }
 0x1b7   : > { %10577 = vst [vmem:[#allocation97_spill] sm:$0xff] %v6883_v43 }
 0x1b8   : > { %10578 = vst [vmem:[#allocation98_spill] sm:$0xff] %v6885_v42 }
 0x1bb   : > { %1096 = vrot.lane.b32.xlu2 %v6888_v26, %s6135_s29  ;;  %1094 = vrot.lane.b32.xlu1 %v6891_v31, %s6135_s29 }
 0x1bc   : > { %1092 = vrot.lane.b32.xlu0 %v6894_v27, %s6135_s29 }
 0x1bd   : > { %v6902_v23 = vpop.permute.xlu2 %958  ;;  %v6904_v43 = vpop.permute.xlu1 %938 }
 0x1be   : > { %10579 = vst [vmem:[#allocation99_spill] sm:$0xff] %v6902_v23  ;;  %v6906_v42 = vpop.permute.xlu0 %936 }
 0x1bf   : > { %10580 = vst [vmem:[#allocation100_spill] sm:$0xff] %v6904_v43 }
 0x1c0   : > { %10581 = vst [vmem:[#allocation101_spill] sm:$0xff] %v6906_v42 }
 0x1c3   : > { %1102 = vrot.lane.b32.xlu2 %v6909_v34, %s6135_s29  ;;  %1100 = vrot.lane.b32.xlu1 %v6912_v33, %s6135_s29 }
 0x1c4   : > { %1098 = vrot.lane.b32.xlu0 %v6915_v51, %s6135_s29 }
 0x1c5   : > { %v6923_v43 = vpop.permute.xlu2 %964  ;;  %v6925_v42 = vpop.permute.xlu1 %944 }
 0x1c6   : > { %10582 = vst [vmem:[#allocation102_spill] sm:$0xff] %v6923_v43  ;;  %v6927_v23 = vpop.permute.xlu0 %942 }
 0x1c7   : > { %10583 = vst [vmem:[#allocation103_spill] sm:$0xff] %v6925_v42 }
 0x1c8   : > { %10584 = vst [vmem:[#allocation104_spill] sm:$0xff] %v6927_v23 }
 0x1cb   : > { %1108 = vrot.lane.b32.xlu2 %v6930_v22, %s6135_s29  ;;  %1106 = vrot.lane.b32.xlu1 %v6933_v21, %s6135_s29 }
 0x1cc   : > { %1104 = vrot.lane.b32.xlu0 %v6936_v20, %s6135_s29 }
 0x1cd   : > { %v6944_v42 = vpop.permute.xlu2 %970  ;;  %v6946_v23 = vpop.permute.xlu1 %950 }
 0x1ce   : > { %10585 = vst [vmem:[#allocation105_spill] sm:$0xff] %v6944_v42  ;;  %v6948_v43 = vpop.permute.xlu0 %948 }
 0x1cf   : > { %10586 = vst [vmem:[#allocation106_spill] sm:$0xff] %v6946_v23 }
 0x1d0   : > { %10587 = vst [vmem:[#allocation107_spill] sm:$0xff] %v6948_v43 }
 0x1d3   : > { %1114 = vrot.lane.b32.xlu2 %v6951_v16, %s6135_s29  ;;  %1112 = vrot.lane.b32.xlu1 %v6954_v15, %s6135_s29 }
 0x1d4   : > { %1110 = vrot.lane.b32.xlu0 %v6957_v14, %s6135_s29 }
 0x1d5   : > { %v6965_v23 = vpop.permute.xlu2 %976  ;;  %v6967_v43 = vpop.permute.xlu1 %956 }
 0x1d6   : > { %10588 = vst [vmem:[#allocation108_spill] sm:$0xff] %v6965_v23  ;;  %v6969_v42 = vpop.permute.xlu0 %954 }
 0x1d7   : > { %10589 = vst [vmem:[#allocation109_spill] sm:$0xff] %v6967_v43 }
 0x1d8   : > { %10590 = vst [vmem:[#allocation110_spill] sm:$0xff] %v6969_v42 }
 0x1db   : > { %1120 = vrot.lane.b32.xlu2 %v6972_v10, %s6135_s29  ;;  %1118 = vrot.lane.b32.xlu1 %v6975_v9, %s6135_s29 }
 0x1dc   : > { %1116 = vrot.lane.b32.xlu0 %v6978_v8, %s6135_s29 }
 0x1dd   : > { %v6986_v43 = vpop.permute.xlu2 %982  ;;  %v6988_v42 = vpop.permute.xlu1 %962 }
 0x1de   : > { %10591 = vst [vmem:[#allocation111_spill] sm:$0xff] %v6986_v43  ;;  %v6990_v23 = vpop.permute.xlu0 %960 }
 0x1df   : > { %10592 = vst [vmem:[#allocation112_spill] sm:$0xff] %v6988_v42 }
 0x1e0   : > { %10593 = vst [vmem:[#allocation113_spill] sm:$0xff] %v6990_v23 }
 0x1e3   : > { %1126 = vrot.lane.b32.xlu2 %v6993_v4, %s6135_s29  ;;  %1124 = vrot.lane.b32.xlu1 %v6996_v3, %s6135_s29 }
 0x1e4   : > { %1122 = vrot.lane.b32.xlu0 %v6999_v2, %s6135_s29 }
 0x1e5   : > { %v7007_v43 = vpop.permute.xlu2 %988  ;;  %v7009_v42 = vpop.permute.xlu1 %968 }
 0x1e6   : > { %10594 = vst [vmem:[#allocation114_spill] sm:$0xff] %v7007_v43  ;;  %v7011_v23 = vpop.permute.xlu0 %966 }
 0x1e7   : > { %10595 = vst [vmem:[#allocation115_spill] sm:$0xff] %v7009_v42 }
 0x1e8   : > { %10596 = vst [vmem:[#allocation116_spill] sm:$0xff] %v7011_v23 }
 0x1eb   : > { %1132 = vrot.lane.b32.xlu2 %v7014_v62, %s6135_s29  ;;  %1130 = vrot.lane.b32.xlu1 %v7017_v13, %s6135_s29 }
 0x1ec   : > { %1128 = vrot.lane.b32.xlu0 %v7020_v61, %s6135_s29 }
 0x1ed   : > { %v7028_v43 = vpop.permute.xlu2 %1066  ;;  %v7030_v42 = vpop.permute.xlu1 %974 }
 0x1ee   : > { %v7032_v23 = vpop.permute.xlu0 %972 }
 0x1f3   : > { %1176 = vrot.lane.b32.xlu2 %v6807_v18, %s6136_s30  ;;  %1174 = vrot.lane.b32.xlu1 %v6810_v63, %s6136_s30 }
 0x1f4   : > { %1172 = vrot.lane.b32.xlu0 %v6789_v30, %s6136_s30 }
 0x1f5   : > { %v7040_v60 = vpop.permute.xlu2 %1072  ;;  %v7042_v54 = vpop.permute.xlu1 %980 }
 0x1f6   : > { %v7044_v35 = vpop.permute.xlu0 %978 }
 0x1f7   : > { %10597 = vst [vmem:[#allocation117_spill] sm:$0xff] %v7044_v35 }
 0x1fb   : > { %1182 = vrot.lane.b32.xlu2 %v6828_v7, %s6136_s30  ;;  %1180 = vrot.lane.b32.xlu1 %v6831_v6, %s6136_s30 }
 0x1fc   : > { %1178 = vrot.lane.b32.xlu0 %v6804_v29, %s6136_s30 }
 0x1fd   : > { %v7052_v18 = vpop.permute.xlu2 %1078  ;;  %v7054_v63 = vpop.permute.xlu1 %986 }
 0x1fe   : > { %10598 = vst [vmem:[#allocation118_spill] sm:$0xff] %v7054_v63  ;;  %v7056_v30 = vpop.permute.xlu0 %984  ;;  %v466_v63 = vld [vmem:[%s6186_s24 + $0xb6] sm:$0xff] }
 0x1ff   : > { %10599 = vst [vmem:[#allocation119_spill] sm:$0xff] %v7056_v30 }
 0x203   : > { %1188 = vrot.lane.b32.xlu2 %v6849_v1, %s6136_s30  ;;  %1186 = vrot.lane.b32.xlu1 %v6852_v0, %s6136_s30 }
 0x204   : > { %1184 = vrot.lane.b32.xlu0 %v6825_v5, %s6136_s30 }
 0x205   : > { %v7064_v7 = vpop.permute.xlu2 %1084  ;;  %v7066_v6 = vpop.permute.xlu1 %1064 }
 0x206   : > { %10600 = vst [vmem:[#allocation120_spill] sm:$0xff] %v7064_v7  ;;  %v7068_v29 = vpop.permute.xlu0 %1062  ;;  %v463_v7 = vld [vmem:[%s6186_s24 + $0x9e] sm:$0xff] }
 0x20b   : > { %1194 = vrot.lane.b32.xlu2 %v6870_v46, %s6136_s30  ;;  %1192 = vrot.lane.b32.xlu1 %v6873_v37, %s6136_s30 }
 0x20c   : > { %1190 = vrot.lane.b32.xlu0 %v6846_v57, %s6136_s30 }
 0x20d   : > { %v7076_v1 = vpop.permute.xlu2 %1090  ;;  %v7078_v0 = vpop.permute.xlu1 %1070 }
 0x20e   : > { %10601 = vst [vmem:[#allocation121_spill] sm:$0xff] %v7076_v1  ;;  %v7080_v5 = vpop.permute.xlu0 %1068  ;;  %v464_v1 = vld [vmem:[%s6186_s24 + $0xa6] sm:$0xff] }
 0x213   : > { %1200 = vrot.lane.b32.xlu2 %v6891_v31, %s6136_s30  ;;  %1198 = vrot.lane.b32.xlu1 %v6894_v27, %s6136_s30 }
 0x214   : > { %1196 = vrot.lane.b32.xlu0 %v6867_v52, %s6136_s30 }
 0x215   : > { %v7088_v46 = vpop.permute.xlu2 %1096  ;;  %v7090_v37 = vpop.permute.xlu1 %1076 }
 0x216   : > { %10602 = vst [vmem:[#allocation122_spill] sm:$0xff] %v7088_v46  ;;  %v7092_v57 = vpop.permute.xlu0 %1074  ;;  %v461_v46 = vld [vmem:[%s6186_s24 + $0x8e] sm:$0xff] }
 0x21b   : > { %1206 = vrot.lane.b32.xlu2 %v6912_v33, %s6136_s30  ;;  %1204 = vrot.lane.b32.xlu1 %v6915_v51, %s6136_s30 }
 0x21c   : > { %1202 = vrot.lane.b32.xlu0 %v6888_v26, %s6136_s30 }
 0x21d   : > { %v7100_v31 = vpop.permute.xlu2 %1102  ;;  %v7102_v27 = vpop.permute.xlu1 %1082 }
 0x21e   : > { %10603 = vst [vmem:[#allocation123_spill] sm:$0xff] %v7100_v31  ;;  %v7104_v52 = vpop.permute.xlu0 %1080  ;;  %v462_v31 = vld [vmem:[%s6186_s24 + $0x96] sm:$0xff] }
 0x21f   : > { %10604 = vst [vmem:[#allocation124_spill] sm:$0xff] %v7102_v27  ;;  %v457_v27 = vld [vmem:[%s6186_s24 + $0x6e] sm:$0xff] }
 0x220   : > { %10605 = vst [vmem:[#allocation125_spill] sm:$0xff] %v7104_v52  ;;  %v467_v52 = vld [vmem:[%s6186_s24 + $0xbe] sm:$0xff] }
 0x223   : > { %1212 = vrot.lane.b32.xlu2 %v6933_v21, %s6136_s30  ;;  %1210 = vrot.lane.b32.xlu1 %v6936_v20, %s6136_s30 }
 0x224   : > { %1208 = vrot.lane.b32.xlu0 %v6909_v34, %s6136_s30 }
 0x225   : > { %v7112_v33 = vpop.permute.xlu2 %1108  ;;  %v7114_v51 = vpop.permute.xlu1 %1088 }
 0x226   : > { %10606 = vst [vmem:[#allocation126_spill] sm:$0xff] %v7112_v33  ;;  %v7116_v26 = vpop.permute.xlu0 %1086  ;;  %v433_v33 = vld [vmem:[%s6186_s24 + $0xcd] sm:$0xff] }
 0x227   : > { %10607 = vst [vmem:[#allocation127_spill] sm:$0xff] %v7114_v51  ;;  %v430_v51 = vld [vmem:[%s6186_s24 + $0xb5] sm:$0xff] }
 0x228   : > { %10608 = vst [vmem:[#allocation128_spill] sm:$0xff] %v7116_v26  ;;  %v431_v26 = vld [vmem:[%s6186_s24 + $0xbd] sm:$0xff] }
 0x22b   : > { %1218 = vrot.lane.b32.xlu2 %v6954_v15, %s6136_s30  ;;  %1216 = vrot.lane.b32.xlu1 %v6957_v14, %s6136_s30 }
 0x22c   : > { %1214 = vrot.lane.b32.xlu0 %v6930_v22, %s6136_s30 }
 0x22d   : > { %v7124_v21 = vpop.permute.xlu2 %1114  ;;  %v7126_v20 = vpop.permute.xlu1 %1094 }
 0x22e   : > { %10609 = vst [vmem:[#allocation129_spill] sm:$0xff] %v7124_v21  ;;  %v7128_v34 = vpop.permute.xlu0 %1092  ;;  %v427_v21 = vld [vmem:[%s6186_s24 + $0x9d] sm:$0xff] }
 0x22f   : > { %10610 = vst [vmem:[#allocation130_spill] sm:$0xff] %v7126_v20  ;;  %v428_v20 = vld [vmem:[%s6186_s24 + $0xa5] sm:$0xff] }
 0x230   : > { %10611 = vst [vmem:[#allocation131_spill] sm:$0xff] %v7128_v34  ;;  %v424_v34 = vld [vmem:[%s6186_s24 + $0x85] sm:$0xff] }
 0x233   : > { %1224 = vrot.lane.b32.xlu2 %v6975_v9, %s6136_s30  ;;  %1222 = vrot.lane.b32.xlu1 %v6978_v8, %s6136_s30 }
 0x234   : > { %1220 = vrot.lane.b32.xlu0 %v6951_v16, %s6136_s30 }
 0x235   : > { %v7136_v14 = vpop.permute.xlu2 %1120  ;;  %v7138_v15 = vpop.permute.xlu1 %1100 }
 0x236   : > { %10612 = vst [vmem:[#allocation132_spill] sm:$0xff] %v7136_v14  ;;  %v7140_v22 = vpop.permute.xlu0 %1098  ;;  %v425_v14 = vld [vmem:[%s6186_s24 + $0x8d] sm:$0xff] }
 0x237   : > { %10613 = vst [vmem:[#allocation133_spill] sm:$0xff] %v7138_v15  ;;  %v421_v15 = vld [vmem:[%s6186_s24 + $0x6d] sm:$0xff] }
 0x238   : > { %10614 = vst [vmem:[#allocation134_spill] sm:$0xff] %v7140_v22  ;;  %v418_v22 = vld [vmem:[%s6186_s24 + $0x55] sm:$0xff] }
 0x23b   : > { %1230 = vrot.lane.b32.xlu2 %v6996_v3, %s6136_s30  ;;  %1228 = vrot.lane.b32.xlu1 %v6999_v2, %s6136_s30 }
 0x23c   : > { %1226 = vrot.lane.b32.xlu0 %v6972_v10, %s6136_s30 }
 0x23d   : > { %v7148_v8 = vpop.permute.xlu2 %1126  ;;  %v7150_v9 = vpop.permute.xlu1 %1106 }
 0x23e   : > { %10615 = vst [vmem:[#allocation135_spill] sm:$0xff] %v7148_v8  ;;  %v7152_v16 = vpop.permute.xlu0 %1104  ;;  %v410_v8 = vld [vmem:[%s6186_s24 + $0x134] sm:$0xff] }
 0x23f   : > { %10616 = vst [vmem:[#allocation136_spill] sm:$0xff] %v7150_v9  ;;  %v411_v9 = vld [vmem:[%s6186_s24 + $0x13c] sm:$0xff] }
 0x240   : > { %10617 = vst [vmem:[#allocation137_spill] sm:$0xff] %v7152_v16  ;;  %v415_v16 = vld [vmem:[%s6186_s24 + $0x3d] sm:$0xff] }
 0x243   : > { %1236 = vrot.lane.b32.xlu2 %v7017_v13, %s6136_s30  ;;  %1234 = vrot.lane.b32.xlu1 %v7020_v61, %s6136_s30 }
 0x244   : > { %1232 = vrot.lane.b32.xlu0 %v6993_v4, %s6136_s30 }
 0x245   : > { %v7160_v2 = vpop.permute.xlu2 %1132  ;;  %v7162_v3 = vpop.permute.xlu1 %1112 }
 0x246   : > { %10618 = vst [vmem:[#allocation138_spill] sm:$0xff] %v7160_v2  ;;  %v7164_v10 = vpop.permute.xlu0 %1110  ;;  %v412_v2 = vld [vmem:[%s6186_s24 + $0x25] sm:$0xff] }
 0x247   : > { %10619 = vst [vmem:[#allocation139_spill] sm:$0xff] %v7162_v3  ;;  %v414_v3 = vld [vmem:[%s6186_s24 + $0x35] sm:$0xff] }
 0x248   : > { %10620 = vst [vmem:[#allocation140_spill] sm:$0xff] %v7164_v10  ;;  %v413_v10 = vld [vmem:[%s6186_s24 + $0x2d] sm:$0xff] }
 0x24b   : > { %1242 = vrot.lane.b32.xlu2 %v411_v9, %s6136_s30  ;;  %1240 = vrot.lane.b32.xlu1 %v410_v8, %s6136_s30 }
 0x24c   : > { %1238 = vrot.lane.b32.xlu0 %v7014_v62, %s6136_s30 }
 0x24d   : > { %v7172_v61 = vpop.permute.xlu2 %1176  ;;  %v7174_v4 = vpop.permute.xlu1 %1118 }
 0x24e   : > { %10621 = vst [vmem:[#allocation141_spill] sm:$0xff] %v7174_v4  ;;  %v7176_v13 = vpop.permute.xlu0 %1116  ;;  %v416_v4 = vld [vmem:[%s6186_s24 + $0x45] sm:$0xff] }
 0x24f   : > { %10622 = vst [vmem:[#allocation142_spill] sm:$0xff] %v7176_v13  ;;  %v417_v13 = vld [vmem:[%s6186_s24 + $0x4d] sm:$0xff] }
 0x253   : > { %1320 = vrot.lane.b32.xlu2 %v414_v3, %s6137_s6  ;;  %1318 = vrot.lane.b32.xlu1 %v413_v10, %s6137_s6 }
 0x254   : > { %1316 = vrot.lane.b32.xlu0 %v412_v2, %s6137_s6 }
 0x255   : > { %v7184_v62 = vpop.permute.xlu2 %1182  ;;  %v7186_v8 = vpop.permute.xlu1 %1124 }
 0x256   : > { %10623 = vst [vmem:[#allocation143_spill] sm:$0xff] %v7186_v8  ;;  %v7188_v9 = vpop.permute.xlu0 %1122  ;;  %v420_v8 = vld [vmem:[%s6186_s24 + $0x65] sm:$0xff] }
 0x257   : > { %10624 = vst [vmem:[#allocation144_spill] sm:$0xff] %v7188_v9  ;;  %v419_v9 = vld [vmem:[%s6186_s24 + $0x5d] sm:$0xff] }
 0x25b   : > { %1326 = vrot.lane.b32.xlu2 %v417_v13, %s6137_s6  ;;  %1324 = vrot.lane.b32.xlu1 %v416_v4, %s6137_s6 }
 0x25c   : > { %1322 = vrot.lane.b32.xlu0 %v415_v16, %s6137_s6 }
 0x25d   : > { %v7196_v3 = vpop.permute.xlu2 %1188  ;;  %v7198_v2 = vpop.permute.xlu1 %1130 }
 0x25e   : > { %10625 = vst [vmem:[#allocation145_spill] sm:$0xff] %v7198_v2  ;;  %v7200_v10 = vpop.permute.xlu0 %1128  ;;  %v423_v2 = vld [vmem:[%s6186_s24 + $0x7d] sm:$0xff] }
 0x25f   : > { %10626 = vst [vmem:[#allocation146_spill] sm:$0xff] %v7200_v10  ;;  %v422_v10 = vld [vmem:[%s6186_s24 + $0x75] sm:$0xff] }
 0x263   : > { %1332 = vrot.lane.b32.xlu2 %v420_v8, %s6137_s6  ;;  %1330 = vrot.lane.b32.xlu1 %v419_v9, %s6137_s6 }
 0x264   : > { %1328 = vrot.lane.b32.xlu0 %v418_v22, %s6137_s6 }
 0x265   : > { %v7208_v4 = vpop.permute.xlu2 %1194  ;;  %v7210_v16 = vpop.permute.xlu1 %1174 }
 0x266   : > { %10627 = vst [vmem:[#allocation147_spill] sm:$0xff] %v7208_v4  ;;  %v7212_v13 = vpop.permute.xlu0 %1172  ;;  %v426_v4 = vld [vmem:[%s6186_s24 + $0x95] sm:$0xff] }
 0x26b   : > { %1338 = vrot.lane.b32.xlu2 %v423_v2, %s6137_s6  ;;  %1336 = vrot.lane.b32.xlu1 %v422_v10, %s6137_s6 }
 0x26c   : > { %1334 = vrot.lane.b32.xlu0 %v421_v15, %s6137_s6 }
 0x26d   : > { %v7220_v8 = vpop.permute.xlu2 %1200  ;;  %v7222_v22 = vpop.permute.xlu1 %1180 }
 0x26e   : > { %10628 = vst [vmem:[#allocation148_spill] sm:$0xff] %v7220_v8  ;;  %v7224_v9 = vpop.permute.xlu0 %1178  ;;  %v429_v8 = vld [vmem:[%s6186_s24 + $0xad] sm:$0xff] }
 0x273   : > { %1344 = vrot.lane.b32.xlu2 %v426_v4, %s6137_s6  ;;  %1342 = vrot.lane.b32.xlu1 %v425_v14, %s6137_s6 }
 0x274   : > { %1340 = vrot.lane.b32.xlu0 %v424_v34, %s6137_s6 }
 0x275   : > { %v7232_v2 = vpop.permute.xlu1 %1186  ;;  %v7234_v15 = vpop.permute.xlu2 %1206 }
 0x276   : > { %10629 = vst [vmem:[#allocation149_spill] sm:$0xff] %v7234_v15  ;;  %v7236_v10 = vpop.permute.xlu0 %1184  ;;  %v432_v15 = vld [vmem:[%s6186_s24 + $0xc5] sm:$0xff] }
 0x27b   : > { %1350 = vrot.lane.b32.xlu2 %v429_v8, %s6137_s6  ;;  %1348 = vrot.lane.b32.xlu1 %v428_v20, %s6137_s6  ;;  %v435_v8 = vld [vmem:[%s6186_s24 + $0xdd] sm:$0xff] }
 0x27c   : > { %1346 = vrot.lane.b32.xlu0 %v427_v21, %s6137_s6 }
 0x27d   : > { %v7244_v14 = vpop.permute.xlu1 %1192  ;;  %v7248_v4 = vpop.permute.xlu2 %1212 }
 0x27e   : > { %10630 = vst [vmem:[#allocation150_spill] sm:$0xff] %v7244_v14  ;;  %v7246_v34 = vpop.permute.xlu0 %1190  ;;  %v434_v14 = vld [vmem:[%s6186_s24 + $0xd5] sm:$0xff] }
 0x27f   : > { %10631 = vst [vmem:[#allocation151_spill] sm:$0xff] %v7246_v34  ;;  %v460_v34 = vld [vmem:[%s6186_s24 + $0x86] sm:$0xff] }
 0x280   : > { %10632 = vst [vmem:[#allocation152_spill] sm:$0xff] %v7248_v4 }
 0x283   : > { %1356 = vrot.lane.b32.xlu2 %v432_v15, %s6137_s6  ;;  %1354 = vrot.lane.b32.xlu1 %v431_v26, %s6137_s6  ;;  %v438_v15 = vld [vmem:[%s6186_s24 + $0xf5] sm:$0xff] }
 0x284   : > { %1352 = vrot.lane.b32.xlu0 %v430_v51, %s6137_s6 }
 0x285   : > { %v7256_v20 = vpop.permute.xlu1 %1198  ;;  %v7263_v4 = vpop.permute.xlu2 %1218 }
 0x286   : > { %10633 = vst [vmem:[#allocation153_spill] sm:$0xff] %v7256_v20  ;;  %v7258_v21 = vpop.permute.xlu0 %1196  ;;  %v436_v20 = vld [vmem:[%s6186_s24 + $0xe5] sm:$0xff] }
 0x287   : > { %10634 = vst [vmem:[#allocation154_spill] sm:$0xff] %v7258_v21  ;;  %v437_v21 = vld [vmem:[%s6186_s24 + $0xed] sm:$0xff] }
 0x288   : > { %10635 = vst [vmem:[#allocation155_spill] sm:$0xff] %v7263_v4  ;;  %v439_v4 = vld [vmem:[%s6186_s24 + $0xfd] sm:$0xff] }
 0x28b   : > { %1362 = vrot.lane.b32.xlu2 %v435_v8, %s6137_s6  ;;  %1360 = vrot.lane.b32.xlu1 %v434_v14, %s6137_s6 }
 0x28c   : > { %1358 = vrot.lane.b32.xlu0 %v433_v33, %s6137_s6 }
 0x28d   : > { %v7268_v26 = vpop.permute.xlu1 %1204  ;;  %v7277_v8 = vpop.permute.xlu2 %1224 }
 0x28e   : > { %10636 = vst [vmem:[#allocation156_spill] sm:$0xff] %v7268_v26  ;;  %v7270_v51 = vpop.permute.xlu0 %1202  ;;  %v441_v26 = vld [vmem:[%s6186_s24 + $0x10d] sm:$0xff] }
 0x28f   : > { %10637 = vst [vmem:[#allocation157_spill] sm:$0xff] %v7270_v51  ;;  %v440_v51 = vld [vmem:[%s6186_s24 + $0x105] sm:$0xff] }
 0x290   : > { %10638 = vst [vmem:[#allocation158_spill] sm:$0xff] %v7277_v8  ;;  %v442_v8 = vld [vmem:[%s6186_s24 + $0x115] sm:$0xff] }
 0x293   : > { %1368 = vrot.lane.b32.xlu2 %v438_v15, %s6137_s6  ;;  %1366 = vrot.lane.b32.xlu1 %v437_v21, %s6137_s6 }
 0x294   : > { %1364 = vrot.lane.b32.xlu0 %v436_v20, %s6137_s6 }
 0x295   : > { %v7280_v14 = vpop.permute.xlu1 %1210  ;;  %v7292_v15 = vpop.permute.xlu2 %1230 }
 0x296   : > { %10639 = vst [vmem:[#allocation159_spill] sm:$0xff] %v7280_v14  ;;  %v7282_v33 = vpop.permute.xlu0 %1208  ;;  %v444_v14 = vld [vmem:[%s6186_s24 + $0x125] sm:$0xff] }
 0x297   : > { %10640 = vst [vmem:[#allocation160_spill] sm:$0xff] %v7282_v33  ;;  %v443_v33 = vld [vmem:[%s6186_s24 + $0x11d] sm:$0xff] }
 0x298   : > { %10642 = vst [vmem:[#allocation162_spill] sm:$0xff] %v7292_v15  ;;  %v445_v15 = vld [vmem:[%s6186_s24 + $0x12d] sm:$0xff] }
 0x29b   : > { %1374 = vrot.lane.b32.xlu2 %v441_v26, %s6137_s6  ;;  %1372 = vrot.lane.b32.xlu1 %v440_v51, %s6137_s6 }
 0x29c   : > { %1370 = vrot.lane.b32.xlu0 %v439_v4, %s6137_s6 }
 0x29d   : > { %v7290_v21 = vpop.permute.xlu1 %1216  ;;  %v7306_v51 = vpop.permute.xlu2 %1236 }
 0x29e   : > { %10641 = vst [vmem:[#allocation161_spill] sm:$0xff] %v7290_v21  ;;  %v7294_v20 = vpop.permute.xlu0 %1214  ;;  %v447_v21 = vld [vmem:[%s6186_s24 + $0x13d] sm:$0xff] }
 0x29f   : > { %10643 = vst [vmem:[#allocation163_spill] sm:$0xff] %v7294_v20  ;;  %v446_v20 = vld [vmem:[%s6186_s24 + $0x135] sm:$0xff] }
 0x2a0   : > { %10646 = vst [vmem:[#allocation166_spill] sm:$0xff] %v7306_v51 }
 0x2a3   : > { %1380 = vrot.lane.b32.xlu2 %v444_v14, %s6137_s6  ;;  %1378 = vrot.lane.b32.xlu1 %v443_v33, %s6137_s6  ;;  %v450_v33 = vld [vmem:[%s6186_s24 + $0x36] sm:$0xff] }
 0x2a4   : > { %1376 = vrot.lane.b32.xlu0 %v442_v8, %s6137_s6 }
 0x2a5   : > { %v7302_v26 = vpop.permute.xlu1 %1222  ;;  %v7321_v51 = vpop.permute.xlu2 %1242 }
 0x2a6   : > { %10644 = vst [vmem:[#allocation164_spill] sm:$0xff] %v7302_v26  ;;  %v7304_v4 = vpop.permute.xlu0 %1220  ;;  %v448_v26 = vld [vmem:[%s6186_s24 + $0x26] sm:$0xff] }
 0x2a7   : > { %10645 = vst [vmem:[#allocation165_spill] sm:$0xff] %v7304_v4  ;;  %v449_v4 = vld [vmem:[%s6186_s24 + $0x2e] sm:$0xff] }
 0x2a8   : > { %10649 = vst [vmem:[#allocation169_spill] sm:$0xff] %v7321_v51  ;;  %v454_v51 = vld [vmem:[%s6186_s24 + $0x56] sm:$0xff] }
 0x2ab   : > { %1386 = vrot.lane.b32.xlu2 %v447_v21, %s6137_s6  ;;  %1384 = vrot.lane.b32.xlu1 %v446_v20, %s6137_s6  ;;  %v453_v20 = vld [vmem:[%s6186_s24 + $0x4e] sm:$0xff] }
 0x2ac   : > { %1382 = vrot.lane.b32.xlu0 %v445_v15, %s6137_s6 }
 0x2ad   : > { %v7314_v14 = vpop.permute.xlu1 %1228 }
 0x2ae   : > { %10647 = vst [vmem:[#allocation167_spill] sm:$0xff] %v7314_v14  ;;  %v7316_v8 = vpop.permute.xlu0 %1226  ;;  %v451_v14 = vld [vmem:[%s6186_s24 + $0x3e] sm:$0xff] }
 0x2af   : > { %10648 = vst [vmem:[#allocation168_spill] sm:$0xff] %v7316_v8  ;;  %v452_v8 = vld [vmem:[%s6186_s24 + $0x46] sm:$0xff] }
 0x2b3   : > { %1464 = vrot.lane.b32.xlu2 %v450_v33, %s6138_s7  ;;  %1462 = vrot.lane.b32.xlu1 %v449_v4, %s6138_s7  ;;  %v7335_v33 = vpop.permute.xlu2 %1320 }
 0x2b4   : > { %1460 = vrot.lane.b32.xlu0 %v448_v26, %s6138_s7 }
 0x2b5   : > { %v7326_v21 = vpop.permute.xlu1 %1234 }
 0x2b6   : > { %10650 = vst [vmem:[#allocation170_spill] sm:$0xff] %v7326_v21  ;;  %v7328_v15 = vpop.permute.xlu0 %1232  ;;  %v456_v21 = vld [vmem:[%s6186_s24 + $0x66] sm:$0xff] }
 0x2b7   : > { %10651 = vst [vmem:[#allocation171_spill] sm:$0xff] %v7328_v15  ;;  %v455_v15 = vld [vmem:[%s6186_s24 + $0x5e] sm:$0xff] }
 0x2bb   : > { %1470 = vrot.lane.b32.xlu2 %v453_v20, %s6138_s7  ;;  %1468 = vrot.lane.b32.xlu1 %v452_v8, %s6138_s7  ;;  %v7350_v20 = vpop.permute.xlu2 %1326 }
 0x2bc   : > { %1466 = vrot.lane.b32.xlu0 %v451_v14, %s6138_s7 }
 0x2bd   : > { %v7338_v4 = vpop.permute.xlu1 %1240 }
 0x2be   : > { %10652 = vst [vmem:[#allocation172_spill] sm:$0xff] %v7338_v4  ;;  %v7340_v26 = vpop.permute.xlu0 %1238  ;;  %v459_v4 = vld [vmem:[%s6186_s24 + $0x7e] sm:$0xff] }
 0x2bf   : > { %10653 = vst [vmem:[#allocation173_spill] sm:$0xff] %v7340_v26  ;;  %v458_v26 = vld [vmem:[%s6186_s24 + $0x76] sm:$0xff] }
 0x2c3   : > { %1476 = vrot.lane.b32.xlu2 %v456_v21, %s6138_s7  ;;  %1474 = vrot.lane.b32.xlu1 %v455_v15, %s6138_s7  ;;  %v7364_v15 = vpop.permute.xlu2 %1332 }
 0x2c4   : > { %1472 = vrot.lane.b32.xlu0 %v454_v51, %s6138_s7 }
 0x2c5   : > { %v7348_v8 = vpop.permute.xlu1 %1318 }
 0x2c6   : > { %v7352_v14 = vpop.permute.xlu0 %1316 }
 0x2cb   : > { %1482 = vrot.lane.b32.xlu2 %v459_v4, %s6138_s7  ;;  %1480 = vrot.lane.b32.xlu1 %v458_v26, %s6138_s7  ;;  %v465_v26 = vld [vmem:[%s6186_s24 + $0xae] sm:$0xff]  ;;  %v7379_v30 = vpop.permute.xlu2 %1338 }
 0x2cc   : > { %1478 = vrot.lane.b32.xlu0 %v457_v27, %s6138_s7  ;;  %10654 = vst [vmem:[#allocation174_spill] sm:$0xff] %v7379_v30  ;;  %v471_v30 = vld [vmem:[%s6186_s24 + $0xde] sm:$0xff] }
 0x2cd   : > { %v7360_v21 = vpop.permute.xlu1 %1324 }
 0x2ce   : > { %v7362_v51 = vpop.permute.xlu0 %1322 }
 0x2d3   : > { %1488 = vrot.lane.b32.xlu2 %v462_v31, %s6138_s7  ;;  %1486 = vrot.lane.b32.xlu1 %v461_v46, %s6138_s7 }
 0x2d4   : > { %1484 = vrot.lane.b32.xlu0 %v460_v34, %s6138_s7  ;;  %v468_v34 = vld [vmem:[%s6186_s24 + $0xc6] sm:$0xff] }
 0x2d5   : > { %v7372_v4 = vpop.permute.xlu1 %1330 }
 0x2d6   : > { %v7374_v27 = vpop.permute.xlu0 %1328 }
 0x2db   : > { %1494 = vrot.lane.b32.xlu2 %v465_v26, %s6138_s7  ;;  %1492 = vrot.lane.b32.xlu1 %v464_v1, %s6138_s7  ;;  %v7393_v26 = vpop.permute.xlu2 %1344 }
 0x2dc   : > { %1490 = vrot.lane.b32.xlu0 %v463_v7, %s6138_s7  ;;  %10657 = vst [vmem:[#allocation177_spill] sm:$0xff] %v7393_v26  ;;  %v473_v26 = vld [vmem:[%s6186_s24 + $0xee] sm:$0xff] }
 0x2dd   : > { %v7384_v46 = vpop.permute.xlu1 %1336 }
 0x2de   : > { %10655 = vst [vmem:[#allocation175_spill] sm:$0xff] %v7384_v46  ;;  %v7386_v31 = vpop.permute.xlu0 %1334  ;;  %v470_v46 = vld [vmem:[%s6186_s24 + $0xd6] sm:$0xff] }
 0x2df   : > { %10656 = vst [vmem:[#allocation176_spill] sm:$0xff] %v7386_v31  ;;  %v469_v31 = vld [vmem:[%s6186_s24 + $0xce] sm:$0xff] }
 0x2e3   : > { %1500 = vrot.lane.b32.xlu2 %v468_v34, %s6138_s7  ;;  %1498 = vrot.lane.b32.xlu1 %v467_v52, %s6138_s7  ;;  %v7408_v34 = vpop.permute.xlu2 %1350 }
 0x2e4   : > { %1496 = vrot.lane.b32.xlu0 %v466_v63, %s6138_s7  ;;  %10661 = vst [vmem:[#allocation181_spill] sm:$0xff] %v7408_v34  ;;  %v475_v34 = vld [vmem:[%s6186_s24 + $0xfe] sm:$0xff] }
 0x2e5   : > { %v7396_v1 = vpop.permute.xlu1 %1342 }
 0x2e6   : > { %10658 = vst [vmem:[#allocation178_spill] sm:$0xff] %v7396_v1  ;;  %v7398_v7 = vpop.permute.xlu0 %1340  ;;  %v474_v1 = vld [vmem:[%s6186_s24 + $0xf6] sm:$0xff] }
 0x2e7   : > { %10659 = vst [vmem:[#allocation179_spill] sm:$0xff] %v7398_v7  ;;  %v472_v7 = vld [vmem:[%s6186_s24 + $0xe6] sm:$0xff] }
 0x2eb   : > { %1506 = vrot.lane.b32.xlu2 %v471_v30, %s6138_s7  ;;  %1504 = vrot.lane.b32.xlu1 %v470_v46, %s6138_s7 }
 0x2ec   : > { %1502 = vrot.lane.b32.xlu0 %v469_v31, %s6138_s7  ;;  %v7422_v31 = vpop.permute.xlu2 %1356 }
 0x2ed   : > { %v7406_v52 = vpop.permute.xlu1 %1348  ;;  %10665 = vst [vmem:[#allocation185_spill] sm:$0xff] %v7422_v31  ;;  %v482_v31 = vld [vmem:[%s6186_s24 + $0x136] sm:$0xff] }
 0x2ee   : > { %10660 = vst [vmem:[#allocation180_spill] sm:$0xff] %v7406_v52  ;;  %v7410_v63 = vpop.permute.xlu0 %1346  ;;  %v477_v52 = vld [vmem:[%s6186_s24 + $0x10e] sm:$0xff] }
 0x2ef   : > { %10662 = vst [vmem:[#allocation182_spill] sm:$0xff] %v7410_v63  ;;  %v476_v63 = vld [vmem:[%s6186_s24 + $0x106] sm:$0xff] }
 0x2f3   : > { %1512 = vrot.lane.b32.xlu2 %v474_v1, %s6138_s7  ;;  %1510 = vrot.lane.b32.xlu1 %v473_v26, %s6138_s7 }
 0x2f4   : > { %1508 = vrot.lane.b32.xlu0 %v472_v7, %s6138_s7  ;;  %v1868_v7 = vld [vmem:[%s10473_s1 + $0x20] sm:$0xf] }
 0x2f5   : > { %v7418_v30 = vpop.permute.xlu1 %1354  ;;  %5488 = vmatpush.msk.msra.mxu0 %vm1982_vm0, %v1868_v7  ;;  %v1865_v7 = vld [vmem:[%s10473_s1 + $0x8] sm:$0xff]  ;;  %vm3554_vm0 = vcmask 256000  }
 0x2f6   : > { %10663 = vst [vmem:[#allocation183_spill] sm:$0xff] %v7418_v30  ;;  %v7420_v46 = vpop.permute.xlu0 %1352  ;;  %v478_v30 = vld [vmem:[%s6186_s24 + $0x116] sm:$0xff] }
 0x2f7   : > { %10664 = vst [vmem:[#allocation184_spill] sm:$0xff] %v7420_v46  ;;  %v1867_v46 = vld [vmem:[%s10473_s1 + $0x18] sm:$0xff] }
 0x2f8   : > { %1998 = vmatpush.msra.mxu0 %v1867_v46 }
 0x2fb   : > { %1518 = vrot.lane.b32.xlu2 %v477_v52, %s6138_s7  ;;  %1516 = vrot.lane.b32.xlu1 %v476_v63, %s6138_s7  ;;  %v480_v52 = vld [vmem:[%s6186_s24 + $0x126] sm:$0xff]  ;;  %v479_v63 = vld [vmem:[%s6186_s24 + $0x11e] sm:$0xff] }
 0x2fc   : > { %1514 = vrot.lane.b32.xlu0 %v475_v34, %s6138_s7  ;;  %v1866_v34 = vld [vmem:[%s10473_s1 + $0x10] sm:$0xff] }
 0x2fd   : > { %v7430_v26 = vpop.permute.xlu1 %1360  ;;  %1999 = vmatpush.msra.mxu0 %v1866_v34 }
 0x2fe   : > { %10666 = vst [vmem:[#allocation186_spill] sm:$0xff] %v7430_v26  ;;  %v7432_v1 = vpop.permute.xlu0 %1358 }
 0x2ff   : > { %10667 = vst [vmem:[#allocation187_spill] sm:$0xff] %v7432_v1  ;;  %v7446_v1 = vpop.permute.xlu2 %1362  ;;  %2000 = vmatpush.msra.mxu0 %v1865_v7 }
 0x300   : > { %10668 = vst [vmem:[#allocation188_spill] sm:$0xff] %v7446_v1  ;;  %v1864_v1 = vld [vmem:[%s10473_s1] sm:$0xff] }
 0x301   : > { %2001 = vmatpush.msra.mxu0 %v1864_v1  ;;  %v228_v1 = vld [vmem:[%s6186_s24] sm:$0xff] }
 0x303   : > { %1524 = vrot.lane.b32.xlu2 %v480_v52, %s6138_s7  ;;  %1522 = vrot.lane.b32.xlu1 %v479_v63, %s6138_s7  ;;  %v483_v52 = vld [vmem:[%s6186_s24 + $0x13e] sm:$0xff]  ;;  %v481_v63 = vld [vmem:[%s6186_s24 + $0x12e] sm:$0xff] }
 0x304   : > { %1520 = vrot.lane.b32.xlu0 %v478_v30, %s6138_s7 }
 0x305   : > { %v7454_v26 = vpop.permute.xlu1 %1366 }
 0x306   : > { %10669 = vst [vmem:[#allocation189_spill] sm:$0xff] %v7454_v26  ;;  %v7456_v46 = vpop.permute.xlu0 %1364 }
 0x307   : > { %10670 = vst [vmem:[#allocation190_spill] sm:$0xff] %v7456_v46  ;;  %v7466_v30 = vpop.permute.xlu2 %1368 }
 0x30b   : > { %1530 = vrot.lane.b32.xlu2 %v483_v52, %s6138_s7  ;;  %1528 = vrot.lane.b32.xlu1 %v482_v31, %s6138_s7  ;;  %v1569_v31 = vsel %vm1568_vm1, %v228_v1, %v6309_v50  ;;  %v229_v1 = vld [vmem:[%s6186_s24 + $0x8] sm:$0xff] }
 0x30c   : > { %1526 = vrot.lane.b32.xlu0 %v481_v63, %s6138_s7 }
 0x30d   : > { %v7469_v34 = vpop.permute.xlu1 %1372 }
 0x30e   : > { %10671 = vst [vmem:[#allocation191_spill] sm:$0xff] %v7469_v34  ;;  %v7471_v7 = vpop.permute.xlu0 %1370 }
 0x30f   : > { %10672 = vst [vmem:[#allocation192_spill] sm:$0xff] %v7471_v7  ;;  %v7473_v46 = vpop.permute.xlu2 %1374  ;;  %v1606_v7 = vsel %vm1605_vm2, %v1569_v31, %v6534_v41 }
 0x315   : > { %v7477_v35 = vpop.permute.xlu1 %1378 }
 0x316   : > { %v7475_v26 = vpop.permute.xlu0 %1376  ;;  %10674 = vst [vmem:[#allocation194_spill] sm:$0xff] %v7477_v35 }
 0x317   : > { %10673 = vst [vmem:[#allocation193_spill] sm:$0xff] %v7475_v26  ;;  %v7484_v63 = vpop.permute.xlu2 %1380  ;;  %v1643_v26 = vsel %vm1642_vm3, %v1606_v7, %v6678_v39 }
 0x318   : > { %v1680_v34 = vsel %vm1679_vm4, %v1643_v26, %v6843_v12  ;;  %v1570_v12 = vsel %vm1568_vm1, %v229_v1, %v6330_v56 }
 0x319   : > { %v1717_v50 = vsel %vm1716_vm5, %v1680_v34, %v7068_v29  ;;  %v1607_v29 = vsel %vm1605_vm2, %v1570_v12, %v6532_v47 }
 0x31a   : > { %v1754_v41 = vsel %vm1753_vm6, %v1717_v50, %v7212_v13  ;;  %v1644_v13 = vsel %vm1642_vm3, %v1607_v29, %v6676_v25  ;;  %v232_v29 = vld [vmem:[%s6186_s24 + $0x20] sm:$0xff] }
 0x31b   : > { %v1791_v39 = vsel %vm1790_vm7, %v1754_v41, %v7352_v14  ;;  %v1681_v14 = vsel %vm1679_vm4, %v1644_v13, %v6841_v24  ;;  %v230_v41 = vld [vmem:[%s6186_s24 + $0x10] sm:$0xff] }
 0x31c   : > { %v1718_v34 = vsel %vm1716_vm5, %v1681_v14, %v7066_v6  ;;  %v1571_v25 = vsel %vm1568_vm1, %v230_v41, %v6307_v49  ;;  %v233_v14 = vld [vmem:[%s6186_s24 + $0x28] sm:$0xff]  ;;  %v242_v41 = vld [vmem:[%s6186_s24 + $0x70] sm:$0xff] }
 0x31d   : > { %v7490_v35 = vpop.permute.xlu1 %1384  ;;  %v1755_v56 = vsel %vm1753_vm6, %v1718_v34, %v7210_v16  ;;  %v1608_v24 = vsel %vm1605_vm2, %v1571_v25, %v6494_v32  ;;  %v237_v25 = vld [vmem:[%s6186_s24 + $0x48] sm:$0xff] }
 0x31e   : > { %v7480_v52 = vpop.permute.xlu0 %1382  ;;  %v1792_v47 = vsel %vm1790_vm7, %v1755_v56, %v7348_v8  ;;  %v1645_v6 = vsel %vm1642_vm3, %v1608_v24, %v6638_v38  ;;  %v245_v56 = vld [vmem:[%s6186_s24 + $0x88] sm:$0xff] }
 0x31f   : > { %v7509_v26 = vpop.permute.xlu2 %1386  ;;  %v1682_v16 = vsel %vm1679_vm4, %v1645_v6, %v6782_v11 }
 0x320   : > { %v1719_v8 = vsel %vm1716_vm5, %v1682_v16, %v7028_v43  ;;  %v251_v16 = vld [vmem:[%s6186_s24 + $0xb8] sm:$0xff] }
 0x321   : > { %v1756_v49 = vsel %vm1753_vm6, %v1719_v8, %v7172_v61  ;;  %v241_v8 = vld [vmem:[%s6186_s24 + $0x68] sm:$0xff] }
 0x325   : > { %v1463_v50 = vpop.permute.xlu1 %1462 }
 0x326   : > { %v1461_v7 = vpop.permute.xlu0 %1460  ;;  %v1829_v1 = vsel %vm1827_vm9, %v1792_v47, %v1463_v50  ;;  %v236_v50 = vld [vmem:[%s6186_s24 + $0x40] sm:$0xff]  ;;  %v235_v47 = vld [vmem:[%s6186_s24 + $0x38] sm:$0xff] }
 0x327   : > { %v1828_v31 = vsel %vm1827_vm9, %v1791_v39, %v1461_v7  ;;  %v1465_v39 = vpop.permute.xlu2 %1464  ;;  %v231_v7 = vld [vmem:[%s6186_s24 + $0x18] sm:$0xff]  ;;  %v1577_v6 = vsel %vm1568_vm1, %v236_v50, %v6288_v44  ;;  %v10684_v50 = vld [vmem:[#allocation10_spill] sm:$0xff] }
 0x328   : > { %5489 = vmatmul.msk.f32.vlgmr.msra.gmra.mxu0 %vm1873_vm8, %v1828_v31  ;;  %v1793_v31 = vsel %vm1790_vm7, %v1756_v49, %v7335_v33  ;;  %v1572_v12 = vsel %vm1568_vm1, %v231_v7, %v6328_v55  ;;  %v10675_v7 = vld [vmem:[#allocation57_spill] sm:$0xff] }
 0x329   : > { %v1830_v32 = vsel %vm1827_vm9, %v1793_v31, %v1465_v39  ;;  %v1609_v38 = vsel %vm1605_vm2, %v1572_v12, %v6546_v45  ;;  %v240_v39 = vld [vmem:[%s6186_s24 + $0x60] sm:$0xff]  ;;  %v10676_v31 = vld [vmem:[#allocation3_spill] sm:$0xff]  ;;  %v10678_v44 = vld [vmem:[#allocation5_spill] sm:$0xff] }
 0x32a   : > { %v1646_v43 = vsel %vm1642_vm3, %v1609_v38, %v6690_v17  ;;  %v1576_v38 = vsel %vm1568_vm1, %v235_v47, %v10678_v44  ;;  %v249_v47 = vld [vmem:[%s6186_s24 + $0xa8] sm:$0xff]  ;;  %v10690_v44 = vld [vmem:[#allocation16_spill] sm:$0xff] }
 0x32b   : > { %v1683_v11 = vsel %vm1679_vm4, %v1646_v43, %v6864_v58  ;;  %v1573_v58 = vsel %vm1568_vm1, %v232_v29, %v6260_v36  ;;  %v244_v43 = vld [vmem:[%s6186_s24 + $0x80] sm:$0xff] }
 0x32c   : > { %v1720_v61 = vsel %vm1716_vm5, %v1683_v11, %v7080_v5  ;;  %v1610_v17 = vsel %vm1605_vm2, %v1573_v58, %v6544_v53  ;;  %v243_v11 = vld [vmem:[%s6186_s24 + $0x78] sm:$0xff]  ;;  %v10680_v29 = vld [vmem:[#allocation6_spill] sm:$0xff]  ;;  %v10682_v58 = vld [vmem:[#allocation8_spill] sm:$0xff] }
 0x32d   : > { %v1757_v55 = vsel %vm1753_vm6, %v1720_v61, %v7224_v9  ;;  %v1647_v5 = vsel %vm1642_vm3, %v1610_v17, %v6688_v19  ;;  %v1469_v36 = vpop.permute.xlu1 %1468  ;;  %v239_v19 = vld [vmem:[%s6186_s24 + $0x58] sm:$0xff]  ;;  %v10679_v61 = vld [vmem:[#allocation88_spill] sm:$0xff] }
 0x32e   : > { %v1467_v33 = vpop.permute.xlu0 %1466  ;;  %v1794_v45 = vsel %vm1790_vm7, %v1757_v55, %v7362_v51  ;;  %v1684_v9 = vsel %vm1679_vm4, %v1647_v5, %v6862_v59  ;;  %v257_v5 = vld [vmem:[%s6186_s24 + $0xe8] sm:$0xff] }
 0x32f   : > { %v1831_v13 = vsel %vm1827_vm9, %v1794_v45, %v1467_v33  ;;  %v1721_v51 = vsel %vm1716_vm5, %v1684_v9, %v7078_v0  ;;  %v1574_v0 = vsel %vm1568_vm1, %v233_v14, %v6271_v40  ;;  %v7590_v40 = vsel %vm1568_vm1, %v239_v19, %v6305_v48  ;;  %v254_v48 = vld [vmem:[%s6186_s24 + $0xd0] sm:$0xff]  ;;  %v10681_v45 = vld [vmem:[#allocation7_spill] sm:$0xff]  ;;  %v247_v9 = vld [vmem:[%s6186_s24 + $0x98] sm:$0xff]  ;;  %v1471_v14 = vpop.permute.xlu2 %1470 }
 0x330   : > { %5490 = vmatmul.msk.f32.gmra.mxu0 %vm1873_vm8, %v1829_v1  ;;  %v1758_v34 = vsel %vm1753_vm6, %v1721_v51, %v7222_v22  ;;  %v234_v1 = vld [vmem:[%s6186_s24 + $0x30] sm:$0xff]  ;;  %v248_v22 = vld [vmem:[%s6186_s24 + $0xa0] sm:$0xff]  ;;  %v1611_v24 = vsel %vm1605_vm2, %v1574_v0, %v6506_v28  ;;  %v1592_v19 = vsel %vm1568_vm1, %v251_v16, %v10684_v50 }
 0x331   : > { %v1795_v53 = vsel %vm1790_vm7, %v1758_v34, %v7360_v21  ;;  %v238_v21 = vld [vmem:[%s6186_s24 + $0x50] sm:$0xff]  ;;  %v1648_v49 = vsel %vm1642_vm3, %v1611_v24, %v10675_v7  ;;  %v1575_v55 = vsel %vm1568_vm1, %v234_v1, %v10680_v29  ;;  %v10683_v34 = vld [vmem:[#allocation9_spill] sm:$0xff]  ;;  %v260_v0 = vld [vmem:[%s6186_s24 + $0x100] sm:$0xff] }
 0x332   : > { %v1832_v59 = vsel %vm1827_vm9, %v1795_v53, %v1469_v36  ;;  %v10677_v28 = vld [vmem:[#allocation4_spill] sm:$0xff]  ;;  %v1685_v33 = vsel %vm1679_vm4, %v1648_v49, %v10679_v61  ;;  %v1579_v17 = vsel %vm1568_vm1, %v238_v21, %v10682_v58  ;;  %v1578_v53 = vsel %vm1568_vm1, %v237_v25, %v10683_v34  ;;  %v10687_v21 = vld [vmem:[#allocation13_spill] sm:$0xff]  ;;  %v10688_v24 = vld [vmem:[#allocation14_spill] sm:$0xff] }
 0x333   : > { %v1586_v12 = vsel %vm1568_vm1, %v245_v56, %v10677_v28  ;;  %v246_v51 = vld [vmem:[%s6186_s24 + $0x90] sm:$0xff]  ;;  %v1722_v36 = vsel %vm1716_vm5, %v1685_v33, %v7040_v60  ;;  %v1595_v25 = vsel %vm1568_vm1, %v254_v48, %v10687_v21  ;;  %v1585_v16 = vsel %vm1568_vm1, %v244_v43, %v10688_v24  ;;  %v263_v7 = vld [vmem:[%s6186_s24 + $0x118] sm:$0xff]  ;;  %v252_v49 = vld [vmem:[%s6186_s24 + $0xc0] sm:$0xff] }
 0x334   : > { %v250_v56 = vld [vmem:[%s6186_s24 + $0xb0] sm:$0xff]  ;;  %v1759_v1 = vsel %vm1753_vm6, %v1722_v36, %v7184_v62  ;;  %v10689_v28 = vld [vmem:[#allocation15_spill] sm:$0xff]  ;;  %v10691_v61 = vld [vmem:[#allocation17_spill] sm:$0xff] }
 0x335   : > { %v10686_v60 = vld [vmem:[#allocation12_spill] sm:$0xff]  ;;  %v1584_v62 = vsel %vm1568_vm1, %v243_v11, %v10689_v28  ;;  %v1588_v48 = vsel %vm1568_vm1, %v247_v9, %v10691_v61  ;;  %v256_v33 = vld [vmem:[%s6186_s24 + $0xe0] sm:$0xff]  ;;  %v255_v43 = vld [vmem:[%s6186_s24 + $0xd8] sm:$0xff] }
 0x336   : > { %v259_v29 = vld [vmem:[%s6186_s24 + $0xf8] sm:$0xff]  ;;  %v10692_v58 = vld [vmem:[#allocation18_spill] sm:$0xff]  ;;  %v10693_v34 = vld [vmem:[#allocation19_spill] sm:$0xff] }
 0x337   : > { %v1587_v36 = vsel %vm1568_vm1, %v246_v51, %v10692_v58  ;;  %v10694_v50 = vld [vmem:[#allocation20_spill] sm:$0xff]  ;;  %v10696_v9 = vld [vmem:[#allocation22_spill] sm:$0xff] }
 0x338   : > { %5491 = vmatmul.msk.f32.gmra.mxu0 %vm1873_vm8, %v1830_v32  ;;  %v1583_v32 = vsel %vm1568_vm1, %v242_v41, %v10676_v31  ;;  %v10685_v41 = vld [vmem:[#allocation11_spill] sm:$0xff]  ;;  %v1796_v31 = vsel %vm1790_vm7, %v1759_v1, %v7350_v20  ;;  %v1601_v20 = vsel %vm1568_vm1, %v260_v0, %v10693_v34  ;;  %v1591_v11 = vsel %vm1568_vm1, %v250_v56, %v10694_v50  ;;  %v258_v1 = vld [vmem:[%s6186_s24 + $0xf0] sm:$0xff]  ;;  %v10701_v61 = vld [vmem:[#allocation26_spill] sm:$0xff] }
 0x339   : > { %v1604_v21 = vsel %vm1568_vm1, %v263_v7, %v10696_v9  ;;  %v10698_v51 = vld [vmem:[#allocation24_spill] sm:$0xff]  ;;  %v261_v0 = vld [vmem:[%s6186_s24 + $0x108] sm:$0xff]  ;;  %v1596_v58 = vsel %vm1568_vm1, %v255_v43, %v10701_v61 }
 0x33a   : > { %v10699_v28 = vld [vmem:[#allocation36_spill] sm:$0xff]  ;;  %v10703_v7 = vld [vmem:[#allocation67_spill] sm:$0xff] }
 0x33b   : > { %v1612_v56 = vsel %vm1605_vm2, %v1575_v55, %v10699_v28  ;;  %v10708_v28 = vld [vmem:[#allocation31_spill] sm:$0xff] }
 0x33c   : > { %v1649_v50 = vsel %vm1642_vm3, %v1612_v56, %v10703_v7  ;;  %v1602_v43 = vsel %vm1568_vm1, %v261_v0, %v10708_v28  ;;  %v10710_v56 = vld [vmem:[#allocation33_spill] sm:$0xff]  ;;  %v10712_v7 = vld [vmem:[#allocation35_spill] sm:$0xff] }
 0x33d   : > { %v1620_v61 = vsel %vm1605_vm2, %v1583_v32, %v10710_v56  ;;  %v10715_v32 = vld [vmem:[#allocation39_spill] sm:$0xff]  ;;  %v10717_v28 = vld [vmem:[#allocation41_spill] sm:$0xff] }
 0x33e   : > { %v10719_v56 = vld [vmem:[#allocation43_spill] sm:$0xff] }
 0x340   : > { %5492 = vmatmul.msk.f32.gmra.mxu0 %vm1873_vm8, %v1831_v13  ;;  %v1589_v13 = vsel %vm1568_vm1, %v248_v22, %v10681_v45  ;;  %v1581_v22 = vsel %vm1568_vm1, %v240_v39, %v10686_v60  ;;  %v1598_v39 = vsel %vm1568_vm1, %v257_v5, %v10690_v44  ;;  %v1833_v45 = vsel %vm1827_vm9, %v1796_v31, %v1471_v14  ;;  %v262_v60 = vld [vmem:[%s6186_s24 + $0x110] sm:$0xff]  ;;  %v10697_v14 = vld [vmem:[#allocation23_spill] sm:$0xff]  ;;  %v10700_v44 = vld [vmem:[#allocation25_spill] sm:$0xff] }
 0x341   : > { %v1593_v31 = vsel %vm1568_vm1, %v252_v49, %v10698_v51  ;;  %v10705_v49 = vld [vmem:[#allocation29_spill] sm:$0xff]  ;;  %v10707_v51 = vld [vmem:[#allocation98_spill] sm:$0xff] }
 0x342   : > { %v1614_v9 = vsel %vm1605_vm2, %v1577_v6, %v10705_v49  ;;  %v1473_v6 = vpop.permute.xlu0 %1472 }
 0x348   : > { %5493 = vmatmul.msk.f32.gmra.mxu0 %vm1873_vm8, %v1832_v59  ;;  %v1582_v59 = vsel %vm1568_vm1, %v241_v8, %v10685_v41  ;;  %v253_v8 = vld [vmem:[%s6186_s24 + $0xc8] sm:$0xff]  ;;  %v10695_v41 = vld [vmem:[#allocation21_spill] sm:$0xff] }
 0x349   : > { %v1590_v5 = vsel %vm1568_vm1, %v249_v47, %v10695_v41  ;;  %v1594_v24 = vsel %vm1568_vm1, %v253_v8, %v10697_v14  ;;  %v1597_v47 = vsel %vm1568_vm1, %v256_v33, %v10700_v44  ;;  %v10704_v8 = vld [vmem:[#allocation28_spill] sm:$0xff]  ;;  %v10706_v14 = vld [vmem:[#allocation30_spill] sm:$0xff]  ;;  %v1686_v33 = vsel %vm1679_vm4, %v1649_v50, %v10707_v51 }
 0x34a   : > { %v1599_v41 = vsel %vm1568_vm1, %v258_v1, %v10704_v8  ;;  %v1603_v55 = vsel %vm1568_vm1, %v262_v60, %v10706_v14  ;;  %v10709_v44 = vld [vmem:[#allocation32_spill] sm:$0xff]  ;;  %v1723_v1 = vsel %vm1716_vm5, %v1686_v33, %v7092_v57  ;;  %v1613_v50 = vsel %vm1605_vm2, %v1576_v38, %v10712_v7  ;;  %v10713_v8 = vld [vmem:[#allocation37_spill] sm:$0xff]  ;;  %v10722_v7 = vld [vmem:[#allocation46_spill] sm:$0xff] }
 0x34b   : > { %v1626_v0 = vsel %vm1605_vm2, %v1589_v13, %v10713_v8  ;;  %v1760_v49 = vsel %vm1753_vm6, %v1723_v1, %v7236_v10  ;;  %v1615_v51 = vsel %vm1605_vm2, %v1578_v53, %v10715_v32  ;;  %v10716_v57 = vld [vmem:[#allocation40_spill] sm:$0xff]  ;;  %v1619_v38 = vsel %vm1605_vm2, %v1582_v59, %v10717_v28  ;;  %v10723_v8 = vld [vmem:[#allocation47_spill] sm:$0xff]  ;;  %v10730_v28 = vld [vmem:[#allocation54_spill] sm:$0xff] }
 0x34c   : > { %v1629_v33 = vsel %vm1605_vm2, %v1592_v19, %v10716_v57  ;;  %v1632_v10 = vsel %vm1605_vm2, %v1595_v25, %v10719_v56  ;;  %v10720_v1 = vld [vmem:[#allocation44_spill] sm:$0xff]  ;;  %v1625_v59 = vsel %vm1605_vm2, %v1588_v48, %v10723_v8  ;;  %v10725_v25 = vld [vmem:[#allocation49_spill] sm:$0xff]  ;;  %v10727_v32 = vld [vmem:[#allocation51_spill] sm:$0xff] }
 0x34d   : > { %v1622_v53 = vsel %vm1605_vm2, %v1585_v16, %v10720_v1  ;;  %v10728_v57 = vld [vmem:[#allocation52_spill] sm:$0xff]  ;;  %v10731_v56 = vld [vmem:[#allocation66_spill] sm:$0xff]  ;;  %v10736_v8 = vld [vmem:[#allocation59_spill] sm:$0xff] }
 0x34e   : > { %v10733_v1 = vld [vmem:[#allocation56_spill] sm:$0xff] }
 0x350   : > { %5494 = vmatmul.msk.f32.gmra.mxu0 %vm1873_vm8, %v1833_v45  ;;  %v10702_v45 = vld [vmem:[#allocation27_spill] sm:$0xff] }
 0x351   : > { %v1600_v34 = vsel %vm1568_vm1, %v259_v29, %v10702_v45  ;;  %v1617_v29 = vsel %vm1605_vm2, %v7590_v40, %v10709_v44  ;;  %v10711_v45 = vld [vmem:[#allocation34_spill] sm:$0xff] }
 0x352   : > { %v1623_v60 = vsel %vm1605_vm2, %v1586_v12, %v10711_v45  ;;  %v10714_v40 = vld [vmem:[#allocation38_spill] sm:$0xff]  ;;  %v1797_v12 = vsel %vm1790_vm7, %v1760_v49, %v7374_v27  ;;  %v10721_v45 = vld [vmem:[#allocation45_spill] sm:$0xff]  ;;  %v1635_v27 = vsel %vm1605_vm2, %v1598_v39, %v10722_v7  ;;  %v1641_v39 = vsel %vm1605_vm2, %v1604_v21, %v10728_v57 }
 0x353   : > { %v1616_v14 = vsel %vm1605_vm2, %v1579_v17, %v10714_v40  ;;  %v10718_v44 = vld [vmem:[#allocation42_spill] sm:$0xff]  ;;  %v1834_v17 = vsel %vm1827_vm9, %v1797_v12, %v1473_v6  ;;  %v1621_v19 = vsel %vm1605_vm2, %v1584_v62, %v10721_v45  ;;  %v1638_v6 = vsel %vm1605_vm2, %v1601_v20, %v10725_v25  ;;  %v10729_v12 = vld [vmem:[#allocation53_spill] sm:$0xff] }
 0x354   : > { %v1618_v13 = vsel %vm1605_vm2, %v1581_v22, %v10718_v44  ;;  %v10724_v22 = vld [vmem:[#allocation48_spill] sm:$0xff]  ;;  %v10726_v40 = vld [vmem:[#allocation50_spill] sm:$0xff]  ;;  %v1627_v62 = vsel %vm1605_vm2, %v1590_v5, %v10727_v32  ;;  %v1631_v48 = vsel %vm1605_vm2, %v1594_v24, %v10729_v12  ;;  %v1630_v44 = vsel %vm1605_vm2, %v1593_v31, %v10730_v28  ;;  %v10735_v7 = vld [vmem:[#allocation97_spill] sm:$0xff] }
 0x355   : > { %v1624_v49 = vsel %vm1605_vm2, %v1587_v36, %v10724_v22  ;;  %v1628_v16 = vsel %vm1605_vm2, %v1591_v11, %v10726_v40  ;;  %v1650_v36 = vsel %vm1642_vm3, %v1613_v50, %v10731_v56  ;;  %v1633_v11 = vsel %vm1605_vm2, %v1596_v58, %v10733_v1  ;;  %v10734_v45 = vld [vmem:[#allocation58_spill] sm:$0xff]  ;;  %v10737_v22 = vld [vmem:[#allocation60_spill] sm:$0xff]  ;;  %v10738_v25 = vld [vmem:[#allocation61_spill] sm:$0xff]  ;;  %v1475_v40 = vpop.permute.xlu1 %1474 }
 0x356   : > { %v1637_v5 = vsel %vm1605_vm2, %v1600_v34, %v10734_v45  ;;  %v1687_v21 = vsel %vm1679_vm4, %v1650_v36, %v10735_v7  ;;  %v1636_v24 = vsel %vm1605_vm2, %v1599_v41, %v10736_v8  ;;  %v1651_v31 = vsel %vm1642_vm3, %v1614_v9, %v10737_v22  ;;  %v10739_v58 = vld [vmem:[#allocation62_spill] sm:$0xff]  ;;  %v10740_v34 = vld [vmem:[#allocation63_spill] sm:$0xff]  ;;  %v10741_v12 = vld [vmem:[#allocation64_spill] sm:$0xff] }
 0x357   : > { %v1640_v50 = vsel %vm1605_vm2, %v1603_v55, %v10738_v25  ;;  %v1639_v32 = vsel %vm1605_vm2, %v1602_v43, %v10739_v58  ;;  %v1654_v57 = vsel %vm1642_vm3, %v1617_v29, %v10740_v34  ;;  %v1657_v28 = vsel %vm1642_vm3, %v1620_v61, %v10741_v12  ;;  %v10742_v9 = vld [vmem:[#allocation65_spill] sm:$0xff]  ;;  %v10743_v55 = vld [vmem:[#allocation68_spill] sm:$0xff]  ;;  %v10745_v1 = vld [vmem:[#allocation70_spill] sm:$0xff] }
 0x358   : > { %5495 = vmatmul.msk.f32.gmra.mxu0 %vm1873_vm8, %v1834_v17  ;;  %v10732_v17 = vld [vmem:[#allocation55_spill] sm:$0xff]  ;;  %v1660_v56 = vsel %vm1642_vm3, %v1623_v60, %v10742_v9  ;;  %v1663_v36 = vsel %vm1642_vm3, %v1626_v0, %v10743_v55  ;;  %v1652_v29 = vsel %vm1642_vm3, %v1615_v51, %v10745_v1  ;;  %v10747_v7 = vld [vmem:[#allocation72_spill] sm:$0xff]  ;;  %v10749_v8 = vld [vmem:[#allocation74_spill] sm:$0xff] }
 0x359   : > { %v1634_v20 = vsel %vm1605_vm2, %v1597_v47, %v10732_v17  ;;  %v1724_v47 = vsel %vm1716_vm5, %v1687_v21, %v7090_v37  ;;  %v10744_v37 = vld [vmem:[#allocation69_spill] sm:$0xff]  ;;  %v10746_v45 = vld [vmem:[#allocation71_spill] sm:$0xff]  ;;  %v10751_v25 = vld [vmem:[#allocation76_spill] sm:$0xff] }
 0x35a   : > { %v1761_v41 = vsel %vm1753_vm6, %v1724_v47, %v7232_v2  ;;  %v1653_v17 = vsel %vm1642_vm3, %v1616_v14, %v10744_v37  ;;  %v1666_v61 = vsel %vm1642_vm3, %v1629_v33, %v10746_v45  ;;  %v1656_v2 = vsel %vm1642_vm3, %v1619_v38, %v10747_v7  ;;  %v10748_v21 = vld [vmem:[#allocation73_spill] sm:$0xff]  ;;  %v10750_v22 = vld [vmem:[#allocation75_spill] sm:$0xff]  ;;  %v10753_v38 = vld [vmem:[#allocation78_spill] sm:$0xff] }
 0x35b   : > { %v1798_v43 = vsel %vm1790_vm7, %v1761_v41, %v7372_v4  ;;  %v1655_v0 = vsel %vm1642_vm3, %v1618_v13, %v10748_v21  ;;  %v1669_v14 = vsel %vm1642_vm3, %v1632_v10, %v10749_v8  ;;  %v1659_v4 = vsel %vm1642_vm3, %v1622_v53, %v10750_v22  ;;  %v10752_v33 = vld [vmem:[#allocation77_spill] sm:$0xff]  ;;  %v10754_v58 = vld [vmem:[#allocation79_spill] sm:$0xff]  ;;  %v10755_v34 = vld [vmem:[#allocation80_spill] sm:$0xff]  ;;  %v1477_v22 = vpop.permute.xlu2 %1476 }
 0x35c   : > { %v1835_v60 = vsel %vm1827_vm9, %v1798_v43, %v1475_v40  ;;  %v1658_v51 = vsel %vm1642_vm3, %v1621_v19, %v10751_v25  ;;  %v1672_v47 = vsel %vm1642_vm3, %v1635_v27, %v10752_v33  ;;  %v1662_v40 = vsel %vm1642_vm3, %v1625_v59, %v10753_v38  ;;  %v10756_v12 = vld [vmem:[#allocation81_spill] sm:$0xff]  ;;  %v10757_v41 = vld [vmem:[#allocation82_spill] sm:$0xff]  ;;  %v10758_v9 = vld [vmem:[#allocation83_spill] sm:$0xff] }
 0x35d   : > { %v1661_v13 = vsel %vm1642_vm3, %v1624_v49, %v10754_v58  ;;  %v1675_v10 = vsel %vm1642_vm3, %v1638_v6, %v10755_v34  ;;  %v1665_v53 = vsel %vm1642_vm3, %v1628_v16, %v10756_v12  ;;  %v1664_v19 = vsel %vm1642_vm3, %v1627_v62, %v10757_v41  ;;  %v10759_v37 = vld [vmem:[#allocation84_spill] sm:$0xff]  ;;  %v10760_v43 = vld [vmem:[#allocation85_spill] sm:$0xff]  ;;  %v10761_v1 = vld [vmem:[#allocation86_spill] sm:$0xff] }
 0x35e   : > { %v1678_v55 = vsel %vm1642_vm3, %v1641_v39, %v10758_v9  ;;  %v1668_v27 = vsel %vm1642_vm3, %v1631_v48, %v10759_v37  ;;  %v1667_v59 = vsel %vm1642_vm3, %v1630_v44, %v10760_v43  ;;  %v1671_v49 = vsel %vm1642_vm3, %v1634_v20, %v10761_v1  ;;  %v10762_v45 = vld [vmem:[#allocation87_spill] sm:$0xff]  ;;  %v10765_v21 = vld [vmem:[#allocation90_spill] sm:$0xff]  ;;  %v10766_v8 = vld [vmem:[#allocation92_spill] sm:$0xff] }
 0x35f   : > { %v1670_v6 = vsel %vm1642_vm3, %v1633_v11, %v10762_v45  ;;  %v10763_v7 = vld [vmem:[#allocation91_spill] sm:$0xff]  ;;  %v1673_v39 = vsel %vm1642_vm3, %v1636_v24, %v10765_v21  ;;  %v1677_v48 = vsel %vm1642_vm3, %v1640_v50, %v10766_v8  ;;  %v10767_v20 = vld [vmem:[#allocation93_spill] sm:$0xff]  ;;  %v10768_v11 = vld [vmem:[#allocation94_spill] sm:$0xff] }
 0x360   : > { %5496 = vmatmul.msk.f32.gmra.mxu0 %vm1873_vm8, %v1835_v60  ;;  %v1688_v16 = vsel %vm1679_vm4, %v1651_v31, %v10763_v7  ;;  %v10764_v60 = vld [vmem:[#allocation89_spill] sm:$0xff]  ;;  %v1676_v25 = vsel %vm1642_vm3, %v1639_v32, %v10767_v20  ;;  %v1691_v33 = vsel %vm1679_vm4, %v1654_v57, %v10768_v11  ;;  %v10769_v31 = vld [vmem:[#allocation95_spill] sm:$0xff]  ;;  %v10770_v24 = vld [vmem:[#allocation96_spill] sm:$0xff] }
 0x361   : > { %v1674_v62 = vsel %vm1642_vm3, %v1637_v5, %v10764_v60  ;;  %v1725_v44 = vsel %vm1716_vm5, %v1688_v16, %v7052_v18  ;;  %v1694_v38 = vsel %vm1679_vm4, %v1657_v28, %v10769_v31  ;;  %v1697_v58 = vsel %vm1679_vm4, %v1660_v56, %v10770_v24  ;;  %v10771_v50 = vld [vmem:[#allocation99_spill] sm:$0xff]  ;;  %v10772_v18 = vld [vmem:[#allocation100_spill] sm:$0xff]  ;;  %v10773_v41 = vld [vmem:[#allocation101_spill] sm:$0xff] }
 0x362   : > { %v1762_v5 = vsel %vm1753_vm6, %v1725_v44, %v7196_v3  ;;  %v1700_v34 = vsel %vm1679_vm4, %v1663_v36, %v10771_v50  ;;  %v1690_v12 = vsel %vm1679_vm4, %v1653_v17, %v10772_v18  ;;  %v1689_v57 = vsel %vm1679_vm4, %v1652_v29, %v10773_v41  ;;  %v10774_v9 = vld [vmem:[#allocation102_spill] sm:$0xff]  ;;  %v10775_v37 = vld [vmem:[#allocation103_spill] sm:$0xff]  ;;  %v10776_v43 = vld [vmem:[#allocation104_spill] sm:$0xff] }
 0x363   : > { %v1799_v32 = vsel %vm1790_vm7, %v1762_v5, %v7364_v15  ;;  %v1703_v28 = vsel %vm1679_vm4, %v1666_v61, %v10774_v9  ;;  %v1693_v3 = vsel %vm1679_vm4, %v1656_v2, %v10775_v37  ;;  %v1692_v36 = vsel %vm1679_vm4, %v1655_v0, %v10776_v43  ;;  %v10777_v1 = vld [vmem:[#allocation105_spill] sm:$0xff]  ;;  %v10778_v45 = vld [vmem:[#allocation106_spill] sm:$0xff]  ;;  %v10779_v7 = vld [vmem:[#allocation107_spill] sm:$0xff] }
 0x364   : > { %v1836_v56 = vsel %vm1827_vm9, %v1799_v32, %v1477_v22  ;;  %v1706_v17 = vsel %vm1679_vm4, %v1669_v14, %v10777_v1  ;;  %v1696_v15 = vsel %vm1679_vm4, %v1659_v4, %v10778_v45  ;;  %v1695_v29 = vsel %vm1679_vm4, %v1658_v51, %v10779_v7  ;;  %v10780_v61 = vld [vmem:[#allocation108_spill] sm:$0xff]  ;;  %v10781_v2 = vld [vmem:[#allocation109_spill] sm:$0xff]  ;;  %v10782_v21 = vld [vmem:[#allocation110_spill] sm:$0xff]  ;;  %v1479_v32 = vpop.permute.xlu0 %1478 }
 0x365   : > { %v1709_v16 = vsel %vm1679_vm4, %v1672_v47, %v10780_v61  ;;  %v1699_v60 = vsel %vm1679_vm4, %v1662_v40, %v10781_v2  ;;  %v1698_v0 = vsel %vm1679_vm4, %v1661_v13, %v10782_v21  ;;  %v10783_v8 = vld [vmem:[#allocation111_spill] sm:$0xff]  ;;  %v10784_v44 = vld [vmem:[#allocation112_spill] sm:$0xff]  ;;  %v10785_v22 = vld [vmem:[#allocation113_spill] sm:$0xff]  ;;  %v1708_v13 = vsel %vm1679_vm4, %v1671_v49, %v7030_v42 }
 0x366   : > { %v1712_v14 = vsel %vm1679_vm4, %v1675_v10, %v10783_v8  ;;  %v1702_v4 = vsel %vm1679_vm4, %v1665_v53, %v10784_v44  ;;  %v1701_v51 = vsel %vm1679_vm4, %v1664_v19, %v10785_v22  ;;  %v10786_v20 = vld [vmem:[#allocation114_spill] sm:$0xff]  ;;  %v10787_v31 = vld [vmem:[#allocation115_spill] sm:$0xff]  ;;  %v10788_v5 = vld [vmem:[#allocation116_spill] sm:$0xff]  ;;  %v1707_v10 = vsel %vm1679_vm4, %v1670_v6, %v7032_v23 }
 0x367   : > { %v1715_v11 = vsel %vm1679_vm4, %v1678_v55, %v10786_v20  ;;  %v1705_v47 = vsel %vm1679_vm4, %v1668_v27, %v10787_v31  ;;  %v1704_v40 = vsel %vm1679_vm4, %v1667_v59, %v10788_v5  ;;  %v1711_v53 = vsel %vm1679_vm4, %v1674_v62, %v7042_v54  ;;  %v10789_v24 = vld [vmem:[#allocation117_spill] sm:$0xff]  ;;  %v10790_v50 = vld [vmem:[#allocation118_spill] sm:$0xff]  ;;  %v10792_v41 = vld [vmem:[#allocation119_spill] sm:$0xff] }
 0x368   : > { %5497 = vmatmul.msk.f32.gmra.mxu0 %vm1873_vm8, %v1836_v56  ;;  %v1710_v19 = vsel %vm1679_vm4, %v1673_v39, %v10789_v24  ;;  %v1714_v55 = vsel %vm1679_vm4, %v1677_v48, %v10790_v50  ;;  %v10791_v18 = vld [vmem:[#allocation125_spill] sm:$0xff]  ;;  %v2147_v59 = vlaneseq  ;;  %v1713_v42 = vsel %vm1679_vm4, %v1676_v25, %v10792_v41  ;;  %v10793_v49 = vld [vmem:[#allocation120_spill] sm:$0xff]  ;;  %v10795_v62 = vld [vmem:[#allocation151_spill] sm:$0xff] }
 0x369   : > { %v1726_v27 = vsel %vm1716_vm5, %v1689_v57, %v10791_v18  ;;  %v1728_v23 = vsel %vm1716_vm5, %v1691_v33, %v10793_v49  ;;  %v10794_v6 = vld [vmem:[#allocation121_spill] sm:$0xff]  ;;  %v10796_v9 = vld [vmem:[#allocation122_spill] sm:$0xff]  ;;  %v10797_v37 = vld [vmem:[#allocation123_spill] sm:$0xff] }
 0x36a   : > { %v1731_v54 = vsel %vm1716_vm5, %v1694_v38, %v10794_v6  ;;  %v1763_v39 = vsel %vm1753_vm6, %v1726_v27, %v10795_v62  ;;  %v1734_v48 = vsel %vm1716_vm5, %v1697_v58, %v10796_v9  ;;  %v1737_v57 = vsel %vm1716_vm5, %v1700_v34, %v10797_v37  ;;  %v10798_v56 = vld [vmem:[#allocation176_spill] sm:$0xff]  ;;  %v10800_v45 = vld [vmem:[#allocation126_spill] sm:$0xff]  ;;  %v10801_v7 = vld [vmem:[#allocation127_spill] sm:$0xff] }
 0x36b   : > { %v1800_v43 = vsel %vm1790_vm7, %v1763_v39, %v10798_v56  ;;  %v7900_v1 = vshrl.u32 %v2147_v59, 7  ;;  %v10799_v25 = vld [vmem:[#allocation124_spill] sm:$0xff]  ;;  %v1740_v38 = vsel %vm1716_vm5, %v1703_v28, %v10800_v45  ;;  %v1730_v61 = vsel %vm1716_vm5, %v1693_v3, %v10801_v7  ;;  %v10803_v34 = vld [vmem:[#allocation129_spill] sm:$0xff]  ;;  %v10804_v44 = vld [vmem:[#allocation130_spill] sm:$0xff] }
 0x36c   : > { %v1727_v33 = vsel %vm1716_vm5, %v1690_v12, %v10799_v25  ;;  %v1837_v2 = vsel %vm1827_vm9, %v1800_v43, %v1479_v32  ;;  %v10802_v58 = vld [vmem:[#allocation128_spill] sm:$0xff]  ;;  %v1743_v8 = vsel %vm1716_vm5, %v1706_v17, %v10803_v34  ;;  %v1733_v22 = vsel %vm1716_vm5, %v1696_v15, %v10804_v44  ;;  %v10805_v20 = vld [vmem:[#allocation131_spill] sm:$0xff]  ;;  %v10807_v5 = vld [vmem:[#allocation133_spill] sm:$0xff] }
 0x36d   : > { %v1729_v21 = vsel %vm1716_vm5, %v1692_v36, %v10802_v58  ;;  %v2187_v12 = vand.u32 65535, %v7900_v1  ;;  %v1732_v28 = vsel %vm1716_vm5, %v1695_v29, %v10805_v20  ;;  %v10806_v31 = vld [vmem:[#allocation132_spill] sm:$0xff]  ;;  %v1736_v24 = vsel %vm1716_vm5, %v1699_v60, %v10807_v5  ;;  %v10808_v36 = vld [vmem:[#allocation134_spill] sm:$0xff]  ;;  %v10809_v17 = vld [vmem:[#allocation135_spill] sm:$0xff] }
 0x36e   : > { %v1746_v3 = vsel %vm1716_vm5, %v1709_v16, %v10806_v31  ;;  %v1735_v50 = vsel %vm1716_vm5, %v1698_v0, %v10808_v36  ;;  %v1749_v18 = vsel %vm1716_vm5, %v1712_v14, %v10809_v17  ;;  %v10810_v15 = vld [vmem:[#allocation136_spill] sm:$0xff]  ;;  %v2188_v32 = vshrl.u32 %v7900_v1, 16  ;;  %v10811_v29 = vld [vmem:[#allocation137_spill] sm:$0xff]  ;;  %v10812_v16 = vld [vmem:[#allocation138_spill] sm:$0xff] }
 0x36f   : > { %v1739_v27 = vsel %vm1716_vm5, %v1702_v4, %v10810_v15  ;;  %v7930_v59 = vmul.u32 58254, %v2187_v12  ;;  %v7934_v41 = vsel %vm1716_vm5, %v1701_v51, %v10811_v29  ;;  %v7938_v60 = vsel %vm1716_vm5, %v1715_v11, %v10812_v16  ;;  %v10813_v49 = vld [vmem:[#allocation139_spill] sm:$0xff]  ;;  %v10814_v14 = vld [vmem:[#allocation140_spill] sm:$0xff]  ;;  %v1481_v4 = vpop.permute.xlu1 %1480  ;;  %v10815_v62 = vld [vmem:[#allocation150_spill] sm:$0xff] }
 0x370   : > { %5498 = vmatmul.msk.f32.gmra.mxu0 %vm1873_vm8, %v1837_v2  ;;  %v7942_v0 = vsel %vm1716_vm5, %v1705_v47, %v10813_v49  ;;  %v7946_v6 = vsel %vm1716_vm5, %v1704_v40, %v10814_v14  ;;  %v1764_v39 = vsel %vm1753_vm6, %v1727_v33, %v10815_v62  ;;  %v2190_v9 = vmul.u32 14564, %v2187_v12  ;;  %v10816_v56 = vld [vmem:[#allocation141_spill] sm:$0xff]  ;;  %v10817_v43 = vld [vmem:[#allocation142_spill] sm:$0xff]  ;;  %v10818_v25 = vld [vmem:[#allocation143_spill] sm:$0xff] }
 0x371   : > { %v7950_v37 = vmul.u32 14564, %v2188_v32  ;;  %v2194_v51 = vshll.u32 %v7930_v59, 16  ;;  %v7955_v11 = vsel %vm1716_vm5, %v1708_v13, %v10816_v56  ;;  %v7959_v47 = vsel %vm1716_vm5, %v1707_v10, %v10817_v43  ;;  %v10819_v45 = vld [vmem:[#allocation175_spill] sm:$0xff]  ;;  %v10820_v7 = vld [vmem:[#allocation144_spill] sm:$0xff]  ;;  %v10821_v58 = vld [vmem:[#allocation145_spill] sm:$0xff] }
 0x372   : > { %v7963_v40 = vsel %vm1716_vm5, %v1711_v53, %v10818_v25  ;;  %v1801_v33 = vsel %vm1790_vm7, %v1764_v39, %v10819_v45  ;;  %v7969_v2 = vsel %vm1716_vm5, %v1710_v19, %v10820_v7  ;;  %v7973_v34 = vsel %vm1716_vm5, %v1714_v55, %v10821_v58  ;;  %v10822_v12 = vld [vmem:[#allocation146_spill] sm:$0xff]  ;;  %v10823_v31 = vld [vmem:[#allocation147_spill] sm:$0xff]  ;;  %v10824_v5 = vld [vmem:[#allocation148_spill] sm:$0xff]  ;;  %v1483_v45 = vpop.permute.xlu2 %1482 }
 0x373   : > { %v1838_v13 = vsel %vm1827_vm9, %v1801_v33, %v1481_v4  ;;  %v2196_v10 = vshll.u32 %v7950_v37, 16  ;;  %vm2198_vm10 = vc.u32 %v2190_v9, %v2194_v51  ;;  %v2200_v44 = vadd.s32 %v2194_v51, %v2190_v9  ;;  %v10825_v36 = vld [vmem:[#allocation149_spill] sm:$0xff]  ;;  %v10826_v15 = vld [vmem:[#allocation152_spill] sm:$0xff]  ;;  %v10827_v16 = vld [vmem:[#allocation155_spill] sm:$0xff] }
 0x374   : > { %v7978_v53 = vadd.s32 8, %v7900_v1  ;;  %v7982_v20 = vsel %vm1716_vm5, %v1713_v42, %v10822_v12  ;;  %v1765_v19 = vsel %vm1753_vm6, %v1728_v23, %v10823_v31  ;;  %v7988_v55 = vsel %vm1753_vm6, %v1731_v54, %v10824_v5  ;;  %v10828_v14 = vld [vmem:[#allocation153_spill] sm:$0xff]  ;;  %v10829_v4 = vld [vmem:[#allocation154_spill] sm:$0xff]  ;;  %v10834_v58 = vld [vmem:[#allocation159_spill] sm:$0xff] }
 0x375   : > { %v7992_v17 = vsel %vm1753_vm6, %v1734_v48, %v10825_v36  ;;  %v7997_v29 = vsel %vm1753_vm6, %v1737_v57, %v10826_v15  ;;  %v8001_v42 = vsel %vm1753_vm6, %v1740_v38, %v10827_v16  ;;  %v2193_v49 = vmul.u32 58254, %v2188_v32  ;;  %v10830_v9 = vld [vmem:[#allocation158_spill] sm:$0xff]  ;;  %v10831_v38 = vld [vmem:[#allocation156_spill] sm:$0xff] }
 0x376   : > { %v2216_v23 = vand.u32 65535, %v7978_v53  ;;  %v8006_v54 = vsel %vm1753_vm6, %v1730_v61, %v10828_v14  ;;  %v1766_v48 = vsel %vm1753_vm6, %v1729_v21, %v10829_v4  ;;  %v6139_v62 = vmov 0   ;;  %v10832_v61 = vld [vmem:[#allocation157_spill] sm:$0xff]  ;;  %v10833_v21 = vld [vmem:[#allocation162_spill] sm:$0xff] }
 0x377   : > { %v2199_v39 = vsel %vm2198_vm10, 1, %v6139_v62  ;;  %v2217_v57 = vshrl.u32 %v7978_v53, 16  ;;  %v8014_v51 = vsel %vm1753_vm6, %v1743_v8, %v10830_v9  ;;  %v8018_v32 = vsel %vm1753_vm6, %v1733_v22, %v10831_v38  ;;  %v10837_v16 = vld [vmem:[#allocation166_spill] sm:$0xff] }
 0x378   : > { %5499 = vmatmul.msk.f32.gmra.mxu0 %vm1873_vm8, %v1838_v13  ;;  %vm2202_vm11 = vc.u32 %v2200_v44, %v2196_v10  ;;  %v2220_v56 = vmul.u32 58254, %v2216_v23  ;;  %v8022_v43 = vsel %vm1753_vm6, %v1732_v28, %v10832_v61  ;;  %v8026_v25 = vsel %vm1753_vm6, %v1746_v3, %v10833_v21  ;;  %v10835_v13 = vld [vmem:[#allocation174_spill] sm:$0xff]  ;;  %v10836_v3 = vld [vmem:[#allocation160_spill] sm:$0xff] }
 0x379   : > { %v2219_v33 = vmul.u32 14564, %v2216_v23  ;;  %v2221_v7 = vmul.u32 14564, %v2217_v57  ;;  %v8030_v8 = vsel %vm1753_vm6, %v1736_v24, %v10834_v58  ;;  %v1802_v22 = vsel %vm1790_vm7, %v1765_v19, %v10835_v13  ;;  %v10842_v13 = vld [vmem:[#allocation179_spill] sm:$0xff] }
 0x37a   : > { %v2201_v10 = vadd.s32 %v2199_v39, %v2193_v49  ;;  %v2223_v44 = vshll.u32 %v2220_v56, 16  ;;  %v2203_v12 = vsel %vm2202_vm11, 1, %v6139_v62  ;;  %v2222_v28 = vmul.u32 58254, %v2217_v57  ;;  %v10838_v49 = vld [vmem:[#allocation161_spill] sm:$0xff] }
 0x37b   : > { %v2225_v31 = vshll.u32 %v2221_v7, 16  ;;  %v8036_v5 = vadd.s32 16, %v7900_v1  ;;  %v8040_v36 = vsel %vm1753_vm6, %v1735_v50, %v10836_v3  ;;  %v1839_v15 = vsel %vm1827_vm9, %v1802_v22, %v1483_v45  ;;  %v10840_v45 = vld [vmem:[#allocation169_spill] sm:$0xff] }
 0x37c   : > { %vm2227_vm12 = vc.u32 %v2219_v33, %v2223_v44  ;;  %v2229_v24 = vadd.s32 %v2223_v44, %v2219_v33  ;;  %v8045_v19 = vsel %vm1753_vm6, %v1749_v18, %v10837_v16  ;;  %v8049_v23 = vsel %vm1753_vm6, %v1739_v27, %v10838_v49  ;;  %v10839_v27 = vld [vmem:[#allocation163_spill] sm:$0xff]  ;;  %v10843_v16 = vld [vmem:[#allocation165_spill] sm:$0xff] }
 0x37d   : > { %v2228_v14 = vsel %vm2227_vm12, 1, %v6139_v62  ;;  %v2245_v4 = vand.u32 65535, %v8036_v5  ;;  %v2195_v50 = vshrl.u32 %v7930_v59, 16  ;;  %v2205_v39 = vadd.s32 %v2203_v12, %v2201_v10  ;;  %v10841_v59 = vld [vmem:[#allocation164_spill] sm:$0xff]  ;;  %v1485_v10 = vpop.permute.xlu0 %1484  ;;  %v10844_v49 = vld [vmem:[#allocation167_spill] sm:$0xff] }
 0x37e   : > { %v2230_v57 = vadd.s32 %v2228_v14, %v2222_v28  ;;  %vm2231_vm13 = vc.u32 %v2229_v24, %v2225_v31  ;;  %v2224_v9 = vshrl.u32 %v2220_v56, 16  ;;  %v2246_v18 = vshrl.u32 %v8036_v5, 16 }
 0x37f   : > { %v2232_v38 = vsel %vm2231_vm13, 1, %v6139_v62  ;;  %v8057_v61 = vmul.u32 58254, %v2245_v4  ;;  %v8062_v21 = vsel %vm1753_vm6, %v7934_v41, %v10839_v27  ;;  %v8067_v33 = vsel %vm1753_vm6, %v7938_v60, %v10840_v45  ;;  %v10848_v27 = vld [vmem:[#allocation172_spill] sm:$0xff] }
 0x380   : > { %5500 = vmatmul.msk.f32.gmra.mxu0 %vm1873_vm8, %v1839_v15  ;;  %v8072_v56 = vsel %vm1753_vm6, %v7942_v0, %v10841_v59  ;;  %v2234_v58 = vadd.s32 %v2232_v38, %v2230_v57  ;;  %v1803_v22 = vsel %vm1790_vm7, %v1766_v48, %v10842_v13  ;;  %v2248_v44 = vmul.u32 14564, %v2245_v4  ;;  %v10845_v4 = vld [vmem:[#allocation168_spill] sm:$0xff]  ;;  %v10847_v57 = vld [vmem:[#allocation171_spill] sm:$0xff]  ;;  %v10849_v13 = vld [vmem:[#allocation173_spill] sm:$0xff] }
 0x381   : > { %v8076_v12 = vmul.u32 14564, %v2246_v18  ;;  %v2252_v41 = vshll.u32 %v8057_v61, 16  ;;  %v2197_v28 = vshrl.u32 %v7950_v37, 16  ;;  %v2206_v31 = vadd.s32 %v2205_v39, %v2195_v50  ;;  %v10846_v50 = vld [vmem:[#allocation170_spill] sm:$0xff] }
 0x382   : > { %v2226_v60 = vshrl.u32 %v2221_v7, 16  ;;  %v2235_v3 = vadd.s32 %v2234_v58, %v2224_v9  ;;  %v2251_v15 = vmul.u32 58254, %v2246_v18  ;;  %v8084_v48 = vsel %vm1753_vm6, %v7946_v6, %v10843_v16 }
 0x383   : > { %v2254_v24 = vshll.u32 %v8076_v12, 16  ;;  %vm2256_vm14 = vc.u32 %v2248_v44, %v2252_v41  ;;  %v2258_v0 = vadd.s32 %v2252_v41, %v2248_v44  ;;  %v8089_v14 = vsel %vm1753_vm6, %v7955_v11, %v10844_v49  ;;  %v10851_v44 = vld [vmem:[#allocation178_spill] sm:$0xff]  ;;  %v1487_v41 = vpop.permute.xlu1 %1486 }
 0x384   : > { %v8094_v37 = vsel %vm1753_vm6, %v7959_v47, %v10845_v4  ;;  %v1840_v7 = vsel %vm1827_vm9, %v1803_v22, %v1485_v10  ;;  %v8100_v39 = vsel %vm1753_vm6, %v7963_v40, %v10846_v50  ;;  %v2257_v6 = vsel %vm2256_vm14, 1, %v6139_v62  ;;  %v10852_v4 = vld [vmem:[#allocation181_spill] sm:$0xff] }
 0x385   : > { %vm2260_vm15 = vc.u32 %v2258_v0, %v2254_v24  ;;  %v8105_v11 = vadd.s32 24, %v7900_v1  ;;  %v8110_v47 = vsel %vm1753_vm6, %v7969_v2, %v10847_v57  ;;  %v2207_v9 = vadd.s32 %v2206_v31, %v2197_v28  ;;  %v10850_v2 = vld [vmem:[#allocation177_spill] sm:$0xff] }
 0x386   : > { %v2236_v38 = vadd.s32 %v2235_v3, %v2226_v60  ;;  %v2259_v18 = vadd.s32 %v2257_v6, %v2251_v15  ;;  %v8115_v40 = vsel %vm1753_vm6, %v7973_v34, %v10848_v27  ;;  %v2261_v45 = vsel %vm2260_vm15, 1, %v6139_v62  ;;  %v10854_v6 = vld [vmem:[#allocation188_spill] sm:$0xff] }
 0x387   : > { %v2274_v59 = vand.u32 65535, %v8105_v11  ;;  %v2275_v58 = vshrl.u32 %v8105_v11, 16  ;;  %v8123_v22 = vsel %vm1753_vm6, %v7982_v20, %v10849_v13  ;;  %v1805_v10 = vsel %vm1790_vm7, %v7988_v55, %v10850_v2  ;;  %v10856_v13 = vld [vmem:[#allocation182_spill] sm:$0xff] }
 0x388   : > { %5501 = vmatmul.msk.f32.gmra.mxu0 %vm1873_vm8, %v1840_v7  ;;  %v1804_v34 = vsel %vm1790_vm7, %v8006_v54, %v10851_v44  ;;  %v10478_v3 = vmov 0.0   ;;  %v2208_v15 = vshrl.u32 %v2207_v9, 4  ;;  %v2237_v20 = vshrl.u32 %v2236_v38, 4 }
 0x389   : > { %v2277_v28 = vmul.u32 14564, %v2274_v59  ;;  %v2278_v31 = vmul.u32 58254, %v2274_v59  ;;  %v8131_v60 = vmul.u32 14564, %v2275_v58  ;;  %3555 = vst.msk [vmem:[#allocation2 + $0x10] sm:$0x7] %vm3554_vm0, %v10478_v3  ;;  %v2253_v24 = vshrl.u32 %v8057_v61, 16 }
 0x38a   : > { %v2263_v0 = vadd.s32 %v2261_v45, %v2259_v18  ;;  %3552 = vst.msk [vmem:[#allocation2] sm:$0xff] %vm1827_vm9, %v10478_v3  ;;  %v2280_v55 = vmul.u32 58254, %v2275_v58  ;;  %v8141_v49 = vadd.s32 32, %v7900_v1  ;;  %v8146_v7 = vsel %vm1790_vm7, %v7992_v17, %v10852_v4  ;;  %v10853_v61 = vld [vmem:[#allocation185_spill] sm:$0xff]  ;;  %v10855_v59 = vld [vmem:[#allocation180_spill] sm:$0xff] }
 0x38b   : > { %v2281_v16 = vshll.u32 %v2278_v31, 16  ;;  %v2283_v54 = vshll.u32 %v8131_v60, 16  ;;  %3553 = vst.msk [vmem:[#allocation2 + $0x8] sm:$0xff] %vm1827_vm9, %v10478_v3  ;;  %v8151_v50 = vsel %vm1790_vm7, %v7997_v29, %v10853_v61  ;;  %v8156_v57 = vsel %vm1790_vm7, %v8001_v42, %v10854_v6 }
 0x38c   : > { %v1841_v9 = vsel %vm1827_vm9, %v1804_v34, %v1487_v41  ;;  %3592 = vst.msk [vmem:[#allocation2 + $0x133] sm:$0xff] %vm1827_vm9, %v10478_v3  ;;  %v8164_v17 = vsel %vm1790_vm7, %v8014_v51, %v7466_v30  ;;  %v2303_v42 = vand.u32 65535, %v8141_v49  ;;  %v2209_v38 = vmul.u32 18, %v2208_v15 }
 0x38d   : > { %vm2285_vm1 = vc.u32 %v2277_v28, %v2281_v16  ;;  %v2287_v29 = vadd.s32 %v2281_v16, %v2277_v28  ;;  %3593 = vst.msk [vmem:[#allocation2 + $0x13b] sm:$0xff] %vm1827_vm9, %v10478_v3  ;;  %v2255_v18 = vshrl.u32 %v8076_v12, 16  ;;  %v2264_v27 = vadd.s32 %v2263_v0, %v2253_v24  ;;  %v1489_v28 = vpop.permute.xlu2 %1488  ;;  %v10857_v16 = vld [vmem:[#allocation183_spill] sm:$0xff] }
 0x38e   : > { %v2286_v45 = vsel %vm2285_vm1, 1, %v6139_v62  ;;  %v8175_v30 = vsel %vm1790_vm7, %v8018_v32, %v10855_v59  ;;  %v2238_v51 = vmul.u32 18, %v2237_v20  ;;  %v1806_v2 = vsel %vm1790_vm7, %v8022_v43, %v10856_v13 }
 0x38f   : > { %v2288_v58 = vadd.s32 %v2286_v45, %v2280_v55  ;;  %vm2289_vm3 = vc.u32 %v2287_v29, %v2283_v54  ;;  %v2304_v34 = vshrl.u32 %v8141_v49, 16  ;;  %v2307_v12 = vmul.u32 58254, %v2303_v42 }
 0x390   : > { %5502 = vmatmul.msk.f32.gmra.mxu0 %vm1873_vm8, %v1841_v9  ;;  %v2290_v44 = vsel %vm2289_vm3, 1, %v6139_v62  ;;  %v8185_v41 = vsel %vm1790_vm7, %v8026_v25, %v7473_v46  ;;  %v2282_v32 = vshrl.u32 %v2278_v31, 16  ;;  %v2306_v20 = vmul.u32 14564, %v2303_v42  ;;  %v10858_v31 = vld [vmem:[#allocation184_spill] sm:$0xff] }
 0x391   : > { %v2292_v15 = vadd.s32 %v2290_v44, %v2288_v58  ;;  %v8188_v24 = vsub.s32 %v7900_v1, %v2209_v38  ;;  %v2265_v0 = vadd.s32 %v2264_v27, %v2255_v18  ;;  %v8190_v55 = vmul.u32 14564, %v2304_v34  ;;  %v1491_v27 = vpop.permute.xlu0 %1490 }
 0x392   : > { %v2310_v43 = vshll.u32 %v2307_v12, 16  ;;  %v8195_v54 = vsel %vm1790_vm7, %v8030_v8, %v10857_v16  ;;  %v8198_v4 = vsub.s32 %v7978_v53, %v2238_v51  ;;  %v2309_v46 = vmul.u32 58254, %v2304_v34 }
 0x393   : > { %v8201_v25 = vadd.s32 40, %v7900_v1  ;;  %v8206_v61 = vsel %vm1790_vm7, %v8040_v36, %v10858_v31  ;;  %v1842_v6 = vsel %vm1827_vm9, %v1805_v10, %v1489_v28  ;;  %v2284_v9 = vshrl.u32 %v8131_v60, 16 }
 0x394   : > { %v2312_v29 = vshll.u32 %v8190_v55, 16  ;;  %v2293_v8 = vadd.s32 %v2292_v15, %v2282_v32  ;;  %vm2314_vm4 = vc.u32 %v2306_v20, %v2310_v43  ;;  %v2316_v53 = vadd.s32 %v2310_v43, %v2306_v20  ;;  %v10861_v32 = vld [vmem:[#allocation186_spill] sm:$0xff]  ;;  %v10862_v20 = vld [vmem:[#allocation187_spill] sm:$0xff] }
 0x395   : > { %v2332_v42 = vand.u32 65535, %v8201_v25  ;;  %v8216_v38 = vsel %vm1790_vm7, %v8045_v19, %v7484_v63  ;;  %vm3228_vm5 = vcmp.ne.s32.totalorder %v8188_v24, 0  ;;  %v2266_v36 = vshrl.u32 %v2265_v0, 4 }
 0x396   : > { %v2315_v10 = vsel %vm2314_vm4, 1, %v6139_v62  ;;  %vm3264_vm6 = vcmp.lt.s32.totalorder %v8188_v24, 0  ;;  %v3336_v60 = vadd.s32 18, %v8188_v24  ;;  %vm3229_vm10 = vcmp.ne.s32.totalorder %v8198_v4, 0 }
 0x397   : > { %v2317_v18 = vadd.s32 %v2315_v10, %v2309_v46  ;;  %v2311_v45 = vshrl.u32 %v2307_v12, 16  ;;  %vm2318_vm11 = vc.u32 %v2316_v53, %v2312_v29  ;;  %v2333_v59 = vshrl.u32 %v8201_v25, 16  ;;  %vm8230_vm13 = vmand %vm3264_vm6, %vm3228_vm5  ;;  %v1493_v46 = vpop.permute.xlu1 %1492 }
 0x398   : > { %5503 = vmatmul.msk.f32.gmra.mxu0 %vm1873_vm8, %v1842_v6  ;;  %v8224_v51 = vmul.u32 58254, %v2332_v42  ;;  %vm3265_vm12 = vcmp.lt.s32.totalorder %v8198_v4, 0  ;;  %v2294_v63 = vadd.s32 %v2293_v8, %v2284_v9  ;;  %v2319_v19 = vsel %vm2318_vm11, 1, %v6139_v62 }
 0x399   : > { %v2335_v58 = vmul.u32 14564, %v2332_v42  ;;  %v2267_v44 = vmul.u32 18, %v2266_v36  ;;  %v2321_v34 = vadd.s32 %v2319_v19, %v2317_v18  ;;  %v8234_v12 = vmul.u32 14564, %v2333_v59  ;;  %vm8263_vm15 = vmand %vm3265_vm12, %vm3229_vm10  ;;  %v10865_v36 = vld [vmem:[#allocation189_spill] sm:$0xff] }
 0x39a   : > { %v2339_v28 = vshll.u32 %v8224_v51, 16  ;;  %v8240_v15 = vsel %vm1790_vm7, %v8049_v23, %v10861_v32  ;;  %v8245_v0 = vsel %vm1790_vm7, %v8062_v21, %v10862_v20  ;;  %v1843_v43 = vsel %vm1827_vm9, %v1806_v2, %v1491_v27  ;;  %v4901_v27 = vld [vmem:[%s10475_s3 + $0x118] sm:$0xff] }
 0x39b   : > { %v8249_v16 = vadd.s32 48, %v7900_v1  ;;  %v8252_v31 = vadd.s32 18, %v8198_v4  ;;  %v2313_v6 = vshrl.u32 %v8190_v55, 16  ;;  %v2322_v9 = vadd.s32 %v2321_v34, %v2311_v45  ;;  %5276 = vmatpush.msra.mxu3 %v4901_v27 }
 0x39c   : > { %vm2343_vm14 = vc.u32 %v2335_v58, %v2339_v28  ;;  %v3372_v23 = vsel %vm8230_vm13, %v3336_v60, %v8188_v24  ;;  %v2295_v2 = vshrl.u32 %v2294_v63, 4  ;;  %v2341_v29 = vshll.u32 %v8234_v12, 16  ;;  %v8285_v60 = vld [vmem:[%s10474_s2] ss:$0 sm:$0xff] }
 0x39d   : > { %v2345_v55 = vadd.s32 %v2339_v28, %v2335_v58  ;;  %v8271_v8 = vsel %vm1790_vm7, %v8067_v33, %v7509_v26  ;;  %v8274_v53 = vsub.s32 %v8036_v5, %v2267_v44  ;;  %v2338_v24 = vmul.u32 58254, %v2333_v59  ;;  %v1495_v28 = vpop.permute.xlu2 %1494 }
 0x39e   : > { %v2361_v42 = vand.u32 65535, %v8249_v16  ;;  %v8280_v10 = vsel %vm1790_vm7, %v8072_v56, %v10865_v36  ;;  %v1844_v26 = vsel %vm1827_vm9, %v8175_v30, %v1493_v46  ;;  %v2344_v33 = vsel %vm2343_vm14, 1, %v6139_v62 }
 0x39f   : > { %v2362_v5 = vshrl.u32 %v8249_v16, 16  ;;  %vm8291_vm0 = vcmp.lt.s32.totalorder %v3372_v23, 16  ;;  %v3373_v56 = vsel %vm8263_vm15, %v8252_v31, %v8198_v4  ;;  %v2323_v45 = vadd.s32 %v2322_v9, %v2313_v6  ;;  %v4900_v4 = vld [vmem:[%s10475_s3 + $0x110] sm:$0xff]  ;;  %v4899_v6 = vld [vmem:[%s10475_s3 + $0x108] sm:$0xff] }
 0x3a0   : > { %5504 = vmatmul.msk.f32.gmra.mxu0 %vm1873_vm8, %v1843_v43  ;;  %v8302_v59 = vmul.u32 58254, %v2361_v42  ;;  %v2296_v30 = vmul.u32 18, %v2295_v2  ;;  %vm8304_vm1 = vc.u32 %v2345_v55, %v2341_v29  ;;  %v2364_v19 = vmul.u32 14564, %v2361_v42  ;;  %5277 = vmatpush.msra.mxu3 %v4900_v4 }
 0x3a1   : > { %v8308_v58 = vmul.u32 14564, %v2362_v5  ;;  %vm3230_vm3 = vcmp.ne.s32.totalorder %v8274_v53, 0  ;;  %vm3266_vm4 = vcmp.lt.s32.totalorder %v8274_v53, 0  ;;  %v2346_v44 = vadd.s32 %v2344_v33, %v2338_v24  ;;  %v10870_v24 = vld [vmem:[#allocation190_spill] sm:$0xff] }
 0x3a2   : > { %v2368_v34 = vshll.u32 %v8302_v59, 16  ;;  %v2367_v20 = vmul.u32 58254, %v2362_v5  ;;  %v8319_v46 = vadd.s32 56, %v7900_v1  ;;  %v2324_v31 = vshrl.u32 %v2323_v45, 4  ;;  %5278 = vmatpush.msra.mxu3 %v4899_v6  ;;  %vm8344_vm6 = vmand %vm3266_vm4, %vm3230_vm3 }
 0x3a3   : > { %v2370_v43 = vshll.u32 %v8308_v58, 16  ;;  %v2348_v9 = vsel %vm8304_vm1, 1, %v6139_v62  ;;  %v3338_v2 = vadd.s32 18, %v8274_v53  ;;  %v8330_v29 = vsub.s32 %v8105_v11, %v2296_v30  ;;  %v4898_v11 = vld [vmem:[%s10475_s3 + $0x100] sm:$0xff] }
 0x3a4   : > { %vm2372_vm5 = vc.u32 %v2364_v19, %v2368_v34  ;;  %v2374_v23 = vadd.s32 %v2368_v34, %v2364_v19  ;;  %v8336_v42 = vsel %vm1790_vm7, %v8084_v48, %v10870_v24  ;;  %v1845_v36 = vsel %vm1827_vm9, %v8146_v7, %v1495_v28  ;;  %5279 = vmatpush.msra.mxu3 %v4898_v11 }
 0x3a5   : > { %v2003_v13 = vpop.f32.mrf.mxu0  ;;  %v2373_v55 = vsel %vm2372_vm5, 1, %v6139_v62  ;;  %v2340_v33 = vshrl.u32 %v8224_v51, 16  ;;  %v2390_v48 = vand.u32 65535, %v8319_v46  ;;  %v2350_v7 = vadd.s32 %v2348_v9, %v2346_v44 }
 0x3a6   : > { %v2004_v32 = vadd.f32 %v8285_v60, %v2003_v13  ;;  %v2375_v27 = vadd.s32 %v2373_v55, %v2367_v20  ;;  %vm2376_vm10 = vc.u32 %v2374_v23, %v2370_v43  ;;  %vm8356_vm11 = vcmp.lt.s32.totalorder %v3373_v56, 16 }
 0x3a7   : > { %v2325_v30 = vmul.u32 18, %v2324_v31  ;;  %v2377_v63 = vsel %vm2376_vm10, 1, %v6139_v62  ;;  %v2391_v51 = vshrl.u32 %v8319_v46, 16  ;;  %v3374_v18 = vsel %vm8344_vm6, %v3338_v2, %v8274_v53  ;;  %v1497_v53 = vpop.permute.xlu0 %1496 }
 0x3a8   : > { %v2111_v21 = vmax.f32 %v2004_v32, 0.0  ;;  %5505 = vmatmul.msk.f32.gmra.mxu0 %vm1873_vm8, %v1844_v26  ;;  %vm3231_vm12 = vcmp.ne.s32.totalorder %v8330_v29, 0  ;;  %v2369_v19 = vshrl.u32 %v8302_v59, 16  ;;  %v2379_v13 = vadd.s32 %v2377_v63, %v2375_v27 }
 0x3a9   : > { %vm3267_vm13 = vcmp.lt.s32.totalorder %v8330_v29, 0  ;;  %v2393_v56 = vmul.u32 14564, %v2390_v48  ;;  %v2394_v44 = vmul.u32 58254, %v2390_v48  ;;  %v8368_v34 = vmul.u32 14564, %v2391_v51 }
 0x3aa   : > { %v3516_v5 = vsel %vm8291_vm0, %v2111_v21, 0.0  ;;  %v2342_v32 = vshrl.u32 %v8234_v12, 16  ;;  %v2351_v20 = vadd.s32 %v2350_v7, %v2340_v33  ;;  %v8373_v43 = vadd.s32 64, %v7900_v1  ;;  %vm8385_vm14 = vmand %vm3267_vm13, %vm3231_vm12  ;;  %v3633_v7 = vld [vmem:[#allocation2 + $0x9] sm:$0xff] }
 0x3ab   : > { %3556 = vst.msk [vmem:[#allocation2 + $0x13] sm:$0xff] %vm1827_vm9, %v3516_v5  ;;  %v3339_v31 = vadd.s32 18, %v8330_v29  ;;  %v8377_v59 = vsub.s32 %v8141_v49, %v2325_v30  ;;  %v2371_v6 = vshrl.u32 %v8308_v58, 16  ;;  %v2397_v9 = vshll.u32 %v2394_v44, 16  ;;  %v10877_v49 = vld [vmem:[#allocation191_spill] sm:$0xff] }
 0x3ac   : > { %v2380_v21 = vadd.s32 %v2379_v13, %v2369_v19  ;;  %v2396_v2 = vmul.u32 58254, %v2391_v51  ;;  %v2399_v55 = vshll.u32 %v8368_v34, 16  ;;  %v8393_v58 = vsel %vm1790_vm7, %v8089_v14, %v10877_v49  ;;  %v3632_v5 = vld [vmem:[#allocation2 + $0x1] sm:$0xff] }
 0x3ad   : > { %v2006_v4 = vpop.f32.mrf.mxu0  ;;  %vm2401_vm15 = vc.u32 %v2393_v56, %v2397_v9  ;;  %v2403_v24 = vadd.s32 %v2397_v9, %v2393_v56  ;;  %vm8398_vm0 = vcmp.lt.s32.totalorder %v3374_v18, 16  ;;  %v1846_v33 = vsel %vm1827_vm9, %v8206_v61, %v1497_v53 }
 0x3ae   : > { %v2007_v28 = vadd.f32 %v8285_v60, %v2006_v4  ;;  %v2352_v48 = vadd.s32 %v2351_v20, %v2342_v32  ;;  %v3375_v14 = vsel %vm8385_vm14, %v3339_v31, %v8330_v29  ;;  %v5583_v27 = vpack.i.bf16 %v3633_v7, %v3632_v5  ;;  %v1499_v32 = vpop.permute.xlu1 %1498 }
 0x3af   : > { %v2402_v45 = vsel %vm2401_vm15, 1, %v6139_v62  ;;  %vm2405_vm1 = vc.u32 %v2403_v24, %v2399_v55  ;;  %vm3232_vm3 = vcmp.ne.s32.totalorder %v8377_v59, 0  ;;  %v2381_v30 = vadd.s32 %v2380_v21, %v2371_v6 }
 0x3b0   : > { %v2112_v23 = vmax.f32 %v2007_v28, 0.0  ;;  %5506 = vmatmul.msk.f32.gmra.mxu0 %vm1873_vm8, %v1845_v36  ;;  %v2419_v36 = vand.u32 65535, %v8373_v43  ;;  %v2404_v63 = vadd.s32 %v2402_v45, %v2396_v2  ;;  %v2406_v51 = vsel %vm2405_vm1, 1, %v6139_v62  ;;  %5584 = vrot.lane.b32.xlu0 %v5583_v27, %s6138_s7 }
 0x3b1   : > { %v2398_v18 = vshrl.u32 %v2394_v44, 16  ;;  %v2420_v19 = vshrl.u32 %v8373_v43, 16  ;;  %vm3268_vm4 = vcmp.lt.s32.totalorder %v8377_v59, 0  ;;  %v2353_v56 = vshrl.u32 %v2352_v48, 4 }
 0x3b2   : > { %v3517_v26 = vsel %vm8356_vm11, %v2112_v23, 0.0  ;;  %v2422_v13 = vmul.u32 14564, %v2419_v36  ;;  %v2423_v4 = vmul.u32 58254, %v2419_v36  ;;  %v2408_v28 = vadd.s32 %v2406_v51, %v2404_v63  ;;  %v3634_v24 = vld [vmem:[#allocation2 + $0x11] sm:$0xff]  ;;  %vm8433_vm10 = vmand %vm3268_vm4, %vm3232_vm3 }
 0x3b3   : > { %3557 = vst.msk [vmem:[#allocation2 + $0x1b] sm:$0xff] %vm1827_vm9, %v3517_v26  ;;  %v2400_v20 = vshrl.u32 %v8368_v34, 16  ;;  %v2424_v53 = vmul.u32 14564, %v2420_v19  ;;  %v2425_v31 = vmul.u32 58254, %v2420_v19  ;;  %v3340_v44 = vadd.s32 18, %v8377_v59  ;;  %v1501_v19 = vpop.permute.xlu2 %1500 }
 0x3b4   : > { %v2426_v6 = vshll.u32 %v2423_v4, 16  ;;  %v2382_v23 = vshrl.u32 %v2381_v30, 4  ;;  %v8419_v12 = vadd.s32 72, %v7900_v1  ;;  %v2409_v21 = vadd.s32 %v2408_v28, %v2398_v18 }
 0x3b5   : > { %v2009_v61 = vpop.f32.mrf.mxu0  ;;  %v2428_v2 = vshll.u32 %v2424_v53, 16  ;;  %vm8423_vm6 = vcmp.lt.s32.totalorder %v3375_v14, 16  ;;  %v1847_v26 = vsel %vm1827_vm9, %v8195_v54, %v1499_v32  ;;  %v2354_v5 = vmul.u32 18, %v2353_v56 }
 0x3b6   : > { %v2010_v29 = vadd.f32 %v8285_v60, %v2009_v61  ;;  %vm2430_vm5 = vc.u32 %v2422_v13, %v2426_v6  ;;  %v2432_v55 = vadd.s32 %v2426_v6, %v2422_v13  ;;  %v2410_v7 = vadd.s32 %v2409_v21, %v2400_v20  ;;  %v1503_v13 = vpop.permute.xlu0 %1502 }
 0x3b7   : > { %v2431_v11 = vsel %vm2430_vm5, 1, %v6139_v62  ;;  %v2427_v27 = vshrl.u32 %v2423_v4, 16  ;;  %v2448_v54 = vand.u32 65535, %v8419_v12  ;;  %v2449_v45 = vshrl.u32 %v8419_v12, 16 }
 0x3b8   : > { %v2113_v9 = vmax.f32 %v2010_v29, 0.0  ;;  %5507 = vmatmul.msk.f32.gmra.mxu0 %vm1873_vm8, %v1846_v33  ;;  %v2433_v14 = vadd.s32 %v2431_v11, %v2425_v31  ;;  %vm2434_vm11 = vc.u32 %v2432_v55, %v2428_v2  ;;  %v3376_v63 = vsel %vm8433_vm10, %v3340_v44, %v8377_v59 }
 0x3b9   : > { %v2383_v51 = vmul.u32 18, %v2382_v23  ;;  %v2411_v61 = vshrl.u32 %v2410_v7, 4  ;;  %v2435_v18 = vsel %vm2434_vm11, 1, %v6139_v62  ;;  %v2451_v56 = vmul.u32 14564, %v2448_v54 }
 0x3ba   : > { %v3518_v49 = vsel %vm8398_vm0, %v2113_v9, 0.0  ;;  %v3635_v36 = vld [vmem:[#allocation2 + $0x19] sm:$0xff]  ;;  %v2437_v29 = vadd.s32 %v2435_v18, %v2433_v14  ;;  %v2452_v28 = vmul.u32 58254, %v2448_v54  ;;  %v8448_v32 = vsub.s32 %v8201_v25, %v2354_v5 }
 0x3bb   : > { %3558 = vst.msk [vmem:[#allocation2 + $0x23] sm:$0xff] %vm1827_vm9, %v3518_v49  ;;  %v5588_v48 = vpack.i.bf16 %v3635_v36, %v3634_v24  ;;  %v2429_v20 = vshrl.u32 %v2424_v53, 16  ;;  %v8450_v31 = vmul.u32 14564, %v2449_v45  ;;  %v8453_v6 = vadd.s32 80, %v7900_v1 }
 0x3bc   : > { %v2438_v9 = vadd.s32 %v2437_v29, %v2427_v27  ;;  %v2454_v44 = vmul.u32 58254, %v2449_v45  ;;  %v2455_v23 = vshll.u32 %v2452_v28, 16  ;;  %v1848_v21 = vsel %vm1827_vm9, %v8151_v50, %v1501_v19 }
 0x3bd   : > { %v2012_v30 = vpop.f32.mrf.mxu0  ;;  %5589 = vrot.lane.b32.xlu1 %v5588_v48, %s6138_s7  ;;  %v8460_v2 = vsel %vm1827_vm9, %v8245_v0, %v1503_v13  ;;  %v8463_v25 = vsub.s32 %v8249_v16, %v2383_v51  ;;  %v2477_v53 = vand.u32 65535, %v8453_v6  ;;  %v2412_v49 = vmul.u32 18, %v2411_v61 }
 0x3be   : > { %v2013_v4 = vadd.f32 %v8285_v60, %v2012_v30  ;;  %v2457_v24 = vshll.u32 %v8450_v31, 16  ;;  %vm2459_vm12 = vc.u32 %v2451_v56, %v2455_v23  ;;  %vm8470_vm13 = vcmp.lt.s32.totalorder %v3376_v63, 16 }
 0x3bf   : > { %vm3233_vm14 = vcmp.ne.s32.totalorder %v8448_v32, 0  ;;  %v2439_v0 = vadd.s32 %v2438_v9, %v2429_v20  ;;  %v2460_v16 = vsel %vm2459_vm12, 1, %v6139_v62  ;;  %vm3269_vm15 = vcmp.lt.s32.totalorder %v8448_v32, 0 }
 0x3c0   : > { %v2114_v59 = vmax.f32 %v2013_v4, 0.0  ;;  %5508 = vmatmul.msk.f32.gmra.mxu0 %vm1873_vm8, %v1847_v26  ;;  %v3341_v34 = vadd.s32 18, %v8448_v32  ;;  %v2461_v36 = vadd.s32 %v2455_v23, %v2451_v56  ;;  %v2462_v26 = vadd.s32 %v2460_v16, %v2454_v44  ;;  %vm8486_vm3 = vmand %vm3269_vm15, %vm3233_vm14 }
 0x3c1   : > { %vm3234_vm0 = vcmp.ne.s32.totalorder %v8463_v25, 0  ;;  %v2478_v11 = vshrl.u32 %v8453_v6, 16  ;;  %v2480_v48 = vmul.u32 14564, %v2477_v53  ;;  %v2481_v5 = vmul.u32 58254, %v2477_v53 }
 0x3c2   : > { %v3519_v55 = vsel %vm8423_vm6, %v2114_v59, 0.0  ;;  %v8482_v14 = vsub.s32 %v8319_v46, %v2412_v49  ;;  %v2456_v27 = vshrl.u32 %v2452_v28, 16  ;;  %vm2463_vm1 = vc.u32 %v2461_v36, %v2457_v24  ;;  %v3636_v59 = vld [vmem:[#allocation2 + $0x21] sm:$0xff] }
 0x3c3   : > { %3559 = vst.msk [vmem:[#allocation2 + $0x2b] sm:$0xff] %vm1827_vm9, %v3519_v55  ;;  %v2440_v45 = vshrl.u32 %v2439_v0, 4  ;;  %v2464_v30 = vsel %vm2463_vm1, 1, %v6139_v62  ;;  %v8491_v63 = vmul.u32 14564, %v2478_v11  ;;  %v2484_v51 = vshll.u32 %v2481_v5, 16 }
 0x3c4   : > { %v2458_v46 = vshrl.u32 %v8450_v31, 16  ;;  %v2466_v18 = vadd.s32 %v2464_v30, %v2462_v26  ;;  %v2483_v19 = vmul.u32 58254, %v2478_v11  ;;  %v8497_v29 = vadd.s32 88, %v7900_v1 }
 0x3c5   : > { %v2015_v33 = vpop.f32.mrf.mxu0  ;;  %v2486_v13 = vshll.u32 %v8491_v63, 16  ;;  %vm2488_vm4 = vc.u32 %v2480_v48, %v2484_v51  ;;  %v2490_v4 = vadd.s32 %v2484_v51, %v2480_v48  ;;  %v3377_v20 = vsel %vm8486_vm3, %v3341_v34, %v8448_v32  ;;  %v1505_v51 = vpop.permute.xlu1 %1504 }
 0x3c6   : > { %v2016_v7 = vadd.f32 %v8285_v60, %v2015_v33  ;;  %vm3270_vm5 = vcmp.lt.s32.totalorder %v8463_v25, 0  ;;  %v3342_v31 = vadd.s32 18, %v8463_v25  ;;  %vm3235_vm6 = vcmp.ne.s32.totalorder %v8482_v14, 0 }
 0x3c7   : > { %v2467_v23 = vadd.s32 %v2466_v18, %v2456_v27  ;;  %vm3271_vm10 = vcmp.lt.s32.totalorder %v8482_v14, 0  ;;  %v2441_v53 = vmul.u32 18, %v2440_v45  ;;  %vm2492_vm11 = vc.u32 %v2490_v4, %v2486_v13 }
 0x3c8   : > { %v2115_v61 = vmax.f32 %v2016_v7, 0.0  ;;  %5509 = vmatmul.msk.f32.gmra.mxu0 %vm1873_vm8, %v1848_v21  ;;  %v2489_v21 = vsel %vm2488_vm4, 1, %v6139_v62  ;;  %v2485_v24 = vshrl.u32 %v2481_v5, 16  ;;  %v2493_v50 = vsel %vm2492_vm11, 1, %v6139_v62  ;;  %vm8545_vm14 = vmand %vm3271_vm10, %vm3235_vm6 }
 0x3c9   : > { %v2491_v32 = vadd.s32 %v2489_v21, %v2483_v19  ;;  %v2468_v49 = vadd.s32 %v2467_v23, %v2458_v46  ;;  %v2506_v0 = vand.u32 65535, %v8497_v29  ;;  %v2507_v36 = vshrl.u32 %v8497_v29, 16 }
 0x3ca   : > { %v3520_v56 = vsel %vm8470_vm13, %v2115_v61, 0.0  ;;  %v3816_v28 = vld [vmem:[#allocation2 + $0x26] sm:$0xff]  ;;  %v8517_v26 = vadd.s32 96, %v7900_v1  ;;  %vm8519_vm12 = vcmp.lt.s32.totalorder %v3377_v20, 16  ;;  %vm8527_vm13 = vmand %vm3270_vm5, %vm3234_vm0  ;;  %v3343_v54 = vadd.s32 18, %v8482_v14 }
 0x3cb   : > { %v3637_v9 = vld [vmem:[#allocation2 + $0x29] sm:$0xff]  ;;  %3560 = vst.msk [vmem:[#allocation2 + $0x33] sm:$0xff] %vm1827_vm9, %v3520_v56  ;;  %5525 = vmatmul.msk.f32.vlgmr.msra.gmra.mxu3 %vm1827_vm9, %v3816_v28  ;;  %v2495_v34 = vadd.s32 %v2493_v50, %v2491_v32  ;;  %v2469_v48 = vshrl.u32 %v2468_v49, 4  ;;  %v2509_v5 = vmul.u32 14564, %v2506_v0  ;;  %v8531_v7 = vmul.u32 58254, %v2506_v0 }
 0x3cc   : > { %v5593_v44 = vpack.i.bf16 %v3637_v9, %v3636_v59  ;;  %v8537_v45 = vsub.s32 %v8373_v43, %v2441_v53  ;;  %v8539_v30 = vmul.u32 14564, %v2507_v36  ;;  %v2487_v46 = vshrl.u32 %v8491_v63, 16  ;;  %v10894_v9 = vld [vmem:[#allocation192_spill] sm:$0xff] }
 0x3cd   : > { %v2018_v55 = vpop.f32.mrf.mxu0  ;;  %v2496_v18 = vadd.s32 %v2495_v34, %v2485_v24  ;;  %v2513_v19 = vshll.u32 %v8531_v7, 16  ;;  %v3378_v4 = vsel %vm8527_vm13, %v3342_v31, %v8463_v25  ;;  %v2535_v28 = vand.u32 65535, %v8517_v26  ;;  %v1507_v24 = vpop.permute.xlu2 %1506 }
 0x3ce   : > { %5594 = vrot.lane.b32.xlu2 %v5593_v44, %s6138_s7  ;;  %v2019_v16 = vadd.f32 %v8285_v60, %v2018_v55  ;;  %v2515_v56 = vshll.u32 %v8539_v30, 16  ;;  %v2470_v63 = vmul.u32 18, %v2469_v48  ;;  %v2536_v59 = vshrl.u32 %v8517_v26, 16 }
 0x3cf   : > { %vm2517_vm15 = vc.u32 %v2509_v5, %v2513_v19  ;;  %v2519_v20 = vadd.s32 %v2513_v19, %v2509_v5  ;;  %v8564_v44 = vsel %vm1790_vm7, %v8094_v37, %v10894_v9  ;;  %v1850_v25 = vsel %vm1827_vm9, %v8240_v15, %v1505_v51 }
 0x3d0   : > { %v2116_v27 = vmax.f32 %v2019_v16, 0.0  ;;  %5510 = vmatmul.msk.f32.gmra.mxu0 %vm1873_vm8, %v8460_v2  ;;  %v2512_v2 = vmul.u32 58254, %v2507_v36  ;;  %v3379_v31 = vsel %vm8545_vm14, %v3343_v54, %v8482_v14  ;;  %v2518_v23 = vsel %vm2517_vm15, 1, %v6139_v62 }
 0x3d1   : > { %vm8572_vm0 = vcmp.lt.s32.totalorder %v3378_v4, 16  ;;  %vm3236_vm1 = vcmp.ne.s32.totalorder %v8537_v45, 0  ;;  %v2497_v32 = vadd.s32 %v2496_v18, %v2487_v46  ;;  %v2514_v49 = vshrl.u32 %v8531_v7, 16 }
 0x3d2   : > { %v3521_v43 = vsel %vm8519_vm12, %v2116_v27, 0.0  ;;  %v3817_v13 = vld [vmem:[#allocation2 + $0x2e] sm:$0xff]  ;;  %v2520_v55 = vadd.s32 %v2518_v23, %v2512_v2  ;;  %vm2521_vm3 = vc.u32 %v2519_v20, %v2515_v56  ;;  %v8579_v15 = vmul.u32 58254, %v2535_v28 }
 0x3d3   : > { %3561 = vst.msk [vmem:[#allocation2 + $0x3b] sm:$0xff] %vm1827_vm9, %v3521_v43  ;;  %5526 = vmatmul.msk.f32.gmra.mxu3 %vm1827_vm9, %v3817_v13  ;;  %vm8581_vm4 = vcmp.lt.s32.totalorder %v3379_v31, 16  ;;  %v8586_v50 = vsub.s32 %v8419_v12, %v2470_v63  ;;  %v2522_v0 = vsel %vm2521_vm3, 1, %v6139_v62  ;;  %v2538_v16 = vmul.u32 14564, %v2535_v28  ;;  %v3638_v51 = vld [vmem:[#allocation2 + $0x31] sm:$0xff] }
 0x3d4   : > { %v8589_v34 = vmul.u32 14564, %v2536_v59  ;;  %vm3272_vm5 = vcmp.lt.s32.totalorder %v8537_v45, 0  ;;  %v8594_v33 = vadd.s32 18, %v8537_v45  ;;  %v2524_v11 = vadd.s32 %v2522_v0, %v2520_v55 }
 0x3d5   : > { %v2021_v21 = vpop.f32.mrf.mxu0  ;;  %v2516_v48 = vshrl.u32 %v8539_v30, 16  ;;  %v2541_v5 = vmul.u32 58254, %v2536_v59  ;;  %v2542_v12 = vshll.u32 %v8579_v15, 16  ;;  %v8599_v7 = vadd.s32 104, %v7900_v1  ;;  %vm8620_vm12 = vmand %vm3272_vm5, %vm3236_vm1 }
 0x3d6   : > { %v2022_v37 = vadd.f32 %v8285_v60, %v2021_v21  ;;  %v1851_v46 = vsel %vm1827_vm9, %v8156_v57, %v1507_v24  ;;  %v2498_v18 = vshrl.u32 %v2497_v32, 4  ;;  %v2544_v2 = vshll.u32 %v8589_v34, 16  ;;  %v1511_v24 = vpop.permute.xlu1 %1510 }
 0x3d7   : > { %vm3237_vm6 = vcmp.ne.s32.totalorder %v8586_v50, 0  ;;  %v2525_v19 = vadd.s32 %v2524_v11, %v2514_v49  ;;  %vm2546_vm10 = vc.u32 %v2538_v16, %v2542_v12  ;;  %vm3273_vm11 = vcmp.lt.s32.totalorder %v8586_v50, 0 }
 0x3d8   : > { %v2117_v36 = vmax.f32 %v2022_v37, 0.0  ;;  %5511 = vmatmul.msk.f32.gmra.mxu0 %vm1873_vm8, %v1850_v25  ;;  %v3345_v43 = vadd.s32 18, %v8586_v50  ;;  %v2547_v13 = vsel %vm2546_vm10, 1, %v6139_v62  ;;  %v2548_v4 = vadd.s32 %v2542_v12, %v2538_v16  ;;  %vm8640_vm14 = vmand %vm3273_vm11, %vm3237_vm6 }
 0x3d9   : > { %v2526_v56 = vadd.s32 %v2525_v19, %v2516_v48  ;;  %v2543_v28 = vshrl.u32 %v8579_v15, 16  ;;  %v2549_v63 = vadd.s32 %v2547_v13, %v2541_v5  ;;  %v2564_v20 = vand.u32 65535, %v8599_v7  ;;  %v1509_v5 = vpop.permute.xlu0 %1508 }
 0x3da   : > { %v3522_v27 = vsel %vm8572_vm0, %v2117_v36, 0.0  ;;  %v3818_v54 = vld [vmem:[#allocation2 + $0x36] sm:$0xff]  ;;  %vm2550_vm13 = vc.u32 %v2548_v4, %v2544_v2  ;;  %v2565_v25 = vshrl.u32 %v8599_v7, 16  ;;  %v8626_v31 = vadd.s32 112, %v7900_v1 }
 0x3db   : > { %v3639_v61 = vld [vmem:[#allocation2 + $0x39] sm:$0xff]  ;;  %3562 = vst.msk [vmem:[#allocation2 + $0x43] sm:$0xff] %vm1827_vm9, %v3522_v27  ;;  %5527 = vmatmul.msk.f32.gmra.mxu3 %vm1827_vm9, %v3818_v54  ;;  %v2499_v23 = vmul.u32 18, %v2498_v18  ;;  %v2551_v21 = vsel %vm2550_vm13, 1, %v6139_v62  ;;  %v2567_v53 = vmul.u32 14564, %v2564_v20  ;;  %v2568_v32 = vmul.u32 58254, %v2564_v20 }
 0x3dc   : > { %v5598_v30 = vpack.i.bf16 %v3639_v61, %v3638_v51  ;;  %v2527_v37 = vshrl.u32 %v2526_v56, 4  ;;  %v2553_v49 = vadd.s32 %v2551_v21, %v2549_v63  ;;  %v8630_v15 = vmul.u32 14564, %v2565_v25 }
 0x3dd   : > { %v2024_v57 = vpop.f32.mrf.mxu0  ;;  %v3380_v0 = vsel %vm8620_vm12, %v8594_v33, %v8537_v45  ;;  %v2545_v36 = vshrl.u32 %v8589_v34, 16  ;;  %v2570_v11 = vmul.u32 58254, %v2565_v25  ;;  %v2571_v48 = vshll.u32 %v2568_v32, 16 }
 0x3de   : > { %5599 = vrot.lane.b32.xlu0 %v5598_v30, %s6138_s7  ;;  %v2025_v59 = vadd.f32 %v8285_v60, %v2024_v57  ;;  %v2554_v54 = vadd.s32 %v2553_v49, %v2543_v28  ;;  %v2573_v45 = vshll.u32 %v8630_v15, 16  ;;  %v2593_v33 = vand.u32 65535, %v8626_v31 }
 0x3df   : > { %v8652_v51 = vsub.s32 %v8453_v6, %v2499_v23  ;;  %vm2575_vm15 = vc.u32 %v2567_v53, %v2571_v48  ;;  %v2577_v34 = vadd.s32 %v2571_v48, %v2567_v53  ;;  %v2594_v61 = vshrl.u32 %v8626_v31, 16 }
 0x3e0   : > { %v2118_v55 = vmax.f32 %v2025_v59, 0.0  ;;  %5512 = vmatmul.msk.f32.gmra.mxu0 %vm1873_vm8, %v1851_v46  ;;  %v1853_v14 = vsel %vm1827_vm9, %v8280_v10, %v1511_v24  ;;  %v3381_v46 = vsel %vm8640_vm14, %v3345_v43, %v8586_v50  ;;  %v2528_v18 = vmul.u32 18, %v2527_v37 }
 0x3e1   : > { %v2576_v2 = vsel %vm2575_vm15, 1, %v6139_v62  ;;  %v1852_v30 = vsel %vm1827_vm9, %v8336_v42, %v1509_v5  ;;  %vm8663_vm0 = vcmp.lt.s32.totalorder %v3380_v0, 16  ;;  %v2555_v13 = vadd.s32 %v2554_v54, %v2545_v36 }
 0x3e2   : > { %v3523_v12 = vsel %vm8581_vm4, %v2118_v55, 0.0  ;;  %v3819_v27 = vld [vmem:[#allocation2 + $0x3e] sm:$0xff]  ;;  %v2578_v4 = vadd.s32 %v2576_v2, %v2570_v11  ;;  %v2572_v10 = vshrl.u32 %v2568_v32, 16  ;;  %vm2579_vm1 = vc.u32 %v2577_v34, %v2573_v45 }
 0x3e3   : > { %3563 = vst.msk [vmem:[#allocation2 + $0x4b] sm:$0xff] %vm1827_vm9, %v3523_v12  ;;  %5528 = vmatmul.msk.f32.gmra.mxu3 %vm1827_vm9, %v3819_v27  ;;  %v2597_v56 = vmul.u32 58254, %v2593_v33  ;;  %vm8668_vm3 = vcmp.lt.s32.totalorder %v3381_v46, 16  ;;  %vm3238_vm4 = vcmp.ne.s32.totalorder %v8652_v51, 0  ;;  %v2580_v42 = vsel %vm2579_vm1, 1, %v6139_v62  ;;  %v3640_v37 = vld [vmem:[#allocation2 + $0x41] sm:$0xff]  ;;  %v1513_v46 = vpop.permute.xlu2 %1512 }
 0x3e4   : > { %v2596_v43 = vmul.u32 14564, %v2593_v33  ;;  %v8674_v28 = vmul.u32 14564, %v2594_v61  ;;  %v8678_v20 = vsub.s32 %v8497_v29, %v2528_v18  ;;  %v2574_v59 = vshrl.u32 %v8630_v15, 16 }
 0x3e5   : > { %v2027_v19 = vpop.f32.mrf.mxu0  ;;  %v2582_v9 = vadd.s32 %v2580_v42, %v2578_v4  ;;  %v2556_v25 = vshrl.u32 %v2555_v13, 4  ;;  %v2600_v23 = vshll.u32 %v2597_v56, 16  ;;  %v8683_v53 = vadd.s32 120, %v7900_v1 }
 0x3e6   : > { %v2028_v57 = vadd.f32 %v8285_v60, %v2027_v19  ;;  %v2602_v21 = vshll.u32 %v8674_v28, 16  ;;  %vm3274_vm5 = vcmp.lt.s32.totalorder %v8652_v51, 0  ;;  %v2599_v24 = vmul.u32 58254, %v2594_v61 }
 0x3e7   : > { %v2583_v29 = vadd.s32 %v2582_v9, %v2572_v10  ;;  %vm2604_vm6 = vc.u32 %v2596_v43, %v2600_v23  ;;  %v2606_v0 = vadd.s32 %v2600_v23, %v2596_v43  ;;  %v2622_v16 = vand.u32 65535, %v8683_v53  ;;  %vm8702_vm13 = vmand %vm3274_vm5, %vm3238_vm4 }
 0x3e8   : > { %v2119_v63 = vmax.f32 %v2028_v57, 0.0  ;;  %5513 = vmatmul.msk.f32.gmra.mxu0 %vm1873_vm8, %v1852_v30  ;;  %v3346_v36 = vadd.s32 18, %v8652_v51  ;;  %vm3239_vm10 = vcmp.ne.s32.totalorder %v8678_v20, 0  ;;  %vm3275_vm11 = vcmp.lt.s32.totalorder %v8678_v20, 0 }
 0x3e9   : > { %v2584_v11 = vadd.s32 %v2583_v29, %v2574_v59  ;;  %v2557_v5 = vmul.u32 18, %v2556_v25  ;;  %v2605_v12 = vsel %vm2604_vm6, 1, %v6139_v62  ;;  %vm2608_vm12 = vc.u32 %v2606_v0, %v2602_v21  ;;  %vm8721_vm14 = vmand %vm3275_vm11, %vm3239_vm10 }
 0x3ea   : > { %v3524_v32 = vsel %vm8663_vm0, %v2119_v63, 0.0  ;;  %v3820_v55 = vld [vmem:[#allocation2 + $0x46] sm:$0xff]  ;;  %v2623_v27 = vshrl.u32 %v8683_v53, 16  ;;  %v8707_v33 = vadd.s32 18, %v8678_v20  ;;  %v2601_v34 = vshrl.u32 %v2597_v56, 16 }
 0x3eb   : > { %v3641_v49 = vld [vmem:[#allocation2 + $0x49] sm:$0xff]  ;;  %3564 = vst.msk [vmem:[#allocation2 + $0x53] sm:$0xff] %vm1827_vm9, %v3524_v32  ;;  %5529 = vmatmul.msk.f32.gmra.mxu3 %vm1827_vm9, %v3820_v55  ;;  %v2607_v61 = vadd.s32 %v2605_v12, %v2599_v24  ;;  %v2603_v18 = vshrl.u32 %v8674_v28, 16  ;;  %v2609_v2 = vsel %vm2608_vm12, 1, %v6139_v62  ;;  %v2625_v30 = vmul.u32 14564, %v2622_v16 }
 0x3ec   : > { %v5603_v15 = vpack.i.bf16 %v3641_v49, %v3640_v37  ;;  %v2626_v19 = vmul.u32 58254, %v2622_v16  ;;  %v2585_v13 = vshrl.u32 %v2584_v11, 4  ;;  %v8712_v57 = vmul.u32 14564, %v2623_v27 }
 0x3ed   : > { %v2030_v48 = vpop.f32.mrf.mxu0  ;;  %v2611_v4 = vadd.s32 %v2609_v2, %v2607_v61  ;;  %v3382_v10 = vsel %vm8702_vm13, %v3346_v36, %v8652_v51  ;;  %v8726_v42 = vsub.s32 %v8517_v26, %v2557_v5  ;;  %v8729_v43 = vadd.s32 128, %v7900_v1 }
 0x3ee   : > { %5604 = vrot.lane.b32.xlu1 %v5603_v15, %s6138_s7  ;;  %v2031_v54 = vadd.f32 %v8285_v60, %v2030_v48  ;;  %v1854_v28 = vsel %vm1827_vm9, %v8164_v17, %v1513_v46  ;;  %v2628_v9 = vmul.u32 58254, %v2623_v27  ;;  %v2631_v26 = vshll.u32 %v8712_v57, 16  ;;  %v1515_v27 = vpop.permute.xlu0 %1514 }
 0x3ef   : > { %v2612_v59 = vadd.s32 %v2611_v4, %v2601_v34  ;;  %v2651_v23 = vand.u32 65535, %v8729_v43  ;;  %vm8739_vm0 = vcmp.lt.s32.totalorder %v3382_v10, 16  ;;  %v3383_v17 = vsel %vm8721_vm14, %v8707_v33, %v8678_v20  ;;  %v10915_v10 = vld [vmem:[#allocation194_spill] sm:$0xff] }
 0x3f0   : > { %v2120_v6 = vmax.f32 %v2031_v54, 0.0  ;;  %5514 = vmatmul.msk.f32.gmra.mxu0 %vm1873_vm8, %v1853_v14  ;;  %v2629_v14 = vshll.u32 %v2626_v19, 16  ;;  %v2586_v50 = vmul.u32 18, %v2585_v13  ;;  %vm3240_vm1 = vcmp.ne.s32.totalorder %v8726_v42, 0 }
 0x3f1   : > { %v2613_v32 = vadd.s32 %v2612_v59, %v2603_v18  ;;  %v2652_v49 = vshrl.u32 %v8729_v43, 16  ;;  %v2630_v15 = vshrl.u32 %v2626_v19, 16  ;;  %vm3276_vm4 = vcmp.lt.s32.totalorder %v8726_v42, 0  ;;  %v1517_v59 = vpop.permute.xlu1 %1516 }
 0x3f2   : > { %v3525_v51 = vsel %vm8668_vm3, %v2120_v6, 0.0  ;;  %v3821_v63 = vld [vmem:[#allocation2 + $0x4e] sm:$0xff]  ;;  %vm2633_vm15 = vc.u32 %v2625_v30, %v2629_v14  ;;  %v2635_v25 = vadd.s32 %v2629_v14, %v2625_v30  ;;  %v2654_v20 = vmul.u32 14564, %v2651_v23  ;;  %vm8775_vm5 = vmand %vm3276_vm4, %vm3240_vm1 }
 0x3f3   : > { %3565 = vst.msk [vmem:[#allocation2 + $0x5b] sm:$0xff] %vm1827_vm9, %v3525_v51  ;;  %5530 = vmatmul.msk.f32.gmra.mxu3 %vm1827_vm9, %v3821_v63  ;;  %v2634_v37 = vsel %vm2633_vm15, 1, %v6139_v62  ;;  %v2614_v24 = vshrl.u32 %v2613_v32, 4  ;;  %v8753_v36 = vmul.u32 58254, %v2651_v23  ;;  %v8757_v48 = vsub.s32 %v8599_v7, %v2586_v50  ;;  %v3642_v18 = vld [vmem:[#allocation2 + $0x51] sm:$0xff] }
 0x3f4   : > { %vm2637_vm3 = vc.u32 %v2635_v25, %v2631_v26  ;;  %v2636_v0 = vadd.s32 %v2634_v37, %v2628_v9  ;;  %v8759_v12 = vmul.u32 14564, %v2652_v49  ;;  %v3348_v54 = vadd.s32 18, %v8726_v42 }
 0x3f5   : > { %v2033_v55 = vpop.f32.mrf.mxu0  ;;  %v2638_v16 = vsel %vm2637_vm3, 1, %v6139_v62  ;;  %v2632_v45 = vshrl.u32 %v8712_v57, 16  ;;  %v2658_v33 = vshll.u32 %v8753_v36, 16  ;;  %v8765_v34 = vadd.s32 136, %v7900_v1 }
 0x3f6   : > { %v2034_v29 = vadd.f32 %v8285_v60, %v2033_v55  ;;  %v2640_v5 = vadd.s32 %v2638_v16, %v2636_v0  ;;  %v2615_v2 = vmul.u32 18, %v2614_v24  ;;  %v2657_v19 = vmul.u32 58254, %v2652_v49 }
 0x3f7   : > { %v2660_v4 = vshll.u32 %v8759_v12, 16  ;;  %vm2662_vm6 = vc.u32 %v2654_v20, %v2658_v33  ;;  %v2664_v57 = vadd.s32 %v2658_v33, %v2654_v20  ;;  %v8783_v56 = vsel %vm1790_vm7, %v8100_v39, %v10915_v10 }
 0x3f8   : > { %v2121_v11 = vmax.f32 %v2034_v29, 0.0  ;;  %5515 = vmatmul.msk.f32.gmra.mxu0 %vm1873_vm8, %v1854_v28  ;;  %v2641_v30 = vadd.s32 %v2640_v5, %v2630_v15  ;;  %v1855_v14 = vsel %vm1827_vm9, %v8564_v44, %v1515_v27  ;;  %vm8787_vm10 = vcmp.lt.s32.totalorder %v3383_v17, 16  ;;  %v1519_v28 = vpop.permute.xlu2 %1518 }
 0x3f9   : > { %vm3241_vm11 = vcmp.ne.s32.totalorder %v8757_v48, 0  ;;  %vm3277_vm12 = vcmp.lt.s32.totalorder %v8757_v48, 0  ;;  %v2663_v63 = vsel %vm2662_vm6, 1, %v6139_v62  ;;  %vm2666_vm13 = vc.u32 %v2664_v57, %v2660_v4 }
 0x3fa   : > { %v3526_v61 = vsel %vm8739_vm0, %v2121_v11, 0.0  ;;  %v3822_v46 = vld [vmem:[#allocation2 + $0x56] sm:$0xff]  ;;  %v2680_v39 = vand.u32 65535, %v8765_v34  ;;  %v3384_v44 = vsel %vm8775_vm5, %v3348_v54, %v8726_v42  ;;  %v2642_v26 = vadd.s32 %v2641_v30, %v2632_v45  ;;  %vm8813_vm14 = vmand %vm3277_vm12, %vm3241_vm11 }
 0x3fb   : > { %v3643_v7 = vld [vmem:[#allocation2 + $0x59] sm:$0xff]  ;;  %3566 = vst.msk [vmem:[#allocation2 + $0x63] sm:$0xff] %vm1827_vm9, %v3526_v61  ;;  %5531 = vmatmul.msk.f32.gmra.mxu3 %vm1827_vm9, %v3822_v46  ;;  %v2665_v25 = vadd.s32 %v2663_v63, %v2657_v19  ;;  %v8801_v23 = vadd.s32 18, %v8757_v48  ;;  %v8804_v21 = vsub.s32 %v8626_v31, %v2615_v2  ;;  %v2667_v17 = vsel %vm2666_vm13, 1, %v6139_v62 }
 0x3fc   : > { %v5608_v6 = vpack.i.bf16 %v3643_v7, %v3642_v18  ;;  %v2681_v50 = vshrl.u32 %v8765_v34, 16  ;;  %v2659_v55 = vshrl.u32 %v8753_v36, 16  ;;  %v2684_v31 = vmul.u32 58254, %v2680_v39 }
 0x3fd   : > { %v2036_v51 = vpop.f32.mrf.mxu0  ;;  %v2669_v37 = vadd.s32 %v2667_v17, %v2665_v25  ;;  %v1856_v49 = vsel %vm1827_vm9, %v8393_v58, %v1517_v59  ;;  %v2683_v29 = vmul.u32 14564, %v2680_v39  ;;  %v8821_v15 = vadd.s32 144, %v7900_v1 }
 0x3fe   : > { %5609 = vrot.lane.b32.xlu2 %v5608_v6, %s6138_s7  ;;  %v2037_v9 = vadd.f32 %v8285_v60, %v2036_v51  ;;  %v2685_v24 = vmul.u32 14564, %v2681_v50  ;;  %vm8825_vm15 = vcmp.lt.s32.totalorder %v3384_v44, 16  ;;  %v2643_v11 = vshrl.u32 %v2642_v26, 4 }
 0x3ff   : > { %v2687_v36 = vshll.u32 %v2684_v31, 16  ;;  %v3385_v58 = vsel %vm8813_vm14, %v8801_v23, %v8757_v48  ;;  %v2686_v5 = vmul.u32 58254, %v2681_v50  ;;  %v2709_v54 = vand.u32 65535, %v8821_v15 }
 0x400   : > { %v2122_v32 = vmax.f32 %v2037_v9, 0.0  ;;  %5516 = vmatmul.msk.f32.gmra.mxu0 %vm1873_vm8, %v1855_v14  ;;  %v2689_v27 = vshll.u32 %v2685_v24, 16  ;;  %vm3242_vm0 = vcmp.ne.s32.totalorder %v8804_v21, 0  ;;  %v2661_v45 = vshrl.u32 %v8759_v12, 16 }
 0x401   : > { %v2670_v33 = vadd.s32 %v2669_v37, %v2659_v55  ;;  %v2710_v61 = vshrl.u32 %v8821_v15, 16  ;;  %vm3278_vm1 = vcmp.lt.s32.totalorder %v8804_v21, 0  ;;  %v8841_v18 = vadd.s32 18, %v8804_v21  ;;  %v10924_v55 = vld [vmem:[#allocation193_spill] sm:$0xff] }
 0x402   : > { %v3527_v0 = vsel %vm8787_vm10, %v2122_v32, 0.0  ;;  %v3823_v16 = vld [vmem:[#allocation2 + $0x5e] sm:$0xff]  ;;  %vm2691_vm3 = vc.u32 %v2683_v29, %v2687_v36  ;;  %v2693_v7 = vadd.s32 %v2687_v36, %v2683_v29  ;;  %v2644_v2 = vmul.u32 18, %v2643_v11  ;;  %vm8867_vm5 = vmand %vm3278_vm1, %vm3242_vm0 }
 0x403   : > { %3567 = vst.msk [vmem:[#allocation2 + $0x6b] sm:$0xff] %vm1827_vm9, %v3527_v0  ;;  %5532 = vmatmul.msk.f32.gmra.mxu3 %vm1827_vm9, %v3823_v16  ;;  %v2688_v30 = vshrl.u32 %v2684_v31, 16  ;;  %v2692_v19 = vsel %vm2691_vm3, 1, %v6139_v62  ;;  %v2712_v12 = vmul.u32 14564, %v2709_v54  ;;  %v8845_v13 = vmul.u32 58254, %v2709_v54  ;;  %v3644_v44 = vld [vmem:[#allocation2 + $0x61] sm:$0xff] }
 0x404   : > { %v2694_v6 = vadd.s32 %v2692_v19, %v2686_v5  ;;  %vm2695_vm4 = vc.u32 %v2693_v7, %v2689_v27  ;;  %v2671_v57 = vadd.s32 %v2670_v33, %v2661_v45  ;;  %v8849_v14 = vmul.u32 14564, %v2710_v61 }
 0x405   : > { %v2039_v46 = vpop.f32.mrf.mxu0  ;;  %v2696_v10 = vsel %vm2695_vm4, 1, %v6139_v62  ;;  %v2690_v51 = vshrl.u32 %v2685_v24, 16  ;;  %v2716_v63 = vshll.u32 %v8845_v13, 16  ;;  %v8853_v39 = vadd.s32 152, %v7900_v1 }
 0x406   : > { %v2040_v48 = vadd.f32 %v8285_v60, %v2039_v46  ;;  %v2698_v60 = vadd.s32 %v2696_v10, %v2694_v6  ;;  %v8858_v25 = vsub.s32 %v8683_v53, %v2644_v2  ;;  %v2715_v23 = vmul.u32 58254, %v2710_v61 }
 0x407   : > { %v2718_v17 = vshll.u32 %v8849_v14, 16  ;;  %vm2720_vm6 = vc.u32 %v2712_v12, %v2716_v63  ;;  %v2738_v53 = vand.u32 65535, %v8853_v39  ;;  %v1821_v37 = vsel %vm1790_vm7, %v8110_v47, %v10924_v55  ;;  %v8887_v47 = vld [vmem:[%s10474_s2] ss:$0 sm:$0xff] }
 0x408   : > { %v2123_v4 = vmax.f32 %v2040_v48, 0.0  ;;  %5517 = vmatmul.msk.f32.gmra.mxu0 %vm1873_vm8, %v1856_v49  ;;  %v2699_v42 = vadd.s32 %v2698_v60, %v2688_v30  ;;  %v1857_v31 = vsel %vm1827_vm9, %v8185_v41, %v1519_v28  ;;  %vm8877_vm10 = vcmp.lt.s32.totalorder %v3385_v58, 16  ;;  %v1521_v58 = vpop.permute.xlu0 %1520 }
 0x409   : > { %v2672_v29 = vshrl.u32 %v2671_v57, 4  ;;  %v2721_v16 = vsel %vm2720_vm6, 1, %v6139_v62  ;;  %v2722_v20 = vadd.s32 %v2716_v63, %v2712_v12  ;;  %v2739_v11 = vshrl.u32 %v8853_v39, 16 }
 0x40a   : > { %v3528_v59 = vsel %vm8825_vm15, %v2123_v4, 0.0  ;;  %v3824_v9 = vld [vmem:[#allocation2 + $0x66] sm:$0xff]  ;;  %v2700_v0 = vadd.s32 %v2699_v42, %v2690_v51  ;;  %v3386_v36 = vsel %vm8867_vm5, %v8841_v18, %v8804_v21  ;;  %vm3243_vm11 = vcmp.ne.s32.totalorder %v8858_v25, 0 }
 0x40b   : > { %v3645_v26 = vld [vmem:[#allocation2 + $0x69] sm:$0xff]  ;;  %3568 = vst.msk [vmem:[#allocation2 + $0x73] sm:$0xff] %vm1827_vm9, %v3528_v59  ;;  %5533 = vmatmul.msk.f32.gmra.mxu3 %vm1827_vm9, %v3824_v9  ;;  %vm3279_vm12 = vcmp.lt.s32.totalorder %v8858_v25, 0  ;;  %v2723_v5 = vadd.s32 %v2721_v16, %v2715_v23  ;;  %vm2724_vm13 = vc.u32 %v2722_v20, %v2718_v17  ;;  %v2741_v27 = vmul.u32 14564, %v2738_v53 }
 0x40c   : > { %v5613_v50 = vpack.i.bf16 %v3645_v26, %v3644_v44  ;;  %v2742_v54 = vmul.u32 58254, %v2738_v53  ;;  %v8898_v33 = vadd.s32 18, %v8858_v25  ;;  %v2725_v61 = vsel %vm2724_vm13, 1, %v6139_v62  ;;  %vm8911_vm14 = vmand %vm3279_vm12, %vm3243_vm11 }
 0x40d   : > { %v2042_v24 = vpop.f32.mrf.mxu0  ;;  %v2743_v46 = vmul.u32 14564, %v2739_v11  ;;  %v2673_v7 = vmul.u32 18, %v2672_v29  ;;  %v2701_v21 = vshrl.u32 %v2700_v0, 4  ;;  %v8902_v48 = vadd.s32 160, %v7900_v1  ;;  %v1523_v0 = vpop.permute.xlu1 %1522 }
 0x40e   : > { %5614 = vrot.lane.b32.xlu0 %v5613_v50, %s6138_s7  ;;  %v2043_v41 = vadd.f32 %v8887_v47, %v2042_v24  ;;  %v2745_v18 = vshll.u32 %v2742_v54, 16  ;;  %v1858_v2 = vsel %vm1827_vm9, %v1821_v37, %v1521_v58  ;;  %v2744_v12 = vmul.u32 58254, %v2739_v11 }
 0x40f   : > { %v2747_v4 = vshll.u32 %v2743_v46, 16  ;;  %v2717_v57 = vshrl.u32 %v8845_v13, 16  ;;  %v2727_v10 = vadd.s32 %v2725_v61, %v2723_v5  ;;  %v2767_v28 = vand.u32 65535, %v8902_v48 }
 0x410   : > { %v2124_v45 = vmax.f32 %v2043_v41, 0.0  ;;  %5518 = vmatmul.msk.f32.gmra.mxu0 %vm1873_vm8, %v1857_v31  ;;  %vm2749_vm15 = vc.u32 %v2741_v27, %v2745_v18  ;;  %vm8919_vm0 = vcmp.lt.s32.totalorder %v3386_v36, 16  ;;  %v2751_v63 = vadd.s32 %v2745_v18, %v2741_v27 }
 0x411   : > { %v2750_v60 = vsel %vm2749_vm15, 1, %v6139_v62  ;;  %v2768_v59 = vshrl.u32 %v8902_v48, 16  ;;  %v3387_v44 = vsel %vm8911_vm14, %v8898_v33, %v8858_v25  ;;  %v8930_v13 = vsub.s32 %v8729_v43, %v2673_v7 }
 0x412   : > { %v3529_v30 = vsel %vm8877_vm10, %v2124_v45, 0.0  ;;  %v3825_v19 = vld [vmem:[#allocation2 + $0x6e] sm:$0xff]  ;;  %v2702_v26 = vmul.u32 18, %v2701_v21  ;;  %v2719_v23 = vshrl.u32 %v8849_v14, 16  ;;  %v2746_v50 = vshrl.u32 %v2742_v54, 16 }
 0x413   : > { %3569 = vst.msk [vmem:[#allocation2 + $0x7b] sm:$0xff] %vm1827_vm9, %v3529_v30  ;;  %5534 = vmatmul.msk.f32.gmra.mxu3 %vm1827_vm9, %v3825_v19  ;;  %v2752_v32 = vadd.s32 %v2750_v60, %v2744_v12  ;;  %vm2753_vm1 = vc.u32 %v2751_v63, %v2747_v4  ;;  %v2728_v42 = vadd.s32 %v2727_v10, %v2717_v57  ;;  %v2770_v55 = vmul.u32 14564, %v2767_v28  ;;  %v3646_v11 = vld [vmem:[#allocation2 + $0x71] sm:$0xff] }
 0x414   : > { %v2754_v53 = vsel %vm2753_vm1, 1, %v6139_v62  ;;  %v8935_v37 = vmul.u32 58254, %v2767_v28  ;;  %v2748_v25 = vshrl.u32 %v2743_v46, 16  ;;  %v8938_v49 = vmul.u32 14564, %v2768_v59 }
 0x415   : > { %v2045_v9 = vpop.f32.mrf.mxu0  ;;  %v2756_v43 = vadd.s32 %v2754_v53, %v2752_v32  ;;  %vm3244_vm3 = vcmp.ne.s32.totalorder %v8930_v13, 0  ;;  %v2773_v14 = vmul.u32 58254, %v2768_v59  ;;  %v8943_v24 = vadd.s32 168, %v7900_v1  ;;  %v1525_v32 = vpop.permute.xlu2 %1524 }
 0x416   : > { %v2046_v17 = vadd.f32 %v8887_v47, %v2045_v9  ;;  %v2774_v29 = vshll.u32 %v8935_v37, 16  ;;  %v8948_v36 = vsub.s32 %v8765_v34, %v2702_v26  ;;  %v2776_v5 = vshll.u32 %v8938_v49, 16 }
 0x417   : > { %v2757_v58 = vadd.s32 %v2756_v43, %v2746_v50  ;;  %v2729_v54 = vadd.s32 %v2728_v42, %v2719_v23  ;;  %v2796_v45 = vand.u32 65535, %v8943_v24  ;;  %vm3280_vm5 = vcmp.lt.s32.totalorder %v8930_v13, 0 }
 0x418   : > { %v2125_v31 = vmax.f32 %v2046_v17, 0.0  ;;  %5519 = vmatmul.msk.f32.gmra.mxu0 %vm1873_vm8, %v1858_v2  ;;  %vm2778_vm4 = vc.u32 %v2770_v55, %v2774_v29  ;;  %v2780_v46 = vadd.s32 %v2774_v29, %v2770_v55  ;;  %v1859_v34 = vsel %vm1827_vm9, %v8783_v56, %v1523_v0  ;;  %vm8969_vm12 = vmand %vm3280_vm5, %vm3244_vm3 }
 0x419   : > { %v2758_v33 = vadd.s32 %v2757_v58, %v2748_v25  ;;  %v2779_v61 = vsel %vm2778_vm4, 1, %v6139_v62  ;;  %vm8958_vm6 = vcmp.lt.s32.totalorder %v3387_v44, 16  ;;  %v3352_v18 = vadd.s32 18, %v8930_v13  ;;  %v1527_v58 = vpop.permute.xlu0 %1526 }
 0x41a   : > { %v3530_v16 = vsel %vm8919_vm0, %v2125_v31, 0.0  ;;  %v3826_v20 = vld [vmem:[#allocation2 + $0x76] sm:$0xff]  ;;  %v2781_v2 = vadd.s32 %v2779_v61, %v2773_v14  ;;  %vm3245_vm10 = vcmp.ne.s32.totalorder %v8948_v36, 0  ;;  %vm2782_vm11 = vc.u32 %v2780_v46, %v2776_v5 }
 0x41b   : > { %v3647_v41 = vld [vmem:[#allocation2 + $0x79] sm:$0xff]  ;;  %3570 = vst.msk [vmem:[#allocation2 + $0x83] sm:$0xff] %vm1827_vm9, %v3530_v16  ;;  %5535 = vmatmul.msk.f32.gmra.mxu3 %vm1827_vm9, %v3826_v20  ;;  %v2797_v19 = vshrl.u32 %v8943_v24, 16  ;;  %v2730_v6 = vshrl.u32 %v2729_v54, 4  ;;  %v2783_v12 = vsel %vm2782_vm11, 1, %v6139_v62  ;;  %v2799_v4 = vmul.u32 14564, %v2796_v45 }
 0x41c   : > { %v5618_v27 = vpack.i.bf16 %v3647_v41, %v3646_v11  ;;  %v2800_v57 = vmul.u32 58254, %v2796_v45  ;;  %v2759_v28 = vshrl.u32 %v2758_v33, 4  ;;  %v2775_v51 = vshrl.u32 %v8935_v37, 16 }
 0x41d   : > { %v2048_v7 = vpop.f32.mrf.mxu0  ;;  %v2785_v60 = vadd.s32 %v2783_v12, %v2781_v2  ;;  %vm3281_vm13 = vcmp.lt.s32.totalorder %v8948_v36, 0  ;;  %v8977_v63 = vmul.u32 14564, %v2797_v19  ;;  %v8980_v9 = vadd.s32 176, %v7900_v1 }
 0x41e   : > { %5619 = vrot.lane.b32.xlu1 %v5618_v27, %s6138_s7  ;;  %v2049_v30 = vadd.f32 %v8887_v47, %v2048_v7  ;;  %v2803_v59 = vshll.u32 %v2800_v57, 16  ;;  %v3388_v23 = vsel %vm8969_vm12, %v3352_v18, %v8930_v13  ;;  %v3353_v17 = vadd.s32 18, %v8948_v36  ;;  %vm8996_vm15 = vmand %vm3281_vm13, %vm3245_vm10 }
 0x41f   : > { %v2802_v50 = vmul.u32 58254, %v2797_v19  ;;  %v2805_v42 = vshll.u32 %v8977_v63, 16  ;;  %v2825_v55 = vand.u32 65535, %v8980_v9  ;;  %v2731_v37 = vmul.u32 18, %v2730_v6 }
 0x420   : > { %v2126_v10 = vmax.f32 %v2049_v30, 0.0  ;;  %5520 = vmatmul.msk.f32.gmra.mxu0 %vm1873_vm8, %v1859_v34  ;;  %vm2807_vm14 = vc.u32 %v2799_v4, %v2803_v59  ;;  %v2809_v53 = vadd.s32 %v2803_v59, %v2799_v4  ;;  %v2760_v31 = vmul.u32 18, %v2759_v28  ;;  %v1531_v28 = vpop.permute.xlu2 %1530 }
 0x421   : > { %v2777_v25 = vshrl.u32 %v8938_v49, 16  ;;  %v2786_v43 = vadd.s32 %v2785_v60, %v2775_v51  ;;  %v1824_v14 = vsel %vm1790_vm7, %v8123_v22, %v7480_v52  ;;  %v2808_v0 = vsel %vm2807_vm14, 1, %v6139_v62 }
 0x422   : > { %v3531_v44 = vsel %vm8958_vm6, %v2126_v10, 0.0  ;;  %v3827_v26 = vld [vmem:[#allocation2 + $0x7e] sm:$0xff]  ;;  %vm2811_vm0 = vc.u32 %v2809_v53, %v2805_v42  ;;  %v2826_v16 = vshrl.u32 %v8980_v9, 16  ;;  %v1860_v20 = vsel %vm1827_vm9, %v8216_v38, %v1525_v32 }
 0x423   : > { %3571 = vst.msk [vmem:[#allocation2 + $0x8b] sm:$0xff] %vm1827_vm9, %v3531_v44  ;;  %5536 = vmatmul.msk.f32.gmra.mxu3 %vm1827_vm9, %v3827_v26  ;;  %vm9009_vm1 = vcmp.lt.s32.totalorder %v3388_v23, 16  ;;  %v2810_v49 = vadd.s32 %v2808_v0, %v2802_v50  ;;  %v3389_v52 = vsel %vm8996_vm15, %v3353_v17, %v8948_v36  ;;  %v2804_v22 = vshrl.u32 %v2800_v57, 16  ;;  %v3648_v2 = vld [vmem:[#allocation2 + $0x81] sm:$0xff]  ;;  %v1529_v23 = vpop.permute.xlu1 %1528 }
 0x424   : > { %v2812_v5 = vsel %vm2811_vm0, 1, %v6139_v62  ;;  %v9017_v27 = vmul.u32 58254, %v2825_v55  ;;  %v9021_v38 = vsub.s32 %v8821_v15, %v2731_v37  ;;  %v9024_v45 = vsub.s32 %v8853_v39, %v2760_v31 }
 0x425   : > { %v2051_v29 = vpop.f32.mrf.mxu0  ;;  %v2787_v33 = vadd.s32 %v2786_v43, %v2777_v25  ;;  %v2814_v61 = vadd.s32 %v2812_v5, %v2810_v49  ;;  %v2828_v46 = vmul.u32 14564, %v2825_v55  ;;  %v9026_v34 = vmul.u32 14564, %v2826_v16 }
 0x426   : > { %v2052_v11 = vadd.f32 %v8887_v47, %v2051_v29  ;;  %v2832_v36 = vshll.u32 %v9017_v27, 16  ;;  %v1825_v7 = vsel %vm1790_vm7, %v8115_v40, %v7490_v35  ;;  %v1861_v21 = vsel %vm1827_vm9, %v1824_v14, %v1527_v58 }
 0x427   : > { %v9036_v30 = vadd.s32 184, %v7900_v1  ;;  %v2806_v56 = vshrl.u32 %v8977_v63, 16  ;;  %v2815_v6 = vadd.s32 %v2814_v61, %v2804_v22  ;;  %v2831_v35 = vmul.u32 58254, %v2826_v16 }
 0x428   : > { %v2127_v54 = vmax.f32 %v2052_v11, 0.0  ;;  %5521 = vmatmul.msk.f32.gmra.mxu0 %vm1873_vm8, %v1860_v20  ;;  %vm9041_vm7 = vcmp.lt.s32.totalorder %v3389_v52, 16  ;;  %vm3246_vm3 = vcmp.ne.s32.totalorder %v9021_v38, 0  ;;  %v2788_v12 = vshrl.u32 %v2787_v33, 4 }
 0x429   : > { %v2834_v4 = vshll.u32 %v9026_v34, 16  ;;  %vm3282_vm4 = vcmp.lt.s32.totalorder %v9021_v38, 0  ;;  %vm3247_vm5 = vcmp.ne.s32.totalorder %v9024_v45, 0  ;;  %vm2836_vm6 = vc.u32 %v2828_v46, %v2832_v36 }
 0x42a   : > { %v3532_v15 = vsel %vm9009_vm1, %v2127_v54, 0.0  ;;  %v3828_v18 = vld [vmem:[#allocation2 + $0x86] sm:$0xff]  ;;  %v2838_v10 = vadd.s32 %v2832_v36, %v2828_v46  ;;  %vm3283_vm10 = vcmp.lt.s32.totalorder %v9024_v45, 0  ;;  %v2837_v60 = vsel %vm2836_vm6, 1, %v6139_v62  ;;  %vm9060_vm12 = vmand %vm3282_vm4, %vm3246_vm3 }
 0x42b   : > { %v3649_v39 = vld [vmem:[#allocation2 + $0x89] sm:$0xff]  ;;  %3572 = vst.msk [vmem:[#allocation2 + $0x93] sm:$0xff] %vm1827_vm9, %v3532_v15  ;;  %5537 = vmatmul.msk.f32.gmra.mxu3 %vm1827_vm9, %v3828_v18  ;;  %v2854_v63 = vand.u32 65535, %v9036_v30  ;;  %v3354_v59 = vadd.s32 18, %v9021_v38  ;;  %v2816_v44 = vadd.s32 %v2815_v6, %v2806_v56  ;;  %v2839_v26 = vadd.s32 %v2837_v60, %v2831_v35  ;;  %vm9074_vm13 = vmand %vm3283_vm10, %vm3247_vm5 }
 0x42c   : > { %v5623_v19 = vpack.i.bf16 %v3649_v39, %v3648_v2  ;;  %vm2840_vm11 = vc.u32 %v2838_v10, %v2834_v4  ;;  %v3355_v32 = vadd.s32 18, %v9024_v45  ;;  %v2789_v42 = vmul.u32 18, %v2788_v12 }
 0x42d   : > { %v2054_v57 = vpop.f32.mrf.mxu0  ;;  %v2841_v53 = vsel %vm2840_vm11, 1, %v6139_v62  ;;  %v9068_v55 = vsel %vm1827_vm9, %v8271_v8, %v1531_v28  ;;  %v2833_v37 = vshrl.u32 %v9017_v27, 16  ;;  %v2855_v25 = vshrl.u32 %v9036_v30, 16 }
 0x42e   : > { %5624 = vrot.lane.b32.xlu2 %v5623_v19, %s6138_s7  ;;  %v2055_v51 = vadd.f32 %v8887_v47, %v2054_v57  ;;  %v2843_v31 = vadd.s32 %v2841_v53, %v2839_v26  ;;  %v2857_v29 = vmul.u32 14564, %v2854_v63  ;;  %v2858_v8 = vmul.u32 58254, %v2854_v63 }
 0x42f   : > { %v9083_v0 = vadd.s32 192, %v7900_v1  ;;  %v1862_v16 = vsel %vm1827_vm9, %v1825_v7, %v1529_v23  ;;  %v3390_v20 = vsel %vm9060_vm12, %v3354_v59, %v9021_v38  ;;  %v2817_v11 = vshrl.u32 %v2816_v44, 4 }
 0x430   : > { %v2128_v17 = vmax.f32 %v2055_v51, 0.0  ;;  %5522 = vmatmul.msk.f32.gmra.mxu0 %vm1873_vm8, %v1861_v21  ;;  %v2859_v41 = vmul.u32 14564, %v2855_v25  ;;  %v3391_v49 = vsel %vm9074_vm13, %v3355_v32, %v9024_v45  ;;  %v9095_v58 = vsub.s32 %v8902_v48, %v2789_v42 }
 0x431   : > { %v2860_v52 = vmul.u32 58254, %v2855_v25  ;;  %v2861_v22 = vshll.u32 %v2858_v8, 16  ;;  %v2835_v27 = vshrl.u32 %v9026_v34, 16  ;;  %v2844_v54 = vadd.s32 %v2843_v31, %v2833_v37 }
 0x432   : > { %v3533_v43 = vsel %vm9041_vm7, %v2128_v17, 0.0  ;;  %v3829_v14 = vld [vmem:[#allocation2 + $0x8e] sm:$0xff]  ;;  %v2883_v33 = vand.u32 65535, %v9083_v0  ;;  %v2884_v61 = vshrl.u32 %v9083_v0, 16  ;;  %vm9101_vm14 = vcmp.lt.s32.totalorder %v3390_v20, 16 }
 0x433   : > { %3573 = vst.msk [vmem:[#allocation2 + $0x9b] sm:$0xff] %vm1827_vm9, %v3533_v43  ;;  %5538 = vmatmul.msk.f32.gmra.mxu3 %vm1827_vm9, %v3829_v14  ;;  %v2863_v45 = vshll.u32 %v2859_v41, 16  ;;  %vm2865_vm15 = vc.u32 %v2857_v29, %v2861_v22  ;;  %vm9105_vm0 = vcmp.lt.s32.totalorder %v3391_v49, 16  ;;  %v2818_v36 = vmul.u32 18, %v2817_v11  ;;  %v3650_v2 = vld [vmem:[#allocation2 + $0x91] sm:$0xff] }
 0x434   : > { %v2866_v34 = vsel %vm2865_vm15, 1, %v6139_v62  ;;  %v2867_v7 = vadd.s32 %v2861_v22, %v2857_v29  ;;  %vm3248_vm1 = vcmp.ne.s32.totalorder %v9095_v58, 0  ;;  %v2862_v15 = vshrl.u32 %v2858_v8, 16 }
 0x435   : > { %v2057_v5 = vpop.f32.mrf.mxu0  ;;  %v2868_v18 = vadd.s32 %v2866_v34, %v2860_v52  ;;  %v2845_v39 = vadd.s32 %v2844_v54, %v2835_v27  ;;  %v2887_v19 = vmul.u32 58254, %v2883_v33  ;;  %v9112_v56 = vmul.u32 14564, %v2884_v61 }
 0x436   : > { %v2058_v38 = vadd.f32 %v8887_v47, %v2057_v5  ;;  %vm2869_vm7 = vc.u32 %v2867_v7, %v2863_v45  ;;  %v2886_v4 = vmul.u32 14564, %v2883_v33  ;;  %v9118_v57 = vadd.s32 200, %v7900_v1 }
 0x437   : > { %v2870_v12 = vsel %vm2869_vm7, 1, %v6139_v62  ;;  %v9123_v28 = vsub.s32 %v8943_v24, %v2818_v36  ;;  %v2890_v60 = vshll.u32 %v2887_v19, 16  ;;  %vm3284_vm3 = vcmp.lt.s32.totalorder %v9095_v58, 0 }
 0x438   : > { %v2129_v21 = vmax.f32 %v2058_v38, 0.0  ;;  %5523 = vmatmul.msk.f32.gmra.mxu0 %vm1873_vm8, %v1862_v16  ;;  %v2872_v51 = vadd.s32 %v2870_v12, %v2868_v18  ;;  %v2864_v63 = vshrl.u32 %v2859_v41, 16  ;;  %v2889_v59 = vmul.u32 58254, %v2884_v61  ;;  %vm9141_vm11 = vmand %vm3284_vm3, %vm3248_vm1 }
 0x439   : > { %v2892_v44 = vshll.u32 %v9112_v56, 16  ;;  %v3356_v23 = vadd.s32 18, %v9095_v58  ;;  %v2846_v17 = vshrl.u32 %v2845_v39, 4  ;;  %v2912_v32 = vand.u32 65535, %v9118_v57 }
 0x43a   : > { %v3534_v6 = vsel %vm9101_vm14, %v2129_v21, 0.0  ;;  %v3830_v35 = vld [vmem:[#allocation2 + $0x96] sm:$0xff]  ;;  %v2873_v50 = vadd.s32 %v2872_v51, %v2862_v15  ;;  %vm2894_vm4 = vc.u32 %v2886_v4, %v2890_v60  ;;  %v2896_v42 = vadd.s32 %v2890_v60, %v2886_v4 }
 0x43b   : > { %v3651_v40 = vld [vmem:[#allocation2 + $0x99] sm:$0xff]  ;;  %3574 = vst.msk [vmem:[#allocation2 + $0xa3] sm:$0xff] %vm1827_vm9, %v3534_v6  ;;  %5539 = vmatmul.msk.f32.gmra.mxu3 %vm1827_vm9, %v3830_v35  ;;  %v2913_v53 = vshrl.u32 %v9118_v57, 16  ;;  %vm3249_vm5 = vcmp.ne.s32.totalorder %v9123_v28, 0  ;;  %vm3285_vm6 = vcmp.lt.s32.totalorder %v9123_v28, 0  ;;  %v2891_v13 = vshrl.u32 %v2887_v19, 16 }
 0x43c   : > { %v5628_v10 = vpack.i.bf16 %v3651_v40, %v3650_v2  ;;  %v2895_v37 = vsel %vm2894_vm4, 1, %v6139_v62  ;;  %v2874_v25 = vadd.s32 %v2873_v50, %v2864_v63  ;;  %vm2898_vm10 = vc.u32 %v2896_v42, %v2892_v44 }
 0x43d   : > { %v2060_v26 = vpop.f32.mrf.mxu0  ;;  %v2897_v43 = vadd.s32 %v2895_v37, %v2889_v59  ;;  %v2899_v29 = vsel %vm2898_vm10, 1, %v6139_v62  ;;  %v2915_v8 = vmul.u32 14564, %v2912_v32  ;;  %v2916_v16 = vmul.u32 58254, %v2912_v32 }
 0x43e   : > { %5629 = vrot.lane.b32.xlu0 %v5628_v10, %s6138_s7  ;;  %v2061_v24 = vadd.f32 %v8887_v47, %v2060_v26  ;;  %v9146_v20 = vmul.u32 14564, %v2913_v53  ;;  %v2847_v41 = vmul.u32 18, %v2846_v17  ;;  %v9151_v52 = vadd.s32 208, %v7900_v1 }
 0x43f   : > { %v2901_v49 = vadd.s32 %v2899_v29, %v2897_v43  ;;  %v3357_v22 = vadd.s32 18, %v9123_v28  ;;  %v2893_v5 = vshrl.u32 %v9112_v56, 16  ;;  %v2918_v27 = vmul.u32 58254, %v2913_v53 }
 0x440   : > { %v2130_v31 = vmax.f32 %v2061_v24, 0.0  ;;  %5524 = vmatmul.msk.f32.gmra.mxu0 %vm1873_vm8, %v9068_v55  ;;  %v2919_v54 = vshll.u32 %v2916_v16, 16  ;;  %v3392_v33 = vsel %vm9141_vm11, %v3356_v23, %v9095_v58  ;;  %vm9164_vm8 = vmand %vm3285_vm6, %vm3249_vm5  ;;  %v2921_v46 = vshll.u32 %v9146_v20, 16 }
 0x441   : > { %v2902_v38 = vadd.s32 %v2901_v49, %v2891_v13  ;;  %v2941_v45 = vand.u32 65535, %v9151_v52  ;;  %v2875_v36 = vshrl.u32 %v2874_v25, 4  ;;  %v2942_v7 = vshrl.u32 %v9151_v52, 16 }
 0x442   : > { %v3535_v55 = vsel %vm9105_vm0, %v2130_v31, 0.0  ;;  %v3831_v11 = vld [vmem:[#allocation2 + $0x9e] sm:$0xff]  ;;  %vm2923_vm12 = vc.u32 %v2915_v8, %v2919_v54  ;;  %v2925_v34 = vadd.s32 %v2919_v54, %v2915_v8  ;;  %v9173_v21 = vsub.s32 %v8980_v9, %v2847_v41 }
 0x443   : > { %3575 = vst.msk [vmem:[#allocation2 + $0xab] sm:$0xff] %vm1827_vm9, %v3535_v55  ;;  %5540 = vmatmul.msk.f32.gmra.mxu3 %vm1827_vm9, %v3831_v11  ;;  %v2924_v15 = vsel %vm2923_vm12, 1, %v6139_v62  ;;  %vm3428_vm13 = vcmp.lt.s32.totalorder %v3392_v33, 16  ;;  %v3393_v18 = vsel %vm9164_vm8, %v3357_v22, %v9123_v28  ;;  %v2903_v2 = vadd.s32 %v2902_v38, %v2893_v5  ;;  %v3652_v51 = vld [vmem:[#allocation2 + $0xa1] sm:$0xff] }
 0x444   : > { %v2926_v39 = vadd.s32 %v2924_v15, %v2918_v27  ;;  %v2920_v56 = vshrl.u32 %v2916_v16, 16  ;;  %vm2927_vm14 = vc.u32 %v2925_v34, %v2921_v46  ;;  %v2945_v6 = vmul.u32 58254, %v2941_v45 }
 0x445   : > { %v2063_v48 = vpop.f32.mrf.mxu0  ;;  %v2876_v35 = vmul.u32 18, %v2875_v36  ;;  %v2928_v40 = vsel %vm2927_vm14, 1, %v6139_v62  ;;  %v2944_v12 = vmul.u32 14564, %v2941_v45  ;;  %v9180_v4 = vmul.u32 14564, %v2942_v7 }
 0x446   : > { %v2064_v58 = vadd.f32 %v8887_v47, %v2063_v48  ;;  %vm3250_vm15 = vcmp.ne.s32.totalorder %v9173_v21, 0  ;;  %vm3286_vm0 = vcmp.lt.s32.totalorder %v9173_v21, 0  ;;  %v2930_v28 = vadd.s32 %v2928_v40, %v2926_v39 }
 0x447   : > { %v2904_v59 = vshrl.u32 %v2903_v2, 4  ;;  %v2948_v44 = vshll.u32 %v2945_v6, 16  ;;  %v2950_v26 = vshll.u32 %v9180_v4, 16  ;;  %v3358_v23 = vadd.s32 18, %v9173_v21  ;;  %vm9195_vm1 = vmand %vm3286_vm0, %vm3250_vm15 }
 0x448   : > { %v2131_v19 = vmax.f32 %v2064_v58, 0.0  ;;  %v2922_v17 = vshrl.u32 %v9146_v20, 16  ;;  %v2931_v50 = vadd.s32 %v2930_v28, %v2920_v56  ;;  %v9190_v32 = vadd.s32 216, %v7900_v1 }
 0x449   : > { %v9200_v53 = vsub.s32 %v9036_v30, %v2876_v35  ;;  %v2947_v13 = vmul.u32 58254, %v2942_v7  ;;  %vm2952_vm7 = vc.u32 %v2944_v12, %v2948_v44  ;;  %v2954_v37 = vadd.s32 %v2948_v44, %v2944_v12 }
 0x44a   : > { %v3536_v9 = vsel %vm3428_vm13, %v2131_v19, 0.0  ;;  %v3832_v10 = vld [vmem:[#allocation2 + $0xa6] sm:$0xff]  ;;  %vm3429_vm3 = vcmp.lt.s32.totalorder %v3393_v18, 16  ;;  %v2905_v25 = vmul.u32 18, %v2904_v59  ;;  %v2953_v43 = vsel %vm2952_vm7, 1, %v6139_v62 }
 0x44b   : > { %v3653_v60 = vld [vmem:[#allocation2 + $0xa9] sm:$0xff]  ;;  %3576 = vst.msk [vmem:[#allocation2 + $0xb3] sm:$0xff] %vm1827_vm9, %v3536_v9  ;;  %5541 = vmatmul.msk.f32.gmra.mxu3 %vm1827_vm9, %v3832_v10  ;;  %vm2956_vm4 = vc.u32 %v2954_v37, %v2950_v26  ;;  %v2970_v14 = vand.u32 65535, %v9190_v32  ;;  %v3394_v8 = vsel %vm9195_vm1, %v3358_v23, %v9173_v21  ;;  %v2932_v16 = vadd.s32 %v2931_v50, %v2922_v17 }
 0x44c   : > { %v5633_v63 = vpack.i.bf16 %v3653_v60, %v3652_v51  ;;  %vm3251_vm5 = vcmp.ne.s32.totalorder %v9200_v53, 0  ;;  %v2949_v30 = vshrl.u32 %v2945_v6, 16  ;;  %v2955_v20 = vadd.s32 %v2953_v43, %v2947_v13 }
 0x44d   : > { %v2066_v24 = vpop.f32.mrf.mxu0  ;;  %v2957_v55 = vsel %vm2956_vm4, 1, %v6139_v62  ;;  %v2971_v49 = vshrl.u32 %v9190_v32, 16  ;;  %v2973_v22 = vmul.u32 14564, %v2970_v14  ;;  %v2974_v5 = vmul.u32 58254, %v2970_v14 }
 0x44e   : > { %5634 = vrot.lane.b32.xlu1 %v5633_v63, %s6138_s7  ;;  %v2067_v31 = vadd.f32 %v8887_v47, %v2066_v24  ;;  %vm3287_vm6 = vcmp.lt.s32.totalorder %v9200_v53, 0  ;;  %v9215_v27 = vsub.s32 %v9083_v0, %v2905_v25  ;;  %v2959_v54 = vadd.s32 %v2957_v55, %v2955_v20 }
 0x44f   : > { %v9218_v33 = vadd.s32 224, %v7900_v1  ;;  %v2933_v61 = vshrl.u32 %v2932_v16, 4  ;;  %v2951_v38 = vshrl.u32 %v9180_v4, 16  ;;  %v2975_v46 = vmul.u32 14564, %v2971_v49  ;;  %vm9228_vm8 = vmand %vm3287_vm6, %vm3251_vm5 }
 0x450   : > { %v2132_v29 = vmax.f32 %v2067_v31, 0.0  ;;  %v2977_v45 = vshll.u32 %v2974_v5, 16  ;;  %v2960_v36 = vadd.s32 %v2959_v54, %v2949_v30  ;;  %v2976_v34 = vmul.u32 58254, %v2971_v49 }
 0x451   : > { %v3359_v58 = vadd.s32 18, %v9200_v53  ;;  %v2999_v0 = vand.u32 65535, %v9218_v33  ;;  %vm3430_vm11 = vcmp.lt.s32.totalorder %v3394_v8, 16  ;;  %vm3252_vm12 = vcmp.ne.s32.totalorder %v9215_v27, 0 }
 0x452   : > { %v3537_v11 = vsel %vm3429_vm3, %v2132_v29, 0.0  ;;  %v3833_v41 = vld [vmem:[#allocation2 + $0xae] sm:$0xff]  ;;  %vm2981_vm10 = vc.u32 %v2973_v22, %v2977_v45  ;;  %v2979_v15 = vshll.u32 %v2975_v46, 16  ;;  %v3000_v18 = vshrl.u32 %v9218_v33, 16 }
 0x453   : > { %3577 = vst.msk [vmem:[#allocation2 + $0xbb] sm:$0xff] %vm1827_vm9, %v3537_v11  ;;  %5542 = vmatmul.msk.f32.gmra.mxu3 %vm1827_vm9, %v3833_v41  ;;  %v2934_v39 = vmul.u32 18, %v2933_v61  ;;  %v2961_v19 = vadd.s32 %v2960_v36, %v2951_v38  ;;  %v2982_v56 = vsel %vm2981_vm10, 1, %v6139_v62  ;;  %vm3288_vm13 = vcmp.lt.s32.totalorder %v9215_v27, 0  ;;  %v3654_v10 = vld [vmem:[#allocation2 + $0xb1] sm:$0xff] }
 0x454   : > { %v3360_v6 = vadd.s32 18, %v9215_v27  ;;  %v2983_v35 = vadd.s32 %v2977_v45, %v2973_v22  ;;  %v2984_v40 = vadd.s32 %v2982_v56, %v2976_v34  ;;  %v3395_v9 = vsel %vm9228_vm8, %v3359_v58, %v9200_v53  ;;  %vm9246_vm15 = vmand %vm3288_vm13, %vm3252_vm12 }
 0x455   : > { %v2069_v48 = vpop.f32.mrf.mxu0  ;;  %v3002_v60 = vmul.u32 14564, %v2999_v0  ;;  %v3003_v28 = vmul.u32 58254, %v2999_v0  ;;  %v2978_v59 = vshrl.u32 %v2974_v5, 16  ;;  %v3004_v44 = vmul.u32 14564, %v3000_v18 }
 0x456   : > { %v2070_v7 = vadd.f32 %v8887_v47, %v2069_v48  ;;  %vm2985_vm14 = vc.u32 %v2983_v35, %v2979_v15  ;;  %v9251_v23 = vsub.s32 %v9118_v57, %v2934_v39  ;;  %v2962_v17 = vshrl.u32 %v2961_v19, 4 }
 0x457   : > { %v2986_v50 = vsel %vm2985_vm14, 1, %v6139_v62  ;;  %v3006_v24 = vshll.u32 %v3003_v28, 16  ;;  %v2980_v53 = vshrl.u32 %v2975_v46, 16  ;;  %v3005_v37 = vmul.u32 58254, %v3000_v18 }
 0x458   : > { %v2133_v2 = vmax.f32 %v2070_v7, 0.0  ;;  %v2988_v13 = vadd.s32 %v2986_v50, %v2984_v40  ;;  %v3008_v31 = vshll.u32 %v3004_v44, 16  ;;  %v9257_v14 = vadd.s32 232, %v7900_v1 }
 0x459   : > { %vm3010_vm0 = vc.u32 %v3002_v60, %v3006_v24  ;;  %v3012_v43 = vadd.s32 %v3006_v24, %v3002_v60  ;;  %vm3431_vm1 = vcmp.lt.s32.totalorder %v3395_v9, 16  ;;  %v3396_v57 = vsel %vm9246_vm15, %v3360_v6, %v9215_v27 }
 0x45a   : > { %v3538_v12 = vsel %vm3430_vm11, %v2133_v2, 0.0  ;;  %v3834_v4 = vld [vmem:[#allocation2 + $0xb6] sm:$0xff]  ;;  %v2989_v29 = vadd.s32 %v2988_v13, %v2978_v59  ;;  %vm3253_vm7 = vcmp.ne.s32.totalorder %v9251_v23, 0  ;;  %v2963_v16 = vmul.u32 18, %v2962_v17 }
 0x45b   : > { %v3655_v51 = vld [vmem:[#allocation2 + $0xb9] sm:$0xff]  ;;  %3578 = vst.msk [vmem:[#allocation2 + $0xc3] sm:$0xff] %vm1827_vm9, %v3538_v12  ;;  %5543 = vmatmul.msk.f32.gmra.mxu3 %vm1827_vm9, %v3834_v4  ;;  %v3011_v30 = vsel %vm3010_vm0, 1, %v6139_v62  ;;  %v3007_v55 = vshrl.u32 %v3003_v28, 16  ;;  %vm3014_vm3 = vc.u32 %v3012_v43, %v3008_v31  ;;  %vm3289_vm4 = vcmp.lt.s32.totalorder %v9251_v23, 0 }
 0x45c   : > { %v5638_v63 = vpack.i.bf16 %v3655_v51, %v3654_v10  ;;  %v2990_v20 = vadd.s32 %v2989_v29, %v2980_v53  ;;  %v3013_v11 = vadd.s32 %v3011_v30, %v3005_v37  ;;  %v3015_v22 = vsel %vm3014_vm3, 1, %v6139_v62  ;;  %vm9282_vm6 = vmand %vm3289_vm4, %vm3253_vm7 }
 0x45d   : > { %v2072_v42 = vpop.f32.mrf.mxu0  ;;  %v3028_v5 = vand.u32 65535, %v9257_v14  ;;  %v3029_v61 = vshrl.u32 %v9257_v14, 16  ;;  %v9271_v38 = vadd.s32 240, %v7900_v1  ;;  %v3361_v46 = vadd.s32 18, %v9251_v23 }
 0x45e   : > { %5639 = vrot.lane.b32.xlu2 %v5638_v63, %s6138_s7  ;;  %v2073_v25 = vadd.f32 %v8887_v47, %v2072_v42  ;;  %v2991_v27 = vshrl.u32 %v2990_v20, 4  ;;  %v3017_v54 = vadd.s32 %v3015_v22, %v3013_v11  ;;  %v9275_v34 = vsub.s32 %v9151_v52, %v2963_v16 }
 0x45f   : > { %v3031_v45 = vmul.u32 14564, %v3028_v5  ;;  %v3032_v48 = vmul.u32 58254, %v3028_v5  ;;  %v3009_v7 = vshrl.u32 %v3004_v44, 16  ;;  %v3033_v0 = vmul.u32 14564, %v3029_v61 }
 0x460   : > { %v2134_v8 = vmax.f32 %v2073_v25, 0.0  ;;  %v3018_v58 = vadd.s32 %v3017_v54, %v3007_v55  ;;  %vm3432_vm5 = vcmp.lt.s32.totalorder %v3396_v57, 16  ;;  %v2992_v2 = vmul.u32 18, %v2991_v27 }
 0x461   : > { %v3035_v18 = vshll.u32 %v3032_v48, 16  ;;  %v3034_v39 = vmul.u32 58254, %v3029_v61  ;;  %v3037_v19 = vshll.u32 %v3033_v0, 16  ;;  %v3057_v52 = vand.u32 65535, %v9271_v38 }
 0x462   : > { %v3539_v41 = vsel %vm3431_vm1, %v2134_v8, 0.0  ;;  %v3835_v49 = vld [vmem:[#allocation2 + $0xbe] sm:$0xff]  ;;  %v3058_v35 = vshrl.u32 %v9271_v38, 16  ;;  %v3397_v40 = vsel %vm9282_vm6, %v3361_v46, %v9251_v23  ;;  %vm3254_vm11 = vcmp.ne.s32.totalorder %v9275_v34, 0 }
 0x463   : > { %3579 = vst.msk [vmem:[#allocation2 + $0xcb] sm:$0xff] %vm1827_vm9, %v3539_v41  ;;  %5544 = vmatmul.msk.f32.gmra.mxu3 %vm1827_vm9, %v3835_v49  ;;  %vm3039_vm10 = vc.u32 %v3031_v45, %v3035_v18  ;;  %v3041_v6 = vadd.s32 %v3035_v18, %v3031_v45  ;;  %v3019_v12 = vadd.s32 %v3018_v58, %v3009_v7  ;;  %v3656_v10 = vld [vmem:[#allocation2 + $0xc1] sm:$0xff]  ;;  %vm3290_vm8 = vcmp.lt.s32.totalorder %v9275_v34, 0 }
 0x464   : > { %v3040_v60 = vsel %vm3039_vm10, 1, %v6139_v62  ;;  %v9297_v63 = vsub.s32 %v9190_v32, %v2992_v2  ;;  %v3036_v59 = vshrl.u32 %v3032_v48, 16  ;;  %v3060_v23 = vmul.u32 14564, %v3057_v52  ;;  %vm9311_vm15 = vmand %vm3290_vm8, %vm3254_vm11 }
 0x465   : > { %v2075_v36 = vpop.f32.mrf.mxu0  ;;  %vm3043_vm12 = vc.u32 %v3041_v6, %v3037_v19  ;;  %v3042_v44 = vadd.s32 %v3040_v60, %v3034_v39  ;;  %v3061_v17 = vmul.u32 58254, %v3057_v52  ;;  %v3062_v50 = vmul.u32 14564, %v3058_v35 }
 0x466   : > { %v2076_v21 = vadd.f32 %v8887_v47, %v2075_v36  ;;  %v3044_v26 = vsel %vm3043_vm12, 1, %v6139_v62  ;;  %v3020_v42 = vshrl.u32 %v3019_v12, 4  ;;  %v3038_v53 = vshrl.u32 %v3033_v0, 16 }
 0x467   : > { %v3046_v13 = vadd.s32 %v3044_v26, %v3042_v44  ;;  %v9302_v37 = vadd.s32 248, %v7900_v1  ;;  %v3063_v32 = vmul.u32 58254, %v3058_v35  ;;  %v3064_v25 = vshll.u32 %v3061_v17, 16 }
 0x468   : > { %v2135_v56 = vmax.f32 %v2076_v21, 0.0  ;;  %v3066_v43 = vshll.u32 %v3062_v50, 16  ;;  %vm3433_vm13 = vcmp.lt.s32.totalorder %v3397_v40, 16  ;;  %v3362_v57 = vadd.s32 18, %v9275_v34 }
 0x469   : > { %vm3255_vm14 = vcmp.ne.s32.totalorder %v9297_v63, 0  ;;  %v3047_v29 = vadd.s32 %v3046_v13, %v3036_v59  ;;  %vm3291_vm0 = vcmp.lt.s32.totalorder %v9297_v63, 0  ;;  %vm3068_vm1 = vc.u32 %v3060_v23, %v3064_v25 }
 0x46a   : > { %v3540_v4 = vsel %vm3432_vm5, %v2135_v56, 0.0  ;;  %v3836_v9 = vld [vmem:[#allocation2 + $0xc6] sm:$0xff]  ;;  %v3070_v30 = vadd.s32 %v3064_v25, %v3060_v23  ;;  %v3021_v20 = vmul.u32 18, %v3020_v42  ;;  %v3069_v11 = vsel %vm3068_vm1, 1, %v6139_v62  ;;  %vm9330_vm3 = vmand %vm3291_vm0, %vm3255_vm14 }
 0x46b   : > { %v3657_v51 = vld [vmem:[#allocation2 + $0xc9] sm:$0xff]  ;;  %3580 = vst.msk [vmem:[#allocation2 + $0xd3] sm:$0xff] %vm1827_vm9, %v3540_v4  ;;  %5545 = vmatmul.msk.f32.gmra.mxu3 %vm1827_vm9, %v3836_v9  ;;  %v3048_v55 = vadd.s32 %v3047_v29, %v3038_v53  ;;  %v3086_v41 = vand.u32 65535, %v9302_v37  ;;  %v3065_v5 = vshrl.u32 %v3061_v17, 16  ;;  %v3071_v27 = vadd.s32 %v3069_v11, %v3063_v32  ;;  %v9347_v4 = vpop.f32.mrf.mxu3 }
 0x46c   : > { %v5643_v28 = vpack.i.bf16 %v3657_v51, %v3656_v10  ;;  %vm3072_vm7 = vc.u32 %v3070_v30, %v3066_v43  ;;  %v3398_v54 = vsel %vm9311_vm15, %v3362_v57, %v9275_v34  ;;  %v3363_v61 = vadd.s32 18, %v9297_v63  ;;  %v9367_v43 = vld [vmem:[%s10474_s2] ss:$0 sm:$0xff] }
 0x46d   : > { %v2078_v24 = vpop.f32.mrf.mxu0  ;;  %v3073_v46 = vsel %vm3072_vm7, 1, %v6139_v62  ;;  %v3087_v45 = vshrl.u32 %v9302_v37, 16  ;;  %v3049_v36 = vshrl.u32 %v3048_v55, 4  ;;  %v3089_v58 = vmul.u32 14564, %v3086_v41 }
 0x46e   : > { %5644 = vrot.lane.b32.xlu0 %v5643_v28, %s6138_s7  ;;  %v2079_v31 = vadd.f32 %v8887_v47, %v2078_v24  ;;  %v3075_v7 = vadd.s32 %v3073_v46, %v3071_v27  ;;  %v3090_v0 = vmul.u32 58254, %v3086_v41  ;;  %v9335_v34 = vsub.s32 %v9218_v33, %v3021_v20 }
 0x46f   : > { %v3067_v15 = vshrl.u32 %v3062_v50, 16  ;;  %v9337_v18 = vmul.u32 14564, %v3087_v45  ;;  %v9340_v2 = vadd.s32 256, %v7900_v1  ;;  %v3092_v52 = vmul.u32 58254, %v3087_v45 }
 0x470   : > { %v2136_v8 = vmax.f32 %v2079_v31, 0.0  ;;  %v3076_v19 = vadd.s32 %v3075_v7, %v3065_v5  ;;  %v3093_v56 = vshll.u32 %v3090_v0, 16  ;;  %vm3434_vm4 = vcmp.lt.s32.totalorder %v3398_v54, 16 }
 0x471   : > { %v3399_v6 = vsel %vm9330_vm3, %v3363_v61, %v9297_v63  ;;  %v3095_v35 = vshll.u32 %v9337_v18, 16  ;;  %v3050_v40 = vmul.u32 18, %v3049_v36  ;;  %vm3256_vm6 = vcmp.ne.s32.totalorder %v9335_v34, 0 }
 0x472   : > { %v3541_v49 = vsel %vm3433_vm13, %v2136_v8, 0.0  ;;  %v3837_v22 = vld [vmem:[#allocation2 + $0xce] sm:$0xff]  ;;  %vm3097_vm5 = vc.u32 %v3089_v58, %v3093_v56  ;;  %v3099_v12 = vadd.s32 %v3093_v56, %v3089_v58  ;;  %v3077_v9 = vadd.s32 %v3076_v19, %v3067_v15 }
 0x473   : > { %3581 = vst.msk [vmem:[#allocation2 + $0xdb] sm:$0xff] %vm1827_vm9, %v3541_v49  ;;  %5546 = vmatmul.msk.f32.gmra.mxu3 %vm1827_vm9, %v3837_v22  ;;  %v3115_v10 = vand.u32 65535, %v9340_v2  ;;  %v3658_v28 = vld [vmem:[#allocation2 + $0xd1] sm:$0xff]  ;;  %vm3292_vm10 = vcmp.lt.s32.totalorder %v9335_v34, 0  ;;  %v3094_v26 = vshrl.u32 %v3090_v0, 16  ;;  %v3116_v17 = vshrl.u32 %v9340_v2, 16  ;;  %v9389_v46 = vpop.f32.mrf.mxu3 }
 0x474   : > { %vm3101_vm11 = vc.u32 %v3099_v12, %v3095_v35  ;;  %v3364_v50 = vadd.s32 18, %v9335_v34  ;;  %v9359_v24 = vsub.s32 %v9257_v14, %v3050_v40  ;;  %v3078_v13 = vshrl.u32 %v3077_v9, 4  ;;  %vm9374_vm12 = vmand %vm3292_vm10, %vm3256_vm6 }
 0x475   : > { %v2081_v21 = vpop.f32.mrf.mxu0  ;;  %v3102_v23 = vsel %vm3101_vm11, 1, %v6139_v62  ;;  %v3118_v31 = vmul.u32 14564, %v3115_v10  ;;  %v3119_v32 = vmul.u32 58254, %v3115_v10  ;;  %v9362_v25 = vmul.u32 14564, %v3116_v17 }
 0x476   : > { %v2082_v39 = vadd.f32 %v8887_v47, %v2081_v21  ;;  %v3098_v47 = vsel %vm3097_vm5, 1, %v6139_v62  ;;  %vm3435_vm8 = vcmp.lt.s32.totalorder %v3399_v6, 16  ;;  %v9379_v29 = vadd.s32 264, %v7900_v1 }
 0x477   : > { %v3100_v63 = vadd.s32 %v3098_v47, %v3092_v52  ;;  %v3096_v8 = vshrl.u32 %v9337_v18, 16  ;;  %v3121_v30 = vmul.u32 58254, %v3116_v17  ;;  %v3122_v20 = vshll.u32 %v3119_v32, 16 }
 0x478   : > { %v2137_v33 = vmax.f32 %v2082_v39, 0.0  ;;  %v3124_v11 = vshll.u32 %v9362_v25, 16  ;;  %v3400_v41 = vsel %vm9374_vm12, %v3364_v50, %v9335_v34  ;;  %vm3257_vm13 = vcmp.ne.s32.totalorder %v9359_v24, 0 }
 0x479   : > { %v3104_v42 = vadd.s32 %v3102_v23, %v3100_v63  ;;  %v3079_v49 = vmul.u32 18, %v3078_v13  ;;  %vm3126_vm14 = vc.u32 %v3118_v31, %v3122_v20  ;;  %v3128_v54 = vadd.s32 %v3122_v20, %v3118_v31 }
 0x47a   : > { %v3542_v51 = vsel %vm3434_vm4, %v2137_v33, 0.0  ;;  %v3838_v60 = vld [vmem:[#allocation2 + $0xd6] sm:$0xff]  ;;  %v3127_v27 = vsel %vm3126_vm14, 1, %v6139_v62  ;;  %v3144_v61 = vand.u32 65535, %v9379_v29  ;;  %vm3293_vm15 = vcmp.lt.s32.totalorder %v9359_v24, 0 }
 0x47b   : > { %v3659_v59 = vld [vmem:[#allocation2 + $0xd9] sm:$0xff]  ;;  %3582 = vst.msk [vmem:[#allocation2 + $0xe3] sm:$0xff] %vm1827_vm9, %v3542_v51  ;;  %5547 = vmatmul.msk.f32.gmra.mxu3 %vm1827_vm9, %v3838_v60  ;;  %v3105_v16 = vadd.s32 %v3104_v42, %v3094_v26  ;;  %v3129_v48 = vadd.s32 %v3127_v27, %v3121_v30  ;;  %v3145_v36 = vshrl.u32 %v9379_v29, 16  ;;  %v3365_v7 = vadd.s32 18, %v9359_v24  ;;  %vm9405_vm7 = vmand %vm3293_vm15, %vm3257_vm13 }
 0x47c   : > { %v5648_v44 = vpack.i.bf16 %v3659_v59, %v3658_v28  ;;  %v3123_v58 = vshrl.u32 %v3119_v32, 16  ;;  %vm3130_vm0 = vc.u32 %v3128_v54, %v3124_v11  ;;  %v9397_v21 = vsub.s32 %v9271_v38, %v3079_v49 }
 0x47d   : > { %v2084_v53 = vpop.f32.mrf.mxu0  ;;  %v3106_v45 = vadd.s32 %v3105_v16, %v3096_v8  ;;  %v3131_v34 = vsel %vm3130_vm0, 1, %v6139_v62  ;;  %v3148_v15 = vmul.u32 58254, %v3144_v61  ;;  %v9400_v18 = vmul.u32 14564, %v3145_v36 }
 0x47e   : > { %5649 = vrot.lane.b32.xlu1 %v5648_v44, %s6138_s7  ;;  %v2085_v57 = vadd.f32 %v9367_v43, %v2084_v53  ;;  %vm3436_vm1 = vcmp.lt.s32.totalorder %v3400_v41, 16  ;;  %v3133_v52 = vadd.s32 %v3131_v34, %v3129_v48  ;;  %v3147_v56 = vmul.u32 14564, %v3144_v61  ;;  %v9423_v53 = vpop.f32.mrf.mxu3 }
 0x47f   : > { %v3107_v6 = vshrl.u32 %v3106_v45, 4  ;;  %v3125_v38 = vshrl.u32 %v9362_v25, 16  ;;  %v3151_v35 = vshll.u32 %v3148_v15, 16  ;;  %v9411_v33 = vadd.s32 272, %v7900_v1 }
 0x480   : > { %v2138_v55 = vmax.f32 %v2085_v57, 0.0  ;;  %v3134_v12 = vadd.s32 %v3133_v52, %v3123_v58  ;;  %v3150_v9 = vmul.u32 58254, %v3145_v36  ;;  %v3153_v47 = vshll.u32 %v9400_v18, 16 }
 0x481   : > { %v3401_v10 = vsel %vm9405_vm7, %v3365_v7, %v9359_v24  ;;  %vm3258_vm3 = vcmp.ne.s32.totalorder %v9397_v21, 0  ;;  %vm3294_vm4 = vcmp.lt.s32.totalorder %v9397_v21, 0  ;;  %vm3155_vm5 = vc.u32 %v3147_v56, %v3151_v35 }
 0x482   : > { %v3543_v22 = vsel %vm3435_vm8, %v2138_v55, 0.0  ;;  %v3839_v5 = vld [vmem:[#allocation2 + $0xde] sm:$0xff]  ;;  %v3157_v63 = vadd.s32 %v3151_v35, %v3147_v56  ;;  %v3108_v26 = vmul.u32 18, %v3107_v6  ;;  %v3156_v23 = vsel %vm3155_vm5, 1, %v6139_v62  ;;  %vm9439_vm11 = vmand %vm3294_vm4, %vm3258_vm3 }
 0x483   : > { %3583 = vst.msk [vmem:[#allocation2 + $0xeb] sm:$0xff] %vm1827_vm9, %v3543_v22  ;;  %5548 = vmatmul.msk.f32.gmra.mxu3 %vm1827_vm9, %v3839_v5  ;;  %v3660_v28 = vld [vmem:[#allocation2 + $0xe1] sm:$0xff]  ;;  %v3173_v17 = vand.u32 65535, %v9411_v33  ;;  %v3135_v50 = vadd.s32 %v3134_v12, %v3125_v38  ;;  %v3152_v24 = vshrl.u32 %v3148_v15, 16  ;;  %v3158_v42 = vadd.s32 %v3156_v23, %v3150_v9 }
 0x484   : > { %vm3159_vm6 = vc.u32 %v3157_v63, %v3153_v47  ;;  %v3174_v32 = vshrl.u32 %v9411_v33, 16  ;;  %vm3437_vm10 = vcmp.lt.s32.totalorder %v3401_v10, 16  ;;  %v3366_v16 = vadd.s32 18, %v9397_v21 }
 0x485   : > { %v2087_v0 = vpop.f32.mrf.mxu0  ;;  %v3160_v31 = vsel %vm3159_vm6, 1, %v6139_v62  ;;  %v3176_v25 = vmul.u32 14564, %v3173_v17  ;;  %v3177_v57 = vmul.u32 58254, %v3173_v17  ;;  %v9431_v30 = vsub.s32 %v9302_v37, %v3108_v26 }
 0x486   : > { %v2088_v39 = vadd.f32 %v9367_v43, %v2087_v0  ;;  %v3162_v8 = vadd.s32 %v3160_v31, %v3158_v42  ;;  %v9433_v20 = vmul.u32 14564, %v3174_v32  ;;  %v3136_v49 = vshrl.u32 %v3135_v50, 4  ;;  %v9460_v6 = vpop.f32.mrf.mxu3 }
 0x487   : > { %v3180_v55 = vshll.u32 %v3177_v57, 16  ;;  %v3179_v22 = vmul.u32 58254, %v3174_v32  ;;  %v9444_v5 = vadd.s32 280, %v7900_v1  ;;  %v3154_v37 = vshrl.u32 %v9400_v18, 16 }
 0x488   : > { %v2139_v40 = vmax.f32 %v2088_v39, 0.0  ;;  %v3163_v27 = vadd.s32 %v3162_v8, %v3152_v24  ;;  %v3182_v54 = vshll.u32 %v9433_v20, 16  ;;  %v3402_v48 = vsel %vm9439_vm11, %v3366_v16, %v9397_v21  ;;  %v3669_v8 = vld [vmem:[#allocation2 + $0xa] sm:$0xff] }
 0x489   : > { %vm3184_vm8 = vc.u32 %v3176_v25, %v3180_v55  ;;  %vm3259_vm12 = vcmp.ne.s32.totalorder %v9431_v30, 0  ;;  %v3186_v36 = vadd.s32 %v3180_v55, %v3176_v25  ;;  %v3137_v7 = vmul.u32 18, %v3136_v49 }
 0x48a   : > { %v3544_v51 = vsel %vm3436_vm1, %v2139_v40, 0.0  ;;  %v3840_v60 = vld [vmem:[#allocation2 + $0xe6] sm:$0xff]  ;;  %v3185_v1 = vsel %vm3184_vm8, 1, %v6139_v62  ;;  %v3202_v0 = vand.u32 65535, %v9444_v5  ;;  %v3203_v34 = vshrl.u32 %v9444_v5, 16 }
 0x48b   : > { %v3661_v59 = vld [vmem:[#allocation2 + $0xe9] sm:$0xff]  ;;  %3584 = vst.msk [vmem:[#allocation2 + $0xf3] sm:$0xff] %vm1827_vm9, %v3544_v51  ;;  %5549 = vmatmul.msk.f32.gmra.mxu3 %vm1827_vm9, %v3840_v60  ;;  %v3187_v58 = vadd.s32 %v3185_v1, %v3179_v22  ;;  %vm3295_vm13 = vcmp.lt.s32.totalorder %v9431_v30, 0  ;;  %v3164_v18 = vadd.s32 %v3163_v27, %v3154_v37  ;;  %v3181_v39 = vshrl.u32 %v3177_v57, 16 }
 0x48c   : > { %v5653_v44 = vpack.i.bf16 %v3661_v59, %v3660_v28  ;;  %vm3188_vm14 = vc.u32 %v3186_v36, %v3182_v54  ;;  %v3205_v52 = vmul.u32 14564, %v3202_v0  ;;  %v3206_v56 = vmul.u32 58254, %v3202_v0  ;;  %vm9468_vm0 = vmand %vm3295_vm13, %vm3259_vm12 }
 0x48d   : > { %v2090_v13 = vpop.f32.mrf.mxu0  ;;  %v3189_v21 = vsel %vm3188_vm14, 1, %v6139_v62  ;;  %vm3438_vm15 = vcmp.lt.s32.totalorder %v3402_v48, 16  ;;  %v3207_v35 = vmul.u32 14564, %v3203_v34  ;;  %v3367_v12 = vadd.s32 18, %v9431_v30 }
 0x48e   : > { %5654 = vrot.lane.b32.xlu2 %v5653_v44, %s6138_s7  ;;  %v2091_v14 = vadd.f32 %v9367_v43, %v2090_v13  ;;  %v3191_v38 = vadd.s32 %v3189_v21, %v3187_v58  ;;  %v3138_v9 = vsub.s32 %v9340_v2, %v3137_v7  ;;  %v3209_v47 = vshll.u32 %v3206_v56, 16  ;;  %v9482_v41 = vpop.f32.mrf.mxu3 }
 0x48f   : > { %v3165_v51 = vshrl.u32 %v3164_v18, 4  ;;  %v3183_v60 = vshrl.u32 %v9433_v20, 16  ;;  %v3208_v28 = vmul.u32 58254, %v3203_v34  ;;  %v3211_v59 = vshll.u32 %v3207_v35, 16  ;;  %v9496_v34 = vld [vmem:[#allocation2 + $0x3a] sm:$0xff]  ;;  %v9502_v18 = vld [vmem:[#allocation2 + $0x32] sm:$0xff] }
 0x490   : > { %v2140_v11 = vmax.f32 %v2091_v14, 0.0  ;;  %v3192_v17 = vadd.s32 %v3191_v38, %v3181_v39  ;;  %vm3213_vm1 = vc.u32 %v3205_v52, %v3209_v47  ;;  %v3215_v2 = vadd.s32 %v3209_v47, %v3205_v52  ;;  %v3668_v14 = vld [vmem:[#allocation2 + $0x2] sm:$0xff] }
 0x491   : > { %v3403_v24 = vsel %vm9468_vm0, %v3367_v12, %v9431_v30  ;;  %v3214_v42 = vsel %vm3213_vm1, 1, %v6139_v62  ;;  %vm3260_vm3 = vcmp.ne.s32.totalorder %v3138_v9, 0  ;;  %v3166_v31 = vmul.u32 18, %v3165_v51 }
 0x492   : > { %v3545_v61 = vsel %vm3437_vm10, %v2140_v11, 0.0  ;;  %v3841_v45 = vld [vmem:[#allocation2 + $0xee] sm:$0xff]  ;;  %vm3217_vm7 = vc.u32 %v3215_v2, %v3211_v59  ;;  %v3216_v32 = vadd.s32 %v3214_v42, %v3208_v28  ;;  %vm3296_vm4 = vcmp.lt.s32.totalorder %v3138_v9, 0  ;;  %v9518_v59 = vld [vmem:[#allocation2 + $0x1a] sm:$0xff] }
 0x493   : > { %3585 = vst.msk [vmem:[#allocation2 + $0xfb] sm:$0xff] %vm1827_vm9, %v3545_v61  ;;  %5550 = vmatmul.msk.f32.gmra.mxu3 %vm1827_vm9, %v3841_v45  ;;  %v3662_v26 = vld [vmem:[#allocation2 + $0xf1] sm:$0xff]  ;;  %v3218_v25 = vsel %vm3217_vm7, 1, %v6139_v62  ;;  %v3193_v16 = vadd.s32 %v3192_v17, %v3183_v60  ;;  %v3210_v20 = vshrl.u32 %v3206_v56, 16  ;;  %vm3439_vm5 = vcmp.lt.s32.totalorder %v3403_v24, 16  ;;  %vm9485_vm6 = vmand %vm3296_vm4, %vm3260_vm3 }
 0x494   : > { %v3220_v30 = vadd.s32 %v3218_v25, %v3216_v32  ;;  %v3368_v11 = vadd.s32 18, %v3138_v9  ;;  %v5673_v22 = vpack.i.bf16 %v3669_v8, %v3668_v14  ;;  %v3167_v62 = vsub.s32 %v9379_v29, %v3166_v31  ;;  %v9516_v28 = vld [vmem:[#allocation2 + $0x6a] sm:$0xff]  ;;  %v9526_v17 = vld [vmem:[#allocation2 + $0x12] sm:$0xff] }
 0x495   : > { %v2093_v15 = vpop.f32.mrf.mxu0  ;;  %v3194_v54 = vshrl.u32 %v3193_v16, 4  ;;  %v3212_v61 = vshrl.u32 %v3207_v35, 16  ;;  %v5678_v24 = vpack.i.bf16 %v9518_v59, %v9526_v17  ;;  %v9548_v8 = vld [vmem:[#allocation2 + $0x92] sm:$0xff]  ;;  %v9550_v16 = vld [vmem:[#allocation2 + $0x4a] sm:$0xff] }
 0x496   : > { %v2094_v19 = vadd.f32 %v9367_v43, %v2093_v15  ;;  %v3221_v45 = vadd.s32 %v3220_v30, %v3210_v20  ;;  %v3404_v48 = vsel %vm9485_vm6, %v3368_v11, %v3138_v9  ;;  %vm3261_vm10 = vcmp.ne.s32.totalorder %v3167_v62, 0  ;;  %v9505_v35 = vpop.f32.mrf.mxu3  ;;  %v9574_v15 = vld [vmem:[#allocation2 + $0x22] sm:$0xff]  ;;  %v9626_v14 = vld [vmem:[#allocation2 + $0xb2] sm:$0xff] }
 0x497   : > { %vm3297_vm11 = vcmp.lt.s32.totalorder %v3167_v62, 0  ;;  %v3195_v29 = vmul.u32 18, %v3194_v54  ;;  %vm3440_vm8 = vcmp.lt.s32.totalorder %v3404_v48, 16  ;;  %v3369_v0 = vadd.s32 18, %v3167_v62 }
 0x498   : > { %v2141_v40 = vmax.f32 %v2094_v19, 0.0  ;;  %v3222_v7 = vadd.s32 %v3221_v45, %v3212_v61  ;;  %vm9498_vm12 = vmand %vm3297_vm11, %vm3261_vm10  ;;  %vm4684_vm6 = vcmask 523264   ;;  %vm4721_vm10 = vcmask 785408  }
 0x499   : > { %v3196_v56 = vsub.s32 %v9411_v33, %v3195_v29  ;;  %v3405_v9 = vsel %vm9498_vm12, %v3369_v0, %v3167_v62  ;;  %v9556_v62 = vld [vmem:[#allocation2 + $0x42] sm:$0xff]  ;;  %v9570_v29 = vld [vmem:[#allocation2 + $0x7a] sm:$0xff]  ;;  %vm3594_vm11 = vcmask 258048  }
 0x49a   : > { %v3546_v63 = vsel %vm3438_vm15, %v2141_v40, 0.0  ;;  %v3842_v44 = vld [vmem:[#allocation2 + $0xf6] sm:$0xff]  ;;  %v3223_v38 = vshrl.u32 %v3222_v7, 4  ;;  %v5688_v40 = vpack.i.bf16 %v9496_v34, %v9502_v18  ;;  %vm3441_vm15 = vcmp.lt.s32.totalorder %v3405_v9, 16  ;;  %v9572_v0 = vld [vmem:[#allocation2 + $0xc2] sm:$0xff] }
 0x49b   : > { %v3663_v23 = vld [vmem:[#allocation2 + $0xf9] sm:$0xff]  ;;  %3586 = vst.msk [vmem:[#allocation2 + $0x103] sm:$0xff] %vm1827_vm9, %v3546_v63  ;;  %5551 = vmatmul.msk.f32.gmra.mxu3 %vm1827_vm9, %v3842_v44  ;;  %vm3262_vm13 = vcmp.ne.s32.totalorder %v3196_v56, 0  ;;  %vm3298_vm14 = vcmp.lt.s32.totalorder %v3196_v56, 0  ;;  %v3370_v60 = vadd.s32 18, %v3196_v56  ;;  %v3744_v9 = vld [vmem:[#allocation2 + $0x24] sm:$0xff] }
 0x49c   : > { %v5658_v50 = vpack.i.bf16 %v3663_v23, %v3662_v26  ;;  %v3224_v10 = vmul.u32 18, %v3223_v38  ;;  %vm9520_vm0 = vmand %vm3298_vm14, %vm3262_vm13  ;;  %v9524_v23 = vld [vmem:[#allocation2 + $0x62] sm:$0xff]  ;;  %v9606_v63 = vld [vmem:[#allocation2 + $0x8a] sm:$0xff] }
 0x49d   : > { %v2096_v13 = vpop.f32.mrf.mxu0  ;;  %v3406_v42 = vsel %vm9520_vm0, %v3370_v60, %v3196_v56  ;;  %v9588_v56 = vld [vmem:[#allocation2 + $0x5a] sm:$0xff] }
 0x49e   : > { %5659 = vrot.lane.b32.xlu0 %v5658_v50, %s6138_s7  ;;  %v2097_v57 = vadd.f32 %v9367_v43, %v2096_v13  ;;  %v3225_v2 = vsub.s32 %v9444_v5, %v3224_v10  ;;  %v5703_v50 = vpack.i.bf16 %v9516_v28, %v9524_v23  ;;  %v9537_v13 = vpop.f32.mrf.mxu3  ;;  %vm3442_vm3 = vcmp.lt.s32.totalorder %v3406_v42, 16  ;;  %v9617_v42 = vld [vmem:[#allocation2 + $0xd2] sm:$0xff] }
 0x4a0   : > { %v2142_v55 = vmax.f32 %v2097_v57, 0.0  ;;  %vm3263_vm1 = vcmp.ne.s32.totalorder %v3225_v2, 0  ;;  %vm3299_vm7 = vcmp.lt.s32.totalorder %v3225_v2, 0  ;;  %v3371_v25 = vadd.s32 18, %v3225_v2  ;;  %v9542_v57 = vld [vmem:[#allocation2 + $0x9a] sm:$0xff] }
 0x4a1   : > { %vm9544_vm4 = vmand %vm3299_vm7, %vm3263_vm1  ;;  %v5718_v49 = vpack.i.bf16 %v9542_v57, %v9548_v8 }
 0x4a2   : > { %v3547_v37 = vsel %vm3439_vm5, %v2142_v55, 0.0  ;;  %v3843_v27 = vld [vmem:[#allocation2 + $0xfe] sm:$0xff] }
 0x4a3   : > { %3587 = vst.msk [vmem:[#allocation2 + $0x10b] sm:$0xff] %vm1827_vm9, %v3547_v37  ;;  %5552 = vmatmul.msk.f32.gmra.mxu3 %vm1827_vm9, %v3843_v27  ;;  %v3664_v21 = vld [vmem:[#allocation2 + $0x101] sm:$0xff]  ;;  %v3407_v37 = vsel %vm9544_vm4, %v3371_v25, %v3225_v2  ;;  %v5693_v27 = vpack.i.bf16 %v9550_v16, %v9556_v62 }
 0x4a4   : > { %vm3443_vm5 = vcmp.lt.s32.totalorder %v3407_v37, 16  ;;  %v9610_v2 = vld [vmem:[#allocation2 + $0x82] sm:$0xff]  ;;  %v3742_v37 = vld [vmem:[#allocation2 + $0x14] sm:$0xff] }
 0x4a5   : > { %v2099_v1 = vpop.f32.mrf.mxu0  ;;  %v3780_v25 = vld [vmem:[#allocation2 + $0x25] sm:$0xff] }
 0x4a6   : > { %5674 = vrot.lane.b32.xlu0 %v5673_v22, %s6141_s10  ;;  %v2100_v36 = vadd.f32 %v9367_v43, %v2099_v1  ;;  %v9566_v45 = vpop.f32.mrf.mxu3  ;;  %v9568_v1 = vld [vmem:[#allocation2 + $0xca] sm:$0xff] }
 0x4a7   : > { %10981 = vst [vmem:[#allocation57_spill] sm:$0xff] %v9566_v45 }
 0x4a8   : > { %v2143_v58 = vmax.f32 %v2100_v36, 0.0  ;;  %v3673_v36 = vld [vmem:[#allocation2 + $0x2a] sm:$0xff] }
 0x4aa   : > { %v3548_v39 = vsel %vm3440_vm8, %v2143_v58, 0.0  ;;  %v3844_v19 = vld [vmem:[#allocation2 + $0x106] sm:$0xff] }
 0x4ab   : > { %v3665_v52 = vld [vmem:[#allocation2 + $0x109] sm:$0xff]  ;;  %3588 = vst.msk [vmem:[#allocation2 + $0x113] sm:$0xff] %vm1827_vm9, %v3548_v39  ;;  %5553 = vmatmul.msk.f32.gmra.mxu3 %vm1827_vm9, %v3844_v19  ;;  %v5683_v39 = vpack.i.bf16 %v3673_v36, %v9574_v15  ;;  %v9581_v19 = vld [vmem:[#allocation2 + $0x72] sm:$0xff] }
 0x4ac   : > { %v5663_v12 = vpack.i.bf16 %v3665_v52, %v3664_v21  ;;  %v5708_v21 = vpack.i.bf16 %v9570_v29, %v9581_v19  ;;  %v3745_v52 = vld [vmem:[#allocation2 + $0x2c] sm:$0xff] }
 0x4ad   : > { %v2102_v47 = vpop.f32.mrf.mxu0 }
 0x4ae   : > { %5689 = vrot.lane.b32.xlu0 %v5688_v40, %s6141_s10  ;;  %5664 = vrot.lane.b32.xlu1 %v5663_v12, %s6138_s7  ;;  %v2103_v33 = vadd.f32 %v9367_v43, %v2102_v47  ;;  %v9590_v38 = vpop.f32.mrf.mxu3  ;;  %v9592_v40 = vld [vmem:[#allocation2 + $0xaa] sm:$0xff]  ;;  %v9594_v47 = vld [vmem:[#allocation2 + $0x52] sm:$0xff] }
 0x4af   : > { %10982 = vst [vmem:[#allocation3_spill] sm:$0xff] %v9590_v38  ;;  %v5698_v10 = vpack.i.bf16 %v9588_v56, %v9594_v47 }
 0x4b0   : > { %v2144_v51 = vmax.f32 %v2103_v33, 0.0  ;;  %v5748_v33 = vpack.i.bf16 %v3745_v52, %v3744_v9  ;;  %v3782_v52 = vld [vmem:[#allocation2 + $0x35] sm:$0xff] }
 0x4b1   : > { %v5773_v9 = vpack.i.bf16 %v9574_v15, %v3782_v52  ;;  %v3788_v52 = vld [vmem:[#allocation2 + $0x65] sm:$0xff] }
 0x4b2   : > { %v3549_v44 = vsel %vm3441_vm15, %v2144_v51, 0.0  ;;  %v3845_v26 = vld [vmem:[#allocation2 + $0x10e] sm:$0xff]  ;;  %v9599_v51 = vld [vmem:[#allocation2 + $0xa2] sm:$0xff] }
 0x4b3   : > { %3589 = vst.msk [vmem:[#allocation2 + $0x11b] sm:$0xff] %vm1827_vm9, %v3549_v44  ;;  %5554 = vmatmul.msk.f32.gmra.mxu3 %vm1827_vm9, %v3845_v26  ;;  %v3666_v55 = vld [vmem:[#allocation2 + $0x111] sm:$0xff]  ;;  %v5723_v60 = vpack.i.bf16 %v9592_v40, %v9599_v51  ;;  %v9608_v44 = vld [vmem:[#allocation2 + $0xda] sm:$0xff] }
 0x4b5   : > { %v2105_v31 = vpop.f32.mrf.mxu0 }
 0x4b6   : > { %5704 = vrot.lane.b32.xlu0 %v5703_v50, %s6141_s10  ;;  %5679 = vrot.lane.b32.xlu1 %v5678_v24, %s6141_s10  ;;  %v2106_v5 = vadd.f32 %v9367_v43, %v2105_v31  ;;  %v9612_v50 = vpop.f32.mrf.mxu3  ;;  %v5713_v24 = vpack.i.bf16 %v9606_v63, %v9610_v2  ;;  %v5738_v31 = vpack.i.bf16 %v9608_v44, %v9617_v42 }
 0x4b7   : > { %10983 = vst [vmem:[#allocation4_spill] sm:$0xff] %v9612_v50 }
 0x4b8   : > { %v2145_v32 = vmax.f32 %v2106_v5, 0.0  ;;  %v3783_v5 = vld [vmem:[#allocation2 + $0x3d] sm:$0xff] }
 0x4ba   : > { %v3550_v20 = vsel %vm3442_vm3, %v2145_v32, 0.0  ;;  %v3846_v30 = vld [vmem:[#allocation2 + $0x116] sm:$0xff] }
 0x4bb   : > { %v3667_v11 = vld [vmem:[#allocation2 + $0x119] sm:$0xff]  ;;  %3590 = vst.msk [vmem:[#allocation2 + $0x123] sm:$0xff] %vm1827_vm9, %v3550_v20  ;;  %5555 = vmatmul.msk.f32.gmra.mxu3 %vm1827_vm9, %v3846_v30  ;;  %v5778_v20 = vpack.i.bf16 %v3673_v36, %v3783_v5  ;;  %v9635_v36 = vpop.permute.xlu0 %5584  ;;  %v3748_v5 = vld [vmem:[#allocation2 + $0x44] sm:$0xff] }
 0x4bc   : > { %v5668_v22 = vpack.i.bf16 %v3667_v11, %v3666_v55  ;;  %v9624_v32 = vld [vmem:[#allocation2 + $0xba] sm:$0xff]  ;;  %v5753_v55 = vpack.i.bf16 %v9526_v17, %v3780_v25  ;;  %v3784_v11 = vld [vmem:[#allocation2 + $0x45] sm:$0xff] }
 0x4bd   : > { %v2108_v54 = vpop.f32.mrf.mxu0  ;;  %v5728_v30 = vpack.i.bf16 %v9624_v32, %v9626_v14  ;;  %v3751_v17 = vld [vmem:[#allocation2 + $0x5c] sm:$0xff] }
 0x4be   : > { %5719 = vrot.lane.b32.xlu0 %v5718_v49, %s6141_s10  ;;  %5669 = vrot.lane.b32.xlu2 %v5668_v22, %s6138_s7  ;;  %v2109_v61 = vadd.f32 %v9367_v43, %v2108_v54  ;;  %v5733_v43 = vpack.i.bf16 %v9568_v1, %v9572_v0  ;;  %v3743_v49 = vld [vmem:[#allocation2 + $0x1c] sm:$0xff] }
 0x4bf   : > { %5694 = vrot.lane.b32.xlu1 %v5693_v27, %s6141_s10  ;;  %v3747_v22 = vld [vmem:[#allocation2 + $0x3c] sm:$0xff]  ;;  %v5793_v27 = vpack.i.bf16 %v9502_v18, %v3784_v11  ;;  %v5743_v54 = vpack.i.bf16 %v3743_v49, %v3742_v37  ;;  %v9644_v18 = vpop.permute.xlu2 %5594  ;;  %v3753_v49 = vld [vmem:[#allocation2 + $0x6c] sm:$0xff] }
 0x4c0   : > { %v2146_v48 = vmax.f32 %v2109_v61, 0.0  ;;  %v3746_v61 = vld [vmem:[#allocation2 + $0x34] sm:$0xff] }
 0x4c1   : > { %v3790_v11 = vld [vmem:[#allocation2 + $0x75] sm:$0xff] }
 0x4c2   : > { %v3551_v7 = vsel %vm3443_vm5, %v2146_v48, 0.0  ;;  %v3847_v58 = vld [vmem:[#allocation2 + $0x11e] sm:$0xff]  ;;  %v5768_v48 = vpack.i.bf16 %v3747_v22, %v3746_v61  ;;  %v5853_v22 = vpack.i.bf16 %v9524_v23, %v3790_v11  ;;  %v3757_v61 = vld [vmem:[#allocation2 + $0x8c] sm:$0xff] }
 0x4c3   : > { %3591 = vst.msk [vmem:[#allocation2 + $0x12b] sm:$0xff] %vm1827_vm9, %v3551_v7  ;;  %5556 = vmatmul.msk.f32.gmra.mxu3 %vm1827_vm9, %v3847_v58  ;;  %v3781_v7 = vld [vmem:[#allocation2 + $0x2d] sm:$0xff] }
 0x4c4   : > { %v3750_v58 = vld [vmem:[#allocation2 + $0x54] sm:$0xff]  ;;  %v4879_v11 = vld [vmem:[%s10475_s3 + $0x68] sm:$0xff] }
 0x4c6   : > { %5734 = vrot.lane.b32.xlu0 %v5733_v43, %s6141_s10  ;;  %5684 = vrot.lane.b32.xlu2 %v5683_v39, %s6141_s10  ;;  %v5808_v43 = vpack.i.bf16 %v3751_v17, %v3750_v58  ;;  %v5758_v39 = vpack.i.bf16 %v9518_v59, %v3781_v7  ;;  %v3756_v17 = vld [vmem:[#allocation2 + $0x84] sm:$0xff] }
 0x4c7   : > { %5709 = vrot.lane.b32.xlu1 %v5708_v21, %s6141_s10  ;;  %v9646_v21 = vpop.permute.xlu0 %5599  ;;  %v9653_v59 = vpop.permute.xlu2 %5609  ;;  %v5868_v7 = vpack.i.bf16 %v3757_v61, %v3756_v17  ;;  %v4877_v17 = vld [vmem:[%s10475_s3 + $0x58] sm:$0xff] }
 0x4ca   : > { %v3848_v12 = vld [vmem:[#allocation2 + $0x126] sm:$0xff]  ;;  %v3849_v26 = vld [vmem:[#allocation2 + $0x12e] sm:$0xff] }
 0x4cb   : > { %5557 = vmatmul.msk.f32.gmra.mxu3 %vm1827_vm9, %v3848_v12  ;;  %v3785_v12 = vld [vmem:[#allocation2 + $0x4d] sm:$0xff] }
 0x4ce   : > { %5749 = vrot.lane.b32.xlu0 %v5748_v33, %s6141_s10  ;;  %5699 = vrot.lane.b32.xlu2 %v5698_v10, %s6141_s10 }
 0x4cf   : > { %5724 = vrot.lane.b32.xlu1 %v5723_v60, %s6141_s10  ;;  %v9655_v10 = vpop.permute.xlu0 %5614  ;;  %v9657_v60 = vpop.permute.xlu1 %5589 }
 0x4d3   : > { %5558 = vmatmul.msk.f32.gmra.mxu3 %vm1827_vm9, %v3849_v26  ;;  %v3789_v26 = vld [vmem:[#allocation2 + $0x6d] sm:$0xff] }
 0x4d4   : > { %v5838_v15 = vpack.i.bf16 %v9588_v56, %v3789_v26  ;;  %v3752_v56 = vld [vmem:[#allocation2 + $0x64] sm:$0xff] }
 0x4d5   : > { %v5828_v37 = vpack.i.bf16 %v3753_v49, %v3752_v56  ;;  %v4895_v49 = vld [vmem:[%s10475_s3 + $0xe8] sm:$0xff]  ;;  %v3754_v56 = vld [vmem:[#allocation2 + $0x74] sm:$0xff] }
 0x4d6   : > { %5764 = vrot.lane.b32.xlu0 %v5748_v33, %s6138_s7  ;;  %5714 = vrot.lane.b32.xlu2 %v5713_v24, %s6141_s10  ;;  %v5798_v33 = vpack.i.bf16 %v9496_v34, %v3785_v12  ;;  %v3749_v24 = vld [vmem:[#allocation2 + $0x4c] sm:$0xff]  ;;  %v3791_v12 = vld [vmem:[#allocation2 + $0x7d] sm:$0xff] }
 0x4d7   : > { %5739 = vrot.lane.b32.xlu1 %v5738_v31, %s6141_s10  ;;  %v3786_v31 = vld [vmem:[#allocation2 + $0x55] sm:$0xff]  ;;  %v5788_v25 = vpack.i.bf16 %v3749_v24, %v3748_v5  ;;  %v5858_v26 = vpack.i.bf16 %v9516_v28, %v3791_v12  ;;  %v3795_v28 = vld [vmem:[#allocation2 + $0x9d] sm:$0xff] }
 0x4d8   : > { %v5813_v34 = vpack.i.bf16 %v9556_v62, %v3786_v31  ;;  %v4880_v24 = vld [vmem:[%s10475_s3 + $0x70] sm:$0xff]  ;;  %v5898_v61 = vpack.i.bf16 %v9606_v63, %v3795_v28 }
 0x4d9   : > { %v4896_v31 = vld [vmem:[%s10475_s3 + $0xf0] sm:$0xff] }
 0x4da   : > { %v4876_v63 = vld [vmem:[%s10475_s3 + $0x50] sm:$0xff] }
 0x4de   : > { %5779 = vrot.lane.b32.xlu0 %v5778_v20, %s6142_s11  ;;  %5729 = vrot.lane.b32.xlu2 %v5728_v30, %s6141_s10  ;;  %v9664_v20 = vpop.permute.xlu2 %5624  ;;  %v9666_v30 = vpop.permute.xlu0 %5629 }
 0x4df   : > { %5754 = vrot.lane.b32.xlu1 %v5753_v55, %s6142_s11  ;;  %v9668_v55 = vpop.permute.xlu1 %5604 }
 0x4e6   : > { %5794 = vrot.lane.b32.xlu0 %v5793_v27, %s6142_s11  ;;  %5744 = vrot.lane.b32.xlu2 %v5743_v54, %s6138_s7  ;;  %v9674_v62 = vpop.permute.xlu2 %5639  ;;  %v9676_v27 = vpop.permute.xlu0 %5644 }
 0x4e7   : > { %5769 = vrot.lane.b32.xlu1 %v5768_v48, %s6141_s10  ;;  %v9678_v54 = vpop.permute.xlu1 %5619 }
 0x4ee   : > { %5809 = vrot.lane.b32.xlu0 %v5808_v43, %s6141_s10  ;;  %5759 = vrot.lane.b32.xlu2 %v5758_v39, %s6142_s11  ;;  %v9684_v58 = vpop.permute.xlu2 %5654 }
 0x4ef   : > { %5784 = vrot.lane.b32.xlu1 %v5768_v48, %s6138_s7  ;;  %v3787_v48 = vld [vmem:[#allocation2 + $0x5d] sm:$0xff]  ;;  %10984 = vst [vmem:[#allocation5_spill] sm:$0xff] %v9684_v58  ;;  %v9688_v39 = vpop.permute.xlu1 %5634 }
 0x4f0   : > { %v5818_v23 = vpack.i.bf16 %v9550_v16, %v3787_v48  ;;  %v4897_v16 = vld [vmem:[%s10475_s3 + $0xf8] sm:$0xff] }
 0x4f1   : > { %5139 = vmatpush.msra.mxu2 %v4897_v16  ;;  %v3759_v16 = vld [vmem:[#allocation2 + $0x9c] sm:$0xff] }
 0x4f3   : > { %5140 = vmatpush.msra.mxu2 %v4896_v31 }
 0x4f5   : > { %5141 = vmatpush.msra.mxu2 %v4895_v49  ;;  %v4873_v49 = vld [vmem:[%s10475_s3 + $0x38] sm:$0xff] }
 0x4f6   : > { %5824 = vrot.lane.b32.xlu0 %v5808_v43, %s6138_s7  ;;  %5774 = vrot.lane.b32.xlu2 %v5773_v9, %s6142_s11  ;;  %v4881_v9 = vld [vmem:[%s10475_s3 + $0x78] sm:$0xff] }
 0x4f7   : > { %5799 = vrot.lane.b32.xlu1 %v5798_v33, %s6142_s11  ;;  %5014 = vmatpush.msra.mxu1 %v4881_v9  ;;  %v5833_v33 = vpack.i.bf16 %v9594_v47, %v3788_v52  ;;  %v9709_v47 = vpop.permute.xlu1 %5649  ;;  %v3796_v9 = vld [vmem:[#allocation2 + $0xa5] sm:$0xff] }
 0x4f8   : > { %v5913_v28 = vpack.i.bf16 %v9548_v8, %v3796_v9  ;;  %v4889_v8 = vld [vmem:[%s10475_s3 + $0xb8] sm:$0xff] }
 0x4f9   : > { %5015 = vmatpush.msra.mxu1 %v4880_v24  ;;  %v4874_v24 = vld [vmem:[%s10475_s3 + $0x40] sm:$0xff] }
 0x4fb   : > { %5016 = vmatpush.msra.mxu1 %v4879_v11 }
 0x4fe   : > { %5839 = vrot.lane.b32.xlu0 %v5838_v15, %s6142_s11  ;;  %5789 = vrot.lane.b32.xlu2 %v5788_v25, %s6141_s10  ;;  %v3755_v15 = vld [vmem:[#allocation2 + $0x7c] sm:$0xff] }
 0x4ff   : > { %5814 = vrot.lane.b32.xlu1 %v5813_v34, %s6142_s11  ;;  %v5848_v48 = vpack.i.bf16 %v3755_v15, %v3754_v56  ;;  %v3758_v15 = vld [vmem:[#allocation2 + $0x94] sm:$0xff] }
 0x500   : > { %v5888_v11 = vpack.i.bf16 %v3759_v16, %v3758_v15  ;;  %v4888_v56 = vld [vmem:[%s10475_s3 + $0xb0] sm:$0xff]  ;;  %v4870_v16 = vld [vmem:[%s10475_s3 + $0x20] sm:$0xff] }
 0x506   : > { %5854 = vrot.lane.b32.xlu0 %v5853_v22, %s6142_s11  ;;  %5804 = vrot.lane.b32.xlu2 %v5788_v25, %s6138_s7  ;;  %v3792_v25 = vld [vmem:[#allocation2 + $0x85] sm:$0xff] }
 0x507   : > { %5829 = vrot.lane.b32.xlu1 %v5828_v37, %s6141_s10  ;;  %v4878_v22 = vld [vmem:[%s10475_s3 + $0x60] sm:$0xff] }
 0x508   : > { %5017 = vmatpush.msra.mxu1 %v4878_v22  ;;  %v4872_v22 = vld [vmem:[%s10475_s3 + $0x30] sm:$0xff] }
 0x50a   : > { %5018 = vmatpush.msra.mxu1 %v4877_v17  ;;  %v4871_v17 = vld [vmem:[%s10475_s3 + $0x28] sm:$0xff] }
 0x50c   : > { %5019 = vmatpush.msra.mxu1 %v4876_v63  ;;  %v3762_v63 = vld [vmem:[#allocation2 + $0xb4] sm:$0xff] }
 0x50e   : > { %5869 = vrot.lane.b32.xlu0 %v5868_v7, %s6141_s10  ;;  %5819 = vrot.lane.b32.xlu2 %v5818_v23, %s6142_s11  ;;  %v4893_v23 = vld [vmem:[%s10475_s3 + $0xd8] sm:$0xff] }
 0x50f   : > { %5844 = vrot.lane.b32.xlu1 %v5828_v37, %s6138_s7  ;;  %v4894_v37 = vld [vmem:[%s10475_s3 + $0xe0] sm:$0xff] }
 0x510   : > { %v9686_v43 = vpop.permute.xlu0 %5659  ;;  %5142 = vmatpush.msra.mxu2 %v4894_v37 }
 0x511   : > { %10985 = vst [vmem:[#allocation88_spill] sm:$0xff] %v9686_v43  ;;  %v3803_v43 = vld [vmem:[#allocation2 + $0xdd] sm:$0xff] }
 0x512   : > { %5143 = vmatpush.msra.mxu2 %v4893_v23 }
 0x516   : > { %5884 = vrot.lane.b32.xlu0 %v5868_v7, %s6138_s7  ;;  %5834 = vrot.lane.b32.xlu2 %v5833_v33, %s6142_s11  ;;  %v5873_v7 = vpack.i.bf16 %v9581_v19, %v3792_v25  ;;  %v4892_v19 = vld [vmem:[%s10475_s3 + $0xd0] sm:$0xff]  ;;  %v4875_v33 = vld [vmem:[%s10475_s3 + $0x48] sm:$0xff] }
 0x517   : > { %5859 = vrot.lane.b32.xlu1 %v5858_v26, %s6142_s11  ;;  %5144 = vmatpush.msra.mxu2 %v4892_v19  ;;  %v4891_v26 = vld [vmem:[%s10475_s3 + $0xc8] sm:$0xff]  ;;  %v4890_v25 = vld [vmem:[%s10475_s3 + $0xc0] sm:$0xff] }
 0x518   : > { %v9707_v5 = vpop.permute.xlu2 %5669  ;;  %v9711_v34 = vpop.permute.xlu0 %5674  ;;  %5020 = vmatpush.msra.mxu1 %v4875_v33  ;;  %v4886_v33 = vld [vmem:[%s10475_s3 + $0xa0] sm:$0xff] }
 0x519   : > { %10986 = vst [vmem:[#allocation6_spill] sm:$0xff] %v9707_v5  ;;  %5145 = vmatpush.msra.mxu2 %v4891_v26 }
 0x51a   : > { %5021 = vmatpush.msra.mxu1 %v4874_v24  ;;  %v4885_v24 = vld [vmem:[%s10475_s3 + $0x98] sm:$0xff] }
 0x51b   : > { %5146 = vmatpush.msra.mxu2 %v4890_v25  ;;  %v3794_v25 = vld [vmem:[#allocation2 + $0x95] sm:$0xff] }
 0x51c   : > { %5022 = vmatpush.msra.mxu1 %v4873_v49  ;;  %v4884_v49 = vld [vmem:[%s10475_s3 + $0x90] sm:$0xff] }
 0x51d   : > { %5147 = vmatpush.msra.mxu2 %v4889_v8  ;;  %v3797_v8 = vld [vmem:[#allocation2 + $0xad] sm:$0xff] }
 0x51e   : > { %5899 = vrot.lane.b32.xlu0 %v5898_v61, %s6142_s11  ;;  %5849 = vrot.lane.b32.xlu2 %v5848_v48, %s6141_s10  ;;  %v3763_v61 = vld [vmem:[#allocation2 + $0xbc] sm:$0xff] }
 0x51f   : > { %5874 = vrot.lane.b32.xlu1 %v5873_v7, %s6142_s11  ;;  %5023 = vmatpush.msra.mxu1 %v4872_v22  ;;  %v4887_v7 = vld [vmem:[%s10475_s3 + $0xa8] sm:$0xff]  ;;  %v5928_v19 = vpack.i.bf16 %v3763_v61, %v3762_v63  ;;  %v5893_v22 = vpack.i.bf16 %v9610_v2, %v3794_v25  ;;  %v4882_v2 = vld [vmem:[%s10475_s3 + $0x80] sm:$0xff] }
 0x520   : > { %v9742_v52 = vpop.permute.xlu2 %5684  ;;  %v9744_v12 = vpop.permute.xlu1 %5664  ;;  %5148 = vmatpush.msra.mxu2 %v4888_v56  ;;  %v4883_v56 = vld [vmem:[%s10475_s3 + $0x88] sm:$0xff] }
 0x521   : > { %10987 = vst [vmem:[#allocation7_spill] sm:$0xff] %v9744_v12  ;;  %v9755_v31 = vpop.permute.xlu0 %5689  ;;  %5024 = vmatpush.msra.mxu1 %v4871_v17  ;;  %v4866_v17 = vld [vmem:[%s10475_s3] sm:$0xff]  ;;  %v3801_v63 = vld [vmem:[#allocation2 + $0xcd] sm:$0xff] }
 0x522   : > { %5149 = vmatpush.msra.mxu2 %v4887_v7 }
 0x523   : > { %5025 = vmatpush.msra.mxu1 %v4870_v16  ;;  %v3798_v16 = vld [vmem:[#allocation2 + $0xb5] sm:$0xff] }
 0x524   : > { %5150 = vmatpush.msra.mxu2 %v4886_v33  ;;  %v3760_v33 = vld [vmem:[#allocation2 + $0xa4] sm:$0xff] }
 0x526   : > { %5914 = vrot.lane.b32.xlu0 %v5913_v28, %s6142_s11  ;;  %5864 = vrot.lane.b32.xlu2 %v5848_v48, %s6138_s7  ;;  %v3793_v48 = vld [vmem:[#allocation2 + $0x8d] sm:$0xff] }
 0x527   : > { %5889 = vrot.lane.b32.xlu1 %v5888_v11, %s6141_s10  ;;  %v5878_v9 = vpack.i.bf16 %v9570_v29, %v3793_v48  ;;  %v4869_v29 = vld [vmem:[%s10475_s3 + $0x18] sm:$0xff]  ;;  %v4868_v28 = vld [vmem:[%s10475_s3 + $0x10] sm:$0xff]  ;;  %5151 = vmatpush.msra.mxu2 %v4885_v24  ;;  %v5918_v48 = vpack.i.bf16 %v9542_v57, %v3797_v8  ;;  %v5933_v24 = vpack.i.bf16 %v9599_v51, %v3798_v16 }
 0x528   : > { %v9776_v37 = vpop.permute.xlu1 %5679  ;;  %v9784_v23 = vpop.permute.xlu2 %5699  ;;  %5026 = vmatpush.msra.mxu1 %v4869_v29 }
 0x529   : > { %v9793_v26 = vpop.permute.xlu0 %5704  ;;  %5152 = vmatpush.msra.mxu2 %v4884_v49  ;;  %v3802_v49 = vld [vmem:[#allocation2 + $0xd5] sm:$0xff] }
 0x52a   : > { %5027 = vmatpush.msra.mxu1 %v4868_v28 }
 0x52b   : > { %5153 = vmatpush.msra.mxu2 %v4883_v56 }
 0x52d   : > { %5154 = vmatpush.msra.mxu2 %v4882_v2  ;;  %v3799_v2 = vld [vmem:[#allocation2 + $0xbd] sm:$0xff] }
 0x52e   : > { %5929 = vrot.lane.b32.xlu0 %v5928_v19, %s6141_s10  ;;  %5879 = vrot.lane.b32.xlu2 %v5878_v9, %s6142_s11  ;;  %v3761_v9 = vld [vmem:[#allocation2 + $0xac] sm:$0xff] }
 0x52f   : > { %5904 = vrot.lane.b32.xlu1 %v5888_v11, %s6138_s7  ;;  %v4867_v11 = vld [vmem:[%s10475_s3 + $0x8] sm:$0xff]  ;;  %v5908_v29 = vpack.i.bf16 %v3761_v9, %v3760_v33 }
 0x530   : > { %v9819_v61 = vpop.permute.xlu2 %5714  ;;  %5028 = vmatpush.msra.mxu1 %v4867_v11  ;;  %v3765_v11 = vld [vmem:[#allocation2 + $0xcc] sm:$0xff] }
 0x531   : > { %v9807_v15 = vpop.permute.xlu1 %5694  ;;  %v9831_v7 = vpop.permute.xlu0 %5719 }
 0x532   : > { %5029 = vmatpush.msra.mxu1 %v4866_v17  ;;  %v3769_v17 = vld [vmem:[#allocation2 + $0xec] sm:$0xff] }
 0x536   : > { %5944 = vrot.lane.b32.xlu0 %v5928_v19, %s6138_s7  ;;  %5894 = vrot.lane.b32.xlu2 %v5893_v22, %s6142_s11  ;;  %v5958_v19 = vpack.i.bf16 %v9624_v32, %v3801_v63  ;;  %v5973_v22 = vpack.i.bf16 %v9572_v0, %v3802_v49  ;;  %v3764_v32 = vld [vmem:[#allocation2 + $0xc4] sm:$0xff]  ;;  %v5938_v0 = vpack.i.bf16 %v9592_v40, %v3799_v2  ;;  %v5676_v49 = vunpack.i.l.bf16 %v9711_v34 }
 0x537   : > { %5919 = vrot.lane.b32.xlu1 %v5918_v48, %s6142_s11  ;;  %v5948_v56 = vpack.i.bf16 %v3765_v11, %v3764_v32  ;;  %v3768_v63 = vld [vmem:[#allocation2 + $0xe4] sm:$0xff]  ;;  %v3706_v32 = vld [vmem:[#allocation2 + $0x13] sm:$0xff] }
 0x538   : > { %v9839_v28 = vpop.permute.xlu2 %5729  ;;  %v5988_v33 = vpack.i.bf16 %v3769_v17, %v3768_v63  ;;  %v3800_v17 = vld [vmem:[#allocation2 + $0xc5] sm:$0xff] }
 0x539   : > { %v9833_v57 = vpop.permute.xlu1 %5709  ;;  %v9844_v8 = vpop.permute.xlu0 %5734  ;;  %v3600_v2 = vld [vmem:[#allocation2 + $0x20] sm:$0xff] }
 0x53e   : > { %5959 = vrot.lane.b32.xlu0 %v5958_v19, %s6142_s11  ;;  %5909 = vrot.lane.b32.xlu2 %v5908_v29, %s6141_s10  ;;  %v5596_v19 = vunpack.i.l.bf16 %v9644_v18 }
 0x53f   : > { %5934 = vrot.lane.b32.xlu1 %v5933_v24, %s6142_s11  ;;  %v5586_v24 = vunpack.i.l.bf16 %v9635_v36 }
 0x540   : > { %v5745_v51 = vpop.permute.xlu2 %5744  ;;  %v4652_v3 = vsel %vm1827_vm9, %v3600_v2, %v5596_v19  ;;  %v5597_v2 = vunpack.i.h.bf16 %v9644_v18  ;;  %v3707_v18 = vld [vmem:[#allocation2 + $0x1b] sm:$0xff] }
 0x541   : > { %v9842_v25 = vpop.permute.xlu1 %5724  ;;  %v9852_v9 = vpop.permute.xlu0 %5749  ;;  %v5746_v16 = vunpack.i.l.bf16 %v5745_v51 }
 0x542   : > { %v5751_v11 = vunpack.i.l.bf16 %v9852_v9 }
 0x543   : > { %v4758_v40 = vsel %vm1827_vm9, %v3706_v32, %v5746_v16  ;;  %v5953_v16 = vpack.i.bf16 %v9626_v14, %v3800_v17  ;;  %v5747_v32 = vunpack.i.h.bf16 %v5745_v51  ;;  %v10988_v14 = vmov 0.0  }
 0x544   : > { %v4794_v38 = vsel %vm4684_vm6, %v4758_v40, %v5751_v11  ;;  %3595 = vst.msk [vmem:[#allocation2 + $0x143] sm:$0x1f] %vm3594_vm11, %v10988_v14  ;;  %v5591_v14 = vunpack.i.l.bf16 %v9657_v60 }
 0x546   : > { %5974 = vrot.lane.b32.xlu0 %v5973_v22, %s6142_s11  ;;  %5924 = vrot.lane.b32.xlu2 %v5908_v29, %s6138_s7  ;;  %v5686_v29 = vunpack.i.l.bf16 %v9742_v52  ;;  %v3596_v22 = vld [vmem:[#allocation2] sm:$0xff] }
 0x547   : > { %5949 = vrot.lane.b32.xlu1 %v5948_v56, %s6141_s10 }
 0x548   : > { %v9867_v58 = vsel %vm4684_vm6, %v4652_v3, %v5686_v29  ;;  %v5760_v50 = vpop.permute.xlu2 %5759  ;;  %v5978_v3 = vpack.i.bf16 %v9568_v1, %v3803_v43  ;;  %v5687_v29 = vunpack.i.h.bf16 %v9742_v52  ;;  %v3601_v52 = vld [vmem:[#allocation2 + $0x28] sm:$0xff] }
 0x549   : > { %v9850_v48 = vpop.permute.xlu1 %5739  ;;  %v5762_v1 = vunpack.i.h.bf16 %v5760_v50  ;;  %v5761_v43 = vunpack.i.l.bf16 %v5760_v50  ;;  %v9885_v51 = vpop.permute.xlu0 %5764 }
 0x54e   : > { %5989 = vrot.lane.b32.xlu0 %v5988_v33, %s6141_s10  ;;  %5939 = vrot.lane.b32.xlu2 %v5938_v0, %s6142_s11  ;;  %v4648_v0 = vsel %vm1827_vm9, %v3596_v22, %v5586_v24  ;;  %v5587_v24 = vunpack.i.h.bf16 %v9635_v36  ;;  %v4759_v36 = vsel %vm1827_vm9, %v3707_v18, %v5747_v32  ;;  %v3804_v22 = vld [vmem:[#allocation2 + $0xe5] sm:$0xff] }
 0x54f   : > { %5964 = vrot.lane.b32.xlu1 %v5948_v56, %s6138_s7  ;;  %v4685_v56 = vsel %vm4684_vm6, %v4648_v0, %v5676_v49  ;;  %v4653_v49 = vsel %vm1827_vm9, %v3601_v52, %v5597_v2  ;;  %v5601_v2 = vunpack.i.l.bf16 %v9646_v21 }
 0x550   : > { %v9892_v40 = vsel %vm4684_vm6, %v4653_v49, %v5687_v29  ;;  %v5993_v29 = vpack.i.bf16 %v9617_v42, %v3804_v22 }
 0x551   : > { %v5755_v63 = vpop.permute.xlu1 %5754  ;;  %v5780_v22 = vpop.permute.xlu0 %5779 }
 0x552   : > { %v5757_v5 = vunpack.i.h.bf16 %v5755_v63  ;;  %v5756_v12 = vunpack.i.l.bf16 %v5755_v63  ;;  %v9896_v63 = vld [vmem:[#allocation2 + $0xea] sm:$0xff] }
 0x554   : > { %v4722_v45 = vsel %vm4721_vm10, %v4685_v56, %v5757_v5  ;;  %v4830_v19 = vsel %vm4721_vm10, %v4794_v38, %v5756_v12  ;;  %v5677_v5 = vunpack.i.h.bf16 %v9711_v34  ;;  %v5752_v38 = vunpack.i.h.bf16 %v9852_v9  ;;  %v3767_v12 = vld [vmem:[#allocation2 + $0xdc] sm:$0xff]  ;;  %v3766_v9 = vld [vmem:[#allocation2 + $0xd4] sm:$0xff] }
 0x555   : > { %5030 = vmatmul.f32.vlgmr.msra.gmra.mxu1 %v4722_v45  ;;  %5155 = vmatmul.f32.vlgmr.msra.gmra.mxu2 %v4830_v19  ;;  %v3597_v45 = vld [vmem:[#allocation2 + $0x8] sm:$0xff]  ;;  %v5968_v0 = vpack.i.bf16 %v3767_v12, %v3766_v9  ;;  %v5766_v56 = vunpack.i.l.bf16 %v9885_v51 }
 0x556   : > { %6004 = vrot.lane.b32.xlu0 %v5988_v33, %s6138_s7  ;;  %5954 = vrot.lane.b32.xlu2 %v5953_v16, %s6142_s11  ;;  %v3807_v33 = vld [vmem:[#allocation2 + $0xfd] sm:$0xff]  ;;  %v4649_v34 = vsel %vm1827_vm9, %v3597_v45, %v5587_v24  ;;  %v4795_v17 = vsel %vm4684_vm6, %v4759_v36, %v5752_v38  ;;  %v5681_v38 = vunpack.i.l.bf16 %v9776_v37  ;;  %v3598_v36 = vld [vmem:[#allocation2 + $0x10] sm:$0xff]  ;;  %v3808_v12 = vld [vmem:[#allocation2 + $0x105] sm:$0xff] }
 0x557   : > { %5979 = vrot.lane.b32.xlu1 %v5978_v3, %s6142_s11  ;;  %v4686_v50 = vsel %vm4684_vm6, %v4649_v34, %v5677_v5  ;;  %v4831_v32 = vsel %vm4721_vm10, %v4795_v17, %v5761_v43  ;;  %v6018_v19 = vpack.i.bf16 %v9896_v63, %v3807_v33  ;;  %v5775_v3 = vpop.permute.xlu2 %5774  ;;  %v5691_v5 = vunpack.i.l.bf16 %v9755_v31  ;;  %v3708_v45 = vld [vmem:[#allocation2 + $0x23] sm:$0xff]  ;;  %v3602_v43 = vld [vmem:[#allocation2 + $0x30] sm:$0xff] }
 0x558   : > { %v4723_v16 = vsel %vm4721_vm10, %v4686_v50, %v5762_v1  ;;  %v5777_v18 = vunpack.i.h.bf16 %v5775_v3  ;;  %v4760_v1 = vsel %vm1827_vm9, %v3708_v45, %v5766_v56  ;;  %v4654_v52 = vsel %vm1827_vm9, %v3602_v43, %v5601_v2  ;;  %v3771_v34 = vld [vmem:[#allocation2 + $0xfc] sm:$0xff]  ;;  %v9919_v17 = vld [vmem:[#allocation2 + $0xf2] sm:$0xff] }
 0x559   : > { %v9888_v11 = vpop.permute.xlu1 %5769  ;;  %v5776_v33 = vunpack.i.l.bf16 %v5775_v3  ;;  %v4650_v49 = vsel %vm1827_vm9, %v3598_v36, %v5591_v14  ;;  %v9916_v9 = vsel %vm4684_vm6, %v4654_v52, %v5691_v5  ;;  %v5767_v56 = vunpack.i.h.bf16 %v9885_v51  ;;  %v3770_v2 = vld [vmem:[#allocation2 + $0xf4] sm:$0xff]  ;;  %v3709_v45 = vld [vmem:[#allocation2 + $0x2b] sm:$0xff] }
 0x55a   : > { %v5771_v24 = vunpack.i.l.bf16 %v9888_v11  ;;  %v4687_v50 = vsel %vm4684_vm6, %v4650_v49, %v5681_v38  ;;  %v5602_v3 = vunpack.i.h.bf16 %v9646_v21  ;;  %v5592_v14 = vunpack.i.h.bf16 %v9657_v60  ;;  %v3773_v60 = vld [vmem:[#allocation2 + $0x10c] sm:$0xff] }
 0x55b   : > { %v5692_v5 = vunpack.i.h.bf16 %v9755_v31  ;;  %v5682_v51 = vunpack.i.h.bf16 %v9776_v37  ;;  %v5782_v21 = vunpack.i.h.bf16 %v5780_v22  ;;  %v3805_v36 = vld [vmem:[#allocation2 + $0xed] sm:$0xff] }
 0x55c   : > { %v4796_v42 = vsel %vm4684_vm6, %v4760_v1, %v5771_v24  ;;  %v5772_v24 = vunpack.i.h.bf16 %v9888_v11  ;;  %v4761_v11 = vsel %vm1827_vm9, %v3709_v45, %v5767_v56  ;;  %v3599_v1 = vld [vmem:[#allocation2 + $0x18] sm:$0xff] }
 0x55d   : > { %5033 = vmatmul.f32.gmra.mxu1 %v4723_v16  ;;  %5158 = vmatmul.f32.gmra.mxu2 %v4831_v32  ;;  %v4724_v16 = vsel %vm4721_vm10, %v4687_v50, %v5777_v18  ;;  %v4832_v32 = vsel %vm4721_vm10, %v4796_v42, %v5776_v33  ;;  %v3603_v18 = vld [vmem:[#allocation2 + $0x38] sm:$0xff]  ;;  %v5781_v42 = vunpack.i.l.bf16 %v5780_v22  ;;  %v9941_v33 = vld [vmem:[#allocation2 + $0x104] sm:$0xff]  ;;  %v5606_v22 = vunpack.i.l.bf16 %v9668_v55 }
 0x55e   : > { %6019 = vrot.lane.b32.xlu0 %v6018_v19, %s6142_s11  ;;  %5969 = vrot.lane.b32.xlu2 %v5968_v0, %s6141_s10  ;;  %v6033_v19 = vpack.i.bf16 %v9919_v17, %v3808_v12  ;;  %v4797_v43 = vsel %vm4684_vm6, %v4761_v11, %v5772_v24  ;;  %v4655_v31 = vsel %vm1827_vm9, %v3603_v18, %v5602_v3  ;;  %v9954_v45 = vld [vmem:[#allocation2 + $0x11c] sm:$0xff] }
 0x55f   : > { %5994 = vrot.lane.b32.xlu1 %v5993_v29, %s6142_s11  ;;  %v6008_v29 = vpack.i.bf16 %v3771_v34, %v3770_v2  ;;  %v9938_v37 = vsel %vm4684_vm6, %v4655_v31, %v5692_v5  ;;  %v5790_v49 = vpop.permute.xlu2 %5789  ;;  %v4833_v50 = vsel %vm4721_vm10, %v4797_v43, %v5781_v42  ;;  %v6048_v56 = vpack.i.bf16 %v3773_v60, %v9941_v33  ;;  %v3806_v5 = vld [vmem:[#allocation2 + $0xf5] sm:$0xff]  ;;  %v3696_v18 = vld [vmem:[#allocation2 + $0xe2] sm:$0xff] }
 0x560   : > { %v5696_v2 = vunpack.i.l.bf16 %v9807_v15  ;;  %v5791_v24 = vunpack.i.l.bf16 %v5790_v49  ;;  %v6013_v31 = vpack.i.bf16 %v3696_v18, %v3806_v5 }
 0x561   : > { %v5785_v38 = vpop.permute.xlu1 %5784 }
 0x562   : > { %v5786_v12 = vunpack.i.l.bf16 %v5785_v38  ;;  %v5787_v42 = vunpack.i.h.bf16 %v5785_v38 }
 0x565   : > { %5036 = vmatmul.f32.gmra.mxu1 %v4724_v16  ;;  %5161 = vmatmul.f32.gmra.mxu2 %v4832_v32  ;;  %v5998_v16 = vpack.i.bf16 %v9608_v44, %v3805_v36  ;;  %v5795_v32 = vpop.permute.xlu0 %5794  ;;  %v3604_v44 = vld [vmem:[#allocation2 + $0x40] sm:$0xff] }
 0x566   : > { %6034 = vrot.lane.b32.xlu0 %v6033_v19, %s6142_s11  ;;  %5984 = vrot.lane.b32.xlu2 %v5968_v0, %s6138_s7  ;;  %v4651_v0 = vsel %vm1827_vm9, %v3599_v1, %v5592_v14  ;;  %v3710_v19 = vld [vmem:[#allocation2 + $0x33] sm:$0xff]  ;;  %v5797_v14 = vunpack.i.h.bf16 %v5795_v32  ;;  %v5796_v11 = vunpack.i.l.bf16 %v5795_v32  ;;  %v5792_v32 = vunpack.i.h.bf16 %v5790_v49 }
 0x567   : > { %6009 = vrot.lane.b32.xlu1 %v6008_v29, %s6141_s10  ;;  %v4688_v52 = vsel %vm4684_vm6, %v4651_v0, %v5682_v51  ;;  %v4762_v3 = vsel %vm1827_vm9, %v3710_v19, %v5786_v12  ;;  %v9960_v36 = vld [vmem:[#allocation2 + $0xfa] sm:$0xff]  ;;  %v9974_v19 = vld [vmem:[#allocation2 + $0x124] sm:$0xff] }
 0x568   : > { %v4725_v34 = vsel %vm4721_vm10, %v4688_v52, %v5782_v21  ;;  %v4798_v51 = vsel %vm4684_vm6, %v4762_v3, %v5791_v24  ;;  %v4656_v21 = vsel %vm1827_vm9, %v3604_v44, %v5606_v22  ;;  %v6063_v0 = vpack.i.bf16 %v9960_v36, %v9954_v45  ;;  %v3605_v22 = vld [vmem:[#allocation2 + $0x48] sm:$0xff] }
 0x569   : > { %v9958_v1 = vsel %vm4684_vm6, %v4656_v21, %v5696_v2  ;;  %v5800_v43 = vpop.permute.xlu1 %5799  ;;  %v4834_v12 = vsel %vm4721_vm10, %v4798_v51, %v5796_v11  ;;  %v5607_v52 = vunpack.i.h.bf16 %v9668_v55  ;;  %v5805_v55 = vpop.permute.xlu2 %5804  ;;  %v9983_v3 = vld [vmem:[#allocation2 + $0x102] sm:$0xff]  ;;  %v6028_v24 = vpack.i.bf16 %v3696_v18, %v9941_v33 }
 0x56a   : > { %v5802_v38 = vunpack.i.h.bf16 %v5800_v43  ;;  %v5806_v5 = vunpack.i.l.bf16 %v5805_v55  ;;  %v6078_v51 = vpack.i.bf16 %v9983_v3, %v9974_v19  ;;  %v5611_v21 = vunpack.i.l.bf16 %v9653_v59  ;;  %v3712_v18 = vld [vmem:[#allocation2 + $0x43] sm:$0xff] }
 0x56b   : > { %v5701_v33 = vunpack.i.l.bf16 %v9784_v23 }
 0x56c   : > { %v4727_v49 = vsel %vm4721_vm10, %v9892_v40, %v5802_v38 }
 0x56d   : > { %5039 = vmatmul.f32.gmra.mxu1 %v4725_v34  ;;  %5164 = vmatmul.f32.gmra.mxu2 %v4833_v50  ;;  %v6038_v34 = vpack.i.bf16 %v9896_v63, %v3773_v60  ;;  %v5697_v50 = vunpack.i.h.bf16 %v9807_v15  ;;  %v4657_v63 = vsel %vm1827_vm9, %v3605_v22, %v5607_v52  ;;  %v9977_v60 = vld [vmem:[#allocation2 + $0x114] sm:$0xff]  ;;  %v5807_v22 = vunpack.i.h.bf16 %v5805_v55 }
 0x56e   : > { %6049 = vrot.lane.b32.xlu0 %v6048_v56, %s6138_s7  ;;  %5999 = vrot.lane.b32.xlu2 %v5998_v16, %s6142_s11  ;;  %v5801_v56 = vunpack.i.l.bf16 %v5800_v43  ;;  %v6053_v43 = vpack.i.bf16 %v9919_v17, %v9977_v60  ;;  %v3813_v52 = vld [vmem:[#allocation2 + $0x12d] sm:$0xff]  ;;  %v3811_v17 = vld [vmem:[#allocation2 + $0x11d] sm:$0xff] }
 0x56f   : > { %6024 = vrot.lane.b32.xlu1 %v6008_v29, %s6138_s7  ;;  %v4726_v29 = vsel %vm4721_vm10, %v9867_v58, %v5797_v14  ;;  %v3711_v58 = vld [vmem:[#allocation2 + $0x3b] sm:$0xff]  ;;  %v9980_v15 = vsel %vm4684_vm6, %v4657_v63, %v5697_v50  ;;  %v5810_v14 = vpop.permute.xlu0 %5809 }
 0x570   : > { %v4763_v16 = vsel %vm1827_vm9, %v3711_v58, %v5787_v42  ;;  %v5811_v40 = vunpack.i.l.bf16 %v5810_v14 }
 0x571   : > { %v4799_v2 = vsel %vm4684_vm6, %v4763_v16, %v5792_v32  ;;  %v5815_v11 = vpop.permute.xlu1 %5814  ;;  %v5820_v58 = vpop.permute.xlu2 %5819 }
 0x572   : > { %v4835_v44 = vsel %vm4721_vm10, %v4799_v2, %v5801_v56  ;;  %v5816_v42 = vunpack.i.l.bf16 %v5815_v11  ;;  %v10004_v56 = vld [vmem:[#allocation2 + $0x11a] sm:$0xff]  ;;  %v5822_v55 = vunpack.i.h.bf16 %v5820_v58 }
 0x573   : > { %v6093_v2 = vpack.i.bf16 %v10004_v56, %v3813_v52 }
 0x575   : > { %5042 = vmatmul.f32.gmra.mxu1 %v4726_v29  ;;  %5167 = vmatmul.f32.gmra.mxu2 %v4834_v12  ;;  %v4764_v29 = vsel %vm1827_vm9, %v3712_v18, %v5806_v5  ;;  %v3809_v12 = vld [vmem:[#allocation2 + $0x10d] sm:$0xff]  ;;  %v5612_v5 = vunpack.i.h.bf16 %v9653_v59  ;;  %v3607_v59 = vld [vmem:[#allocation2 + $0x58] sm:$0xff] }
 0x576   : > { %6064 = vrot.lane.b32.xlu0 %v6063_v0, %s6141_s10  ;;  %6014 = vrot.lane.b32.xlu2 %v6013_v31, %s6142_s11  ;;  %v5817_v31 = vunpack.i.h.bf16 %v5815_v11  ;;  %v3606_v0 = vld [vmem:[#allocation2 + $0x50] sm:$0xff]  ;;  %v4800_v38 = vsel %vm4684_vm6, %v4764_v29, %v5811_v40  ;;  %v6043_v16 = vpack.i.bf16 %v9960_v36, %v3809_v12  ;;  %v5812_v36 = vunpack.i.h.bf16 %v5810_v14 }
 0x577   : > { %6039 = vrot.lane.b32.xlu1 %v6038_v34, %s6141_s10  ;;  %v4658_v34 = vsel %vm1827_vm9, %v3606_v0, %v5611_v21  ;;  %v4836_v63 = vsel %vm4721_vm10, %v4800_v38, %v5816_v42  ;;  %v3810_v11 = vld [vmem:[#allocation2 + $0x115] sm:$0xff]  ;;  %v4659_v18 = vsel %vm1827_vm9, %v3607_v59, %v5612_v5  ;;  %v4729_v0 = vsel %vm4721_vm10, %v9938_v37, %v5822_v55 }
 0x578   : > { %v10001_v50 = vsel %vm4684_vm6, %v4658_v34, %v5701_v33  ;;  %v4728_v32 = vsel %vm4721_vm10, %v9916_v9, %v5817_v31  ;;  %v3713_v9 = vld [vmem:[#allocation2 + $0x4b] sm:$0xff]  ;;  %v3704_v33 = vld [vmem:[#allocation2 + $0x122] sm:$0xff]  ;;  %v3814_v40 = vld [vmem:[#allocation2 + $0x135] sm:$0xff]  ;;  %v6058_v29 = vpack.i.bf16 %v9983_v3, %v3810_v11  ;;  %v6073_v59 = vpack.i.bf16 %v9954_v45, %v9977_v60 }
 0x579   : > { %v4765_v21 = vsel %vm1827_vm9, %v3713_v9, %v5807_v22  ;;  %v3812_v31 = vld [vmem:[#allocation2 + $0x125] sm:$0xff]  ;;  %v6108_v34 = vpack.i.bf16 %v3704_v33, %v3814_v40  ;;  %v5835_v38 = vpop.permute.xlu2 %5834  ;;  %v3714_v37 = vld [vmem:[#allocation2 + $0x53] sm:$0xff]  ;;  %v5617_v33 = vunpack.i.h.bf16 %v9655_v10 }
 0x57a   : > { %v4801_v14 = vsel %vm4684_vm6, %v4765_v21, %v5812_v36  ;;  %v5837_v3 = vunpack.i.h.bf16 %v5835_v38  ;;  %v3777_v36 = vld [vmem:[#allocation2 + $0x12c] sm:$0xff] }
 0x57c   : > { %v4730_v21 = vsel %vm4721_vm10, %v9958_v1, %v5837_v3  ;;  %v5711_v3 = vunpack.i.l.bf16 %v9833_v57 }
 0x57d   : > { %5045 = vmatmul.f32.gmra.mxu1 %v4727_v49  ;;  %5170 = vmatmul.f32.gmra.mxu2 %v4835_v44  ;;  %v5702_v44 = vunpack.i.h.bf16 %v9784_v23  ;;  %v5830_v23 = vpop.permute.xlu1 %5829 }
 0x57e   : > { %6079 = vrot.lane.b32.xlu0 %v6078_v51, %s6141_s10  ;;  %6029 = vrot.lane.b32.xlu2 %v6028_v24, %s6141_s10  ;;  %v10011_v24 = vld [vmem:[#allocation2 + $0x10a] sm:$0xff]  ;;  %v5821_v51 = vunpack.i.l.bf16 %v5820_v58  ;;  %v5616_v58 = vunpack.i.l.bf16 %v9655_v10  ;;  %v5832_v40 = vunpack.i.h.bf16 %v5830_v23 }
 0x57f   : > { %6054 = vrot.lane.b32.xlu1 %v6053_v43, %s6141_s10  ;;  %v6068_v49 = vpack.i.bf16 %v10011_v24, %v3811_v17  ;;  %v5825_v43 = vpop.permute.xlu0 %5824  ;;  %v10022_v42 = vsel %vm4684_vm6, %v4659_v18, %v5702_v44  ;;  %v10029_v17 = vld [vmem:[#allocation2 + $0x112] sm:$0xff]  ;;  %v5836_v44 = vunpack.i.l.bf16 %v5835_v38  ;;  %v3705_v18 = vld [vmem:[#allocation2 + $0x12a] sm:$0xff]  ;;  %v6088_v38 = vpack.i.bf16 %v10011_v24, %v3777_v36 }
 0x580   : > { %v5826_v12 = vunpack.i.l.bf16 %v5825_v43  ;;  %v4837_v52 = vsel %vm4721_vm10, %v4801_v14, %v5821_v51  ;;  %v6083_v22 = vpack.i.bf16 %v10029_v17, %v3812_v31  ;;  %v5827_v51 = vunpack.i.h.bf16 %v5825_v43  ;;  %v3715_v43 = vld [vmem:[#allocation2 + $0x5b] sm:$0xff]  ;;  %v3609_v10 = vld [vmem:[#allocation2 + $0x68] sm:$0xff] }
 0x581   : > { %v6098_v31 = vpack.i.bf16 %v3777_v36, %v9974_v19  ;;  %v5707_v14 = vunpack.i.h.bf16 %v9793_v26 }
 0x582   : > { %v4767_v45 = vsel %vm1827_vm9, %v3715_v43, %v5827_v51  ;;  %v3611_v43 = vld [vmem:[#allocation2 + $0x78] sm:$0xff] }
 0x583   : > { %v4803_v60 = vsel %vm4684_vm6, %v4767_v45, %v5832_v40  ;;  %v5712_v40 = vunpack.i.h.bf16 %v9833_v57 }
 0x585   : > { %5048 = vmatmul.f32.gmra.mxu1 %v4728_v32  ;;  %5173 = vmatmul.f32.gmra.mxu2 %v4836_v63  ;;  %v5706_v32 = vunpack.i.l.bf16 %v9793_v26  ;;  %v4766_v63 = vsel %vm1827_vm9, %v3714_v37, %v5826_v12  ;;  %v5845_v1 = vpop.permute.xlu1 %5844  ;;  %v3716_v37 = vld [vmem:[#allocation2 + $0x63] sm:$0xff] }
 0x586   : > { %6094 = vrot.lane.b32.xlu0 %v6093_v2, %s6142_s11  ;;  %6044 = vrot.lane.b32.xlu2 %v6043_v16, %s6142_s11  ;;  %v5831_v16 = vunpack.i.l.bf16 %v5830_v23  ;;  %v3608_v2 = vld [vmem:[#allocation2 + $0x60] sm:$0xff]  ;;  %v4661_v23 = vsel %vm1827_vm9, %v3609_v10, %v5617_v33  ;;  %v5846_v19 = vunpack.i.l.bf16 %v5845_v1  ;;  %v5847_v51 = vunpack.i.h.bf16 %v5845_v1 }
 0x587   : > { %6069 = vrot.lane.b32.xlu1 %v6068_v49, %s6142_s11  ;;  %v4660_v49 = vsel %vm1827_vm9, %v3608_v2, %v5616_v58  ;;  %v5840_v55 = vpop.permute.xlu0 %5839  ;;  %v10058_v26 = vsel %vm4684_vm6, %v4661_v23, %v5707_v14  ;;  %v5622_v33 = vunpack.i.h.bf16 %v9678_v54  ;;  %v3815_v10 = vld [vmem:[#allocation2 + $0x13d] sm:$0xff] }
 0x588   : > { %v4802_v5 = vsel %vm4684_vm6, %v4766_v63, %v5831_v16  ;;  %v10041_v9 = vsel %vm4684_vm6, %v4660_v49, %v5706_v32  ;;  %v5841_v12 = vunpack.i.l.bf16 %v5840_v55  ;;  %v5621_v16 = vunpack.i.l.bf16 %v9678_v54  ;;  %v3778_v49 = vld [vmem:[#allocation2 + $0x134] sm:$0xff] }
 0x589   : > { %v4838_v11 = vsel %vm4721_vm10, %v4802_v5, %v5836_v44  ;;  %v4768_v63 = vsel %vm1827_vm9, %v3716_v37, %v5846_v19  ;;  %v3610_v5 = vld [vmem:[#allocation2 + $0x70] sm:$0xff]  ;;  %v4663_v45 = vsel %vm1827_vm9, %v3611_v43, %v5622_v33 }
 0x58a   : > { %v4839_v58 = vsel %vm4721_vm10, %v4803_v60, %v5841_v12  ;;  %v4662_v44 = vsel %vm1827_vm9, %v3610_v5, %v5621_v16 }
 0x58d   : > { %5051 = vmatmul.f32.gmra.mxu1 %v4729_v0  ;;  %5176 = vmatmul.f32.gmra.mxu2 %v4837_v52  ;;  %v3779_v0 = vld [vmem:[#allocation2 + $0x13c] sm:$0xff]  ;;  %v5850_v52 = vpop.permute.xlu2 %5849 }
 0x58e   : > { %6109 = vrot.lane.b32.xlu0 %v6108_v34, %s6142_s11  ;;  %6059 = vrot.lane.b32.xlu2 %v6058_v29, %s6142_s11  ;;  %v5842_v29 = vunpack.i.h.bf16 %v5840_v55  ;;  %v6113_v32 = vpack.i.bf16 %v10004_v56, %v3779_v0  ;;  %v5851_v2 = vunpack.i.l.bf16 %v5850_v52  ;;  %v10073_v56 = vsel %vm4684_vm6, %v4662_v44, %v5711_v3  ;;  %v5860_v55 = vpop.permute.xlu1 %5859 }
 0x58f   : > { %6084 = vrot.lane.b32.xlu1 %v6083_v22, %s6142_s11  ;;  %v5855_v22 = vpop.permute.xlu0 %5854  ;;  %v5861_v14 = vunpack.i.l.bf16 %v5860_v55  ;;  %v5626_v0 = vunpack.i.l.bf16 %v9664_v20  ;;  %v5627_v44 = vunpack.i.h.bf16 %v9664_v20 }
 0x590   : > { %v4731_v34 = vsel %vm4721_vm10, %v9980_v15, %v5842_v29  ;;  %v5857_v15 = vunpack.i.h.bf16 %v5855_v22  ;;  %v4804_v24 = vsel %vm4684_vm6, %v4768_v63, %v5851_v2  ;;  %v5856_v36 = vunpack.i.l.bf16 %v5855_v22 }
 0x591   : > { %v5852_v29 = vunpack.i.h.bf16 %v5850_v52  ;;  %v5716_v52 = vunpack.i.l.bf16 %v9819_v61 }
 0x595   : > { %5054 = vmatmul.f32.gmra.mxu1 %v4730_v21  ;;  %5179 = vmatmul.f32.gmra.mxu2 %v4838_v11  ;;  %v4732_v21 = vsel %vm4721_vm10, %v10001_v50, %v5857_v15  ;;  %v4840_v11 = vsel %vm4721_vm10, %v4804_v24, %v5856_v36  ;;  %v5865_v50 = vpop.permute.xlu2 %5864 }
 0x596   : > { %4212 = vrot.lane.b32.xlu0 %v3705_v18, %s6142_s11  ;;  %6074 = vrot.lane.b32.xlu2 %v6073_v59, %s6138_s7  ;;  %v6103_v59 = vpack.i.bf16 %v10029_v17, %v3778_v49  ;;  %v3717_v18 = vld [vmem:[#allocation2 + $0x6b] sm:$0xff]  ;;  %v10085_v17 = vsel %vm4684_vm6, %v4663_v45, %v5712_v40  ;;  %v5866_v57 = vunpack.i.l.bf16 %v5865_v50  ;;  %v5875_v19 = vpop.permute.xlu1 %5874  ;;  %v5867_v2 = vunpack.i.h.bf16 %v5865_v50  ;;  %v3719_v49 = vld [vmem:[#allocation2 + $0x7b] sm:$0xff] }
 0x597   : > { %6099 = vrot.lane.b32.xlu1 %v6098_v31, %s6138_s7  ;;  %v5862_v31 = vunpack.i.h.bf16 %v5860_v55  ;;  %v4769_v1 = vsel %vm1827_vm9, %v3717_v18, %v5847_v51  ;;  %v5870_v60 = vpop.permute.xlu0 %5869  ;;  %v5876_v16 = vunpack.i.l.bf16 %v5875_v19  ;;  %v3613_v40 = vld [vmem:[#allocation2 + $0x88] sm:$0xff]  ;;  %s222_s7 = smul.u32 36, %s5481_s19 }
 0x598   : > { %v4805_v54 = vsel %vm4684_vm6, %v4769_v1, %v5852_v29  ;;  %v5872_v24 = vunpack.i.h.bf16 %v5870_v60  ;;  %v4771_v51 = vsel %vm1827_vm9, %v3719_v49, %v5867_v2  ;;  %v5631_v29 = vunpack.i.l.bf16 %v9666_v30  ;;  %v3615_v2 = vld [vmem:[#allocation2 + $0x98] sm:$0xff] }
 0x599   : > { %v4733_v23 = vsel %vm4721_vm10, %v10022_v42, %v5862_v31  ;;  %v4841_v12 = vsel %vm4721_vm10, %v4805_v54, %v5861_v14  ;;  %v4665_v14 = vsel %vm1827_vm9, %v3613_v40, %v5627_v44  ;;  %v5721_v54 = vunpack.i.l.bf16 %v9831_v7  ;;  %v3722_v44 = vld [vmem:[#allocation2 + $0x93] sm:$0xff]  ;;  %p223_p4 = scmp.lt.s32.totalorder %s222_s7, 71 }
 0x59a   : > { %v4807_v33 = vsel %vm4684_vm6, %v4771_v51, %v5872_v24  ;;  %v5636_v51 = vunpack.i.l.bf16 %v9688_v39 }
 0x59b   : > { %s10999_s7 = smov (!%p223_p4, %s222_s7), 71 }
 0x59d   : > { %5057 = vmatmul.f32.gmra.mxu1 %v4731_v34  ;;  %5182 = vmatmul.f32.gmra.mxu2 %v4839_v58  ;;  %v5871_v34 = vunpack.i.l.bf16 %v5870_v60  ;;  %v3718_v58 = vld [vmem:[#allocation2 + $0x73] sm:$0xff]  ;;  %v5880_v37 = vpop.permute.xlu2 %5879 }
 0x59e   : > { %6089 = vrot.lane.b32.xlu2 %v6088_v38, %s6141_s10  ;;  %v5877_v38 = vunpack.i.h.bf16 %v5875_v19  ;;  %v4770_v22 = vsel %vm1827_vm9, %v3718_v58, %v5866_v57  ;;  %v5882_v36 = vunpack.i.h.bf16 %v5880_v37  ;;  %v5881_v55 = vunpack.i.l.bf16 %v5880_v37  ;;  %v3614_v57 = vld [vmem:[#allocation2 + $0x90] sm:$0xff] }
 0x59f   : > { %6114 = vrot.lane.b32.xlu1 %v6113_v32, %s6141_s10  ;;  %v3612_v32 = vld [vmem:[#allocation2 + $0x80] sm:$0xff]  ;;  %v4806_v3 = vsel %vm4684_vm6, %v4770_v22, %v5871_v34 }
 0x5a0   : > { %v4664_v42 = vsel %vm1827_vm9, %v3612_v32, %v5626_v0  ;;  %v4734_v15 = vsel %vm4721_vm10, %v10041_v9, %v5877_v38  ;;  %v4842_v5 = vsel %vm4721_vm10, %v4806_v3, %v5876_v16  ;;  %v4735_v18 = vsel %vm4721_vm10, %v10058_v26, %v5882_v36  ;;  %v3721_v38 = vld [vmem:[#allocation2 + $0x8b] sm:$0xff] }
 0x5a1   : > { %v10098_v63 = vsel %vm4684_vm6, %v4664_v42, %v5716_v52  ;;  %v4843_v31 = vsel %vm4721_vm10, %v4807_v33, %v5881_v55  ;;  %v4666_v0 = vsel %vm1827_vm9, %v3614_v57, %v5631_v29  ;;  %v5632_v16 = vunpack.i.h.bf16 %v9666_v30 }
 0x5a2   : > { %v10123_v34 = vsel %vm4684_vm6, %v4666_v0, %v5721_v54  ;;  %v5642_v29 = vunpack.i.h.bf16 %v9674_v62 }
 0x5a3   : > { %v4667_v30 = vsel %vm1827_vm9, %v3615_v2, %v5632_v16  ;;  %v5732_v16 = vunpack.i.h.bf16 %v9839_v28 }
 0x5a5   : > { %5060 = vmatmul.f32.gmra.mxu1 %v4732_v21  ;;  %5185 = vmatmul.f32.gmra.mxu2 %v4840_v11  ;;  %v5717_v21 = vunpack.i.h.bf16 %v9819_v61  ;;  %v5885_v11 = vpop.permute.xlu0 %5884  ;;  %v5895_v20 = vpop.permute.xlu2 %5894  ;;  %v3720_v61 = vld [vmem:[#allocation2 + $0x83] sm:$0xff] }
 0x5a6   : > { %6104 = vrot.lane.b32.xlu2 %v6103_v59, %s6141_s10  ;;  %v5890_v59 = vpop.permute.xlu1 %5889  ;;  %v5886_v9 = vunpack.i.l.bf16 %v5885_v11  ;;  %v5897_v50 = vunpack.i.h.bf16 %v5895_v20 }
 0x5a7   : > { %v5891_v1 = vunpack.i.l.bf16 %v5890_v59  ;;  %v10112_v43 = vsel %vm4684_vm6, %v4665_v14, %v5717_v21  ;;  %v5892_v52 = vunpack.i.h.bf16 %v5890_v59 }
 0x5a8   : > { %v4772_v45 = vsel %vm1827_vm9, %v3720_v61, %v5886_v9  ;;  %v10145_v9 = vld [vmem:[%s10476_s4] ss:$0 sm:$0xff] }
 0x5a9   : > { %v4808_v26 = vsel %vm4684_vm6, %v4772_v45, %v5891_v1  ;;  %v5637_v45 = vunpack.i.h.bf16 %v9688_v39  ;;  %v5647_v39 = vunpack.i.h.bf16 %v9676_v27 }
 0x5ad   : > { %5063 = vmatmul.f32.gmra.mxu1 %v4733_v23  ;;  %5188 = vmatmul.f32.gmra.mxu2 %v4841_v12  ;;  %v5900_v60 = vpop.permute.xlu0 %5899  ;;  %v5887_v23 = vunpack.i.h.bf16 %v5885_v11  ;;  %v4736_v12 = vsel %vm4721_vm10, %v10073_v56, %v5897_v50  ;;  %v5722_v56 = vunpack.i.h.bf16 %v9831_v7  ;;  %v5641_v50 = vunpack.i.l.bf16 %v9674_v62 }
 0x5ae   : > { %4610 = vrot.lane.b32.xlu2 %v3815_v10, %s6142_s11  ;;  %v5896_v10 = vunpack.i.l.bf16 %v5895_v20  ;;  %v5905_v58 = vpop.permute.xlu1 %5904  ;;  %v5902_v22 = vunpack.i.h.bf16 %v5900_v60  ;;  %v5901_v37 = vunpack.i.l.bf16 %v5900_v60  ;;  %s5487_s11 = sshll.u32 %s10999_s7, 3 }
 0x5af   : > { %v4773_v32 = vsel %vm1827_vm9, %v3721_v38, %v5887_v23  ;;  %v5906_v3 = vunpack.i.l.bf16 %v5905_v58  ;;  %v10136_v7 = vsel %vm4684_vm6, %v4667_v30, %v5722_v56  ;;  %v5736_v38 = vunpack.i.l.bf16 %v9844_v8  ;;  %s10172_s20 = scalar_lea.vmem %s10477_s5, %s5487_s11 }
 0x5b0   : > { %v4844_v19 = vsel %vm4721_vm10, %v4808_v26, %v5896_v10  ;;  %v4809_v42 = vsel %vm4684_vm6, %v4773_v32, %v5892_v52  ;;  %v3723_v26 = vld [vmem:[#allocation2 + $0x9b] sm:$0xff]  ;;  %v3618_v32 = vld [vmem:[#allocation2 + $0xb0] sm:$0xff] }
 0x5b1   : > { %v4845_v24 = vsel %vm4721_vm10, %v4809_v42, %v5901_v37  ;;  %v4774_v36 = vsel %vm1827_vm9, %v3722_v44, %v5906_v3  ;;  %v4670_v37 = vsel %vm1827_vm9, %v3618_v32, %v5641_v50  ;;  %v3622_v32 = vld [vmem:[#allocation2 + $0xd0] sm:$0xff] }
 0x5b5   : > { %5066 = vmatmul.f32.gmra.mxu1 %v4734_v15  ;;  %5191 = vmatmul.f32.gmra.mxu2 %v4842_v5  ;;  %v5910_v15 = vpop.permute.xlu2 %5909  ;;  %v4737_v5 = vsel %vm4721_vm10, %v10085_v17, %v5902_v22  ;;  %v5915_v49 = vpop.permute.xlu0 %5914  ;;  %v5726_v17 = vunpack.i.l.bf16 %v9842_v25 }
 0x5b6   : > { %v5911_v55 = vunpack.i.l.bf16 %v5910_v15  ;;  %v5917_v21 = vunpack.i.h.bf16 %v5915_v49  ;;  %v5916_v59 = vunpack.i.l.bf16 %v5915_v49  ;;  %v5920_v40 = vpop.permute.xlu1 %5919  ;;  %v5912_v0 = vunpack.i.h.bf16 %v5910_v15 }
 0x5b7   : > { %v5922_v10 = vunpack.i.h.bf16 %v5920_v40  ;;  %v5921_v60 = vunpack.i.l.bf16 %v5920_v40 }
 0x5b8   : > { %v4810_v11 = vsel %vm4684_vm6, %v4774_v36, %v5911_v55  ;;  %v4738_v14 = vsel %vm4721_vm10, %v10098_v63, %v5917_v21  ;;  %v5646_v63 = vunpack.i.l.bf16 %v9676_v27  ;;  %v3617_v27 = vld [vmem:[#allocation2 + $0xa8] sm:$0xff] }
 0x5b9   : > { %v4846_v20 = vsel %vm4721_vm10, %v4810_v11, %v5916_v59  ;;  %v4739_v2 = vsel %vm4721_vm10, %v10112_v43, %v5922_v10  ;;  %v3621_v36 = vld [vmem:[#allocation2 + $0xc8] sm:$0xff] }
 0x5ba   : > { %v3724_v11 = vld [vmem:[#allocation2 + $0xa3] sm:$0xff] }
 0x5bd   : > { %5069 = vmatmul.f32.gmra.mxu1 %v4735_v18  ;;  %5194 = vmatmul.f32.gmra.mxu2 %v4843_v31  ;;  %v3616_v18 = vld [vmem:[#allocation2 + $0xa0] sm:$0xff]  ;;  %v5907_v31 = vunpack.i.h.bf16 %v5905_v58  ;;  %v5925_v52 = vpop.permute.xlu2 %5924  ;;  %v5737_v58 = vunpack.i.h.bf16 %v9844_v8  ;;  %v5930_v3 = vpop.permute.xlu0 %5929 }
 0x5be   : > { %v4668_v1 = vsel %vm1827_vm9, %v3616_v18, %v5636_v51  ;;  %v5935_v30 = vpop.permute.xlu1 %5934  ;;  %v4673_v51 = vsel %vm1827_vm9, %v3621_v36, %v5647_v39  ;;  %v5931_v21 = vunpack.i.l.bf16 %v5930_v3  ;;  %v5742_v39 = vunpack.i.h.bf16 %v9850_v48 }
 0x5bf   : > { %v10154_v61 = vsel %vm4684_vm6, %v4668_v1, %v5726_v17  ;;  %v4775_v23 = vsel %vm1827_vm9, %v3723_v26, %v5907_v31  ;;  %v10200_v59 = vsel %vm4684_vm6, %v4673_v51, %v5737_v58  ;;  %v5936_v40 = vunpack.i.l.bf16 %v5935_v30 }
 0x5c0   : > { %v4811_v42 = vsel %vm4684_vm6, %v4775_v23, %v5912_v0  ;;  %v5652_v0 = vunpack.i.h.bf16 %v9709_v47 }
 0x5c1   : > { %v4847_v15 = vsel %vm4721_vm10, %v4811_v42, %v5921_v60  ;;  %v3725_v60 = vld [vmem:[#allocation2 + $0xab] sm:$0xff] }
 0x5c5   : > { %5072 = vmatmul.f32.gmra.mxu1 %v4736_v12  ;;  %5197 = vmatmul.f32.gmra.mxu2 %v4844_v19  ;;  %v5731_v12 = vunpack.i.l.bf16 %v9839_v28  ;;  %v5727_v19 = vunpack.i.h.bf16 %v9842_v25  ;;  %v3619_v25 = vld [vmem:[#allocation2 + $0xb8] sm:$0xff]  ;;  %v5926_v28 = vunpack.i.l.bf16 %v5925_v52  ;;  %v5940_v1 = vpop.permute.xlu2 %5939 }
 0x5c6   : > { %v4671_v8 = vsel %vm1827_vm9, %v3619_v25, %v5642_v29  ;;  %v5942_v23 = vunpack.i.h.bf16 %v5940_v1  ;;  %v5950_v58 = vpop.permute.xlu1 %5949 }
 0x5c7   : > { %v10188_v49 = vsel %vm4684_vm6, %v4670_v37, %v5731_v12  ;;  %v10192_v43 = vsel %vm4684_vm6, %v4671_v8, %v5732_v16  ;;  %v4776_v31 = vsel %vm1827_vm9, %v3724_v11, %v5926_v28  ;;  %v5951_v8 = vunpack.i.l.bf16 %v5950_v58  ;;  %v3726_v28 = vld [vmem:[#allocation2 + $0xb3] sm:$0xff] }
 0x5c8   : > { %v4812_v50 = vsel %vm4684_vm6, %v4776_v31, %v5931_v21 }
 0x5c9   : > { %v4848_v26 = vsel %vm4721_vm10, %v4812_v50, %v5936_v40  ;;  %v5952_v40 = vunpack.i.h.bf16 %v5950_v58 }
 0x5cd   : > { %5075 = vmatmul.f32.gmra.mxu1 %v4737_v5  ;;  %5200 = vmatmul.f32.gmra.mxu2 %v4845_v24  ;;  %v4669_v5 = vsel %vm1827_vm9, %v3617_v27, %v5637_v45  ;;  %v3620_v24 = vld [vmem:[#allocation2 + $0xc0] sm:$0xff]  ;;  %v5927_v45 = vunpack.i.h.bf16 %v5925_v52  ;;  %v5945_v52 = vpop.permute.xlu0 %5944  ;;  %v3623_v27 = vld [vmem:[#allocation2 + $0xd8] sm:$0xff]  ;;  %v5955_v37 = vpop.permute.xlu2 %5954 }
 0x5ce   : > { %v4672_v44 = vsel %vm1827_vm9, %v3620_v24, %v5646_v63  ;;  %v5932_v63 = vunpack.i.h.bf16 %v5930_v3  ;;  %v5946_v25 = vunpack.i.l.bf16 %v5945_v52 }
 0x5cf   : > { %v10195_v55 = vsel %vm4684_vm6, %v4672_v44, %v5736_v38  ;;  %v5956_v44 = vunpack.i.l.bf16 %v5955_v37 }
 0x5d2   : > { %v5031_v33 = vpop.f32.mrf.mxu1 }
 0x5d3   : > { %v5032_v54 = vadd.f32 %v10145_v9, %v5031_v33  ;;  %v5937_v33 = vunpack.i.h.bf16 %v5935_v30 }
 0x5d5   : > { %5078 = vmatmul.f32.gmra.mxu1 %v4738_v14  ;;  %5203 = vmatmul.f32.gmra.mxu2 %v4846_v20  ;;  %v5960_v51 = vpop.permute.xlu0 %5959 }
 0x5d8   : > { %v5156_v57 = vpop.f32.mrf.mxu2 }
 0x5d9   : > { %v5157_v62 = vadd.f32 %v5156_v57, %v5032_v54  ;;  %v4740_v54 = vsel %vm4721_vm10, %v10123_v34, %v5937_v33  ;;  %v5651_v57 = vunpack.i.l.bf16 %v9709_v47  ;;  %v5741_v34 = vunpack.i.l.bf16 %v9850_v48 }
 0x5da   : > { %v5034_v22 = vpop.f32.mrf.mxu1  ;;  %v4675_v48 = vsel %vm1827_vm9, %v3623_v27, %v5652_v0 }
 0x5db   : > { %v5282_v56 = vadd.f32 %v9347_v4, %v5157_v62  ;;  %v10185_v4 = vsel %vm4684_vm6, %v4669_v5, %v5727_v19  ;;  %v5035_v17 = vadd.f32 %v10145_v9, %v5034_v22  ;;  %v4777_v19 = vsel %vm1827_vm9, %v3725_v60, %v5927_v45 }
 0x5dc   : > { %v4813_v22 = vsel %vm4684_vm6, %v4777_v19, %v5932_v63  ;;  %v4674_v42 = vsel %vm1827_vm9, %v3622_v32, %v5651_v57  ;;  %v10229_v3 = vsel %vm4684_vm6, %v4675_v48, %v5742_v39  ;;  %v4778_v5 = vsel %vm1827_vm9, %v3726_v28, %v5946_v25 }
 0x5dd   : > { %5389 = vst.msk [vmem:[%s10172_s20] sm:$0xff] %vm1605_vm2, %v5282_v56  ;;  %5081 = vmatmul.f32.gmra.mxu1 %v4739_v2  ;;  %5206 = vmatmul.f32.gmra.mxu2 %v4847_v15  ;;  %v4741_v56 = vsel %vm4721_vm10, %v10136_v7, %v5942_v23  ;;  %v5957_v2 = vunpack.i.h.bf16 %v5955_v37  ;;  %v4814_v30 = vsel %vm4684_vm6, %v4778_v5, %v5951_v8  ;;  %v5961_v45 = vunpack.i.l.bf16 %v5960_v51  ;;  %v5975_v23 = vpop.permute.xlu0 %5974 }
 0x5de   : > { %v4850_v33 = vsel %vm4721_vm10, %v4814_v30, %v5956_v44  ;;  %v5976_v39 = vunpack.i.l.bf16 %v5975_v23 }
 0x5df   : > { %v4742_v11 = vsel %vm4721_vm10, %v10154_v61, %v5957_v2 }
 0x5e0   : > { %v5159_v18 = vpop.f32.mrf.mxu2 }
 0x5e1   : > { %v5160_v14 = vadd.f32 %v5159_v18, %v5035_v17  ;;  %v5947_v17 = vunpack.i.h.bf16 %v5945_v52  ;;  %v5965_v18 = vpop.permute.xlu1 %5964 }
 0x5e2   : > { %v5037_v20 = vpop.f32.mrf.mxu1 }
 0x5e3   : > { %v5285_v29 = vadd.f32 %v9389_v46, %v5160_v14  ;;  %v5038_v10 = vadd.f32 %v10145_v9, %v5037_v20  ;;  %v5941_v46 = vunpack.i.l.bf16 %v5940_v1  ;;  %v3727_v14 = vld [vmem:[#allocation2 + $0xbb] sm:$0xff]  ;;  %v10241_v20 = vpop.f32.mrf.mxu3  ;;  %v5962_v1 = vunpack.i.h.bf16 %v5960_v51 }
 0x5e5   : > { %5390 = vst.msk [vmem:[%s10172_s20 + $0x8] sm:$0xff] %vm1605_vm2, %v5285_v29  ;;  %5084 = vmatmul.f32.gmra.mxu1 %v4740_v54  ;;  %5209 = vmatmul.f32.gmra.mxu2 %v4848_v26  ;;  %v4849_v47 = vsel %vm4721_vm10, %v4813_v22, %v5941_v46  ;;  %v4779_v29 = vsel %vm1827_vm9, %v3727_v14, %v5947_v17  ;;  %v5966_v54 = vunpack.i.l.bf16 %v5965_v18  ;;  %v3728_v46 = vld [vmem:[#allocation2 + $0xc3] sm:$0xff]  ;;  %v5967_v22 = vunpack.i.h.bf16 %v5965_v18  ;;  %v5990_v5 = vpop.permute.xlu0 %5989  ;;  %v10989_v14 = vld [vmem:[#allocation57_spill] sm:$0xff] }
 0x5e6   : > { %v4815_v61 = vsel %vm4684_vm6, %v4779_v29, %v5952_v40  ;;  %v4743_v60 = vsel %vm4721_vm10, %v10185_v4, %v5962_v1  ;;  %v5991_v51 = vunpack.i.l.bf16 %v5990_v5 }
 0x5e7   : > { %v4851_v57 = vsel %vm4721_vm10, %v4815_v61, %v5961_v45 }
 0x5e8   : > { %v5162_v12 = vpop.f32.mrf.mxu2 }
 0x5e9   : > { %v5163_v62 = vadd.f32 %v5162_v12, %v5038_v10  ;;  %v5970_v10 = vpop.permute.xlu2 %5969  ;;  %v4780_v12 = vsel %vm1827_vm9, %v3728_v46, %v5966_v54  ;;  %v5992_v54 = vunpack.i.h.bf16 %v5990_v5 }
 0x5ea   : > { %v5040_v38 = vpop.f32.mrf.mxu1  ;;  %v5971_v19 = vunpack.i.l.bf16 %v5970_v10 }
 0x5eb   : > { %v5288_v16 = vadd.f32 %v9423_v53, %v5163_v62  ;;  %v10225_v53 = vsel %vm4684_vm6, %v4674_v42, %v5741_v34  ;;  %v5041_v7 = vadd.f32 %v10145_v9, %v5040_v38  ;;  %v5977_v34 = vunpack.i.h.bf16 %v5975_v23  ;;  %v10254_v4 = vpop.f32.mrf.mxu3  ;;  %v5980_v38 = vpop.permute.xlu1 %5979 }
 0x5ec   : > { %v4816_v62 = vsel %vm4684_vm6, %v4780_v12, %v5971_v19  ;;  %v5982_v42 = vunpack.i.h.bf16 %v5980_v38  ;;  %v5981_v27 = vunpack.i.l.bf16 %v5980_v38 }
 0x5ed   : > { %5391 = vst.msk [vmem:[%s10172_s20 + $0x10] sm:$0xff] %vm1605_vm2, %v5288_v16  ;;  %5087 = vmatmul.f32.gmra.mxu1 %v4741_v56  ;;  %5212 = vmatmul.f32.gmra.mxu2 %v4849_v47  ;;  %v4744_v32 = vsel %vm4721_vm10, %v10188_v49, %v5977_v34  ;;  %v4852_v25 = vsel %vm4721_vm10, %v4816_v62, %v5976_v39  ;;  %v3729_v47 = vld [vmem:[#allocation2 + $0xcb] sm:$0xff] }
 0x5ee   : > { %v4781_v8 = vsel %vm1827_vm9, %v3729_v47, %v5967_v22  ;;  %v4745_v30 = vsel %vm4721_vm10, %v10192_v43, %v5982_v42  ;;  %v3732_v22 = vld [vmem:[#allocation2 + $0xe3] sm:$0xff] }
 0x5f0   : > { %v5165_v15 = vpop.f32.mrf.mxu2 }
 0x5f1   : > { %v5166_v24 = vadd.f32 %v5165_v15, %v5041_v7  ;;  %v5985_v48 = vpop.permute.xlu2 %5984 }
 0x5f2   : > { %v5043_v36 = vpop.f32.mrf.mxu1  ;;  %v5987_v29 = vunpack.i.h.bf16 %v5985_v48 }
 0x5f3   : > { %v5291_v21 = vadd.f32 %v9460_v6, %v5166_v24  ;;  %v5044_v31 = vadd.f32 %v10145_v9, %v5043_v36  ;;  %v10266_v15 = vpop.f32.mrf.mxu3  ;;  %v5986_v24 = vunpack.i.l.bf16 %v5985_v48  ;;  %v5995_v36 = vpop.permute.xlu1 %5994 }
 0x5f4   : > { %v5997_v17 = vunpack.i.h.bf16 %v5995_v36 }
 0x5f5   : > { %5392 = vst.msk [vmem:[%s10172_s20 + $0x18] sm:$0xff] %vm1605_vm2, %v5291_v21  ;;  %5090 = vmatmul.f32.gmra.mxu1 %v4742_v11  ;;  %5215 = vmatmul.f32.gmra.mxu2 %v4850_v33  ;;  %v3730_v21 = vld [vmem:[#allocation2 + $0xd3] sm:$0xff]  ;;  %v5996_v11 = vunpack.i.l.bf16 %v5995_v36 }
 0x5f6   : > { %v4782_v40 = vsel %vm1827_vm9, %v3730_v21, %v5986_v24 }
 0x5f8   : > { %v5168_v6 = vpop.f32.mrf.mxu2 }
 0x5f9   : > { %v5169_v50 = vadd.f32 %v5168_v6, %v5044_v31  ;;  %v6000_v43 = vpop.permute.xlu2 %5999  ;;  %v4818_v6 = vsel %vm4684_vm6, %v4782_v40, %v5991_v51 }
 0x5fa   : > { %v5046_v26 = vpop.f32.mrf.mxu1  ;;  %v4854_v61 = vsel %vm4721_vm10, %v4818_v6, %v5996_v11 }
 0x5fb   : > { %v5294_v63 = vadd.f32 %v9482_v41, %v5169_v50  ;;  %v5047_v0 = vadd.f32 %v10145_v9, %v5046_v26  ;;  %v4746_v50 = vsel %vm4721_vm10, %v10195_v55, %v5997_v17  ;;  %v10282_v45 = vpop.f32.mrf.mxu3  ;;  %v6005_v26 = vpop.permute.xlu0 %6004 }
 0x5fc   : > { %v6010_v12 = vpop.permute.xlu1 %6009 }
 0x5fd   : > { %5393 = vst.msk [vmem:[%s10172_s20 + $0x20] sm:$0xff] %vm1605_vm2, %v5294_v63  ;;  %5093 = vmatmul.f32.gmra.mxu1 %v4743_v60  ;;  %5218 = vmatmul.f32.gmra.mxu2 %v4851_v57  ;;  %v6002_v60 = vunpack.i.h.bf16 %v6000_v43  ;;  %v6001_v57 = vunpack.i.l.bf16 %v6000_v43  ;;  %v6011_v38 = vunpack.i.l.bf16 %v6010_v12  ;;  %v10992_v43 = vld [vmem:[#allocation5_spill] sm:$0xff] }
 0x5ff   : > { %v4747_v62 = vsel %vm4721_vm10, %v10200_v59, %v6002_v60 }
 0x600   : > { %v5171_v41 = vpop.f32.mrf.mxu2 }
 0x601   : > { %v5172_v52 = vadd.f32 %v5171_v41, %v5047_v0  ;;  %v10990_v0 = vld [vmem:[#allocation3_spill] sm:$0xff] }
 0x602   : > { %v5049_v58 = vpop.f32.mrf.mxu1 }
 0x603   : > { %v5297_v16 = vadd.f32 %v9505_v35, %v5172_v52  ;;  %v5050_v56 = vadd.f32 %v10145_v9, %v5049_v58  ;;  %v5972_v35 = vunpack.i.h.bf16 %v5970_v10  ;;  %v3731_v10 = vld [vmem:[#allocation2 + $0xdb] sm:$0xff]  ;;  %v6006_v52 = vunpack.i.l.bf16 %v6005_v26  ;;  %v6015_v58 = vpop.permute.xlu2 %6014  ;;  %v6020_v42 = vpop.permute.xlu0 %6019 }
 0x604   : > { %v4783_v46 = vsel %vm1827_vm9, %v3731_v10, %v5987_v29  ;;  %v6025_v5 = vpop.permute.xlu1 %6024  ;;  %v6021_v11 = vunpack.i.l.bf16 %v6020_v42 }
 0x605   : > { %5394 = vst.msk [vmem:[%s10172_s20 + $0x28] sm:$0xff] %vm1605_vm2, %v5297_v16  ;;  %5096 = vmatmul.f32.gmra.mxu1 %v4744_v32  ;;  %5221 = vmatmul.f32.gmra.mxu2 %v4852_v25  ;;  %v4817_v2 = vsel %vm4684_vm6, %v4781_v8, %v5972_v35  ;;  %v4819_v41 = vsel %vm4684_vm6, %v4783_v46, %v5992_v54  ;;  %v10294_v32 = vpop.f32.mrf.mxu3  ;;  %v6017_v25 = vunpack.i.h.bf16 %v6015_v58  ;;  %v10991_v35 = vld [vmem:[#allocation4_spill] sm:$0xff] }
 0x606   : > { %v4853_v44 = vsel %vm4721_vm10, %v4817_v2, %v5981_v27  ;;  %v4855_v39 = vsel %vm4721_vm10, %v4819_v41, %v6001_v57  ;;  %v4784_v47 = vsel %vm1827_vm9, %v3732_v22, %v6006_v52  ;;  %v6012_v2 = vunpack.i.h.bf16 %v6010_v12 }
 0x607   : > { %v4820_v27 = vsel %vm4684_vm6, %v4784_v47, %v6011_v38  ;;  %v5657_v41 = vunpack.i.h.bf16 %v10992_v43  ;;  %v6027_v52 = vunpack.i.h.bf16 %v6025_v5 }
 0x608   : > { %v5174_v37 = vpop.f32.mrf.mxu2 }
 0x609   : > { %v5175_v7 = vadd.f32 %v5174_v37, %v5050_v56  ;;  %v6016_v37 = vunpack.i.l.bf16 %v6015_v58 }
 0x60a   : > { %v5052_v28 = vpop.f32.mrf.mxu1 }
 0x60b   : > { %v5300_v49 = vadd.f32 %v9537_v13, %v5175_v7  ;;  %v5053_v13 = vadd.f32 %v10145_v9, %v5052_v28  ;;  %v6007_v7 = vunpack.i.h.bf16 %v6005_v26  ;;  %v4748_v28 = vsel %vm4721_vm10, %v10225_v53, %v6017_v25  ;;  %v6030_v36 = vpop.permute.xlu2 %6029  ;;  %v3735_v25 = vld [vmem:[#allocation2 + $0xfb] sm:$0xff] }
 0x60c   : > { %v6032_v29 = vunpack.i.h.bf16 %v6030_v36  ;;  %v6031_v54 = vunpack.i.l.bf16 %v6030_v36  ;;  %v6040_v26 = vpop.permute.xlu1 %6039 }
 0x60d   : > { %5395 = vst.msk [vmem:[%s10172_s20 + $0x30] sm:$0xff] %vm1605_vm2, %v5300_v49  ;;  %5099 = vmatmul.f32.gmra.mxu1 %v4745_v30  ;;  %5224 = vmatmul.f32.gmra.mxu2 %v4853_v44  ;;  %v4856_v49 = vsel %vm4721_vm10, %v4820_v27, %v6016_v37  ;;  %v3733_v30 = vld [vmem:[#allocation2 + $0xeb] sm:$0xff]  ;;  %v6022_v44 = vunpack.i.h.bf16 %v6020_v42  ;;  %v10307_v17 = vpop.f32.mrf.mxu3  ;;  %v6042_v38 = vunpack.i.h.bf16 %v6040_v26  ;;  %v4787_v42 = vsel %vm1827_vm9, %v3735_v25, %v6027_v52 }
 0x60e   : > { %v3737_v52 = vld [vmem:[#allocation2 + $0x10b] sm:$0xff] }
 0x610   : > { %v5177_v33 = vpop.f32.mrf.mxu2 }
 0x611   : > { %v5178_v18 = vadd.f32 %v5177_v33, %v5053_v13  ;;  %v4785_v13 = vsel %vm1827_vm9, %v3733_v30, %v6007_v7  ;;  %v6026_v33 = vunpack.i.l.bf16 %v6025_v5 }
 0x612   : > { %v5055_v31 = vpop.f32.mrf.mxu1  ;;  %v4821_v53 = vsel %vm4684_vm6, %v4785_v13, %v6012_v2 }
 0x613   : > { %v5303_v1 = vadd.f32 %v10989_v14, %v5178_v18  ;;  %v5056_v63 = vadd.f32 %v10145_v9, %v5055_v31  ;;  %v6035_v18 = vpop.permute.xlu0 %6034  ;;  %v5656_v14 = vunpack.i.l.bf16 %v10992_v43  ;;  %v4857_v6 = vsel %vm4721_vm10, %v4821_v53, %v6021_v11  ;;  %v6045_v12 = vpop.permute.xlu2 %6044  ;;  %v3626_v53 = vld [vmem:[#allocation2 + $0xf0] sm:$0xff]  ;;  %v3736_v11 = vld [vmem:[#allocation2 + $0x103] sm:$0xff] }
 0x614   : > { %v6037_v10 = vunpack.i.h.bf16 %v6035_v18 }
 0x615   : > { %5396 = vst.msk [vmem:[%s10172_s20 + $0x38] sm:$0xff] %vm1605_vm2, %v5303_v1  ;;  %5102 = vmatmul.f32.gmra.mxu1 %v4746_v50  ;;  %5227 = vmatmul.f32.gmra.mxu2 %v4854_v61  ;;  %v4749_v1 = vsel %vm4721_vm10, %v10229_v3, %v6022_v44  ;;  %v3734_v50 = vld [vmem:[#allocation2 + $0xf3] sm:$0xff] }
 0x616   : > { %v4786_v61 = vsel %vm1827_vm9, %v3734_v50, %v6026_v33 }
 0x617   : > { %v4822_v46 = vsel %vm4684_vm6, %v4786_v61, %v6031_v54 }
 0x618   : > { %v5180_v23 = vpop.f32.mrf.mxu2 }
 0x619   : > { %v5181_v55 = vadd.f32 %v5180_v23, %v5056_v63 }
 0x61a   : > { %v5058_v19 = vpop.f32.mrf.mxu1 }
 0x61b   : > { %v5306_v34 = vadd.f32 %v10990_v0, %v5181_v55  ;;  %v5059_v16 = vadd.f32 %v10145_v9, %v5058_v19  ;;  %v6036_v55 = vunpack.i.l.bf16 %v6035_v18  ;;  %v10327_v58 = vpop.permute.xlu0 %6049 }
 0x61c   : > { %v6051_v5 = vunpack.i.l.bf16 %v10327_v58 }
 0x61d   : > { %5397 = vst.msk [vmem:[%s10172_s20 + $0x40] sm:$0xff] %vm1605_vm2, %v5306_v34  ;;  %5105 = vmatmul.f32.gmra.mxu1 %v4747_v62  ;;  %5230 = vmatmul.f32.gmra.mxu2 %v4855_v39  ;;  %v10322_v34 = vpop.f32.mrf.mxu3  ;;  %v4858_v39 = vsel %vm4721_vm10, %v4822_v46, %v6036_v55 }
 0x61e   : > { %v4788_v18 = vsel %vm1827_vm9, %v3736_v11, %v6051_v5 }
 0x620   : > { %v5183_v56 = vpop.f32.mrf.mxu2 }
 0x621   : > { %v5184_v59 = vadd.f32 %v5183_v56, %v5059_v16  ;;  %v6041_v16 = vunpack.i.l.bf16 %v6040_v26 }
 0x622   : > { %v5061_v8 = vpop.f32.mrf.mxu1 }
 0x623   : > { %v5309_v48 = vadd.f32 %v10991_v35, %v5184_v59  ;;  %v5062_v24 = vadd.f32 %v10145_v9, %v5061_v8  ;;  %v6055_v59 = vpop.permute.xlu1 %6054  ;;  %v4823_v8 = vsel %vm4684_vm6, %v4787_v42, %v6041_v16  ;;  %v6047_v35 = vunpack.i.h.bf16 %v6045_v12  ;;  %v3851_v42 = vld [vmem:[#allocation2 + $0x13e] sm:$0xff] }
 0x624   : > { %v6057_v36 = vunpack.i.h.bf16 %v6055_v59 }
 0x625   : > { %5398 = vst.msk [vmem:[%s10172_s20 + $0x48] sm:$0xff] %vm1605_vm2, %v5309_v48  ;;  %5108 = vmatmul.f32.gmra.mxu1 %v4748_v28  ;;  %5233 = vmatmul.f32.gmra.mxu2 %v4856_v49  ;;  %v6046_v48 = vunpack.i.l.bf16 %v6045_v12  ;;  %v10993_v49 = vld [vmem:[#allocation88_spill] sm:$0xff]  ;;  %v10343_v13 = vpop.f32.mrf.mxu3 }
 0x626   : > { %v5661_v2 = vunpack.i.l.bf16 %v10993_v49 }
 0x627   : > { %v4859_v44 = vsel %vm4721_vm10, %v4823_v8, %v6046_v48 }
 0x628   : > { %v5186_v51 = vpop.f32.mrf.mxu2 }
 0x629   : > { %v5187_v21 = vadd.f32 %v5186_v51, %v5062_v24  ;;  %v6060_v24 = vpop.permute.xlu2 %6059  ;;  %v6056_v51 = vunpack.i.l.bf16 %v6055_v59  ;;  %v10994_v59 = vld [vmem:[#allocation7_spill] sm:$0xff] }
 0x62a   : > { %v5064_v40 = vpop.f32.mrf.mxu1  ;;  %v5667_v11 = vunpack.i.h.bf16 %v10994_v59 }
 0x62b   : > { %v5312_v31 = vadd.f32 %v10241_v20, %v5187_v21  ;;  %v5065_v63 = vadd.f32 %v10145_v9, %v5064_v40  ;;  %v3624_v20 = vld [vmem:[#allocation2 + $0xe0] sm:$0xff]  ;;  %v6065_v21 = vpop.permute.xlu0 %6064  ;;  %v4678_v40 = vsel %vm1827_vm9, %v3626_v53, %v5661_v2  ;;  %v6070_v50 = vpop.permute.xlu1 %6069 }
 0x62c   : > { %v4676_v57 = vsel %vm1827_vm9, %v3624_v20, %v5656_v14  ;;  %v4715_v43 = vsel %vm4684_vm6, %v4678_v40, %v6057_v36  ;;  %v4824_v14 = vsel %vm4684_vm6, %v4788_v18, %v6056_v51  ;;  %v5662_v20 = vunpack.i.h.bf16 %v10993_v49 }
 0x62d   : > { %5399 = vst.msk [vmem:[%s10172_s20 + $0x50] sm:$0xff] %vm1605_vm2, %v5312_v31  ;;  %5111 = vmatmul.f32.gmra.mxu1 %v4749_v1  ;;  %5236 = vmatmul.f32.gmra.mxu2 %v4857_v6  ;;  %v4713_v23 = vsel %vm4684_vm6, %v4676_v57, %v6032_v29  ;;  %v6062_v1 = vunpack.i.h.bf16 %v6060_v24  ;;  %v6061_v6 = vunpack.i.l.bf16 %v6060_v24  ;;  %v6067_v57 = vunpack.i.h.bf16 %v6065_v21  ;;  %v3628_v24 = vld [vmem:[#allocation2 + $0x100] sm:$0xff] }
 0x62e   : > { %v4750_v62 = vsel %vm4721_vm10, %v4713_v23, %v6037_v10  ;;  %v6052_v10 = vunpack.i.h.bf16 %v10327_v58  ;;  %v10361_v23 = vpop.f32.mrf.mxu3  ;;  %v6072_v46 = vunpack.i.h.bf16 %v6070_v50  ;;  %v6071_v55 = vunpack.i.l.bf16 %v6070_v50 }
 0x62f   : > { %v4752_v54 = vsel %vm4721_vm10, %v4715_v43, %v6062_v1  ;;  %v4860_v26 = vsel %vm4721_vm10, %v4824_v14, %v6061_v6  ;;  %v3629_v1 = vld [vmem:[#allocation2 + $0x108] sm:$0xff]  ;;  %v3739_v6 = vld [vmem:[#allocation2 + $0x11b] sm:$0xff] }
 0x630   : > { %v5189_v60 = vpop.f32.mrf.mxu2  ;;  %v4789_v58 = vsel %vm1827_vm9, %v3737_v52, %v6052_v10 }
 0x631   : > { %v5190_v3 = vadd.f32 %v5189_v60, %v5065_v63  ;;  %v3850_v63 = vld [vmem:[#allocation2 + $0x136] sm:$0xff]  ;;  %v10357_v60 = vpop.permute.xlu2 %6074 }
 0x632   : > { %v5067_v19 = vpop.f32.mrf.mxu1  ;;  %5559 = vmatmul.msk.f32.gmra.mxu3 %vm1827_vm9, %v3850_v63 }
 0x633   : > { %v5315_v0 = vadd.f32 %v10254_v4, %v5190_v3  ;;  %v5068_v22 = vadd.f32 %v10145_v9, %v5067_v19  ;;  %v3625_v4 = vld [vmem:[#allocation2 + $0xe8] sm:$0xff]  ;;  %v6066_v3 = vunpack.i.l.bf16 %v6065_v21  ;;  %v6080_v19 = vpop.permute.xlu0 %6079 }
 0x634   : > { %v4677_v47 = vsel %vm1827_vm9, %v3625_v4, %v5657_v41  ;;  %v3627_v41 = vld [vmem:[#allocation2 + $0xf8] sm:$0xff]  ;;  %v6076_v4 = vunpack.i.l.bf16 %v10357_v60 }
 0x635   : > { %5400 = vst.msk [vmem:[%s10172_s20 + $0x58] sm:$0xff] %vm1605_vm2, %v5315_v0  ;;  %5114 = vmatmul.f32.gmra.mxu1 %v4750_v62  ;;  %5239 = vmatmul.f32.gmra.mxu2 %v4858_v39  ;;  %v4714_v37 = vsel %vm4684_vm6, %v4677_v47, %v6042_v38  ;;  %v4679_v39 = vsel %vm1827_vm9, %v3627_v41, %v5662_v20  ;;  %v6085_v47 = vpop.permute.xlu1 %6084 }
 0x636   : > { %v4751_v30 = vsel %vm4721_vm10, %v4714_v37, %v6047_v35  ;;  %v4716_v16 = vsel %vm4684_vm6, %v4679_v39, %v6067_v57  ;;  %v6081_v37 = vunpack.i.l.bf16 %v6080_v19  ;;  %v3738_v35 = vld [vmem:[#allocation2 + $0x113] sm:$0xff] }
 0x637   : > { %v4753_v25 = vsel %vm4721_vm10, %v4716_v16, %v6072_v46  ;;  %v4790_v2 = vsel %vm1827_vm9, %v3738_v35, %v6076_v4 }
 0x638   : > { %v5192_v56 = vpop.f32.mrf.mxu2  ;;  %v4826_v53 = vsel %vm4684_vm6, %v4790_v2, %v6081_v37 }
 0x639   : > { %v5193_v27 = vadd.f32 %v5192_v56, %v5068_v22  ;;  %v4825_v22 = vsel %vm4684_vm6, %v4789_v58, %v6066_v3  ;;  %v6090_v48 = vpop.permute.xlu2 %6089 }
 0x63a   : > { %v5070_v7 = vpop.f32.mrf.mxu1  ;;  %v4861_v56 = vsel %vm4721_vm10, %v4825_v22, %v6071_v55  ;;  %5560 = vmatmul.msk.f32.gmra.mxu3 %vm1827_vm9, %v3851_v42  ;;  %v6091_v43 = vunpack.i.l.bf16 %v6090_v48  ;;  %v10995_v55 = vld [vmem:[#allocation6_spill] sm:$0xff] }
 0x63b   : > { %v5318_v28 = vadd.f32 %v10266_v15, %v5193_v27  ;;  %v5071_v15 = vadd.f32 %v10145_v9, %v5070_v7  ;;  %v5666_v27 = vunpack.i.l.bf16 %v10994_v59  ;;  %v6087_v7 = vunpack.i.h.bf16 %v6085_v47  ;;  %v6095_v51 = vpop.permute.xlu0 %6094 }
 0x63c   : > { %v6096_v50 = vunpack.i.l.bf16 %v6095_v51  ;;  %v5672_v37 = vunpack.i.h.bf16 %v10995_v55 }
 0x63d   : > { %5401 = vst.msk [vmem:[%s10172_s20 + $0x60] sm:$0xff] %vm1605_vm2, %v5318_v28  ;;  %5117 = vmatmul.f32.gmra.mxu1 %v4751_v30  ;;  %5242 = vmatmul.f32.gmra.mxu2 %v4859_v44  ;;  %v6086_v28 = vunpack.i.l.bf16 %v6085_v47  ;;  %v10377_v30 = vpop.f32.mrf.mxu3  ;;  %v4680_v36 = vsel %vm1827_vm9, %v3628_v24, %v5666_v27  ;;  %v6100_v14 = vpop.permute.xlu1 %6099  ;;  %v3741_v24 = vld [vmem:[#allocation2 + $0x12b] sm:$0xff] }
 0x63e   : > { %v6101_v57 = vunpack.i.l.bf16 %v6100_v14 }
 0x63f   : > { %v4862_v18 = vsel %vm4721_vm10, %v4826_v53, %v6086_v28 }
 0x640   : > { %v5195_v33 = vpop.f32.mrf.mxu2 }
 0x641   : > { %v5196_v31 = vadd.f32 %v5195_v33, %v5071_v15  ;;  %v6077_v33 = vunpack.i.h.bf16 %v10357_v60  ;;  %v6105_v60 = vpop.permute.xlu2 %6104 }
 0x642   : > { %v5073_v29 = vpop.f32.mrf.mxu1  ;;  %v6107_v52 = vunpack.i.h.bf16 %v6105_v60  ;;  %v6106_v58 = vunpack.i.l.bf16 %v6105_v60 }
 0x643   : > { %v5321_v61 = vadd.f32 %v10282_v45, %v5196_v31  ;;  %v5074_v45 = vadd.f32 %v10145_v9, %v5073_v29  ;;  %v6092_v31 = vunpack.i.h.bf16 %v6090_v48  ;;  %v6097_v29 = vunpack.i.h.bf16 %v6095_v51  ;;  %v6110_v41 = vpop.permute.xlu0 %6109 }
 0x644   : > { %v6112_v16 = vunpack.i.h.bf16 %v6110_v41  ;;  %v6111_v42 = vunpack.i.l.bf16 %v6110_v41 }
 0x645   : > { %5402 = vst.msk [vmem:[%s10172_s20 + $0x68] sm:$0xff] %vm1605_vm2, %v5321_v61  ;;  %5120 = vmatmul.f32.gmra.mxu1 %v4752_v54  ;;  %5245 = vmatmul.f32.gmra.mxu2 %v4860_v26  ;;  %v4681_v54 = vsel %vm1827_vm9, %v3629_v1, %v5667_v11  ;;  %v4791_v26 = vsel %vm1827_vm9, %v3739_v6, %v6077_v33  ;;  %v10395_v46 = vpop.f32.mrf.mxu3  ;;  %v6115_v59 = vpop.permute.xlu1 %6114 }
 0x646   : > { %v4718_v20 = vsel %vm4684_vm6, %v4681_v54, %v6092_v31  ;;  %v4827_v10 = vsel %vm4684_vm6, %v4791_v26, %v6091_v43  ;;  %v6116_v28 = vunpack.i.l.bf16 %v6115_v59 }
 0x648   : > { %v5198_v12 = vpop.f32.mrf.mxu2 }
 0x649   : > { %v5199_v0 = vadd.f32 %v5198_v12, %v5074_v45  ;;  %v5671_v12 = vunpack.i.l.bf16 %v10995_v55  ;;  %v4611_v51 = vpop.permute.xlu2 %4610 }
 0x64a   : > { %v5076_v62 = vpop.f32.mrf.mxu1 }
 0x64b   : > { %v5324_v38 = vadd.f32 %v10294_v32, %v5199_v0  ;;  %v6082_v32 = vunpack.i.h.bf16 %v6080_v19  ;;  %v5077_v8 = vadd.f32 %v10145_v9, %v5076_v62  ;;  %v4755_v19 = vsel %vm4721_vm10, %v4718_v20, %v6097_v29  ;;  %v3740_v62 = vld [vmem:[#allocation2 + $0x123] sm:$0xff]  ;;  %v4213_v33 = vpop.permute.xlu0 %4212 }
 0x64c   : > { %v4863_v0 = vsel %vm4721_vm10, %v4827_v10, %v6096_v50  ;;  %v4792_v39 = vsel %vm1827_vm9, %v3740_v62, %v6101_v57 }
 0x64d   : > { %5403 = vst.msk [vmem:[%s10172_s20 + $0x70] sm:$0xff] %vm1605_vm2, %v5324_v38  ;;  %5123 = vmatmul.f32.gmra.mxu1 %v4753_v25  ;;  %5248 = vmatmul.f32.gmra.mxu2 %v4861_v56  ;;  %v4717_v15 = vsel %vm4684_vm6, %v4680_v36, %v6082_v32  ;;  %v3630_v38 = vld [vmem:[#allocation2 + $0x110] sm:$0xff]  ;;  %v4828_v47 = vsel %vm4684_vm6, %v4792_v39, %v6106_v58 }
 0x64e   : > { %v4754_v40 = vsel %vm4721_vm10, %v4717_v15, %v6087_v7  ;;  %v4682_v4 = vsel %vm1827_vm9, %v3630_v38, %v5671_v12  ;;  %v4864_v48 = vsel %vm4721_vm10, %v4828_v47, %v6111_v42  ;;  %v6117_v7 = vunpack.i.h.bf16 %v6115_v59 }
 0x64f   : > { %v4719_v56 = vsel %vm4684_vm6, %v4682_v4, %v6107_v52 }
 0x650   : > { %v5201_v49 = vpop.f32.mrf.mxu2  ;;  %v4756_v35 = vsel %vm4721_vm10, %v4719_v56, %v6112_v16 }
 0x651   : > { %v5202_v5 = vadd.f32 %v5201_v49, %v5077_v8  ;;  %v6102_v8 = vunpack.i.h.bf16 %v6100_v14  ;;  %v5344_v49 = vpop.f32.mrf.mxu3 }
 0x652   : > { %v5079_v44 = vpop.f32.mrf.mxu1 }
 0x653   : > { %v5327_v21 = vadd.f32 %v10307_v17, %v5202_v5  ;;  %v5080_v17 = vadd.f32 %v10145_v9, %v5079_v44  ;;  %v3631_v5 = vld [vmem:[#allocation2 + $0x118] sm:$0xff]  ;;  %v4793_v36 = vsel %vm1827_vm9, %v3741_v24, %v6102_v8 }
 0x654   : > { %v4683_v44 = vsel %vm1827_vm9, %v3631_v5, %v5672_v37  ;;  %v4829_v53 = vsel %vm4684_vm6, %v4793_v36, %v6116_v28  ;;  %v6122_v37 = vld [vmem:[%s10476_s4] ss:$0 sm:$0xff] }
 0x655   : > { %5404 = vst.msk [vmem:[%s10172_s20 + $0x78] sm:$0xff] %vm1605_vm2, %v5327_v21  ;;  %5126 = vmatmul.f32.gmra.mxu1 %v4754_v40  ;;  %5251 = vmatmul.f32.gmra.mxu2 %v4862_v18  ;;  %v4720_v15 = vsel %vm4684_vm6, %v4683_v44, %v6117_v7  ;;  %v4865_v31 = vsel %vm4721_vm10, %v4829_v53, %v4611_v51 }
 0x656   : > { %v4757_v18 = vsel %vm4721_vm10, %v4720_v15, %v4213_v33 }
 0x658   : > { %v5204_v61 = vpop.f32.mrf.mxu2 }
 0x659   : > { %v5205_v63 = vadd.f32 %v5204_v61, %v5080_v17  ;;  %v5347_v14 = vpop.f32.mrf.mxu3 }
 0x65a   : > { %v5082_v3 = vpop.f32.mrf.mxu1 }
 0x65b   : > { %v5330_v45 = vadd.f32 %v10322_v34, %v5205_v63  ;;  %v5083_v34 = vadd.f32 %v10145_v9, %v5082_v3 }
 0x65d   : > { %5405 = vst.msk [vmem:[%s10172_s20 + $0x80] sm:$0xff] %vm1605_vm2, %v5330_v45  ;;  %5129 = vmatmul.f32.gmra.mxu1 %v4755_v19  ;;  %5254 = vmatmul.f32.gmra.mxu2 %v4863_v0 }
 0x660   : > { %v5207_v22 = vpop.f32.mrf.mxu2 }
 0x661   : > { %v5208_v25 = vadd.f32 %v5207_v22, %v5083_v34  ;;  %v5350_v54 = vpop.f32.mrf.mxu3 }
 0x662   : > { %v5085_v27 = vpop.f32.mrf.mxu1 }
 0x663   : > { %v5333_v32 = vadd.f32 %v10343_v13, %v5208_v25  ;;  %v5086_v2 = vadd.f32 %v10145_v9, %v5085_v27 }
 0x665   : > { %5406 = vst.msk [vmem:[%s10172_s20 + $0x88] sm:$0xff] %vm1605_vm2, %v5333_v32  ;;  %5132 = vmatmul.f32.gmra.mxu1 %v4756_v35  ;;  %5257 = vmatmul.f32.gmra.mxu2 %v4864_v48 }
 0x668   : > { %v5210_v13 = vpop.f32.mrf.mxu2 }
 0x669   : > { %v5211_v21 = vadd.f32 %v5210_v13, %v5086_v2  ;;  %v5353_v3 = vpop.f32.mrf.mxu3 }
 0x66a   : > { %v5088_v11 = vpop.f32.mrf.mxu1 }
 0x66b   : > { %v5336_v40 = vadd.f32 %v10361_v23, %v5211_v21  ;;  %v5089_v43 = vadd.f32 %v10145_v9, %v5088_v11 }
 0x66d   : > { %5407 = vst.msk [vmem:[%s10172_s20 + $0x90] sm:$0xff] %vm1605_vm2, %v5336_v40  ;;  %5135 = vmatmul.f32.gmra.mxu1 %v4757_v18  ;;  %5260 = vmatmul.f32.gmra.mxu2 %v4865_v31 }
 0x670   : > { %v5213_v17 = vpop.f32.mrf.mxu2 }
 0x671   : > { %v5214_v1 = vadd.f32 %v5213_v17, %v5089_v43 }
 0x672   : > { %v5091_v6 = vpop.f32.mrf.mxu1 }
 0x673   : > { %v5339_v29 = vadd.f32 %v10377_v30, %v5214_v1  ;;  %v5092_v23 = vadd.f32 %v10145_v9, %v5091_v6 }
 0x675   : > { %5408 = vst.msk [vmem:[%s10172_s20 + $0x98] sm:$0xff] %vm1605_vm2, %v5339_v29 }
 0x678   : > { %v5216_v50 = vpop.f32.mrf.mxu2 }
 0x679   : > { %v5217_v61 = vadd.f32 %v5216_v50, %v5092_v23 }
 0x67a   : > { %v5094_v26 = vpop.f32.mrf.mxu1 }
 0x67b   : > { %v5342_v63 = vadd.f32 %v10395_v46, %v5217_v61  ;;  %v5095_v20 = vadd.f32 %v10145_v9, %v5094_v26  ;;  %v5356_v46 = vpop.f32.mrf.mxu3 }
 0x67d   : > { %5409 = vst.msk [vmem:[%s10172_s20 + $0xa0] sm:$0xff] %vm1605_vm2, %v5342_v63 }
 0x680   : > { %v5219_v10 = vpop.f32.mrf.mxu2 }
 0x681   : > { %v5220_v60 = vadd.f32 %v5219_v10, %v5095_v20 }
 0x682   : > { %v5097_v57 = vpop.f32.mrf.mxu1 }
 0x683   : > { %v5345_v30 = vadd.f32 %v5344_v49, %v5220_v60  ;;  %v5098_v45 = vadd.f32 %v10145_v9, %v5097_v57  ;;  %v5359_v38 = vpop.f32.mrf.mxu3 }
 0x685   : > { %5410 = vst.msk [vmem:[%s10172_s20 + $0xa8] sm:$0xff] %vm1605_vm2, %v5345_v30 }
 0x688   : > { %v5222_v55 = vpop.f32.mrf.mxu2 }
 0x689   : > { %v5223_v12 = vadd.f32 %v5222_v55, %v5098_v45 }
 0x68a   : > { %v5100_v19 = vpop.f32.mrf.mxu1 }
 0x68b   : > { %v5348_v0 = vadd.f32 %v5347_v14, %v5223_v12  ;;  %v5101_v41 = vadd.f32 %v10145_v9, %v5100_v19  ;;  %v5362_v59 = vpop.f32.mrf.mxu3 }
 0x68d   : > { %5411 = vst.msk [vmem:[%s10172_s20 + $0xb0] sm:$0xff] %vm1605_vm2, %v5348_v0 }
 0x690   : > { %v5225_v52 = vpop.f32.mrf.mxu2 }
 0x691   : > { %v5226_v62 = vadd.f32 %v5225_v52, %v5101_v41 }
 0x692   : > { %v5103_v39 = vpop.f32.mrf.mxu1 }
 0x693   : > { %v5351_v58 = vadd.f32 %v5350_v54, %v5226_v62  ;;  %v5104_v34 = vadd.f32 %v10145_v9, %v5103_v39  ;;  %v5365_v49 = vpop.f32.mrf.mxu3 }
 0x695   : > { %5412 = vst.msk [vmem:[%s10172_s20 + $0xb8] sm:$0xff] %vm1605_vm2, %v5351_v58 }
 0x698   : > { %v5228_v16 = vpop.f32.mrf.mxu2 }
 0x699   : > { %v5229_v22 = vadd.f32 %v5228_v16, %v5104_v34 }
 0x69a   : > { %v5106_v4 = vpop.f32.mrf.mxu1 }
 0x69b   : > { %v5354_v25 = vadd.f32 %v5353_v3, %v5229_v22  ;;  %v5107_v56 = vadd.f32 %v10145_v9, %v5106_v4  ;;  %v5368_v44 = vpop.f32.mrf.mxu3 }
 0x69d   : > { %5413 = vst.msk [vmem:[%s10172_s20 + $0xc0] sm:$0xff] %vm1605_vm2, %v5354_v25 }
 0x6a0   : > { %v5231_v47 = vpop.f32.mrf.mxu2 }
 0x6a1   : > { %v5232_v42 = vadd.f32 %v5231_v47, %v5107_v56 }
 0x6a2   : > { %v5109_v27 = vpop.f32.mrf.mxu1 }
 0x6a3   : > { %v5357_v32 = vadd.f32 %v5356_v46, %v5232_v42  ;;  %v5110_v8 = vadd.f32 %v6122_v37, %v5109_v27  ;;  %v5371_v33 = vpop.f32.mrf.mxu3 }
 0x6a5   : > { %5414 = vst.msk [vmem:[%s10172_s20 + $0xc8] sm:$0xff] %vm1605_vm2, %v5357_v32 }
 0x6a8   : > { %v5234_v35 = vpop.f32.mrf.mxu2 }
 0x6a9   : > { %v5235_v48 = vadd.f32 %v5234_v35, %v5110_v8 }
 0x6aa   : > { %v5112_v7 = vpop.f32.mrf.mxu1 }
 0x6ab   : > { %v5360_v28 = vadd.f32 %v5359_v38, %v5235_v48  ;;  %v5113_v9 = vadd.f32 %v6122_v37, %v5112_v7  ;;  %v5374_v6 = vpop.f32.mrf.mxu3 }
 0x6ad   : > { %5415 = vst.msk [vmem:[%s10172_s20 + $0xd0] sm:$0xff] %vm1605_vm2, %v5360_v28 }
 0x6b0   : > { %v5237_v2 = vpop.f32.mrf.mxu2 }
 0x6b1   : > { %v5238_v5 = vadd.f32 %v5237_v2, %v5113_v9 }
 0x6b2   : > { %v5115_v24 = vpop.f32.mrf.mxu1 }
 0x6b3   : > { %v5363_v13 = vadd.f32 %v5362_v59, %v5238_v5  ;;  %v5116_v36 = vadd.f32 %v6122_v37, %v5115_v24  ;;  %v5377_v20 = vpop.f32.mrf.mxu3 }
 0x6b5   : > { %5416 = vst.msk [vmem:[%s10172_s20 + $0xd8] sm:$0xff] %vm1605_vm2, %v5363_v13 }
 0x6b8   : > { %v5240_v51 = vpop.f32.mrf.mxu2 }
 0x6b9   : > { %v5241_v21 = vadd.f32 %v5240_v51, %v5116_v36 }
 0x6ba   : > { %v5118_v15 = vpop.f32.mrf.mxu1 }
 0x6bb   : > { %v5366_v53 = vadd.f32 %v5365_v49, %v5241_v21  ;;  %v5119_v11 = vadd.f32 %v6122_v37, %v5118_v15  ;;  %v5380_v45 = vpop.f32.mrf.mxu3 }
 0x6bd   : > { %5417 = vst.msk [vmem:[%s10172_s20 + $0xe0] sm:$0xff] %vm1605_vm2, %v5366_v53 }
 0x6c0   : > { %v5243_v40 = vpop.f32.mrf.mxu2 }
 0x6c1   : > { %v5244_v18 = vadd.f32 %v5243_v40, %v5119_v11 }
 0x6c2   : > { %v5121_v31 = vpop.f32.mrf.mxu1 }
 0x6c3   : > { %v5369_v43 = vadd.f32 %v5368_v44, %v5244_v18  ;;  %v5122_v14 = vadd.f32 %v6122_v37, %v5121_v31  ;;  %v5383_v41 = vpop.f32.mrf.mxu3 }
 0x6c5   : > { %5418 = vst.msk [vmem:[%s10172_s20 + $0xe8] sm:$0xff] %vm1605_vm2, %v5369_v43 }
 0x6c8   : > { %v5246_v17 = vpop.f32.mrf.mxu2 }
 0x6c9   : > { %v5247_v1 = vadd.f32 %v5246_v17, %v5122_v14 }
 0x6ca   : > { %v5124_v29 = vpop.f32.mrf.mxu1 }
 0x6cb   : > { %v5372_v23 = vadd.f32 %v5371_v33, %v5247_v1  ;;  %v5125_v50 = vadd.f32 %v6122_v37, %v5124_v29  ;;  %v5386_v22 = vpop.f32.mrf.mxu3 }
 0x6cd   : > { %5419 = vst.msk [vmem:[%s10172_s20 + $0xf0] sm:$0xff] %vm1605_vm2, %v5372_v23 }
 0x6d0   : > { %v5249_v61 = vpop.f32.mrf.mxu2 }
 0x6d1   : > { %v5250_v54 = vadd.f32 %v5249_v61, %v5125_v50 }
 0x6d2   : > { %v5127_v26 = vpop.f32.mrf.mxu1 }
 0x6d3   : > { %v5375_v63 = vadd.f32 %v5374_v6, %v5250_v54  ;;  %v5128_v10 = vadd.f32 %v6122_v37, %v5127_v26 }
 0x6d5   : > { %5420 = vst.msk [vmem:[%s10172_s20 + $0xf8] sm:$0xff] %vm1605_vm2, %v5375_v63 }
 0x6d8   : > { %v5252_v60 = vpop.f32.mrf.mxu2 }
 0x6d9   : > { %v5253_v57 = vadd.f32 %v5252_v60, %v5128_v10 }
 0x6da   : > { %v5130_v30 = vpop.f32.mrf.mxu1 }
 0x6db   : > { %v5378_v3 = vadd.f32 %v5377_v20, %v5253_v57  ;;  %v5131_v55 = vadd.f32 %v6122_v37, %v5130_v30 }
 0x6dd   : > { %5421 = vst.msk [vmem:[%s10172_s20 + $0x100] sm:$0xff] %vm1605_vm2, %v5378_v3 }
 0x6e0   : > { %v5255_v12 = vpop.f32.mrf.mxu2 }
 0x6e1   : > { %v5256_v19 = vadd.f32 %v5255_v12, %v5131_v55 }
 0x6e2   : > { %v5133_v0 = vpop.f32.mrf.mxu1 }
 0x6e3   : > { %v5381_v46 = vadd.f32 %v5380_v45, %v5256_v19  ;;  %v5134_v52 = vadd.f32 %v6122_v37, %v5133_v0 }
 0x6e5   : > { %5422 = vst.msk [vmem:[%s10172_s20 + $0x108] sm:$0xff] %vm1605_vm2, %v5381_v46 }
 0x6e8   : > { %v5258_v62 = vpop.f32.mrf.mxu2 }
 0x6e9   : > { %v5259_v39 = vadd.f32 %v5258_v62, %v5134_v52 }
 0x6ea   : > { %v5136_v34 = vpop.f32.mrf.mxu1 }
 0x6eb   : > { %v5384_v58 = vadd.f32 %v5383_v41, %v5259_v39  ;;  %v5137_v38 = vadd.f32 %v6122_v37, %v5136_v34 }
 0x6ed   : > { %5423 = vst.msk [vmem:[%s10172_s20 + $0x110] sm:$0xff] %vm1605_vm2, %v5384_v58 }
 0x6f0   : > { %v5261_v16 = vpop.f32.mrf.mxu2 }
 0x6f1   : > { %v5262_v4 = vadd.f32 %v5261_v16, %v5137_v38 }
 0x6f3   : > { %v5387_v25 = vadd.f32 %v5386_v22, %v5262_v4 }
 0x6f5   : > { %5424 = vst.msk [vmem:[%s10172_s20 + $0x118] sm:$0xff] %vm1605_vm2, %v5387_v25 }
 0x6f6 PF: > { %s15_s18 = sadd.s32 1, %s6129_s18  }
 0x6f7   : > { %p12_p5 = scmp.ge.s32.totalorder %s15_s18, 4  }
 0x6f9   :  { %14 = sbr.rel (!%p12_p5) target bundleno = 1 (0x1), region = 70 }

</bundles_post_ra>
